<compile_context>
chip_gen: v7x
topology: tpu7x:2x2x1
jax: 0.10.0
libtpu: 0.0.40
codegen_flags: <defaults>
</compile_context>

<pallas_src>
import numpy as np
import jax
import jax.numpy as jnp
from jax.experimental import pallas as pl
from jax.experimental.pallas import tpu as pltpu

# Module hyper-parameters: input_shape = (C, S, S), out_size
C_IN = 4
S = 16                 # input spatial size; also conv2..conv4 channel count
H2 = S // 2            # spatial size after the stride-2 conv (8)
OUT_SIZE = 8
BATCH = 2
FC_IN = S * H2 * H2    # 16 * 8 * 8 = 1024


# ----------------------------- fused Pallas kernel -----------------------------

def _encoder_kernel(x00, x01, x10, x11,
                    w1, b1, w2, b2, w3, b3, w4, b4, wfr, bf,
                    out_ref,
                    xp00, xp01, xp10, xp11, padr):
    """Fused conv1..conv4 + fc forward.

    x{p}{q}:  (B, 8, 8, 4)    input parity class x[:, p::2, q::2, :] (NHWC)
    w1:       (36, 3)         conv1 weight, (KH,KW,Cin) flattened x Cout
    w2:       (12, 16)        conv2 weight, (KH,KW,Cin) flattened x Cout
    w3, w4:   (144, 16)
    wfr:      (8, 64, 16)     fc weight re-indexed as [n, h*8+w, c]
    b1..b4:   (1, Cout)       biases;   bf: (1, 8, 1, 1)
    out_ref:  (B, 8, 1, 1)
    xp{p}{q}: (B, 10, 10, 4)  VMEM scratch: zero-padded input parity classes
    padr:     (B, 10, 10, 16) VMEM scratch: zero-padded conv3/conv4 input
    """
    B = x00.shape[0]
    H = x00.shape[1]            # 8
    M = B * H * H               # 128 matmul rows, ordered (b, h, w)

    def relu(v):
        return jnp.maximum(v, 0.0)

    def mm(a, w_ref):
        return jnp.dot(a, w_ref[...], preferred_element_type=jnp.float32)

    # ---- conv1: 3x3 / stride 1 / pad 1, 4 -> 3 channels, + ReLU ------------
    # Zero-pad each input parity class in VMEM (zero once, write interior).
    xrefs = ((x00, x01), (x10, x11))
    xpads = ((xp00, xp01), (xp10, xp11))
    for p in range(2):
        for q in range(2):
            xpads[p][q][...] = jnp.zeros_like(xpads[p][q])
            xpads[p][q][:, 1:H + 1, 1:H + 1, :] = xrefs[p][q][...]
    xv = tuple(tuple(xpads[p][q][...] for q in range(2)) for p in range(2))

    # Evaluate conv1 separately on each output-parity class (ky, kx) so that
    # conv2's stride-2 / space-to-depth gather is just a lane concatenation.
    h1 = []
    for ky in range(2):
        for kx in range(2):
            taps = []
            for dy in range(3):
                for dx in range(3):
                    ah, aw = ky + dy - 1, kx + dx - 1      # original-pixel offsets
                    si, pi = ah // 2, ah % 2               # parity-split coords
                    sj, pj = aw // 2, aw % 2
                    t = xv[pi][pj][:, si + 1:si + 1 + H, sj + 1:sj + 1 + H, :]
                    taps.append(t.reshape(M, C_IN))
            im = jnp.concatenate(taps, axis=-1)            # (M, 36) im2col
            h1.append(relu(mm(im, w1) + b1[...]))          # (M, 3)

    # ---- conv2: 2x2 / stride 2 == 1x1 conv over the gathered parity block --
    h2 = relu(mm(jnp.concatenate(h1, axis=-1), w2) + b2[...])   # (M, 16)
    C = h2.shape[-1]

    # ---- conv3 / conv4: 3x3 / stride 1 / pad 1 as one im2col matmul each ---
    padr[...] = jnp.zeros_like(padr)                       # border stays zero

    def conv3x3(h, w_ref, b_ref):
        padr[:, 1:H + 1, 1:H + 1, :] = h.reshape(B, H, H, C)
        xp = padr[...]
        taps = [xp[:, dy:dy + H, dx:dx + H, :].reshape(M, C)
                for dy in range(3) for dx in range(3)]
        im = jnp.concatenate(taps, axis=-1)                # (M, 144)
        return relu(mm(im, w_ref) + b_ref[...])            # (M, 16)

    h3 = conv3x3(h2, w3, b3)
    h4 = conv3x3(h3, w4, b4)

    # ---- fc: flatten order absorbed into wfr; contraction on the VPU so the
    #      activation never needs a sublane->lane reshape --------------------
    h4b = h4.reshape(B, H * H, C)                          # (B, 64, 16)
    prod = h4b[:, None, :, :] * wfr[...]                   # (B, 8, 64, 16)
    r = jnp.sum(prod, axis=3, keepdims=True)               # (B, 8, 64, 1)
    r = jnp.sum(r, axis=2, keepdims=True)                  # (B, 8, 1, 1)
    out_ref[...] = (r + bf[...]).astype(out_ref.dtype)


# ----------------------------- wrapper -----------------------------

def _fullspec(shape):
    nd = len(shape)
    return pl.BlockSpec(shape, lambda i, _nd=nd: (0,) * _nd)


def _hwio_flat(w):
    """(O, I, KH, KW) -> (KH*KW*I, O)."""
    O, I, KH, KW = w.shape
    return jnp.transpose(w, (2, 3, 1, 0)).reshape(KH * KW * I, O)


def base_encoder_forward(x_nchw, p):
    """x_nchw: (B, C_IN, S, S) float32 -> (B, OUT_SIZE)."""
    B = x_nchw.shape[0]

    # One-shot trace-time glue on tiny arrays (4 KB input, ~52 KB weights).
    x = jnp.transpose(x_nchw, (0, 2, 3, 1))                # NHWC
    xpq = [x[:, py::2, qx::2, :] for py in range(2) for qx in range(2)]

    # fc weight: PyTorch flattens NCHW (c*64 + h*8 + w); our activation rows
    # are (h*8 + w) with channels last, so permute the weight, not the data.
    wfr = p['wf'].reshape(OUT_SIZE, S, H2 * H2).transpose(0, 2, 1)   # (8, 64, 16)

    inputs = xpq + [
        _hwio_flat(p['w1']), p['b1'].reshape(1, -1),
        _hwio_flat(p['w2']), p['b2'].reshape(1, -1),
        _hwio_flat(p['w3']), p['b3'].reshape(1, -1),
        _hwio_flat(p['w4']), p['b4'].reshape(1, -1),
        wfr, p['bf'].reshape(1, OUT_SIZE, 1, 1),
    ]

    out = pl.pallas_call(
        _encoder_kernel,
        out_shape=jax.ShapeDtypeStruct((B, OUT_SIZE, 1, 1), jnp.float32),
        grid_spec=pltpu.PrefetchScalarGridSpec(
            num_scalar_prefetch=0,
            grid=(1,),
            in_specs=[_fullspec(a.shape) for a in inputs],
            out_specs=pl.BlockSpec((B, OUT_SIZE, 1, 1), lambda i: (0, 0, 0, 0)),
            scratch_shapes=(
                [pltpu.VMEM((B, H2 + 2, H2 + 2, C_IN), jnp.float32)
                 for _ in range(4)]
                + [pltpu.VMEM((B, H2 + 2, H2 + 2, S), jnp.float32)]),
        ),
        # NOTE: on v7x a "parallel" batch/H grid axis would engage the second
        # TensorCore; with B=2 the work is tiny, so batch is folded into the
        # MXU M dimension instead (better on v5e/v6e, harmless on v7x).
        compiler_params=pltpu.CompilerParams(dimension_semantics=("arbitrary",)),
    )(*inputs)
    return out.reshape(B, OUT_SIZE)


# ----------------------------- params & reference -----------------------------

def init_params(key):
    """Deterministic PyTorch-style uniform(-1/sqrt(fan_in), 1/sqrt(fan_in)) init."""
    ks = jax.random.split(key, 10)

    def u(k, shape, fan_in):
        bound = 1.0 / np.sqrt(fan_in)
        return jax.random.uniform(k, shape, jnp.float32, -bound, bound)

    return {
        'w1': u(ks[0], (3, C_IN, 3, 3), C_IN * 9),
        'b1': u(ks[1], (3,), C_IN * 9),
        'w2': u(ks[2], (S, 3, 2, 2), 3 * 4),
        'b2': u(ks[3], (S,), 3 * 4),
        'w3': u(ks[4], (S, S, 3, 3), S * 9),
        'b3': u(ks[5], (S,), S * 9),
        'w4': u(ks[6], (S, S, 3, 3), S * 9),
        'b4': u(ks[7], (S,), S * 9),
        'wf': u(ks[8], (OUT_SIZE, FC_IN), FC_IN),
        'bf': u(ks[9], (OUT_SIZE,), FC_IN),
    }


def reference_forward(x, p):
    """Pure-JAX reference mirroring the PyTorch module (NCHW / OIHW)."""
    def conv(h, w, b, stride, pad):
        y = jax.lax.conv_general_dilated(
            h, w, window_strides=(stride, stride),
            padding=((pad, pad), (pad, pad)),
            dimension_numbers=('NCHW', 'OIHW', 'NCHW'),
            precision=jax.lax.Precision.HIGHEST)
        return y + b[None, :, None, None]

    h = jax.nn.relu(conv(x, p['w1'], p['b1'], 1, 1))
    h = jax.nn.relu(conv(h, p['w2'], p['b2'], 2, 0))
    h = jax.nn.relu(conv(h, p['w3'], p['b3'], 1, 1))
    h = jax.nn.relu(conv(h, p['w4'], p['b4'], 1, 1))
    h = h.reshape(h.shape[0], -1)
    return jnp.dot(h, p['wf'].T, precision=jax.lax.Precision.HIGHEST) + p['bf']


# ----------------------------- main -----------------------------

if __name__ == "__main__":
    key = jax.random.PRNGKey(0)
    k_x, k_p = jax.random.split(key)
    x = jax.random.normal(k_x, (BATCH, C_IN, S, S), jnp.float32)
    params = init_params(k_p)

    out = jax.jit(base_encoder_forward)(x, params)
    out = jax.block_until_ready(out)
    assert out.shape == (BATCH, OUT_SIZE)

    ref = reference_forward(x, params)
    # Tightened from 2e-2; margin left for possible multi-pass MXU fp32 dots.
    np.testing.assert_allclose(np.asarray(out), np.asarray(ref),
                               rtol=5e-3, atol=5e-3)

    print("KERNEL_OK")
</pallas_src>

<mosaic_0001>
module attributes {stable_mosaic.version = 11 : i64} {
  func.func @_encoder_kernel(%arg0: i32, %arg1: memref<2x8x8x4xf32, #tpu.memory_space<vmem>>, %arg2: memref<2x8x8x4xf32, #tpu.memory_space<vmem>>, %arg3: memref<2x8x8x4xf32, #tpu.memory_space<vmem>>, %arg4: memref<2x8x8x4xf32, #tpu.memory_space<vmem>>, %arg5: memref<36x3xf32, #tpu.memory_space<vmem>>, %arg6: memref<1x3xf32, #tpu.memory_space<vmem>>, %arg7: memref<12x16xf32, #tpu.memory_space<vmem>>, %arg8: memref<1x16xf32, #tpu.memory_space<vmem>>, %arg9: memref<144x16xf32, #tpu.memory_space<vmem>>, %arg10: memref<1x16xf32, #tpu.memory_space<vmem>>, %arg11: memref<144x16xf32, #tpu.memory_space<vmem>>, %arg12: memref<1x16xf32, #tpu.memory_space<vmem>>, %arg13: memref<8x64x16xf32, #tpu.memory_space<vmem>>, %arg14: memref<1x8x1x1xf32, #tpu.memory_space<vmem>>, %arg15: memref<2x8x1x1xf32, #tpu.memory_space<vmem>>, %arg16: memref<2x10x10x4xf32, #tpu.memory_space<vmem>>, %arg17: memref<2x10x10x4xf32, #tpu.memory_space<vmem>>, %arg18: memref<2x10x10x4xf32, #tpu.memory_space<vmem>>, %arg19: memref<2x10x10x4xf32, #tpu.memory_space<vmem>>, %arg20: memref<2x10x10x16xf32, #tpu.memory_space<vmem>>) attributes {dimension_semantics = [#tpu.dimension_semantics<arbitrary>], iteration_bounds = array<i64: 1>, scalar_prefetch = 0 : i64, scratch_operands = 5 : i64, tpu.core_type = #tpu.core_type<tc>, window_params = [{pipeline_mode = #tpu.pipeline_mode<synchronous>, transform_indices = @transform_0, window_bounds = array<i64: 2, 8, 8, 4>}, {pipeline_mode = #tpu.pipeline_mode<synchronous>, transform_indices = @transform_1, window_bounds = array<i64: 2, 8, 8, 4>}, {pipeline_mode = #tpu.pipeline_mode<synchronous>, transform_indices = @transform_2, window_bounds = array<i64: 2, 8, 8, 4>}, {pipeline_mode = #tpu.pipeline_mode<synchronous>, transform_indices = @transform_3, window_bounds = array<i64: 2, 8, 8, 4>}, {pipeline_mode = #tpu.pipeline_mode<synchronous>, transform_indices = @transform_4, window_bounds = array<i64: 36, 3>}, {pipeline_mode = #tpu.pipeline_mode<synchronous>, transform_indices = @transform_5, window_bounds = array<i64: 1, 3>}, {pipeline_mode = #tpu.pipeline_mode<synchronous>, transform_indices = @transform_6, window_bounds = array<i64: 12, 16>}, {pipeline_mode = #tpu.pipeline_mode<synchronous>, transform_indices = @transform_7, window_bounds = array<i64: 1, 16>}, {pipeline_mode = #tpu.pipeline_mode<synchronous>, transform_indices = @transform_8, window_bounds = array<i64: 144, 16>}, {pipeline_mode = #tpu.pipeline_mode<synchronous>, transform_indices = @transform_9, window_bounds = array<i64: 1, 16>}, {pipeline_mode = #tpu.pipeline_mode<synchronous>, transform_indices = @transform_10, window_bounds = array<i64: 144, 16>}, {pipeline_mode = #tpu.pipeline_mode<synchronous>, transform_indices = @transform_11, window_bounds = array<i64: 1, 16>}, {pipeline_mode = #tpu.pipeline_mode<synchronous>, transform_indices = @transform_12, window_bounds = array<i64: 8, 64, 16>}, {pipeline_mode = #tpu.pipeline_mode<synchronous>, transform_indices = @transform_13, window_bounds = array<i64: 1, 8, 1, 1>}, {pipeline_mode = #tpu.pipeline_mode<synchronous>, transform_indices = @transform_14, window_bounds = array<i64: 2, 8, 1, 1>}]} {
    %cst = arith.constant 0.000000e+00 : f32
    %0 = vector.broadcast %cst : f32 to vector<2x10x10x4xf32>
    %c0 = arith.constant 0 : index
    %c0_0 = arith.constant 0 : index
    %c0_1 = arith.constant 0 : index
    %c0_2 = arith.constant 0 : index
    %1 = vector.load %arg16[%c0, %c0_0, %c0_1, %c0_2] : memref<2x10x10x4xf32, #tpu.memory_space<vmem>>, vector<2x10x10x4xf32>
    tpu.vector_store %arg16[%c0, %c0_0, %c0_1, %c0_2], %0 {strides = array<i32>} : memref<2x10x10x4xf32, #tpu.memory_space<vmem>>, vector<2x10x10x4xf32>,
    %c0_3 = arith.constant 0 : index
    %c0_4 = arith.constant 0 : index
    %c0_5 = arith.constant 0 : index
    %c0_6 = arith.constant 0 : index
    %2 = vector.load %arg1[%c0_3, %c0_4, %c0_5, %c0_6] : memref<2x8x8x4xf32, #tpu.memory_space<vmem>>, vector<2x8x8x4xf32>
    %c0_7 = arith.constant 0 : index
    %c1 = arith.constant 1 : index
    %c1_8 = arith.constant 1 : index
    %c0_9 = arith.constant 0 : index
    %3 = vector.load %arg16[%c0_7, %c1, %c1_8, %c0_9] : memref<2x10x10x4xf32, #tpu.memory_space<vmem>>, vector<2x8x8x4xf32>
    tpu.vector_store %arg16[%c0_7, %c1, %c1_8, %c0_9], %2 {strides = array<i32>} : memref<2x10x10x4xf32, #tpu.memory_space<vmem>>, vector<2x8x8x4xf32>,
    %cst_10 = arith.constant 0.000000e+00 : f32
    %4 = vector.broadcast %cst_10 : f32 to vector<2x10x10x4xf32>
    %c0_11 = arith.constant 0 : index
    %c0_12 = arith.constant 0 : index
    %c0_13 = arith.constant 0 : index
    %c0_14 = arith.constant 0 : index
    %5 = vector.load %arg17[%c0_11, %c0_12, %c0_13, %c0_14] : memref<2x10x10x4xf32, #tpu.memory_space<vmem>>, vector<2x10x10x4xf32>
    tpu.vector_store %arg17[%c0_11, %c0_12, %c0_13, %c0_14], %4 {strides = array<i32>} : memref<2x10x10x4xf32, #tpu.memory_space<vmem>>, vector<2x10x10x4xf32>,
    %c0_15 = arith.constant 0 : index
    %c0_16 = arith.constant 0 : index
    %c0_17 = arith.constant 0 : index
    %c0_18 = arith.constant 0 : index
    %6 = vector.load %arg2[%c0_15, %c0_16, %c0_17, %c0_18] : memref<2x8x8x4xf32, #tpu.memory_space<vmem>>, vector<2x8x8x4xf32>
    %c0_19 = arith.constant 0 : index
    %c1_20 = arith.constant 1 : index
    %c1_21 = arith.constant 1 : index
    %c0_22 = arith.constant 0 : index
    %7 = vector.load %arg17[%c0_19, %c1_20, %c1_21, %c0_22] : memref<2x10x10x4xf32, #tpu.memory_space<vmem>>, vector<2x8x8x4xf32>
    tpu.vector_store %arg17[%c0_19, %c1_20, %c1_21, %c0_22], %6 {strides = array<i32>} : memref<2x10x10x4xf32, #tpu.memory_space<vmem>>, vector<2x8x8x4xf32>,
    %cst_23 = arith.constant 0.000000e+00 : f32
    %8 = vector.broadcast %cst_23 : f32 to vector<2x10x10x4xf32>
    %c0_24 = arith.constant 0 : index
    %c0_25 = arith.constant 0 : index
    %c0_26 = arith.constant 0 : index
    %c0_27 = arith.constant 0 : index
    %9 = vector.load %arg18[%c0_24, %c0_25, %c0_26, %c0_27] : memref<2x10x10x4xf32, #tpu.memory_space<vmem>>, vector<2x10x10x4xf32>
    tpu.vector_store %arg18[%c0_24, %c0_25, %c0_26, %c0_27], %8 {strides = array<i32>} : memref<2x10x10x4xf32, #tpu.memory_space<vmem>>, vector<2x10x10x4xf32>,
    %c0_28 = arith.constant 0 : index
    %c0_29 = arith.constant 0 : index
    %c0_30 = arith.constant 0 : index
    %c0_31 = arith.constant 0 : index
    %10 = vector.load %arg3[%c0_28, %c0_29, %c0_30, %c0_31] : memref<2x8x8x4xf32, #tpu.memory_space<vmem>>, vector<2x8x8x4xf32>
    %c0_32 = arith.constant 0 : index
    %c1_33 = arith.constant 1 : index
    %c1_34 = arith.constant 1 : index
    %c0_35 = arith.constant 0 : index
    %11 = vector.load %arg18[%c0_32, %c1_33, %c1_34, %c0_35] : memref<2x10x10x4xf32, #tpu.memory_space<vmem>>, vector<2x8x8x4xf32>
    tpu.vector_store %arg18[%c0_32, %c1_33, %c1_34, %c0_35], %10 {strides = array<i32>} : memref<2x10x10x4xf32, #tpu.memory_space<vmem>>, vector<2x8x8x4xf32>,
    %cst_36 = arith.constant 0.000000e+00 : f32
    %12 = vector.broadcast %cst_36 : f32 to vector<2x10x10x4xf32>
    %c0_37 = arith.constant 0 : index
    %c0_38 = arith.constant 0 : index
    %c0_39 = arith.constant 0 : index
    %c0_40 = arith.constant 0 : index
    %13 = vector.load %arg19[%c0_37, %c0_38, %c0_39, %c0_40] : memref<2x10x10x4xf32, #tpu.memory_space<vmem>>, vector<2x10x10x4xf32>
    tpu.vector_store %arg19[%c0_37, %c0_38, %c0_39, %c0_40], %12 {strides = array<i32>} : memref<2x10x10x4xf32, #tpu.memory_space<vmem>>, vector<2x10x10x4xf32>,
    %c0_41 = arith.constant 0 : index
    %c0_42 = arith.constant 0 : index
    %c0_43 = arith.constant 0 : index
    %c0_44 = arith.constant 0 : index
    %14 = vector.load %arg4[%c0_41, %c0_42, %c0_43, %c0_44] : memref<2x8x8x4xf32, #tpu.memory_space<vmem>>, vector<2x8x8x4xf32>
    %c0_45 = arith.constant 0 : index
    %c1_46 = arith.constant 1 : index
    %c1_47 = arith.constant 1 : index
    %c0_48 = arith.constant 0 : index
    %15 = vector.load %arg19[%c0_45, %c1_46, %c1_47, %c0_48] : memref<2x10x10x4xf32, #tpu.memory_space<vmem>>, vector<2x8x8x4xf32>
    tpu.vector_store %arg19[%c0_45, %c1_46, %c1_47, %c0_48], %14 {strides = array<i32>} : memref<2x10x10x4xf32, #tpu.memory_space<vmem>>, vector<2x8x8x4xf32>,
    %c0_49 = arith.constant 0 : index
    %c0_50 = arith.constant 0 : index
    %c0_51 = arith.constant 0 : index
    %c0_52 = arith.constant 0 : index
    %16 = vector.load %arg16[%c0_49, %c0_50, %c0_51, %c0_52] : memref<2x10x10x4xf32, #tpu.memory_space<vmem>>, vector<2x10x10x4xf32>
    %c0_53 = arith.constant 0 : index
    %c0_54 = arith.constant 0 : index
    %c0_55 = arith.constant 0 : index
    %c0_56 = arith.constant 0 : index
    %17 = vector.load %arg17[%c0_53, %c0_54, %c0_55, %c0_56] : memref<2x10x10x4xf32, #tpu.memory_space<vmem>>, vector<2x10x10x4xf32>
    %c0_57 = arith.constant 0 : index
    %c0_58 = arith.constant 0 : index
    %c0_59 = arith.constant 0 : index
    %c0_60 = arith.constant 0 : index
    %18 = vector.load %arg18[%c0_57, %c0_58, %c0_59, %c0_60] : memref<2x10x10x4xf32, #tpu.memory_space<vmem>>, vector<2x10x10x4xf32>
    %c0_61 = arith.constant 0 : index
    %c0_62 = arith.constant 0 : index
    %c0_63 = arith.constant 0 : index
    %c0_64 = arith.constant 0 : index
    %19 = vector.load %arg19[%c0_61, %c0_62, %c0_63, %c0_64] : memref<2x10x10x4xf32, #tpu.memory_space<vmem>>, vector<2x10x10x4xf32>
    %20 = vector.extract_strided_slice %19 {offsets = [0, 0, 0, 0], sizes = [2, 8, 8, 4], strides = [1, 1, 1, 1]} : vector<2x10x10x4xf32> to vector<2x8x8x4xf32>
    %21 = vector.shape_cast %20 : vector<2x8x8x4xf32> to vector<128x4xf32>
    %22 = vector.extract_strided_slice %18 {offsets = [0, 0, 1, 0], sizes = [2, 8, 8, 4], strides = [1, 1, 1, 1]} : vector<2x10x10x4xf32> to vector<2x8x8x4xf32>
    %23 = vector.shape_cast %22 : vector<2x8x8x4xf32> to vector<128x4xf32>
    %24 = vector.extract_strided_slice %19 {offsets = [0, 0, 1, 0], sizes = [2, 8, 8, 4], strides = [1, 1, 1, 1]} : vector<2x10x10x4xf32> to vector<2x8x8x4xf32>
    %25 = vector.shape_cast %24 : vector<2x8x8x4xf32> to vector<128x4xf32>
    %26 = vector.extract_strided_slice %17 {offsets = [0, 1, 0, 0], sizes = [2, 8, 8, 4], strides = [1, 1, 1, 1]} : vector<2x10x10x4xf32> to vector<2x8x8x4xf32>
    %27 = vector.shape_cast %26 : vector<2x8x8x4xf32> to vector<128x4xf32>
    %28 = vector.extract_strided_slice %16 {offsets = [0, 1, 1, 0], sizes = [2, 8, 8, 4], strides = [1, 1, 1, 1]} : vector<2x10x10x4xf32> to vector<2x8x8x4xf32>
    %29 = vector.shape_cast %28 : vector<2x8x8x4xf32> to vector<128x4xf32>
    %30 = vector.extract_strided_slice %17 {offsets = [0, 1, 1, 0], sizes = [2, 8, 8, 4], strides = [1, 1, 1, 1]} : vector<2x10x10x4xf32> to vector<2x8x8x4xf32>
    %31 = vector.shape_cast %30 : vector<2x8x8x4xf32> to vector<128x4xf32>
    %32 = vector.extract_strided_slice %19 {offsets = [0, 1, 0, 0], sizes = [2, 8, 8, 4], strides = [1, 1, 1, 1]} : vector<2x10x10x4xf32> to vector<2x8x8x4xf32>
    %33 = vector.shape_cast %32 : vector<2x8x8x4xf32> to vector<128x4xf32>
    %34 = vector.extract_strided_slice %18 {offsets = [0, 1, 1, 0], sizes = [2, 8, 8, 4], strides = [1, 1, 1, 1]} : vector<2x10x10x4xf32> to vector<2x8x8x4xf32>
    %35 = vector.shape_cast %34 : vector<2x8x8x4xf32> to vector<128x4xf32>
    %36 = vector.extract_strided_slice %19 {offsets = [0, 1, 1, 0], sizes = [2, 8, 8, 4], strides = [1, 1, 1, 1]} : vector<2x10x10x4xf32> to vector<2x8x8x4xf32>
    %37 = vector.shape_cast %36 : vector<2x8x8x4xf32> to vector<128x4xf32>
    %38 = tpu.concatenate %21, %23, %25, %27, %29, %31, %33, %35, %37 in 1 : vector<128x4xf32>, vector<128x4xf32>, vector<128x4xf32>, vector<128x4xf32>, vector<128x4xf32>, vector<128x4xf32>, vector<128x4xf32>, vector<128x4xf32>, vector<128x4xf32> -> vector<128x36xf32>
    %c0_65 = arith.constant 0 : index
    %c0_66 = arith.constant 0 : index
    %39 = vector.load %arg5[%c0_65, %c0_66] : memref<36x3xf32, #tpu.memory_space<vmem>>, vector<36x3xf32>
    %cst_67 = arith.constant dense<0.000000e+00> : vector<128x3xf32>
    %40 = tpu.matmul %38, %39, %cst_67 {dimension_numbers = #tpu.dot_dimension_numbers<[1], [0], [0], [1], [0, 0, 1, 1], [], []>} : vector<128x36xf32>, vector<36x3xf32>, vector<128x3xf32> -> vector<128x3xf32>
    %c0_68 = arith.constant 0 : index
    %c0_69 = arith.constant 0 : index
    %41 = vector.load %arg6[%c0_68, %c0_69] : memref<1x3xf32, #tpu.memory_space<vmem>>, vector<1x3xf32>
    %42 = vector.broadcast %41 : vector<1x3xf32> to vector<128x3xf32>
    %43 = arith.addf %40, %42 : vector<128x3xf32>
    %cst_70 = arith.constant 0.000000e+00 : f32
    %44 = vector.broadcast %cst_70 : f32 to vector<128x3xf32>
    %45 = arith.maximumf %43, %44 : vector<128x3xf32>
    %46 = vector.extract_strided_slice %18 {offsets = [0, 0, 1, 0], sizes = [2, 8, 8, 4], strides = [1, 1, 1, 1]} : vector<2x10x10x4xf32> to vector<2x8x8x4xf32>
    %47 = vector.shape_cast %46 : vector<2x8x8x4xf32> to vector<128x4xf32>
    %48 = vector.extract_strided_slice %19 {offsets = [0, 0, 1, 0], sizes = [2, 8, 8, 4], strides = [1, 1, 1, 1]} : vector<2x10x10x4xf32> to vector<2x8x8x4xf32>
    %49 = vector.shape_cast %48 : vector<2x8x8x4xf32> to vector<128x4xf32>
    %50 = vector.extract_strided_slice %18 {offsets = [0, 0, 2, 0], sizes = [2, 8, 8, 4], strides = [1, 1, 1, 1]} : vector<2x10x10x4xf32> to vector<2x8x8x4xf32>
    %51 = vector.shape_cast %50 : vector<2x8x8x4xf32> to vector<128x4xf32>
    %52 = vector.extract_strided_slice %16 {offsets = [0, 1, 1, 0], sizes = [2, 8, 8, 4], strides = [1, 1, 1, 1]} : vector<2x10x10x4xf32> to vector<2x8x8x4xf32>
    %53 = vector.shape_cast %52 : vector<2x8x8x4xf32> to vector<128x4xf32>
    %54 = vector.extract_strided_slice %17 {offsets = [0, 1, 1, 0], sizes = [2, 8, 8, 4], strides = [1, 1, 1, 1]} : vector<2x10x10x4xf32> to vector<2x8x8x4xf32>
    %55 = vector.shape_cast %54 : vector<2x8x8x4xf32> to vector<128x4xf32>
    %56 = vector.extract_strided_slice %16 {offsets = [0, 1, 2, 0], sizes = [2, 8, 8, 4], strides = [1, 1, 1, 1]} : vector<2x10x10x4xf32> to vector<2x8x8x4xf32>
    %57 = vector.shape_cast %56 : vector<2x8x8x4xf32> to vector<128x4xf32>
    %58 = vector.extract_strided_slice %18 {offsets = [0, 1, 1, 0], sizes = [2, 8, 8, 4], strides = [1, 1, 1, 1]} : vector<2x10x10x4xf32> to vector<2x8x8x4xf32>
    %59 = vector.shape_cast %58 : vector<2x8x8x4xf32> to vector<128x4xf32>
    %60 = vector.extract_strided_slice %19 {offsets = [0, 1, 1, 0], sizes = [2, 8, 8, 4], strides = [1, 1, 1, 1]} : vector<2x10x10x4xf32> to vector<2x8x8x4xf32>
    %61 = vector.shape_cast %60 : vector<2x8x8x4xf32> to vector<128x4xf32>
    %62 = vector.extract_strided_slice %18 {offsets = [0, 1, 2, 0], sizes = [2, 8, 8, 4], strides = [1, 1, 1, 1]} : vector<2x10x10x4xf32> to vector<2x8x8x4xf32>
    %63 = vector.shape_cast %62 : vector<2x8x8x4xf32> to vector<128x4xf32>
    %64 = tpu.concatenate %47, %49, %51, %53, %55, %57, %59, %61, %63 in 1 : vector<128x4xf32>, vector<128x4xf32>, vector<128x4xf32>, vector<128x4xf32>, vector<128x4xf32>, vector<128x4xf32>, vector<128x4xf32>, vector<128x4xf32>, vector<128x4xf32> -> vector<128x36xf32>
    %c0_71 = arith.constant 0 : index
    %c0_72 = arith.constant 0 : index
    %65 = vector.load %arg5[%c0_71, %c0_72] : memref<36x3xf32, #tpu.memory_space<vmem>>, vector<36x3xf32>
    %cst_73 = arith.constant dense<0.000000e+00> : vector<128x3xf32>
    %66 = tpu.matmul %64, %65, %cst_73 {dimension_numbers = #tpu.dot_dimension_numbers<[1], [0], [0], [1], [0, 0, 1, 1], [], []>} : vector<128x36xf32>, vector<36x3xf32>, vector<128x3xf32> -> vector<128x3xf32>
    %c0_74 = arith.constant 0 : index
    %c0_75 = arith.constant 0 : index
    %67 = vector.load %arg6[%c0_74, %c0_75] : memref<1x3xf32, #tpu.memory_space<vmem>>, vector<1x3xf32>
    %68 = vector.broadcast %67 : vector<1x3xf32> to vector<128x3xf32>
    %69 = arith.addf %66, %68 : vector<128x3xf32>
    %cst_76 = arith.constant 0.000000e+00 : f32
    %70 = vector.broadcast %cst_76 : f32 to vector<128x3xf32>
    %71 = arith.maximumf %69, %70 : vector<128x3xf32>
    %72 = vector.extract_strided_slice %17 {offsets = [0, 1, 0, 0], sizes = [2, 8, 8, 4], strides = [1, 1, 1, 1]} : vector<2x10x10x4xf32> to vector<2x8x8x4xf32>
    %73 = vector.shape_cast %72 : vector<2x8x8x4xf32> to vector<128x4xf32>
    %74 = vector.extract_strided_slice %16 {offsets = [0, 1, 1, 0], sizes = [2, 8, 8, 4], strides = [1, 1, 1, 1]} : vector<2x10x10x4xf32> to vector<2x8x8x4xf32>
    %75 = vector.shape_cast %74 : vector<2x8x8x4xf32> to vector<128x4xf32>
    %76 = vector.extract_strided_slice %17 {offsets = [0, 1, 1, 0], sizes = [2, 8, 8, 4], strides = [1, 1, 1, 1]} : vector<2x10x10x4xf32> to vector<2x8x8x4xf32>
    %77 = vector.shape_cast %76 : vector<2x8x8x4xf32> to vector<128x4xf32>
    %78 = vector.extract_strided_slice %19 {offsets = [0, 1, 0, 0], sizes = [2, 8, 8, 4], strides = [1, 1, 1, 1]} : vector<2x10x10x4xf32> to vector<2x8x8x4xf32>
    %79 = vector.shape_cast %78 : vector<2x8x8x4xf32> to vector<128x4xf32>
    %80 = vector.extract_strided_slice %18 {offsets = [0, 1, 1, 0], sizes = [2, 8, 8, 4], strides = [1, 1, 1, 1]} : vector<2x10x10x4xf32> to vector<2x8x8x4xf32>
    %81 = vector.shape_cast %80 : vector<2x8x8x4xf32> to vector<128x4xf32>
    %82 = vector.extract_strided_slice %19 {offsets = [0, 1, 1, 0], sizes = [2, 8, 8, 4], strides = [1, 1, 1, 1]} : vector<2x10x10x4xf32> to vector<2x8x8x4xf32>
    %83 = vector.shape_cast %82 : vector<2x8x8x4xf32> to vector<128x4xf32>
    %84 = vector.extract_strided_slice %17 {offsets = [0, 2, 0, 0], sizes = [2, 8, 8, 4], strides = [1, 1, 1, 1]} : vector<2x10x10x4xf32> to vector<2x8x8x4xf32>
    %85 = vector.shape_cast %84 : vector<2x8x8x4xf32> to vector<128x4xf32>
    %86 = vector.extract_strided_slice %16 {offsets = [0, 2, 1, 0], sizes = [2, 8, 8, 4], strides = [1, 1, 1, 1]} : vector<2x10x10x4xf32> to vector<2x8x8x4xf32>
    %87 = vector.shape_cast %86 : vector<2x8x8x4xf32> to vector<128x4xf32>
    %88 = vector.extract_strided_slice %17 {offsets = [0, 2, 1, 0], sizes = [2, 8, 8, 4], strides = [1, 1, 1, 1]} : vector<2x10x10x4xf32> to vector<2x8x8x4xf32>
    %89 = vector.shape_cast %88 : vector<2x8x8x4xf32> to vector<128x4xf32>
    %90 = tpu.concatenate %73, %75, %77, %79, %81, %83, %85, %87, %89 in 1 : vector<128x4xf32>, vector<128x4xf32>, vector<128x4xf32>, vector<128x4xf32>, vector<128x4xf32>, vector<128x4xf32>, vector<128x4xf32>, vector<128x4xf32>, vector<128x4xf32> -> vector<128x36xf32>
    %c0_77 = arith.constant 0 : index
    %c0_78 = arith.constant 0 : index
    %91 = vector.load %arg5[%c0_77, %c0_78] : memref<36x3xf32, #tpu.memory_space<vmem>>, vector<36x3xf32>
    %cst_79 = arith.constant dense<0.000000e+00> : vector<128x3xf32>
    %92 = tpu.matmul %90, %91, %cst_79 {dimension_numbers = #tpu.dot_dimension_numbers<[1], [0], [0], [1], [0, 0, 1, 1], [], []>} : vector<128x36xf32>, vector<36x3xf32>, vector<128x3xf32> -> vector<128x3xf32>
    %c0_80 = arith.constant 0 : index
    %c0_81 = arith.constant 0 : index
    %93 = vector.load %arg6[%c0_80, %c0_81] : memref<1x3xf32, #tpu.memory_space<vmem>>, vector<1x3xf32>
    %94 = vector.broadcast %93 : vector<1x3xf32> to vector<128x3xf32>
    %95 = arith.addf %92, %94 : vector<128x3xf32>
    %cst_82 = arith.constant 0.000000e+00 : f32
    %96 = vector.broadcast %cst_82 : f32 to vector<128x3xf32>
    %97 = arith.maximumf %95, %96 : vector<128x3xf32>
    %98 = vector.extract_strided_slice %16 {offsets = [0, 1, 1, 0], sizes = [2, 8, 8, 4], strides = [1, 1, 1, 1]} : vector<2x10x10x4xf32> to vector<2x8x8x4xf32>
    %99 = vector.shape_cast %98 : vector<2x8x8x4xf32> to vector<128x4xf32>
    %100 = vector.extract_strided_slice %17 {offsets = [0, 1, 1, 0], sizes = [2, 8, 8, 4], strides = [1, 1, 1, 1]} : vector<2x10x10x4xf32> to vector<2x8x8x4xf32>
    %101 = vector.shape_cast %100 : vector<2x8x8x4xf32> to vector<128x4xf32>
    %102 = vector.extract_strided_slice %16 {offsets = [0, 1, 2, 0], sizes = [2, 8, 8, 4], strides = [1, 1, 1, 1]} : vector<2x10x10x4xf32> to vector<2x8x8x4xf32>
    %103 = vector.shape_cast %102 : vector<2x8x8x4xf32> to vector<128x4xf32>
    %104 = vector.extract_strided_slice %18 {offsets = [0, 1, 1, 0], sizes = [2, 8, 8, 4], strides = [1, 1, 1, 1]} : vector<2x10x10x4xf32> to vector<2x8x8x4xf32>
    %105 = vector.shape_cast %104 : vector<2x8x8x4xf32> to vector<128x4xf32>
    %106 = vector.extract_strided_slice %19 {offsets = [0, 1, 1, 0], sizes = [2, 8, 8, 4], strides = [1, 1, 1, 1]} : vector<2x10x10x4xf32> to vector<2x8x8x4xf32>
    %107 = vector.shape_cast %106 : vector<2x8x8x4xf32> to vector<128x4xf32>
    %108 = vector.extract_strided_slice %18 {offsets = [0, 1, 2, 0], sizes = [2, 8, 8, 4], strides = [1, 1, 1, 1]} : vector<2x10x10x4xf32> to vector<2x8x8x4xf32>
    %109 = vector.shape_cast %108 : vector<2x8x8x4xf32> to vector<128x4xf32>
    %110 = vector.extract_strided_slice %16 {offsets = [0, 2, 1, 0], sizes = [2, 8, 8, 4], strides = [1, 1, 1, 1]} : vector<2x10x10x4xf32> to vector<2x8x8x4xf32>
    %111 = vector.shape_cast %110 : vector<2x8x8x4xf32> to vector<128x4xf32>
    %112 = vector.extract_strided_slice %17 {offsets = [0, 2, 1, 0], sizes = [2, 8, 8, 4], strides = [1, 1, 1, 1]} : vector<2x10x10x4xf32> to vector<2x8x8x4xf32>
    %113 = vector.shape_cast %112 : vector<2x8x8x4xf32> to vector<128x4xf32>
    %114 = vector.extract_strided_slice %16 {offsets = [0, 2, 2, 0], sizes = [2, 8, 8, 4], strides = [1, 1, 1, 1]} : vector<2x10x10x4xf32> to vector<2x8x8x4xf32>
    %115 = vector.shape_cast %114 : vector<2x8x8x4xf32> to vector<128x4xf32>
    %116 = tpu.concatenate %99, %101, %103, %105, %107, %109, %111, %113, %115 in 1 : vector<128x4xf32>, vector<128x4xf32>, vector<128x4xf32>, vector<128x4xf32>, vector<128x4xf32>, vector<128x4xf32>, vector<128x4xf32>, vector<128x4xf32>, vector<128x4xf32> -> vector<128x36xf32>
    %c0_83 = arith.constant 0 : index
    %c0_84 = arith.constant 0 : index
    %117 = vector.load %arg5[%c0_83, %c0_84] : memref<36x3xf32, #tpu.memory_space<vmem>>, vector<36x3xf32>
    %cst_85 = arith.constant dense<0.000000e+00> : vector<128x3xf32>
    %118 = tpu.matmul %116, %117, %cst_85 {dimension_numbers = #tpu.dot_dimension_numbers<[1], [0], [0], [1], [0, 0, 1, 1], [], []>} : vector<128x36xf32>, vector<36x3xf32>, vector<128x3xf32> -> vector<128x3xf32>
    %c0_86 = arith.constant 0 : index
    %c0_87 = arith.constant 0 : index
    %119 = vector.load %arg6[%c0_86, %c0_87] : memref<1x3xf32, #tpu.memory_space<vmem>>, vector<1x3xf32>
    %120 = vector.broadcast %119 : vector<1x3xf32> to vector<128x3xf32>
    %121 = arith.addf %118, %120 : vector<128x3xf32>
    %cst_88 = arith.constant 0.000000e+00 : f32
    %122 = vector.broadcast %cst_88 : f32 to vector<128x3xf32>
    %123 = arith.maximumf %121, %122 : vector<128x3xf32>
    %124 = tpu.concatenate %45, %71, %97, %123 in 1 : vector<128x3xf32>, vector<128x3xf32>, vector<128x3xf32>, vector<128x3xf32> -> vector<128x12xf32>
    %c0_89 = arith.constant 0 : index
    %c0_90 = arith.constant 0 : index
    %125 = vector.load %arg7[%c0_89, %c0_90] : memref<12x16xf32, #tpu.memory_space<vmem>>, vector<12x16xf32>
    %cst_91 = arith.constant dense<0.000000e+00> : vector<128x16xf32>
    %126 = tpu.matmul %124, %125, %cst_91 {dimension_numbers = #tpu.dot_dimension_numbers<[1], [0], [0], [1], [0, 0, 1, 1], [], []>} : vector<128x12xf32>, vector<12x16xf32>, vector<128x16xf32> -> vector<128x16xf32>
    %c0_92 = arith.constant 0 : index
    %c0_93 = arith.constant 0 : index
    %127 = vector.load %arg8[%c0_92, %c0_93] : memref<1x16xf32, #tpu.memory_space<vmem>>, vector<1x16xf32>
    %128 = vector.broadcast %127 : vector<1x16xf32> to vector<128x16xf32>
    %129 = arith.addf %126, %128 : vector<128x16xf32>
    %cst_94 = arith.constant 0.000000e+00 : f32
    %130 = vector.broadcast %cst_94 : f32 to vector<128x16xf32>
    %131 = arith.maximumf %129, %130 : vector<128x16xf32>
    %cst_95 = arith.constant 0.000000e+00 : f32
    %132 = vector.broadcast %cst_95 : f32 to vector<2x10x10x16xf32>
    %c0_96 = arith.constant 0 : index
    %c0_97 = arith.constant 0 : index
    %c0_98 = arith.constant 0 : index
    %c0_99 = arith.constant 0 : index
    %133 = vector.load %arg20[%c0_96, %c0_97, %c0_98, %c0_99] : memref<2x10x10x16xf32, #tpu.memory_space<vmem>>, vector<2x10x10x16xf32>
    tpu.vector_store %arg20[%c0_96, %c0_97, %c0_98, %c0_99], %132 {strides = array<i32>} : memref<2x10x10x16xf32, #tpu.memory_space<vmem>>, vector<2x10x10x16xf32>,
    %134 = vector.shape_cast %131 : vector<128x16xf32> to vector<2x8x8x16xf32>
    %c0_100 = arith.constant 0 : index
    %c1_101 = arith.constant 1 : index
    %c1_102 = arith.constant 1 : index
    %c0_103 = arith.constant 0 : index
    %135 = vector.load %arg20[%c0_100, %c1_101, %c1_102, %c0_103] : memref<2x10x10x16xf32, #tpu.memory_space<vmem>>, vector<2x8x8x16xf32>
    tpu.vector_store %arg20[%c0_100, %c1_101, %c1_102, %c0_103], %134 {strides = array<i32>} : memref<2x10x10x16xf32, #tpu.memory_space<vmem>>, vector<2x8x8x16xf32>,
    %c0_104 = arith.constant 0 : index
    %c0_105 = arith.constant 0 : index
    %c0_106 = arith.constant 0 : index
    %c0_107 = arith.constant 0 : index
    %136 = vector.load %arg20[%c0_104, %c0_105, %c0_106, %c0_107] : memref<2x10x10x16xf32, #tpu.memory_space<vmem>>, vector<2x10x10x16xf32>
    %137 = vector.extract_strided_slice %136 {offsets = [0, 0, 0, 0], sizes = [2, 8, 8, 16], strides = [1, 1, 1, 1]} : vector<2x10x10x16xf32> to vector<2x8x8x16xf32>
    %138 = vector.shape_cast %137 : vector<2x8x8x16xf32> to vector<128x16xf32>
    %139 = vector.extract_strided_slice %136 {offsets = [0, 0, 1, 0], sizes = [2, 8, 8, 16], strides = [1, 1, 1, 1]} : vector<2x10x10x16xf32> to vector<2x8x8x16xf32>
    %140 = vector.shape_cast %139 : vector<2x8x8x16xf32> to vector<128x16xf32>
    %141 = vector.extract_strided_slice %136 {offsets = [0, 0, 2, 0], sizes = [2, 8, 8, 16], strides = [1, 1, 1, 1]} : vector<2x10x10x16xf32> to vector<2x8x8x16xf32>
    %142 = vector.shape_cast %141 : vector<2x8x8x16xf32> to vector<128x16xf32>
    %143 = vector.extract_strided_slice %136 {offsets = [0, 1, 0, 0], sizes = [2, 8, 8, 16], strides = [1, 1, 1, 1]} : vector<2x10x10x16xf32> to vector<2x8x8x16xf32>
    %144 = vector.shape_cast %143 : vector<2x8x8x16xf32> to vector<128x16xf32>
    %145 = vector.extract_strided_slice %136 {offsets = [0, 1, 1, 0], sizes = [2, 8, 8, 16], strides = [1, 1, 1, 1]} : vector<2x10x10x16xf32> to vector<2x8x8x16xf32>
    %146 = vector.shape_cast %145 : vector<2x8x8x16xf32> to vector<128x16xf32>
    %147 = vector.extract_strided_slice %136 {offsets = [0, 1, 2, 0], sizes = [2, 8, 8, 16], strides = [1, 1, 1, 1]} : vector<2x10x10x16xf32> to vector<2x8x8x16xf32>
    %148 = vector.shape_cast %147 : vector<2x8x8x16xf32> to vector<128x16xf32>
    %149 = vector.extract_strided_slice %136 {offsets = [0, 2, 0, 0], sizes = [2, 8, 8, 16], strides = [1, 1, 1, 1]} : vector<2x10x10x16xf32> to vector<2x8x8x16xf32>
    %150 = vector.shape_cast %149 : vector<2x8x8x16xf32> to vector<128x16xf32>
    %151 = vector.extract_strided_slice %136 {offsets = [0, 2, 1, 0], sizes = [2, 8, 8, 16], strides = [1, 1, 1, 1]} : vector<2x10x10x16xf32> to vector<2x8x8x16xf32>
    %152 = vector.shape_cast %151 : vector<2x8x8x16xf32> to vector<128x16xf32>
    %153 = vector.extract_strided_slice %136 {offsets = [0, 2, 2, 0], sizes = [2, 8, 8, 16], strides = [1, 1, 1, 1]} : vector<2x10x10x16xf32> to vector<2x8x8x16xf32>
    %154 = vector.shape_cast %153 : vector<2x8x8x16xf32> to vector<128x16xf32>
    %155 = tpu.concatenate %138, %140, %142, %144, %146, %148, %150, %152, %154 in 1 : vector<128x16xf32>, vector<128x16xf32>, vector<128x16xf32>, vector<128x16xf32>, vector<128x16xf32>, vector<128x16xf32>, vector<128x16xf32>, vector<128x16xf32>, vector<128x16xf32> -> vector<128x144xf32>
    %c0_108 = arith.constant 0 : index
    %c0_109 = arith.constant 0 : index
    %156 = vector.load %arg9[%c0_108, %c0_109] : memref<144x16xf32, #tpu.memory_space<vmem>>, vector<144x16xf32>
    %cst_110 = arith.constant dense<0.000000e+00> : vector<128x16xf32>
    %157 = tpu.matmul %155, %156, %cst_110 {dimension_numbers = #tpu.dot_dimension_numbers<[1], [0], [0], [1], [0, 0, 1, 1], [], []>} : vector<128x144xf32>, vector<144x16xf32>, vector<128x16xf32> -> vector<128x16xf32>
    %c0_111 = arith.constant 0 : index
    %c0_112 = arith.constant 0 : index
    %158 = vector.load %arg10[%c0_111, %c0_112] : memref<1x16xf32, #tpu.memory_space<vmem>>, vector<1x16xf32>
    %159 = vector.broadcast %158 : vector<1x16xf32> to vector<128x16xf32>
    %160 = arith.addf %157, %159 : vector<128x16xf32>
    %cst_113 = arith.constant 0.000000e+00 : f32
    %161 = vector.broadcast %cst_113 : f32 to vector<128x16xf32>
    %162 = arith.maximumf %160, %161 : vector<128x16xf32>
    %163 = vector.shape_cast %162 : vector<128x16xf32> to vector<2x8x8x16xf32>
    %c0_114 = arith.constant 0 : index
    %c1_115 = arith.constant 1 : index
    %c1_116 = arith.constant 1 : index
    %c0_117 = arith.constant 0 : index
    %164 = vector.load %arg20[%c0_114, %c1_115, %c1_116, %c0_117] : memref<2x10x10x16xf32, #tpu.memory_space<vmem>>, vector<2x8x8x16xf32>
    tpu.vector_store %arg20[%c0_114, %c1_115, %c1_116, %c0_117], %163 {strides = array<i32>} : memref<2x10x10x16xf32, #tpu.memory_space<vmem>>, vector<2x8x8x16xf32>,
    %c0_118 = arith.constant 0 : index
    %c0_119 = arith.constant 0 : index
    %c0_120 = arith.constant 0 : index
    %c0_121 = arith.constant 0 : index
    %165 = vector.load %arg20[%c0_118, %c0_119, %c0_120, %c0_121] : memref<2x10x10x16xf32, #tpu.memory_space<vmem>>, vector<2x10x10x16xf32>
    %166 = vector.extract_strided_slice %165 {offsets = [0, 0, 0, 0], sizes = [2, 8, 8, 16], strides = [1, 1, 1, 1]} : vector<2x10x10x16xf32> to vector<2x8x8x16xf32>
    %167 = vector.shape_cast %166 : vector<2x8x8x16xf32> to vector<128x16xf32>
    %168 = vector.extract_strided_slice %165 {offsets = [0, 0, 1, 0], sizes = [2, 8, 8, 16], strides = [1, 1, 1, 1]} : vector<2x10x10x16xf32> to vector<2x8x8x16xf32>
    %169 = vector.shape_cast %168 : vector<2x8x8x16xf32> to vector<128x16xf32>
    %170 = vector.extract_strided_slice %165 {offsets = [0, 0, 2, 0], sizes = [2, 8, 8, 16], strides = [1, 1, 1, 1]} : vector<2x10x10x16xf32> to vector<2x8x8x16xf32>
    %171 = vector.shape_cast %170 : vector<2x8x8x16xf32> to vector<128x16xf32>
    %172 = vector.extract_strided_slice %165 {offsets = [0, 1, 0, 0], sizes = [2, 8, 8, 16], strides = [1, 1, 1, 1]} : vector<2x10x10x16xf32> to vector<2x8x8x16xf32>
    %173 = vector.shape_cast %172 : vector<2x8x8x16xf32> to vector<128x16xf32>
    %174 = vector.extract_strided_slice %165 {offsets = [0, 1, 1, 0], sizes = [2, 8, 8, 16], strides = [1, 1, 1, 1]} : vector<2x10x10x16xf32> to vector<2x8x8x16xf32>
    %175 = vector.shape_cast %174 : vector<2x8x8x16xf32> to vector<128x16xf32>
    %176 = vector.extract_strided_slice %165 {offsets = [0, 1, 2, 0], sizes = [2, 8, 8, 16], strides = [1, 1, 1, 1]} : vector<2x10x10x16xf32> to vector<2x8x8x16xf32>
    %177 = vector.shape_cast %176 : vector<2x8x8x16xf32> to vector<128x16xf32>
    %178 = vector.extract_strided_slice %165 {offsets = [0, 2, 0, 0], sizes = [2, 8, 8, 16], strides = [1, 1, 1, 1]} : vector<2x10x10x16xf32> to vector<2x8x8x16xf32>
    %179 = vector.shape_cast %178 : vector<2x8x8x16xf32> to vector<128x16xf32>
    %180 = vector.extract_strided_slice %165 {offsets = [0, 2, 1, 0], sizes = [2, 8, 8, 16], strides = [1, 1, 1, 1]} : vector<2x10x10x16xf32> to vector<2x8x8x16xf32>
    %181 = vector.shape_cast %180 : vector<2x8x8x16xf32> to vector<128x16xf32>
    %182 = vector.extract_strided_slice %165 {offsets = [0, 2, 2, 0], sizes = [2, 8, 8, 16], strides = [1, 1, 1, 1]} : vector<2x10x10x16xf32> to vector<2x8x8x16xf32>
    %183 = vector.shape_cast %182 : vector<2x8x8x16xf32> to vector<128x16xf32>
    %184 = tpu.concatenate %167, %169, %171, %173, %175, %177, %179, %181, %183 in 1 : vector<128x16xf32>, vector<128x16xf32>, vector<128x16xf32>, vector<128x16xf32>, vector<128x16xf32>, vector<128x16xf32>, vector<128x16xf32>, vector<128x16xf32>, vector<128x16xf32> -> vector<128x144xf32>
    %c0_122 = arith.constant 0 : index
    %c0_123 = arith.constant 0 : index
    %185 = vector.load %arg11[%c0_122, %c0_123] : memref<144x16xf32, #tpu.memory_space<vmem>>, vector<144x16xf32>
    %cst_124 = arith.constant dense<0.000000e+00> : vector<128x16xf32>
    %186 = tpu.matmul %184, %185, %cst_124 {dimension_numbers = #tpu.dot_dimension_numbers<[1], [0], [0], [1], [0, 0, 1, 1], [], []>} : vector<128x144xf32>, vector<144x16xf32>, vector<128x16xf32> -> vector<128x16xf32>
    %c0_125 = arith.constant 0 : index
    %c0_126 = arith.constant 0 : index
    %187 = vector.load %arg12[%c0_125, %c0_126] : memref<1x16xf32, #tpu.memory_space<vmem>>, vector<1x16xf32>
    %188 = vector.broadcast %187 : vector<1x16xf32> to vector<128x16xf32>
    %189 = arith.addf %186, %188 : vector<128x16xf32>
    %cst_127 = arith.constant 0.000000e+00 : f32
    %190 = vector.broadcast %cst_127 : f32 to vector<128x16xf32>
    %191 = arith.maximumf %189, %190 : vector<128x16xf32>
    %192 = vector.shape_cast %191 : vector<128x16xf32> to vector<2x64x16xf32>
    %193 = vector.shape_cast %192 : vector<2x64x16xf32> to vector<2x1x64x16xf32>
    %c0_128 = arith.constant 0 : index
    %c0_129 = arith.constant 0 : index
    %c0_130 = arith.constant 0 : index
    %194 = vector.load %arg13[%c0_128, %c0_129, %c0_130] : memref<8x64x16xf32, #tpu.memory_space<vmem>>, vector<8x64x16xf32>
    %195 = vector.shape_cast %194 : vector<8x64x16xf32> to vector<1x8x64x16xf32>
    %196 = vector.broadcast %193 : vector<2x1x64x16xf32> to vector<2x8x64x16xf32>
    %197 = vector.broadcast %195 : vector<1x8x64x16xf32> to vector<2x8x64x16xf32>
    %198 = arith.mulf %196, %197 : vector<2x8x64x16xf32>
    %cst_131 = arith.constant dense<0.000000e+00> : vector<2x8x64xf32>
    %199 = vector.multi_reduction <add>, %198, %cst_131 [3] : vector<2x8x64x16xf32> to vector<2x8x64xf32>
    %200 = vector.shape_cast %199 : vector<2x8x64xf32> to vector<2x8x64x1xf32>
    %cst_132 = arith.constant dense<0.000000e+00> : vector<2x8x1xf32>
    %201 = vector.multi_reduction <add>, %200, %cst_132 [2] : vector<2x8x64x1xf32> to vector<2x8x1xf32>
    %202 = vector.shape_cast %201 : vector<2x8x1xf32> to vector<2x8x1x1xf32>
    %c0_133 = arith.constant 0 : index
    %c0_134 = arith.constant 0 : index
    %c0_135 = arith.constant 0 : index
    %c0_136 = arith.constant 0 : index
    %203 = vector.load %arg14[%c0_133, %c0_134, %c0_135, %c0_136] : memref<1x8x1x1xf32, #tpu.memory_space<vmem>>, vector<1x8x1x1xf32>
    %204 = vector.broadcast %203 : vector<1x8x1x1xf32> to vector<2x8x1x1xf32>
    %205 = arith.addf %202, %204 : vector<2x8x1x1xf32>
    %c0_137 = arith.constant 0 : index
    %c0_138 = arith.constant 0 : index
    %c0_139 = arith.constant 0 : index
    %c0_140 = arith.constant 0 : index
    %206 = vector.load %arg15[%c0_137, %c0_138, %c0_139, %c0_140] : memref<2x8x1x1xf32, #tpu.memory_space<vmem>>, vector<2x8x1x1xf32>
    tpu.vector_store %arg15[%c0_137, %c0_138, %c0_139, %c0_140], %205 {strides = array<i32>} : memref<2x8x1x1xf32, #tpu.memory_space<vmem>>, vector<2x8x1x1xf32>,
    return
  }
  func.func @transform_0(%arg0: i32) -> (i32, i32, i32, i32) {
    %c0_i32 = arith.constant 0 : i32
    %c0_i32_0 = arith.constant 0 : i32
    %c0_i32_1 = arith.constant 0 : i32
    %c0_i32_2 = arith.constant 0 : i32
    %c0_i32_3 = arith.constant 0 : i32
    return %c0_i32, %c0_i32_0, %c0_i32_1, %c0_i32_2 : i32, i32, i32, i32
  }
  func.func @transform_1(%arg0: i32) -> (i32, i32, i32, i32) {
    %c0_i32 = arith.constant 0 : i32
    %c0_i32_0 = arith.constant 0 : i32
    %c0_i32_1 = arith.constant 0 : i32
    %c0_i32_2 = arith.constant 0 : i32
    %c0_i32_3 = arith.constant 0 : i32
    return %c0_i32, %c0_i32_0, %c0_i32_1, %c0_i32_2 : i32, i32, i32, i32
  }
  func.func @transform_2(%arg0: i32) -> (i32, i32, i32, i32) {
    %c0_i32 = arith.constant 0 : i32
    %c0_i32_0 = arith.constant 0 : i32
    %c0_i32_1 = arith.constant 0 : i32
    %c0_i32_2 = arith.constant 0 : i32
    %c0_i32_3 = arith.constant 0 : i32
    return %c0_i32, %c0_i32_0, %c0_i32_1, %c0_i32_2 : i32, i32, i32, i32
  }
  func.func @transform_3(%arg0: i32) -> (i32, i32, i32, i32) {
    %c0_i32 = arith.constant 0 : i32
    %c0_i32_0 = arith.constant 0 : i32
    %c0_i32_1 = arith.constant 0 : i32
    %c0_i32_2 = arith.constant 0 : i32
    %c0_i32_3 = arith.constant 0 : i32
    return %c0_i32, %c0_i32_0, %c0_i32_1, %c0_i32_2 : i32, i32, i32, i32
  }
  func.func @transform_4(%arg0: i32) -> (i32, i32) {
    %c0_i32 = arith.constant 0 : i32
    %c0_i32_0 = arith.constant 0 : i32
    %c0_i32_1 = arith.constant 0 : i32
    return %c0_i32, %c0_i32_0 : i32, i32
  }
  func.func @transform_5(%arg0: i32) -> (i32, i32) {
    %c0_i32 = arith.constant 0 : i32
    %c0_i32_0 = arith.constant 0 : i32
    %c0_i32_1 = arith.constant 0 : i32
    return %c0_i32, %c0_i32_0 : i32, i32
  }
  func.func @transform_6(%arg0: i32) -> (i32, i32) {
    %c0_i32 = arith.constant 0 : i32
    %c0_i32_0 = arith.constant 0 : i32
    %c0_i32_1 = arith.constant 0 : i32
    return %c0_i32, %c0_i32_0 : i32, i32
  }
  func.func @transform_7(%arg0: i32) -> (i32, i32) {
    %c0_i32 = arith.constant 0 : i32
    %c0_i32_0 = arith.constant 0 : i32
    %c0_i32_1 = arith.constant 0 : i32
    return %c0_i32, %c0_i32_0 : i32, i32
  }
  func.func @transform_8(%arg0: i32) -> (i32, i32) {
    %c0_i32 = arith.constant 0 : i32
    %c0_i32_0 = arith.constant 0 : i32
    %c0_i32_1 = arith.constant 0 : i32
    return %c0_i32, %c0_i32_0 : i32, i32
  }
  func.func @transform_9(%arg0: i32) -> (i32, i32) {
    %c0_i32 = arith.constant 0 : i32
    %c0_i32_0 = arith.constant 0 : i32
    %c0_i32_1 = arith.constant 0 : i32
    return %c0_i32, %c0_i32_0 : i32, i32
  }
  func.func @transform_10(%arg0: i32) -> (i32, i32) {
    %c0_i32 = arith.constant 0 : i32
    %c0_i32_0 = arith.constant 0 : i32
    %c0_i32_1 = arith.constant 0 : i32
    return %c0_i32, %c0_i32_0 : i32, i32
  }
  func.func @transform_11(%arg0: i32) -> (i32, i32) {
    %c0_i32 = arith.constant 0 : i32
    %c0_i32_0 = arith.constant 0 : i32
    %c0_i32_1 = arith.constant 0 : i32
    return %c0_i32, %c0_i32_0 : i32, i32
  }
  func.func @transform_12(%arg0: i32) -> (i32, i32, i32) {
    %c0_i32 = arith.constant 0 : i32
    %c0_i32_0 = arith.constant 0 : i32
    %c0_i32_1 = arith.constant 0 : i32
    %c0_i32_2 = arith.constant 0 : i32
    return %c0_i32, %c0_i32_0, %c0_i32_1 : i32, i32, i32
  }
  func.func @transform_13(%arg0: i32) -> (i32, i32, i32, i32) {
    %c0_i32 = arith.constant 0 : i32
    %c0_i32_0 = arith.constant 0 : i32
    %c0_i32_1 = arith.constant 0 : i32
    %c0_i32_2 = arith.constant 0 : i32
    %c0_i32_3 = arith.constant 0 : i32
    return %c0_i32, %c0_i32_0, %c0_i32_1, %c0_i32_2 : i32, i32, i32, i32
  }
  func.func @transform_14(%arg0: i32) -> (i32, i32, i32, i32) {
    %c0_i32 = arith.constant 0 : i32
    %c0_i32_0 = arith.constant 0 : i32
    %c0_i32_1 = arith.constant 0 : i32
    %c0_i32_2 = arith.constant 0 : i32
    %c0_i32_3 = arith.constant 0 : i32
    return %c0_i32, %c0_i32_0, %c0_i32_1, %c0_i32_2 : i32, i32, i32, i32
  }
}

</mosaic_0001>

<bundles_post_ra>
// kernel: base_encoder_forward.1
= control target key start
LH: loop header
LB: loop body
LE: loop exit
PB: predicated region body
PF: predicated region fallthrough
CT: control target
= control target key end

     0   :  { %vm47_vm0 = vcmask 31744   ;;  %vm49_vm1 = vcmask 25600   ;;  %v14673_v0 = vmov 0.0   ;;  %vm517_vm2 = vcmask 1046528   ;;  %s8158_s23 = smov 4   ;;  %s8160_s30 = smov 12   ;;  %s14656_s2 = inlined_call_operand.vmem [shape: f32[2,8,8,4], index: 2, kind: input, shape index: {}]   ;;  %s14657_s3 = inlined_call_operand.vmem [shape: f32[2,8,8,4], index: 3, kind: input, shape index: {}]   ;;  %s14658_s1 = inlined_call_operand.vmem [shape: f32[2,8,8,4], index: 1, kind: input, shape index: {}]   ;;  %s14659_s0 = inlined_call_operand.vmem [shape: f32[2,8,8,4], index: 0, kind: input, shape index: {}]   ;;  %s14660_s4 = inlined_call_operand.vmem [shape: f32[36,3], index: 4, kind: input, shape index: {}]   ;;  %s14661_s5 = inlined_call_operand.vmem [shape: f32[1,3], index: 5, kind: input, shape index: {}]   ;;  %s14662_s6 = inlined_call_operand.vmem [shape: f32[12,16], index: 6, kind: input, shape index: {}]   ;;  %s14663_s8 = inlined_call_operand.vmem [shape: f32[144,16], index: 8, kind: input, shape index: {}]   ;;  %s14664_s7 = inlined_call_operand.vmem [shape: f32[1,16], index: 7, kind: input, shape index: {}]   ;;  %s14665_s9 = inlined_call_operand.vmem [shape: f32[1,16], index: 9, kind: input, shape index: {}]   ;;  %s14666_s10 = inlined_call_operand.vmem [shape: f32[144,16], index: 10, kind: input, shape index: {}]   ;;  %s14667_s11 = inlined_call_operand.vmem [shape: f32[1,16], index: 11, kind: input, shape index: {}]   ;;  %s14668_s12 = inlined_call_operand.vmem [shape: f32[8,64,16], index: 12, kind: input, shape index: {}]   ;;  %s14669_s13 = inlined_call_operand.vmem [shape: f32[1,8,1,1], index: 13, kind: input, shape index: {}]   ;;  %s14670_s14 = inlined_call_operand.vmem [shape: f32[2,8,1,1], index: 14, kind: output, shape index: {}]  }
   0x1   :  { %195 = vst.msk [vmem:[#allocation4] sm:$0xff] %vm47_vm0, %v14673_v0  ;;  %51 = vst.msk [vmem:[#allocation2 + $0x10] sm:$0xff] %vm47_vm0, %v14673_v0  ;;  %v236_v1 = vld [vmem:[%s14656_s2 + $0x8] sm:$0xff]  ;;  %v235_v2 = vld [vmem:[%s14656_s2] sm:$0xff]  ;;  %vm1292_vm3 = vcmask 130048   ;;  %s8162_s18 = smov 20  }
   0x2   :  { %196 = vst.msk [vmem:[#allocation4 + $0x8] sm:$0x3] %vm49_vm1, %v14673_v0  ;;  %52 = vst.msk [vmem:[#allocation2 + $0x18] sm:$0x3] %vm49_vm1, %v14673_v0  ;;  %v237_v3 = vld [vmem:[%s14656_s2 + $0x10] sm:$0xff]  ;;  %v238_v4 = vld [vmem:[%s14656_s2 + $0x18] sm:$0xff] }
   0x3   :  { %53 = vst.msk [vmem:[#allocation2 + $0x20] sm:$0xff] %vm47_vm0, %v14673_v0  ;;  %55 = vst.msk [vmem:[#allocation2 + $0x30] sm:$0xff] %vm47_vm0, %v14673_v0  ;;  %v239_v5 = vld [vmem:[%s14656_s2 + $0x20] sm:$0xff]  ;;  %v240_v6 = vld [vmem:[%s14656_s2 + $0x28] sm:$0xff]  ;;  %vm1603_vm4 = vcmask 1045504   ;;  %s8163_s19 = smov 24  }
   0x4   :  { %54 = vst.msk [vmem:[#allocation2 + $0x28] sm:$0x3] %vm49_vm1, %v14673_v0  ;;  %56 = vst.msk [vmem:[#allocation2 + $0x38] sm:$0x3] %vm49_vm1, %v14673_v0  ;;  %v241_v7 = vld [vmem:[%s14656_s2 + $0x30] sm:$0xff]  ;;  %v243_v8 = vld [vmem:[%s14656_s2 + $0x40] sm:$0xff] }
   0x5   :  { %57 = vst.msk [vmem:[#allocation2 + $0x40] sm:$0xff] %vm47_vm0, %v14673_v0  ;;  %59 = vst.msk [vmem:[#allocation2 + $0x50] sm:$0xff] %vm47_vm0, %v14673_v0  ;;  %v244_v9 = vld [vmem:[%s14656_s2 + $0x48] sm:$0xff]  ;;  %v245_v10 = vld [vmem:[%s14656_s2 + $0x50] sm:$0xff]  ;;  %s8164_s20 = smov 28   ;;  %vm1438_vm5 = vcmask 1043456  }
   0x6   :  { %58 = vst.msk [vmem:[#allocation2 + $0x48] sm:$0x3] %vm49_vm1, %v14673_v0  ;;  %60 = vst.msk [vmem:[#allocation2 + $0x58] sm:$0x3] %vm49_vm1, %v14673_v0  ;;  %v246_v11 = vld [vmem:[%s14656_s2 + $0x58] sm:$0xff]  ;;  %v247_v12 = vld [vmem:[%s14656_s2 + $0x60] sm:$0xff] }
   0x7   :  { %61 = vst.msk [vmem:[#allocation2 + $0x60] sm:$0xff] %vm47_vm0, %v14673_v0  ;;  %63 = vst.msk [vmem:[#allocation2 + $0x70] sm:$0xff] %vm47_vm0, %v14673_v0  ;;  %v248_v13 = vld [vmem:[%s14656_s2 + $0x68] sm:$0xff]  ;;  %v249_v14 = vld [vmem:[%s14656_s2 + $0x70] sm:$0xff]  ;;  %s8165_s16 = smov 32   ;;  %vm1258_vm6 = vcmask 64512  }
   0x8   :  { %62 = vst.msk [vmem:[#allocation2 + $0x68] sm:$0x3] %vm49_vm1, %v14673_v0  ;;  %64 = vst.msk [vmem:[#allocation2 + $0x78] sm:$0x3] %vm49_vm1, %v14673_v0  ;;  %v308_v15 = vld [vmem:[%s14657_s3] sm:$0xff]  ;;  %v309_v16 = vld [vmem:[%s14657_s3 + $0x8] sm:$0xff] }
   0x9   :  { %65 = vst.msk [vmem:[#allocation2 + $0x80] sm:$0xff] %vm47_vm0, %v14673_v0  ;;  %67 = vst.msk [vmem:[#allocation2 + $0x90] sm:$0xff] %vm47_vm0, %v14673_v0  ;;  %v310_v17 = vld [vmem:[%s14657_s3 + $0x10] sm:$0xff]  ;;  %v311_v18 = vld [vmem:[%s14657_s3 + $0x18] sm:$0xff]  ;;  %vm1275_vm7 = vcmask 97280   ;;  %vm1309_vm8 = vcmask 162816  }
   0xa   :  { %66 = vst.msk [vmem:[#allocation2 + $0x88] sm:$0x3] %vm49_vm1, %v14673_v0  ;;  %68 = vst.msk [vmem:[#allocation2 + $0x98] sm:$0x3] %vm49_vm1, %v14673_v0  ;;  %v312_v19 = vld [vmem:[%s14657_s3 + $0x20] sm:$0xff]  ;;  %v313_v20 = vld [vmem:[%s14657_s3 + $0x28] sm:$0xff] }
   0xb   :  { %71 = vst.msk [vmem:[#allocation2 + $0xb0] sm:$0xff] %vm47_vm0, %v14673_v0  ;;  %73 = vst.msk [vmem:[#allocation2 + $0xc0] sm:$0xff] %vm47_vm0, %v14673_v0  ;;  %v314_v21 = vld [vmem:[%s14657_s3 + $0x30] sm:$0xff]  ;;  %v413_v22 = vld [vmem:[#allocation4] sm:$0xff]  ;;  %vm1326_vm9 = vcmask 195584   ;;  %vm1343_vm10 = vcmask 228352  }
   0xc   :  { %72 = vst.msk [vmem:[#allocation2 + $0xb8] sm:$0x3] %vm49_vm1, %v14673_v0  ;;  %74 = vst.msk [vmem:[#allocation2 + $0xc8] sm:$0x3] %vm49_vm1, %v14673_v0  ;;  %v414_v23 = vld [vmem:[#allocation4 + $0x8] sm:$0x3] }
   0xd   :  { %75 = vst.msk [vmem:[#allocation2 + $0xd0] sm:$0xff] %vm47_vm0, %v14673_v0  ;;  %77 = vst.msk [vmem:[#allocation2 + $0xe0] sm:$0xff] %vm47_vm0, %v14673_v0  ;;  %v518_v24 = vrot.slane %v413_v22, 1  ;;  %v519_v25 = vrot.slane %v414_v23, 1  ;;  %vm1360_vm11 = vcmask 261120   ;;  %vm1389_vm12 = vcmask 293888  }
   0xe   :  { %76 = vst.msk [vmem:[#allocation2 + $0xd8] sm:$0x3] %vm49_vm1, %v14673_v0  ;;  %78 = vst.msk [vmem:[#allocation2 + $0xe8] sm:$0x3] %vm49_vm1, %v14673_v0  ;;  %vm8166_vm13 = vmmov 1   ;;  %s8169_s21 = smov 9  }
   0xf   :  { %79 = vst.msk [vmem:[#allocation2 + $0xf0] sm:$0xff] %vm47_vm0, %v14673_v0  ;;  %81 = vst.msk [vmem:[#allocation2 + $0x100] sm:$0xff] %vm47_vm0, %v14673_v0  ;;  %v8624_v32 = vsel %vm517_vm2, %v518_v24, %v519_v25  ;;  %vm4087_vm15 = vcmask 23552   ;;  %s8174_s22 = smov 96   ;;  %s8175_s24 = smov 112  }
  0x10   :  { %80 = vst.msk [vmem:[#allocation2 + $0xf8] sm:$0x3] %vm49_vm1, %v14673_v0  ;;  %82 = vst.msk [vmem:[#allocation2 + $0x108] sm:$0x3] %vm49_vm1, %v14673_v0  ;;  %858 = vrot.lane.b32.xlu0 %v8624_v32, %s8158_s23 }
  0x11   :  { %83 = vst.msk [vmem:[#allocation2 + $0x110] sm:$0xff] %vm47_vm0, %v14673_v0  ;;  %85 = vst.msk [vmem:[#allocation2 + $0x120] sm:$0xff] %vm47_vm0, %v14673_v0 }
  0x12   :  { %84 = vst.msk [vmem:[#allocation2 + $0x118] sm:$0x3] %vm49_vm1, %v14673_v0  ;;  %86 = vst.msk [vmem:[#allocation2 + $0x128] sm:$0x3] %vm49_vm1, %v14673_v0 }
  0x13   :  { %87 = vst.msk [vmem:[#allocation2 + $0x130] sm:$0xff] %vm47_vm0, %v14673_v0  ;;  %124 = vst.msk [vmem:[#allocation3 + $0x10] sm:$0xff] %vm47_vm0, %v14673_v0 }
  0x14   :  { %88 = vst.msk [vmem:[#allocation2 + $0x138] sm:$0x3] %vm49_vm1, %v14673_v0  ;;  %125 = vst.msk [vmem:[#allocation3 + $0x18] sm:$0x3] %vm49_vm1, %v14673_v0 }
  0x15   :  { %126 = vst.msk [vmem:[#allocation3 + $0x20] sm:$0xff] %vm47_vm0, %v14673_v0  ;;  %128 = vst.msk [vmem:[#allocation3 + $0x30] sm:$0xff] %vm47_vm0, %v14673_v0 }
  0x16   :  { %127 = vst.msk [vmem:[#allocation3 + $0x28] sm:$0x3] %vm49_vm1, %v14673_v0  ;;  %129 = vst.msk [vmem:[#allocation3 + $0x38] sm:$0x3] %vm49_vm1, %v14673_v0 }
  0x17   :  { %130 = vst.msk [vmem:[#allocation3 + $0x40] sm:$0xff] %vm47_vm0, %v14673_v0  ;;  %132 = vst.msk [vmem:[#allocation3 + $0x50] sm:$0xff] %vm47_vm0, %v14673_v0 }
  0x18   :  { %131 = vst.msk [vmem:[#allocation3 + $0x48] sm:$0x3] %vm49_vm1, %v14673_v0  ;;  %133 = vst.msk [vmem:[#allocation3 + $0x58] sm:$0x3] %vm49_vm1, %v14673_v0 }
  0x19   :  { %134 = vst.msk [vmem:[#allocation3 + $0x60] sm:$0xff] %vm47_vm0, %v14673_v0  ;;  %136 = vst.msk [vmem:[#allocation3 + $0x70] sm:$0xff] %vm47_vm0, %v14673_v0 }
  0x1a   :  { %135 = vst.msk [vmem:[#allocation3 + $0x68] sm:$0x3] %vm49_vm1, %v14673_v0  ;;  %137 = vst.msk [vmem:[#allocation3 + $0x78] sm:$0x3] %vm49_vm1, %v14673_v0 }
  0x1b   :  { %138 = vst.msk [vmem:[#allocation3 + $0x80] sm:$0xff] %vm47_vm0, %v14673_v0  ;;  %140 = vst.msk [vmem:[#allocation3 + $0x90] sm:$0xff] %vm47_vm0, %v14673_v0 }
  0x1c   :  { %139 = vst.msk [vmem:[#allocation3 + $0x88] sm:$0x3] %vm49_vm1, %v14673_v0  ;;  %141 = vst.msk [vmem:[#allocation3 + $0x98] sm:$0x3] %vm49_vm1, %v14673_v0 }
  0x1d   :  { %144 = vst.msk [vmem:[#allocation3 + $0xb0] sm:$0xff] %vm47_vm0, %v14673_v0  ;;  %146 = vst.msk [vmem:[#allocation3 + $0xc0] sm:$0xff] %vm47_vm0, %v14673_v0 }
  0x1e   :  { %145 = vst.msk [vmem:[#allocation3 + $0xb8] sm:$0x3] %vm49_vm1, %v14673_v0  ;;  %147 = vst.msk [vmem:[#allocation3 + $0xc8] sm:$0x3] %vm49_vm1, %v14673_v0 }
  0x1f   :  { %148 = vst.msk [vmem:[#allocation3 + $0xd0] sm:$0xff] %vm47_vm0, %v14673_v0  ;;  %150 = vst.msk [vmem:[#allocation3 + $0xe0] sm:$0xff] %vm47_vm0, %v14673_v0 }
  0x20   :  { %149 = vst.msk [vmem:[#allocation3 + $0xd8] sm:$0x3] %vm49_vm1, %v14673_v0  ;;  %151 = vst.msk [vmem:[#allocation3 + $0xe8] sm:$0x3] %vm49_vm1, %v14673_v0 }
  0x21   :  { %152 = vst.msk [vmem:[#allocation3 + $0xf0] sm:$0xff] %vm47_vm0, %v14673_v0  ;;  %154 = vst.msk [vmem:[#allocation3 + $0x100] sm:$0xff] %vm47_vm0, %v14673_v0 }
  0x22   :  { %153 = vst.msk [vmem:[#allocation3 + $0xf8] sm:$0x3] %vm49_vm1, %v14673_v0  ;;  %155 = vst.msk [vmem:[#allocation3 + $0x108] sm:$0x3] %vm49_vm1, %v14673_v0 }
  0x23   :  { %156 = vst.msk [vmem:[#allocation3 + $0x110] sm:$0xff] %vm47_vm0, %v14673_v0  ;;  %158 = vst.msk [vmem:[#allocation3 + $0x120] sm:$0xff] %vm47_vm0, %v14673_v0 }
  0x24   :  { %157 = vst.msk [vmem:[#allocation3 + $0x118] sm:$0x3] %vm49_vm1, %v14673_v0  ;;  %159 = vst.msk [vmem:[#allocation3 + $0x128] sm:$0x3] %vm49_vm1, %v14673_v0 }
  0x25   :  { %160 = vst.msk [vmem:[#allocation3 + $0x130] sm:$0xff] %vm47_vm0, %v14673_v0  ;;  %197 = vst.msk [vmem:[#allocation4 + $0x10] sm:$0xff] %vm47_vm0, %v14673_v0 }
  0x26   :  { %161 = vst.msk [vmem:[#allocation3 + $0x138] sm:$0x3] %vm49_vm1, %v14673_v0  ;;  %198 = vst.msk [vmem:[#allocation4 + $0x18] sm:$0x3] %vm49_vm1, %v14673_v0 }
  0x27   :  { %199 = vst.msk [vmem:[#allocation4 + $0x20] sm:$0xff] %vm47_vm0, %v14673_v0  ;;  %201 = vst.msk [vmem:[#allocation4 + $0x30] sm:$0xff] %vm47_vm0, %v14673_v0 }
  0x28   :  { %200 = vst.msk [vmem:[#allocation4 + $0x28] sm:$0x3] %vm49_vm1, %v14673_v0  ;;  %202 = vst.msk [vmem:[#allocation4 + $0x38] sm:$0x3] %vm49_vm1, %v14673_v0 }
  0x29   :  { %203 = vst.msk [vmem:[#allocation4 + $0x40] sm:$0xff] %vm47_vm0, %v14673_v0  ;;  %205 = vst.msk [vmem:[#allocation4 + $0x50] sm:$0xff] %vm47_vm0, %v14673_v0 }
  0x2a   :  { %204 = vst.msk [vmem:[#allocation4 + $0x48] sm:$0x3] %vm49_vm1, %v14673_v0  ;;  %206 = vst.msk [vmem:[#allocation4 + $0x58] sm:$0x3] %vm49_vm1, %v14673_v0 }
  0x2b   :  { %207 = vst.msk [vmem:[#allocation4 + $0x60] sm:$0xff] %vm47_vm0, %v14673_v0  ;;  %209 = vst.msk [vmem:[#allocation4 + $0x70] sm:$0xff] %vm47_vm0, %v14673_v0 }
  0x2c   :  { %208 = vst.msk [vmem:[#allocation4 + $0x68] sm:$0x3] %vm49_vm1, %v14673_v0  ;;  %210 = vst.msk [vmem:[#allocation4 + $0x78] sm:$0x3] %vm49_vm1, %v14673_v0 }
  0x2d   :  { %211 = vst.msk [vmem:[#allocation4 + $0x80] sm:$0xff] %vm47_vm0, %v14673_v0  ;;  %215 = vst.msk [vmem:[#allocation4 + $0xa0] sm:$0xff] %vm47_vm0, %v14673_v0 }
  0x2e   :  { %212 = vst.msk [vmem:[#allocation4 + $0x88] sm:$0x3] %vm49_vm1, %v14673_v0  ;;  %216 = vst.msk [vmem:[#allocation4 + $0xa8] sm:$0x3] %vm49_vm1, %v14673_v0 }
  0x2f   :  { %217 = vst.msk [vmem:[#allocation4 + $0xb0] sm:$0xff] %vm47_vm0, %v14673_v0  ;;  %219 = vst.msk [vmem:[#allocation4 + $0xc0] sm:$0xff] %vm47_vm0, %v14673_v0 }
  0x30   :  { %218 = vst.msk [vmem:[#allocation4 + $0xb8] sm:$0x3] %vm49_vm1, %v14673_v0  ;;  %220 = vst.msk [vmem:[#allocation4 + $0xc8] sm:$0x3] %vm49_vm1, %v14673_v0 }
  0x31   :  { %221 = vst.msk [vmem:[#allocation4 + $0xd0] sm:$0xff] %vm47_vm0, %v14673_v0  ;;  %223 = vst.msk [vmem:[#allocation4 + $0xe0] sm:$0xff] %vm47_vm0, %v14673_v0 }
  0x32   :  { %222 = vst.msk [vmem:[#allocation4 + $0xd8] sm:$0x3] %vm49_vm1, %v14673_v0  ;;  %224 = vst.msk [vmem:[#allocation4 + $0xe8] sm:$0x3] %vm49_vm1, %v14673_v0 }
  0x33   :  { %225 = vst.msk [vmem:[#allocation4 + $0xf0] sm:$0xff] %vm47_vm0, %v14673_v0  ;;  %227 = vst.msk [vmem:[#allocation4 + $0x100] sm:$0xff] %vm47_vm0, %v14673_v0 }
  0x34   :  { %226 = vst.msk [vmem:[#allocation4 + $0xf8] sm:$0x3] %vm49_vm1, %v14673_v0  ;;  %228 = vst.msk [vmem:[#allocation4 + $0x108] sm:$0x3] %vm49_vm1, %v14673_v0  ;;  %v431_v57 = vld [vmem:[#allocation4 + $0xa0] sm:$0xff] }
  0x35   :  { %229 = vst.msk [vmem:[#allocation4 + $0x110] sm:$0xff] %vm47_vm0, %v14673_v0  ;;  %231 = vst.msk [vmem:[#allocation4 + $0x120] sm:$0xff] %vm47_vm0, %v14673_v0  ;;  %v432_v58 = vld [vmem:[#allocation4 + $0xa8] sm:$0x3] }
  0x36   :  { %230 = vst.msk [vmem:[#allocation4 + $0x118] sm:$0x3] %vm49_vm1, %v14673_v0  ;;  %232 = vst.msk [vmem:[#allocation4 + $0x128] sm:$0x3] %vm49_vm1, %v14673_v0 }
  0x37   :  { %268 = vst.msk [vmem:[#allocation5] sm:$0xff] %vm47_vm0, %v14673_v0  ;;  %270 = vst.msk [vmem:[#allocation5 + $0x10] sm:$0xff] %vm47_vm0, %v14673_v0 }
  0x38   :  { %269 = vst.msk [vmem:[#allocation5 + $0x8] sm:$0x3] %vm49_vm1, %v14673_v0  ;;  %271 = vst.msk [vmem:[#allocation5 + $0x18] sm:$0x3] %vm49_vm1, %v14673_v0 }
  0x39   :  { %272 = vst.msk [vmem:[#allocation5 + $0x20] sm:$0xff] %vm47_vm0, %v14673_v0  ;;  %274 = vst.msk [vmem:[#allocation5 + $0x30] sm:$0xff] %vm47_vm0, %v14673_v0 }
  0x3a   :  { %273 = vst.msk [vmem:[#allocation5 + $0x28] sm:$0x3] %vm49_vm1, %v14673_v0  ;;  %275 = vst.msk [vmem:[#allocation5 + $0x38] sm:$0x3] %vm49_vm1, %v14673_v0 }
  0x3b   :  { %276 = vst.msk [vmem:[#allocation5 + $0x40] sm:$0xff] %vm47_vm0, %v14673_v0  ;;  %278 = vst.msk [vmem:[#allocation5 + $0x50] sm:$0xff] %vm47_vm0, %v14673_v0 }
  0x3c   :  { %277 = vst.msk [vmem:[#allocation5 + $0x48] sm:$0x3] %vm49_vm1, %v14673_v0  ;;  %279 = vst.msk [vmem:[#allocation5 + $0x58] sm:$0x3] %vm49_vm1, %v14673_v0 }
  0x3d   :  { %280 = vst.msk [vmem:[#allocation5 + $0x60] sm:$0xff] %vm47_vm0, %v14673_v0  ;;  %282 = vst.msk [vmem:[#allocation5 + $0x70] sm:$0xff] %vm47_vm0, %v14673_v0 }
  0x3e   :  { %281 = vst.msk [vmem:[#allocation5 + $0x68] sm:$0x3] %vm49_vm1, %v14673_v0  ;;  %283 = vst.msk [vmem:[#allocation5 + $0x78] sm:$0x3] %vm49_vm1, %v14673_v0 }
  0x3f   :  { %284 = vst.msk [vmem:[#allocation5 + $0x80] sm:$0xff] %vm47_vm0, %v14673_v0  ;;  %288 = vst.msk [vmem:[#allocation5 + $0xa0] sm:$0xff] %vm47_vm0, %v14673_v0 }
  0x40   :  { %285 = vst.msk [vmem:[#allocation5 + $0x88] sm:$0x3] %vm49_vm1, %v14673_v0  ;;  %289 = vst.msk [vmem:[#allocation5 + $0xa8] sm:$0x3] %vm49_vm1, %v14673_v0 }
  0x41   :  { %290 = vst.msk [vmem:[#allocation5 + $0xb0] sm:$0xff] %vm47_vm0, %v14673_v0  ;;  %292 = vst.msk [vmem:[#allocation5 + $0xc0] sm:$0xff] %vm47_vm0, %v14673_v0 }
  0x42   :  { %291 = vst.msk [vmem:[#allocation5 + $0xb8] sm:$0x3] %vm49_vm1, %v14673_v0  ;;  %293 = vst.msk [vmem:[#allocation5 + $0xc8] sm:$0x3] %vm49_vm1, %v14673_v0 }
  0x43   :  { %294 = vst.msk [vmem:[#allocation5 + $0xd0] sm:$0xff] %vm47_vm0, %v14673_v0  ;;  %296 = vst.msk [vmem:[#allocation5 + $0xe0] sm:$0xff] %vm47_vm0, %v14673_v0 }
  0x44   :  { %295 = vst.msk [vmem:[#allocation5 + $0xd8] sm:$0x3] %vm49_vm1, %v14673_v0  ;;  %297 = vst.msk [vmem:[#allocation5 + $0xe8] sm:$0x3] %vm49_vm1, %v14673_v0 }
  0x45   :  { %298 = vst.msk [vmem:[#allocation5 + $0xf0] sm:$0xff] %vm47_vm0, %v14673_v0  ;;  %300 = vst.msk [vmem:[#allocation5 + $0x100] sm:$0xff] %vm47_vm0, %v14673_v0 }
  0x46   :  { %299 = vst.msk [vmem:[#allocation5 + $0xf8] sm:$0x3] %vm49_vm1, %v14673_v0  ;;  %301 = vst.msk [vmem:[#allocation5 + $0x108] sm:$0x3] %vm49_vm1, %v14673_v0 }
  0x47   :  { %302 = vst.msk [vmem:[#allocation5 + $0x110] sm:$0xff] %vm47_vm0, %v14673_v0  ;;  %304 = vst.msk [vmem:[#allocation5 + $0x120] sm:$0xff] %vm47_vm0, %v14673_v0 }
  0x48   :  { %303 = vst.msk [vmem:[#allocation5 + $0x118] sm:$0x3] %vm49_vm1, %v14673_v0  ;;  %305 = vst.msk [vmem:[#allocation5 + $0x128] sm:$0x3] %vm49_vm1, %v14673_v0  ;;  %vm4121_vm1 = vcmask 72704  }
  0x49   :  { %253 = vst.msk [vmem:[#allocation4 + $0x21] sm:$0xff] %vm47_vm0, %v236_v1  ;;  %252 = vst.msk [vmem:[#allocation4 + $0x11] sm:$0xff] %vm47_vm0, %v235_v2  ;;  %v542_v2 = vrot.slane %v431_v57, 1 }
  0x4a   :  { %254 = vst.msk [vmem:[#allocation4 + $0x31] sm:$0xff] %vm47_vm0, %v237_v3  ;;  %255 = vst.msk [vmem:[#allocation4 + $0x41] sm:$0xff] %vm47_vm0, %v238_v4  ;;  %v543_v3 = vrot.slane %v432_v58, 1  ;;  %v170_v58 = vld [vmem:[%s14658_s1 + $0x40] sm:$0xff] }
  0x4b   :  { %256 = vst.msk [vmem:[#allocation4 + $0x51] sm:$0xff] %vm47_vm0, %v239_v5  ;;  %257 = vst.msk [vmem:[#allocation4 + $0x61] sm:$0xff] %vm47_vm0, %v240_v6 }
  0x4c   :  { %258 = vst.msk [vmem:[#allocation4 + $0x71] sm:$0xff] %vm47_vm0, %v241_v7  ;;  %260 = vst.msk [vmem:[#allocation4 + $0xb1] sm:$0xff] %vm47_vm0, %v243_v8 }
  0x4d   :  { %261 = vst.msk [vmem:[#allocation4 + $0xc1] sm:$0xff] %vm47_vm0, %v244_v9  ;;  %262 = vst.msk [vmem:[#allocation4 + $0xd1] sm:$0xff] %vm47_vm0, %v245_v10 }
  0x4e   :  { %263 = vst.msk [vmem:[#allocation4 + $0xe1] sm:$0xff] %vm47_vm0, %v246_v11  ;;  %264 = vst.msk [vmem:[#allocation4 + $0xf1] sm:$0xff] %vm47_vm0, %v247_v12  ;;  %v8662_v11 = vsel %vm517_vm2, %v542_v2, %v543_v3  ;;  %v173_v3 = vld [vmem:[%s14658_s1 + $0x58] sm:$0xff] }
  0x4f   :  { %265 = vst.msk [vmem:[#allocation4 + $0x101] sm:$0xff] %vm47_vm0, %v248_v13  ;;  %266 = vst.msk [vmem:[#allocation4 + $0x111] sm:$0xff] %vm47_vm0, %v249_v14 }
  0x50   :  { %325 = vst.msk [vmem:[#allocation5 + $0x11] sm:$0xff] %vm47_vm0, %v308_v15  ;;  %326 = vst.msk [vmem:[#allocation5 + $0x21] sm:$0xff] %vm47_vm0, %v309_v16  ;;  %v417_v26 = vld [vmem:[#allocation4 + $0x20] sm:$0xff]  ;;  %v415_v27 = vld [vmem:[#allocation4 + $0x10] sm:$0xff] }
  0x51   :  { %327 = vst.msk [vmem:[#allocation5 + $0x31] sm:$0xff] %vm47_vm0, %v310_v17  ;;  %328 = vst.msk [vmem:[#allocation5 + $0x41] sm:$0xff] %vm47_vm0, %v311_v18  ;;  %v418_v28 = vld [vmem:[#allocation4 + $0x28] sm:$0x3]  ;;  %v524_v29 = vrot.slane %v417_v26, 1  ;;  %v521_v31 = vrot.slane %v415_v27, 1 }
  0x52   :  { %329 = vst.msk [vmem:[#allocation5 + $0x51] sm:$0xff] %vm47_vm0, %v312_v19  ;;  %330 = vst.msk [vmem:[#allocation5 + $0x61] sm:$0xff] %vm47_vm0, %v313_v20  ;;  %v416_v30 = vld [vmem:[#allocation4 + $0x18] sm:$0x3]  ;;  %v525_v33 = vrot.slane %v418_v28, 1  ;;  %v419_v35 = vld [vmem:[#allocation4 + $0x30] sm:$0xff] }
  0x53   :  { %331 = vst.msk [vmem:[#allocation5 + $0x71] sm:$0xff] %vm47_vm0, %v314_v21  ;;  %14914 = vst [vmem:[#allocation7_spill] sm:$0xff] %v8624_v32  ;;  %v522_v34 = vrot.slane %v416_v30, 1  ;;  %v420_v36 = vld [vmem:[#allocation4 + $0x38] sm:$0x3]  ;;  %v421_v37 = vld [vmem:[#allocation4 + $0x40] sm:$0xff] }
  0x54   :  { %v527_v38 = vrot.slane %v419_v35, 1  ;;  %v528_v39 = vrot.slane %v420_v36, 1  ;;  %v422_v40 = vld [vmem:[#allocation4 + $0x48] sm:$0x3]  ;;  %v423_v41 = vld [vmem:[#allocation4 + $0x50] sm:$0xff]  ;;  %v8629_v42 = vsel %vm517_vm2, %v524_v29, %v525_v33  ;;  %v530_v44 = vrot.slane %v421_v37, 1  ;;  %vm7419_vm14 = vmpackc.low %vm1438_vm5, %vm8166_vm13 }
  0x55   :  { %14915 = vst [vmem:[#allocation8_spill] sm:$0xff] %v8629_v42  ;;  %v8632_v43 = vsel %vm517_vm2, %v521_v31, %v522_v34  ;;  %v531_v45 = vrot.slane %v422_v40, 1  ;;  %v424_v46 = vld [vmem:[#allocation4 + $0x58] sm:$0x3]  ;;  %862 = vrot.lane.b32.xlu1 %v8629_v42, %s8158_s23  ;;  %v425_v47 = vld [vmem:[#allocation4 + $0x60] sm:$0xff]  ;;  %v533_v50 = vrot.slane %v423_v41, 1 }
  0x56   :  { %14916 = vst [vmem:[#allocation9_spill] sm:$0xff] %v8632_v43  ;;  %v426_v48 = vld [vmem:[#allocation4 + $0x68] sm:$0x3]  ;;  %v8637_v49 = vsel %vm517_vm2, %v527_v38, %v528_v39  ;;  %v534_v51 = vrot.slane %v424_v46, 1  ;;  %860 = vrot.lane.b32.xlu0 %v8632_v43, %s8158_s23  ;;  %v427_v52 = vld [vmem:[#allocation4 + $0x70] sm:$0xff]  ;;  %v536_v55 = vrot.slane %v425_v47, 1 }
  0x57   :  { %14917 = vst [vmem:[#allocation10_spill] sm:$0xff] %v8637_v49  ;;  %v428_v53 = vld [vmem:[#allocation4 + $0x78] sm:$0x3]  ;;  %v8642_v54 = vsel %vm517_vm2, %v530_v44, %v531_v45  ;;  %v537_v56 = vrot.slane %v426_v48, 1  ;;  %v539_v60 = vrot.slane %v427_v52, 1  ;;  %v433_v62 = vld [vmem:[#allocation4 + $0xb0] sm:$0xff] }
  0x58   :  { %14918 = vst [vmem:[#allocation11_spill] sm:$0xff] %v8642_v54  ;;  %v8647_v59 = vsel %vm517_vm2, %v533_v50, %v534_v51  ;;  %v540_v61 = vrot.slane %v428_v53, 1  ;;  %v434_v63 = vld [vmem:[#allocation4 + $0xb8] sm:$0x3]  ;;  %v435_v4 = vld [vmem:[#allocation4 + $0xc0] sm:$0xff]  ;;  %v545_v7 = vrot.slane %v433_v62, 1 }
  0x59   :  { %864 = vrot.lane.b32.xlu1 %v8637_v49, %s8158_s23  ;;  %14919 = vst [vmem:[#allocation12_spill] sm:$0xff] %v8647_v59  ;;  %v8652_v1 = vsel %vm517_vm2, %v536_v55, %v537_v56  ;;  %v436_v5 = vld [vmem:[#allocation4 + $0xc8] sm:$0x3]  ;;  %v546_v8 = vrot.slane %v434_v63, 1  ;;  %v437_v9 = vld [vmem:[#allocation4 + $0xd0] sm:$0xff]  ;;  %14922 = vst [vmem:[#allocation15_spill] sm:$0xff] %v8662_v11 }
  0x5a   :  { %866 = vrot.lane.b32.xlu0 %v8642_v54, %s8158_s23  ;;  %14920 = vst [vmem:[#allocation13_spill] sm:$0xff] %v8652_v1  ;;  %v8657_v6 = vsel %vm517_vm2, %v539_v60, %v540_v61  ;;  %v438_v10 = vld [vmem:[#allocation4 + $0xd8] sm:$0x3]  ;;  %v548_v12 = vrot.slane %v435_v4, 1  ;;  %v549_v13 = vrot.slane %v436_v5, 1  ;;  %v439_v14 = vld [vmem:[#allocation4 + $0xe0] sm:$0xff] }
  0x5b   :  { %14921 = vst [vmem:[#allocation14_spill] sm:$0xff] %v8657_v6  ;;  %v440_v15 = vld [vmem:[#allocation4 + $0xe8] sm:$0x3]  ;;  %v8667_v16 = vsel %vm517_vm2, %v545_v7, %v546_v8  ;;  %v551_v17 = vrot.slane %v437_v9, 1  ;;  %v552_v18 = vrot.slane %v438_v10, 1  ;;  %v441_v19 = vld [vmem:[#allocation4 + $0xf0] sm:$0xff] }
  0x5c   :  { %14923 = vst [vmem:[#allocation16_spill] sm:$0xff] %v8667_v16  ;;  %v442_v20 = vld [vmem:[#allocation4 + $0xf8] sm:$0x3]  ;;  %v8671_v21 = vld [vmem:[#allocation4 + $0x100] sm:$0xff]  ;;  %v8673_v22 = vld [vmem:[#allocation4 + $0x108] sm:$0x3]  ;;  %v8676_v23 = vsel %vm517_vm2, %v548_v12, %v549_v13 }
  0x5d   :  { %868 = vrot.lane.b32.xlu1 %v8647_v59, %s8158_s23  ;;  %14924 = vst [vmem:[#allocation17_spill] sm:$0xff] %v8676_v23  ;;  %v554_v24 = vrot.slane %v439_v14, 1  ;;  %v555_v25 = vrot.slane %v440_v15, 1  ;;  %v316_v26 = vld [vmem:[%s14657_s3 + $0x40] sm:$0xff]  ;;  %v317_v27 = vld [vmem:[%s14657_s3 + $0x48] sm:$0xff]  ;;  %v318_v28 = vld [vmem:[%s14657_s3 + $0x50] sm:$0xff]  ;;  %v8706_v35 = vsel %vm517_vm2, %v551_v17, %v552_v18 }
  0x5e   :  { %870 = vrot.lane.b32.xlu0 %v8652_v1, %s8158_s23  ;;  %v8689_v29 = vld [vmem:[#allocation4 + $0x110] sm:$0xff]  ;;  %v8691_v30 = vld [vmem:[#allocation4 + $0x118] sm:$0x3]  ;;  %333 = vst.msk [vmem:[#allocation5 + $0xb1] sm:$0xff] %vm47_vm0, %v316_v26  ;;  %334 = vst.msk [vmem:[#allocation5 + $0xc1] sm:$0xff] %vm47_vm0, %v317_v27  ;;  %v557_v36 = vrot.slane %v441_v19, 1 }
  0x5f   :  { %335 = vst.msk [vmem:[#allocation5 + $0xd1] sm:$0xff] %vm47_vm0, %v318_v28  ;;  %v319_v31 = vld [vmem:[%s14657_s3 + $0x58] sm:$0xff]  ;;  %v320_v33 = vld [vmem:[%s14657_s3 + $0x60] sm:$0xff]  ;;  %v321_v34 = vld [vmem:[%s14657_s3 + $0x68] sm:$0xff]  ;;  %v558_v37 = vrot.slane %v442_v20, 1  ;;  %v8735_v48 = vsel %vm517_vm2, %v554_v24, %v555_v25  ;;  %v560_v50 = vrot.slane %v8671_v21, 1 }
  0x60   :  { %14925 = vst [vmem:[#allocation18_spill] sm:$0xff] %v8706_v35  ;;  %336 = vst.msk [vmem:[#allocation5 + $0xe1] sm:$0xff] %vm47_vm0, %v319_v31  ;;  %v322_v38 = vld [vmem:[%s14657_s3 + $0x70] sm:$0xff]  ;;  %v162_v39 = vld [vmem:[%s14658_s1] sm:$0xff]  ;;  %v561_v51 = vrot.slane %v8673_v22, 1  ;;  %v563_v63 = vrot.slane %v8689_v29, 1 }
  0x61   :  { %872 = vrot.lane.b32.xlu1 %v8657_v6, %s8158_s23  ;;  %337 = vst.msk [vmem:[#allocation5 + $0xf1] sm:$0xff] %vm47_vm0, %v320_v33  ;;  %338 = vst.msk [vmem:[#allocation5 + $0x101] sm:$0xff] %vm47_vm0, %v321_v34  ;;  %v163_v40 = vld [vmem:[%s14658_s1 + $0x8] sm:$0xff]  ;;  %v449_v41 = vld [vmem:[#allocation5] sm:$0xff]  ;;  %v8768_v62 = vsel %vm517_vm2, %v557_v36, %v558_v37  ;;  %v564_v2 = vrot.slane %v8691_v30, 1 }
  0x62   :  { %874 = vrot.lane.b32.xlu0 %v8662_v11, %s8158_s23  ;;  %v450_v44 = vld [vmem:[#allocation5 + $0x8] sm:$0x3]  ;;  %339 = vst.msk [vmem:[#allocation5 + $0x111] sm:$0xff] %vm47_vm0, %v322_v38  ;;  %179 = vst.msk [vmem:[#allocation3 + $0x11] sm:$0xff] %vm47_vm0, %v162_v39  ;;  %v164_v45 = vld [vmem:[%s14658_s1 + $0x10] sm:$0xff]  ;;  %v8799_v10 = vsel %vm517_vm2, %v560_v50, %v561_v51  ;;  %v614_v12 = vrot.slane %v449_v41, 1 }
  0x63   :  { %180 = vst.msk [vmem:[#allocation3 + $0x21] sm:$0xff] %vm47_vm0, %v163_v40  ;;  %v165_v46 = vld [vmem:[%s14658_s1 + $0x18] sm:$0xff]  ;;  %v166_v47 = vld [vmem:[%s14658_s1 + $0x20] sm:$0xff]  ;;  %14926 = vst [vmem:[#allocation19_spill] sm:$0xff] %v8735_v48  ;;  %v615_v13 = vrot.slane %v450_v44, 1  ;;  %v8809_v17 = vsel %vm517_vm2, %v563_v63, %v564_v2 }
  0x64   :  { %181 = vst.msk [vmem:[#allocation3 + $0x31] sm:$0xff] %vm47_vm0, %v164_v45  ;;  %182 = vst.msk [vmem:[#allocation3 + $0x41] sm:$0xff] %vm47_vm0, %v165_v46  ;;  %v167_v52 = vld [vmem:[%s14658_s1 + $0x28] sm:$0xff]  ;;  %v168_v53 = vld [vmem:[%s14658_s1 + $0x30] sm:$0xff] }
  0x65   :  { %876 = vrot.lane.b32.xlu1 %v8667_v16, %s8158_s23  ;;  %183 = vst.msk [vmem:[#allocation3 + $0x51] sm:$0xff] %vm47_vm0, %v166_v47  ;;  %v169_v55 = vld [vmem:[%s14658_s1 + $0x38] sm:$0xff]  ;;  %v8753_v56 = vld [vmem:[#allocation5 + $0x10] sm:$0xff]  ;;  %184 = vst.msk [vmem:[#allocation3 + $0x61] sm:$0xff] %vm47_vm0, %v167_v52  ;;  %v8817_v22 = vsel %vm517_vm2, %v614_v12, %v615_v13 }
  0x66   :  { %878 = vrot.lane.b32.xlu0 %v8676_v23, %s8158_s23  ;;  %v452_v57 = vld [vmem:[#allocation5 + $0x18] sm:$0x3]  ;;  %185 = vst.msk [vmem:[#allocation3 + $0x71] sm:$0xff] %vm47_vm0, %v168_v53  ;;  %186 = vst.msk [vmem:[#allocation3 + $0x81] sm:$0xff] %vm47_vm0, %v169_v55  ;;  %v171_v60 = vld [vmem:[%s14658_s1 + $0x48] sm:$0xff]  ;;  %v617_v18 = vrot.slane %v8753_v56, 1 }
  0x67   :  { %v172_v61 = vld [vmem:[%s14658_s1 + $0x50] sm:$0xff]  ;;  %14927 = vst [vmem:[#allocation20_spill] sm:$0xff] %v8768_v62  ;;  %187 = vst.msk [vmem:[#allocation3 + $0xb1] sm:$0xff] %vm47_vm0, %v170_v58  ;;  %v174_v4 = vld [vmem:[%s14658_s1 + $0x60] sm:$0xff]  ;;  %v618_v19 = vrot.slane %v452_v57, 1 }
  0x68   :  { %188 = vst.msk [vmem:[#allocation3 + $0xc1] sm:$0xff] %vm47_vm0, %v171_v60  ;;  %189 = vst.msk [vmem:[#allocation3 + $0xd1] sm:$0xff] %vm47_vm0, %v172_v61  ;;  %v175_v5 = vld [vmem:[%s14658_s1 + $0x68] sm:$0xff]  ;;  %v176_v7 = vld [vmem:[%s14658_s1 + $0x70] sm:$0xff] }
  0x69   :  { %880 = vrot.lane.b32.xlu1 %v8706_v35, %s8158_s23  ;;  %190 = vst.msk [vmem:[#allocation3 + $0xe1] sm:$0xff] %vm47_vm0, %v173_v3  ;;  %191 = vst.msk [vmem:[#allocation3 + $0xf1] sm:$0xff] %vm47_vm0, %v174_v4  ;;  %v177_v8 = vld [vmem:[%s14658_s1 + $0x78] sm:$0xff]  ;;  %v89_v9 = vld [vmem:[%s14659_s0] sm:$0xff]  ;;  %v8825_v28 = vsel %vm517_vm2, %v617_v18, %v618_v19  ;;  %s8159_s1 = smov 8  }
  0x6a   :  { %882 = vrot.lane.b32.xlu0 %v8735_v48, %s8158_s23  ;;  %192 = vst.msk [vmem:[#allocation3 + $0x101] sm:$0xff] %vm47_vm0, %v175_v5  ;;  %14928 = vst [vmem:[#allocation21_spill] sm:$0xff] %v8799_v10  ;;  %v8806_v14 = vld [vmem:[#allocation5 + $0x20] sm:$0xff]  ;;  %v454_v15 = vld [vmem:[#allocation5 + $0x28] sm:$0x3] }
  0x6b   :  { %193 = vst.msk [vmem:[#allocation3 + $0x111] sm:$0xff] %vm47_vm0, %v176_v7  ;;  %194 = vst.msk [vmem:[#allocation3 + $0x121] sm:$0xff] %vm47_vm0, %v177_v8  ;;  %v8814_v20 = vld [vmem:[#allocation5 + $0x30] sm:$0xff]  ;;  %v456_v21 = vld [vmem:[#allocation5 + $0x38] sm:$0x3]  ;;  %v620_v24 = vrot.slane %v8806_v14, 1 }
  0x6c   :  { %106 = vst.msk [vmem:[#allocation2 + $0x11] sm:$0xff] %vm47_vm0, %v89_v9  ;;  %14929 = vst [vmem:[#allocation22_spill] sm:$0xff] %v8809_v17  ;;  %v621_v25 = vrot.slane %v454_v15, 1  ;;  %v8822_v26 = vld [vmem:[#allocation5 + $0x40] sm:$0xff]  ;;  %v458_v27 = vld [vmem:[#allocation5 + $0x48] sm:$0x3] }
  0x6d   :  { %884 = vrot.lane.b32.xlu1 %v8768_v62, %s8158_s23  ;;  %14930 = vst [vmem:[#allocation23_spill] sm:$0xff] %v8817_v22  ;;  %14931 = vst [vmem:[#allocation24_spill] sm:$0xff] %v8825_v28  ;;  %v623_v29 = vrot.slane %v8814_v20, 1  ;;  %v624_v30 = vrot.slane %v456_v21, 1  ;;  %v8830_v31 = vld [vmem:[#allocation5 + $0x50] sm:$0xff]  ;;  %v626_v36 = vrot.slane %v8822_v26, 1 }
  0x6e   :  { %886 = vrot.lane.b32.xlu0 %v8799_v10, %s8158_s23  ;;  %v460_v33 = vld [vmem:[#allocation5 + $0x58] sm:$0x3]  ;;  %v8833_v34 = vsel %vm517_vm2, %v620_v24, %v621_v25  ;;  %v627_v37 = vrot.slane %v458_v27, 1  ;;  %v8838_v38 = vld [vmem:[#allocation5 + $0x60] sm:$0xff]  ;;  %v462_v39 = vld [vmem:[#allocation5 + $0x68] sm:$0x3] }
  0x6f   :  { %14932 = vst [vmem:[#allocation25_spill] sm:$0xff] %v8833_v34  ;;  %v8841_v40 = vsel %vm517_vm2, %v623_v29, %v624_v30  ;;  %v629_v41 = vrot.slane %v8830_v31, 1  ;;  %v630_v44 = vrot.slane %v460_v33, 1  ;;  %v8844_v45 = vld [vmem:[#allocation5 + $0x70] sm:$0xff]  ;;  %v464_v46 = vld [vmem:[#allocation5 + $0x78] sm:$0x3] }
  0x70   :  { %14933 = vst [vmem:[#allocation26_spill] sm:$0xff] %v8841_v40  ;;  %v467_v47 = vld [vmem:[#allocation5 + $0xa0] sm:$0xff]  ;;  %v90_v50 = vld [vmem:[%s14659_s0 + $0x8] sm:$0xff]  ;;  %v8852_v51 = vsel %vm517_vm2, %v626_v36, %v627_v37  ;;  %v632_v52 = vrot.slane %v8838_v38, 1  ;;  %v633_v53 = vrot.slane %v462_v39, 1  ;;  %v91_v57 = vld [vmem:[%s14659_s0 + $0x10] sm:$0xff] }
  0x71   :  { %888 = vrot.lane.b32.xlu1 %v8809_v17, %s8158_s23  ;;  %14934 = vst [vmem:[#allocation27_spill] sm:$0xff] %v8852_v51  ;;  %v468_v55 = vld [vmem:[#allocation5 + $0xa8] sm:$0x3]  ;;  %107 = vst.msk [vmem:[#allocation2 + $0x21] sm:$0xff] %vm47_vm0, %v90_v50  ;;  %v92_v58 = vld [vmem:[%s14659_s0 + $0x18] sm:$0xff]  ;;  %v8878_v4 = vsel %vm517_vm2, %v629_v41, %v630_v44  ;;  %v635_v5 = vrot.slane %v8844_v45, 1 }
  0x72   :  { %906 = vrot.lane.b32.xlu0 %v8817_v22, %s8159_s1  ;;  %v8864_v60 = vld [vmem:[#allocation5 + $0xb0] sm:$0xff]  ;;  %v470_v61 = vld [vmem:[#allocation5 + $0xb8] sm:$0x3]  ;;  %108 = vst.msk [vmem:[#allocation2 + $0x31] sm:$0xff] %vm47_vm0, %v91_v57  ;;  %109 = vst.msk [vmem:[#allocation2 + $0x41] sm:$0xff] %vm47_vm0, %v92_v58  ;;  %v636_v7 = vrot.slane %v464_v46, 1  ;;  %v8908_v19 = vsel %vm517_vm2, %v632_v52, %v633_v53 }
  0x73   :  { %v93_v63 = vld [vmem:[%s14659_s0 + $0x20] sm:$0xff]  ;;  %v94_v2 = vld [vmem:[%s14659_s0 + $0x28] sm:$0xff]  ;;  %v95_v3 = vld [vmem:[%s14659_s0 + $0x30] sm:$0xff]  ;;  %14935 = vst [vmem:[#allocation28_spill] sm:$0xff] %v8878_v4  ;;  %v638_v21 = vrot.slane %v467_v47, 1  ;;  %v639_v24 = vrot.slane %v468_v55, 1 }
  0x74   :  { %110 = vst.msk [vmem:[#allocation2 + $0x51] sm:$0xff] %vm47_vm0, %v93_v63  ;;  %111 = vst.msk [vmem:[#allocation2 + $0x61] sm:$0xff] %vm47_vm0, %v94_v2  ;;  %v96_v8 = vld [vmem:[%s14659_s0 + $0x38] sm:$0xff]  ;;  %v97_v9 = vld [vmem:[%s14659_s0 + $0x40] sm:$0xff]  ;;  %v8930_v36 = vsel %vm517_vm2, %v635_v5, %v636_v7  ;;  %v641_v37 = vrot.slane %v8864_v60, 1  ;;  %v642_v39 = vrot.slane %v470_v61, 1 }
  0x75   :  { %908 = vrot.lane.b32.xlu1 %v8825_v28, %s8159_s1  ;;  %112 = vst.msk [vmem:[#allocation2 + $0x71] sm:$0xff] %vm47_vm0, %v95_v3  ;;  %v98_v12 = vld [vmem:[%s14659_s0 + $0x48] sm:$0xff]  ;;  %113 = vst.msk [vmem:[#allocation2 + $0x81] sm:$0xff] %vm47_vm0, %v96_v8  ;;  %v99_v13 = vld [vmem:[%s14659_s0 + $0x50] sm:$0xff]  ;;  %v8942_v47 = vsel %vm517_vm2, %v638_v21, %v639_v24 }
  0x76   :  { %910 = vrot.lane.b32.xlu0 %v8833_v34, %s8159_s1  ;;  %114 = vst.msk [vmem:[#allocation2 + $0xb1] sm:$0xff] %vm47_vm0, %v97_v9  ;;  %115 = vst.msk [vmem:[#allocation2 + $0xc1] sm:$0xff] %vm47_vm0, %v98_v12  ;;  %v100_v15 = vld [vmem:[%s14659_s0 + $0x58] sm:$0xff]  ;;  %v101_v18 = vld [vmem:[%s14659_s0 + $0x60] sm:$0xff]  ;;  %v8950_v57 = vsel %vm517_vm2, %v641_v37, %v642_v39 }
  0x77   :  { %14936 = vst [vmem:[#allocation29_spill] sm:$0xff] %v8908_v19  ;;  %116 = vst.msk [vmem:[#allocation2 + $0xd1] sm:$0xff] %vm47_vm0, %v99_v13  ;;  %v102_v25 = vld [vmem:[%s14659_s0 + $0x68] sm:$0xff]  ;;  %v103_v27 = vld [vmem:[%s14659_s0 + $0x70] sm:$0xff] }
  0x78   :  { %117 = vst.msk [vmem:[#allocation2 + $0xe1] sm:$0xff] %vm47_vm0, %v100_v15  ;;  %118 = vst.msk [vmem:[#allocation2 + $0xf1] sm:$0xff] %vm47_vm0, %v101_v18  ;;  %v104_v29 = vld [vmem:[%s14659_s0 + $0x78] sm:$0xff]  ;;  %v8924_v30 = vld [vmem:[#allocation5 + $0xc0] sm:$0xff] }
  0x79   :  { %912 = vrot.lane.b32.xlu1 %v8841_v40, %s8159_s1  ;;  %v472_v33 = vld [vmem:[#allocation5 + $0xc8] sm:$0x3]  ;;  %119 = vst.msk [vmem:[#allocation2 + $0x101] sm:$0xff] %vm47_vm0, %v102_v25  ;;  %120 = vst.msk [vmem:[#allocation2 + $0x111] sm:$0xff] %vm47_vm0, %v103_v27  ;;  %v315_v41 = vld [vmem:[%s14657_s3 + $0x38] sm:$0xff]  ;;  %v644_v50 = vrot.slane %v8924_v30, 1 }
  0x7a   :  { %914 = vrot.lane.b32.xlu0 %v8852_v51, %s8159_s1  ;;  %121 = vst.msk [vmem:[#allocation2 + $0x121] sm:$0xff] %vm47_vm0, %v104_v29  ;;  %14937 = vst [vmem:[#allocation30_spill] sm:$0xff] %v8930_v36  ;;  %v8938_v44 = vld [vmem:[#allocation5 + $0xd0] sm:$0xff]  ;;  %v474_v46 = vld [vmem:[#allocation5 + $0xd8] sm:$0x3]  ;;  %v645_v52 = vrot.slane %v472_v33, 1 }
  0x7b   :  { %332 = vst.msk [vmem:[#allocation5 + $0x81] sm:$0xff] %vm47_vm0, %v315_v41  ;;  %14938 = vst [vmem:[#allocation31_spill] sm:$0xff] %v8942_v47  ;;  %v8947_v53 = vld [vmem:[#allocation5 + $0xe0] sm:$0xff]  ;;  %v476_v55 = vld [vmem:[#allocation5 + $0xe8] sm:$0x3]  ;;  %v647_v58 = vrot.slane %v8938_v44, 1 }
  0x7c   :  { %14939 = vst [vmem:[#allocation32_spill] sm:$0xff] %v8950_v57  ;;  %v648_v61 = vrot.slane %v474_v46, 1  ;;  %v8955_v63 = vld [vmem:[#allocation5 + $0xf0] sm:$0xff]  ;;  %v478_v2 = vld [vmem:[#allocation5 + $0xf8] sm:$0x3]  ;;  %v8958_v3 = vsel %vm517_vm2, %v644_v50, %v645_v52  ;;  %v650_v5 = vrot.slane %v8947_v53, 1 }
  0x7d   :  { %916 = vrot.lane.b32.xlu1 %v8878_v4, %s8159_s1  ;;  %14940 = vst [vmem:[#allocation33_spill] sm:$0xff] %v8958_v3  ;;  %v651_v7 = vrot.slane %v476_v55, 1  ;;  %v8963_v8 = vld [vmem:[#allocation5 + $0x100] sm:$0xff]  ;;  %v480_v9 = vld [vmem:[#allocation5 + $0x108] sm:$0x3]  ;;  %v653_v13 = vrot.slane %v8955_v63, 1 }
  0x7e   :  { %918 = vrot.lane.b32.xlu0 %v8908_v19, %s8159_s1  ;;  %v8966_v12 = vsel %vm517_vm2, %v647_v58, %v648_v61  ;;  %v654_v15 = vrot.slane %v478_v2, 1  ;;  %v8971_v18 = vld [vmem:[#allocation5 + $0x110] sm:$0xff]  ;;  %v482_v21 = vld [vmem:[#allocation5 + $0x118] sm:$0x3]  ;;  %v656_v25 = vrot.slane %v8963_v8, 1  ;;  %v657_v27 = vrot.slane %v480_v9, 1 }
  0x7f   :  { %14941 = vst [vmem:[#allocation34_spill] sm:$0xff] %v8966_v12  ;;  %v8974_v24 = vsel %vm517_vm2, %v650_v5, %v651_v7  ;;  %v659_v33 = vrot.slane %v8971_v18, 1  ;;  %v660_v37 = vrot.slane %v482_v21, 1  ;;  %v8995_v46 = vld [vmem:[#allocation3 + $0x10] sm:$0xff]  ;;  %v323_v50 = vld [vmem:[%s14657_s3 + $0x78] sm:$0xff]  ;;  %v9002_v52 = vld [vmem:[#allocation3 + $0x20] sm:$0xff] }
  0x80   :  { %14942 = vst [vmem:[#allocation35_spill] sm:$0xff] %v8974_v24  ;;  %v8980_v29 = vsel %vm517_vm2, %v653_v13, %v654_v15  ;;  %v8986_v39 = vsel %vm517_vm2, %v656_v25, %v657_v27  ;;  %340 = vst.msk [vmem:[#allocation5 + $0x121] sm:$0xff] %vm47_vm0, %v323_v50  ;;  %v9007_v55 = vld [vmem:[#allocation3 + $0x30] sm:$0xff]  ;;  %v242_v58 = vld [vmem:[%s14656_s2 + $0x38] sm:$0xff] }
  0x81   :  { %920 = vrot.lane.b32.xlu1 %v8930_v36, %s8159_s1  ;;  %14943 = vst [vmem:[#allocation36_spill] sm:$0xff] %v8980_v29  ;;  %14944 = vst [vmem:[#allocation37_spill] sm:$0xff] %v8986_v39  ;;  %v8991_v41 = vsel %vm517_vm2, %v659_v33, %v660_v37  ;;  %v9014_v61 = vld [vmem:[#allocation3 + $0x40] sm:$0xff]  ;;  %v9019_v2 = vld [vmem:[#allocation3 + $0x50] sm:$0xff] }
  0x82   :  { %922 = vrot.lane.b32.xlu0 %v8942_v47, %s8159_s1  ;;  %14945 = vst [vmem:[#allocation38_spill] sm:$0xff] %v8991_v41  ;;  %259 = vst.msk [vmem:[#allocation4 + $0x81] sm:$0xff] %vm47_vm0, %v242_v58  ;;  %v9023_v5 = vld [vmem:[#allocation3 + $0x60] sm:$0xff]  ;;  %v9027_v7 = vld [vmem:[#allocation3 + $0x70] sm:$0xff] }
  0x83   :  { %v9031_v9 = vld [vmem:[#allocation3 + $0x80] sm:$0xff]  ;;  %v9035_v13 = vld [vmem:[#allocation3 + $0xb0] sm:$0xff]  ;;  %v250_v25 = vld [vmem:[%s14656_s2 + $0x78] sm:$0xff]  ;;  %4359 = vst.msk [vmem:[#allocation6] sm:$0xff] %vm1292_vm3, %v14673_v0  ;;  %s8161_s2 = smov 16  }
  0x84   :  { %v9039_v15 = vld [vmem:[#allocation3 + $0xc0] sm:$0xff]  ;;  %v9043_v21 = vld [vmem:[#allocation3 + $0xd0] sm:$0xff]  ;;  %4362 = vst.msk [vmem:[#allocation6 + $0x10] sm:$0xff] %vm1292_vm3, %v14673_v0  ;;  %4364 = vst.msk [vmem:[#allocation6 + $0x20] sm:$0xff] %vm1292_vm3, %v14673_v0 }
  0x85   :  { %924 = vrot.lane.b32.xlu1 %v8950_v57, %s8159_s1  ;;  %v9050_v27 = vld [vmem:[#allocation3 + $0xe0] sm:$0xff]  ;;  %4366 = vst.msk [vmem:[#allocation6 + $0x30] sm:$0xff] %vm1292_vm3, %v14673_v0  ;;  %4368 = vst.msk [vmem:[#allocation6 + $0x40] sm:$0xff] %vm1292_vm3, %v14673_v0  ;;  %v9095_v33 = vld [vmem:[#allocation3 + $0xf0] sm:$0xff] }
  0x86   :  { %926 = vrot.lane.b32.xlu0 %v8958_v3, %s8159_s1  ;;  %4370 = vst.msk [vmem:[#allocation6 + $0x50] sm:$0xff] %vm1292_vm3, %v14673_v0  ;;  %4372 = vst.msk [vmem:[#allocation6 + $0x60] sm:$0xff] %vm1292_vm3, %v14673_v0  ;;  %v341_v37 = vld [vmem:[#allocation2 + $0x10] sm:$0xff]  ;;  %v342_v50 = vld [vmem:[#allocation2 + $0x18] sm:$0x3] }
  0x87   :  { %4374 = vst.msk [vmem:[#allocation6 + $0x70] sm:$0xff] %vm1292_vm3, %v14673_v0  ;;  %4376 = vst.msk [vmem:[#allocation6 + $0x80] sm:$0xff] %vm1292_vm3, %v14673_v0  ;;  %v9099_v58 = vld [vmem:[#allocation3 + $0x100] sm:$0xff]  ;;  %v344_v32 = vld [vmem:[#allocation2 + $0x28] sm:$0x3]  ;;  %v695_v47 = vrot.slane %v342_v50, 1 }
  0x88   :  { %4378 = vst.msk [vmem:[#allocation6 + $0x90] sm:$0xff] %vm1292_vm3, %v14673_v0  ;;  %4380 = vst.msk [vmem:[#allocation6 + $0xa0] sm:$0xff] %vm1292_vm3, %v14673_v0  ;;  %v343_v11 = vld [vmem:[#allocation2 + $0x20] sm:$0xff]  ;;  %v345_v22 = vld [vmem:[#allocation2 + $0x30] sm:$0xff] }
  0x89   :  { %928 = vrot.lane.b32.xlu1 %v8966_v12, %s8159_s1  ;;  %4382 = vst.msk [vmem:[#allocation6 + $0xb0] sm:$0xff] %vm1292_vm3, %v14673_v0  ;;  %4384 = vst.msk [vmem:[#allocation6 + $0xc0] sm:$0xff] %vm1292_vm3, %v14673_v0  ;;  %v347_v12 = vld [vmem:[#allocation2 + $0x40] sm:$0xff]  ;;  %v348_v3 = vld [vmem:[#allocation2 + $0x48] sm:$0x3]  ;;  %v700_v36 = vrot.slane %v345_v22, 1 }
  0x8a   :  { %930 = vrot.lane.b32.xlu0 %v8974_v24, %s8159_s1  ;;  %4386 = vst.msk [vmem:[#allocation6 + $0xd0] sm:$0xff] %vm1292_vm3, %v14673_v0  ;;  %4388 = vst.msk [vmem:[#allocation6 + $0xe0] sm:$0xff] %vm1292_vm3, %v14673_v0  ;;  %v698_v24 = vrot.slane %v344_v32, 1  ;;  %v349_v50 = vld [vmem:[#allocation2 + $0x50] sm:$0xff]  ;;  %v350_v19 = vld [vmem:[#allocation2 + $0x58] sm:$0x3] }
  0x8b   :  { %4390 = vst.msk [vmem:[#allocation6 + $0xf0] sm:$0xff] %vm1292_vm3, %v14673_v0  ;;  %4392 = vst.msk [vmem:[#allocation6 + $0x100] sm:$0xff] %vm1292_vm3, %v14673_v0  ;;  %v704_v32 = vrot.slane %v348_v3, 1  ;;  %v351_v51 = vld [vmem:[#allocation2 + $0x60] sm:$0xff]  ;;  %v352_v40 = vld [vmem:[#allocation2 + $0x68] sm:$0x3] }
  0x8c   :  { %4394 = vst.msk [vmem:[#allocation6 + $0x110] sm:$0xff] %vm1292_vm3, %v14673_v0  ;;  %4396 = vst.msk [vmem:[#allocation6 + $0x120] sm:$0xff] %vm1292_vm3, %v14673_v0  ;;  %v706_v22 = vrot.slane %v349_v50, 1  ;;  %v354_v34 = vld [vmem:[#allocation2 + $0x78] sm:$0x3]  ;;  %v709_v3 = vrot.slane %v351_v51, 1 }
  0x8d   :  { %932 = vrot.lane.b32.xlu1 %v8980_v29, %s8159_s1  ;;  %4398 = vst.msk [vmem:[#allocation6 + $0x130] sm:$0xff] %vm1292_vm3, %v14673_v0  ;;  %v9103_v0 = vld [vmem:[#allocation3 + $0x110] sm:$0xff]  ;;  %v697_v29 = vrot.slane %v343_v11, 1  ;;  %v703_v11 = vrot.slane %v347_v12, 1  ;;  %v710_v12 = vrot.slane %v352_v40, 1 }
  0x8e   :  { %934 = vrot.lane.b32.xlu0 %v8986_v39, %s8159_s1  ;;  %267 = vst.msk [vmem:[#allocation4 + $0x121] sm:$0xff] %vm47_vm0, %v250_v25  ;;  %v694_v25 = vrot.slane %v341_v37, 1  ;;  %v9107_v39 = vld [vmem:[#allocation3 + $0x120] sm:$0xff]  ;;  %v359_v50 = vld [vmem:[#allocation2 + $0xb0] sm:$0xff] }
  0x8f   :  { %v9117_v4 = vsel %vm517_vm2, %v697_v29, %v698_v24  ;;  %v9127_v24 = vsel %vm517_vm2, %v703_v11, %v704_v32  ;;  %v355_v29 = vld [vmem:[#allocation2 + $0x80] sm:$0xff]  ;;  %v9137_v11 = vsel %vm517_vm2, %v709_v3, %v710_v12 }
  0x90   :  { %v9112_v57 = vsel %vm517_vm2, %v694_v25, %v695_v47  ;;  %14947 = vst [vmem:[#allocation40_spill] sm:$0xff] %v9117_v4  ;;  %v353_v25 = vld [vmem:[#allocation2 + $0x70] sm:$0xff]  ;;  %14949 = vst [vmem:[#allocation42_spill] sm:$0xff] %v9127_v24  ;;  %v715_v51 = vrot.slane %v355_v29, 1  ;;  %v361_v32 = vld [vmem:[#allocation2 + $0xc0] sm:$0xff] }
  0x91   :  { %936 = vrot.lane.b32.xlu1 %v8991_v41, %s8159_s1  ;;  %v346_v41 = vld [vmem:[#allocation2 + $0x38] sm:$0x3]  ;;  %14946 = vst [vmem:[#allocation39_spill] sm:$0xff] %v9112_v57  ;;  %14951 = vst [vmem:[#allocation44_spill] sm:$0xff] %v9137_v11  ;;  %v721_v12 = vrot.slane %v361_v32, 1  ;;  %v365_v29 = vld [vmem:[#allocation2 + $0xe0] sm:$0xff] }
  0x92   :  { %954 = vrot.lane.b32.xlu0 %v8995_v46, %s8160_s30  ;;  %v701_v37 = vrot.slane %v346_v41, 1  ;;  %v707_v41 = vrot.slane %v350_v19, 1  ;;  %v713_v19 = vrot.slane %v354_v34, 1  ;;  %v369_v32 = vld [vmem:[#allocation2 + $0x100] sm:$0xff] }
  0x94   :  { %v9122_v47 = vsel %vm517_vm2, %v700_v36, %v701_v37  ;;  %v9132_v36 = vsel %vm517_vm2, %v706_v22, %v707_v41  ;;  %v712_v37 = vrot.slane %v353_v25, 1  ;;  %v718_v41 = vrot.slane %v359_v50, 1  ;;  %v363_v25 = vld [vmem:[#allocation2 + $0xd0] sm:$0xff] }
  0x95   :  { %956 = vrot.lane.b32.xlu1 %v9002_v52, %s8160_s30  ;;  %14948 = vst [vmem:[#allocation41_spill] sm:$0xff] %v9122_v47  ;;  %14950 = vst [vmem:[#allocation43_spill] sm:$0xff] %v9132_v36  ;;  %v367_v50 = vld [vmem:[#allocation2 + $0xf0] sm:$0xff] }
  0x96   :  { %958 = vrot.lane.b32.xlu0 %v9007_v55, %s8160_s30  ;;  %v9142_v22 = vsel %vm517_vm2, %v712_v37, %v713_v19  ;;  %v724_v19 = vrot.slane %v363_v25, 1  ;;  %v9166_v25 = vpop.permute.xlu0 %858 }
  0x97   :  { %14952 = vst [vmem:[#allocation45_spill] sm:$0xff] %v9142_v22  ;;  %14957 = vst [vmem:[#allocation50_spill] sm:$0xff] %v9166_v25 }
  0x99   :  { %960 = vrot.lane.b32.xlu1 %v9014_v61, %s8160_s30 }
  0x9a   :  { %962 = vrot.lane.b32.xlu0 %v9019_v2, %s8160_s30 }
  0x9d   :  { %964 = vrot.lane.b32.xlu1 %v9023_v5, %s8160_s30 }
  0x9e   :  { %966 = vrot.lane.b32.xlu0 %v9027_v7, %s8160_s30 }
  0xa1   :  { %968 = vrot.lane.b32.xlu1 %v9031_v9, %s8160_s30 }
  0xa2   :  { %970 = vrot.lane.b32.xlu0 %v9035_v13, %s8160_s30 }
  0xa5   :  { %972 = vrot.lane.b32.xlu1 %v9039_v15, %s8160_s30 }
  0xa6   :  { %974 = vrot.lane.b32.xlu0 %v9043_v21, %s8160_s30 }
  0xa9   :  { %976 = vrot.lane.b32.xlu1 %v9050_v27, %s8160_s30 }
  0xaa   :  { %978 = vrot.lane.b32.xlu0 %v9095_v33, %s8160_s30 }
  0xad   :  { %980 = vrot.lane.b32.xlu1 %v9099_v58, %s8160_s30 }
  0xae   :  { %982 = vrot.lane.b32.xlu0 %v9103_v0, %s8160_s30 }
  0xb1   :  { %984 = vrot.lane.b32.xlu1 %v9107_v39, %s8160_s30 }
  0xb2   :  { %1002 = vrot.lane.b32.xlu0 %v9112_v57, %s8161_s2  ;;  %v356_v57 = vld [vmem:[#allocation2 + $0x88] sm:$0x3] }
  0xb3   :  { %v716_v40 = vrot.slane %v356_v57, 1 }
  0xb5   :  { %1004 = vrot.lane.b32.xlu1 %v9117_v4, %s8161_s2  ;;  %v360_v4 = vld [vmem:[#allocation2 + $0xb8] sm:$0x3]  ;;  %v9147_v3 = vsel %vm517_vm2, %v715_v51, %v716_v40  ;;  %v727_v40 = vrot.slane %v365_v29, 1 }
  0xb6   :  { %1006 = vrot.lane.b32.xlu0 %v9122_v47, %s8161_s2  ;;  %v362_v47 = vld [vmem:[#allocation2 + $0xc8] sm:$0x3]  ;;  %v719_v34 = vrot.slane %v360_v4, 1  ;;  %14953 = vst [vmem:[#allocation46_spill] sm:$0xff] %v9147_v3 }
  0xb7   :  { %v722_v57 = vrot.slane %v362_v47, 1 }
  0xb8   :  { %v9152_v37 = vsel %vm517_vm2, %v718_v41, %v719_v34  ;;  %v730_v34 = vrot.slane %v367_v50, 1 }
  0xb9   :  { %1008 = vrot.lane.b32.xlu1 %v9127_v24, %s8161_s2  ;;  %v364_v24 = vld [vmem:[#allocation2 + $0xd8] sm:$0x3]  ;;  %14954 = vst [vmem:[#allocation47_spill] sm:$0xff] %v9152_v37  ;;  %v9157_v51 = vsel %vm517_vm2, %v721_v12, %v722_v57 }
  0xba   :  { %1010 = vrot.lane.b32.xlu0 %v9132_v36, %s8161_s2  ;;  %v366_v36 = vld [vmem:[#allocation2 + $0xe8] sm:$0x3]  ;;  %v725_v4 = vrot.slane %v364_v24, 1  ;;  %14955 = vst [vmem:[#allocation48_spill] sm:$0xff] %v9157_v51  ;;  %v372_v12 = vld [vmem:[#allocation2 + $0x118] sm:$0x3] }
  0xbb   :  { %v728_v47 = vrot.slane %v366_v36, 1  ;;  %v733_v36 = vrot.slane %v369_v32, 1 }
  0xbc   :  { %v9162_v41 = vsel %vm517_vm2, %v724_v19, %v725_v4  ;;  %v373_v19 = vld [vmem:[#allocation2 + $0x120] sm:$0xff]  ;;  %v374_v4 = vld [vmem:[#allocation2 + $0x128] sm:$0x3] }
  0xbd   :  { %1012 = vrot.lane.b32.xlu1 %v9137_v11, %s8161_s2  ;;  %v368_v11 = vld [vmem:[#allocation2 + $0xf8] sm:$0x3]  ;;  %14956 = vst [vmem:[#allocation49_spill] sm:$0xff] %v9162_v41  ;;  %v9169_v57 = vsel %vm517_vm2, %v727_v40, %v728_v47  ;;  %v739_v47 = vrot.slane %v373_v19, 1  ;;  %v740_v32 = vrot.slane %v374_v4, 1 }
  0xbe   :  { %1014 = vrot.lane.b32.xlu0 %v9142_v22, %s8161_s2  ;;  %v370_v22 = vld [vmem:[#allocation2 + $0x108] sm:$0x3]  ;;  %v731_v24 = vrot.slane %v368_v11, 1  ;;  %14958 = vst [vmem:[#allocation51_spill] sm:$0xff] %v9169_v57  ;;  %v378_v40 = vld [vmem:[#allocation3 + $0x18] sm:$0x3] }
  0xbf   :  { %v734_v29 = vrot.slane %v370_v22, 1  ;;  %v9199_v19 = vsel %vm517_vm2, %v739_v47, %v740_v32  ;;  %v386_v47 = vld [vmem:[#allocation3 + $0x58] sm:$0x3]  ;;  %v799_v32 = vrot.slane %v9014_v61, 1 }
  0xc0   :  { %v9176_v11 = vsel %vm517_vm2, %v730_v34, %v731_v24  ;;  %v380_v34 = vld [vmem:[#allocation3 + $0x28] sm:$0x3]  ;;  %14963 = vst [vmem:[#allocation56_spill] sm:$0xff] %v9199_v19 }
  0xc1   :  { %1016 = vrot.lane.b32.xlu1 %v9147_v3, %s8161_s2  ;;  %v371_v3 = vld [vmem:[#allocation2 + $0x110] sm:$0xff]  ;;  %14960 = vst [vmem:[#allocation53_spill] sm:$0xff] %v9176_v11  ;;  %v9183_v22 = vsel %vm517_vm2, %v733_v36, %v734_v29  ;;  %v382_v36 = vld [vmem:[#allocation3 + $0x38] sm:$0x3]  ;;  %v793_v29 = vrot.slane %v9002_v52, 1  ;;  %v794_v4 = vrot.slane %v380_v34, 1 }
  0xc2   :  { %1018 = vrot.lane.b32.xlu0 %v9152_v37, %s8161_s2  ;;  %v736_v50 = vrot.slane %v371_v3, 1  ;;  %14961 = vst [vmem:[#allocation54_spill] sm:$0xff] %v9183_v22  ;;  %v790_v3 = vrot.slane %v8995_v46, 1  ;;  %v384_v46 = vld [vmem:[#allocation3 + $0x48] sm:$0x3] }
  0xc3   :  { %v9215_v34 = vsel %vm517_vm2, %v793_v29, %v794_v4  ;;  %v390_v29 = vld [vmem:[#allocation3 + $0x78] sm:$0x3]  ;;  %v805_v4 = vrot.slane %v9023_v5, 1 }
  0xc4   :  { %14965 = vst [vmem:[#allocation58_spill] sm:$0xff] %v9215_v34 }
  0xc5   :  { %1020 = vrot.lane.b32.xlu1 %v9157_v51, %s8161_s2  ;;  %v737_v51 = vrot.slane %v372_v12, 1  ;;  %v791_v12 = vrot.slane %v378_v40, 1  ;;  %v797_v40 = vrot.slane %v382_v36, 1  ;;  %v803_v36 = vrot.slane %v386_v47, 1 }
  0xc6   :  { %1022 = vrot.lane.b32.xlu0 %v9162_v41, %s8161_s2  ;;  %v809_v47 = vrot.slane %v390_v29, 1 }
  0xc7   :  { %v9171_v37 = vpop.permute.xlu1 %862  ;;  %v9191_v24 = vsel %vm517_vm2, %v736_v50, %v737_v51  ;;  %v796_v51 = vrot.slane %v9007_v55, 1  ;;  %v9207_v50 = vsel %vm517_vm2, %v790_v3, %v791_v12  ;;  %v388_v55 = vld [vmem:[#allocation3 + $0x68] sm:$0x3]  ;;  %v802_v3 = vrot.slane %v9019_v2, 1 }
  0xc8   :  { %14959 = vst [vmem:[#allocation52_spill] sm:$0xff] %v9171_v37  ;;  %v9180_v25 = vpop.permute.xlu0 %860  ;;  %14962 = vst [vmem:[#allocation55_spill] sm:$0xff] %v9191_v24  ;;  %v392_v2 = vld [vmem:[#allocation3 + $0x88] sm:$0x3] }
  0xc9   :  { %1024 = vrot.lane.b32.xlu1 %v9169_v57, %s8161_s2  ;;  %14964 = vst [vmem:[#allocation57_spill] sm:$0xff] %v9207_v50  ;;  %v9223_v12 = vsel %vm517_vm2, %v796_v51, %v797_v40  ;;  %v808_v51 = vrot.slane %v9027_v7, 1  ;;  %v9239_v40 = vsel %vm517_vm2, %v802_v3, %v803_v36  ;;  %v398_v7 = vld [vmem:[#allocation3 + $0xc8] sm:$0x3]  ;;  %v814_v3 = vrot.slane %v9035_v13, 1 }
  0xca   :  { %1026 = vrot.lane.b32.xlu0 %v9176_v11, %s8161_s2  ;;  %14966 = vst [vmem:[#allocation59_spill] sm:$0xff] %v9223_v12  ;;  %14968 = vst [vmem:[#allocation61_spill] sm:$0xff] %v9239_v40  ;;  %v402_v13 = vld [vmem:[#allocation3 + $0xe8] sm:$0x3] }
  0xcb   :  { %v9185_v37 = vpop.permute.xlu1 %864  ;;  %v9255_v36 = vsel %vm517_vm2, %v808_v51, %v809_v47  ;;  %v820_v51 = vrot.slane %v9043_v21, 1  ;;  %v406_v21 = vld [vmem:[#allocation3 + $0x108] sm:$0x3] }
  0xcc   :  { %v9195_v57 = vpop.permute.xlu0 %866  ;;  %14970 = vst [vmem:[#allocation63_spill] sm:$0xff] %v9255_v36 }
  0xcd   :  { %1028 = vrot.lane.b32.xlu1 %v9183_v22, %s8161_s2  ;;  %v800_v22 = vrot.slane %v384_v46, 1 }
  0xce   :  { %1030 = vrot.lane.b32.xlu0 %v9191_v24, %s8161_s2 }
  0xcf   :  { %v9201_v11 = vpop.permute.xlu1 %868  ;;  %v9231_v46 = vsel %vm517_vm2, %v799_v32, %v800_v22  ;;  %v396_v22 = vld [vmem:[#allocation3 + $0xb8] sm:$0x3]  ;;  %v811_v32 = vrot.slane %v9031_v9, 1 }
  0xd0   :  { %v9211_v52 = vpop.permute.xlu0 %870  ;;  %14967 = vst [vmem:[#allocation60_spill] sm:$0xff] %v9231_v46  ;;  %v815_v29 = vrot.slane %v396_v22, 1 }
  0xd1   :  { %1032 = vrot.lane.b32.xlu1 %v9199_v19, %s8161_s2  ;;  %v806_v19 = vrot.slane %v388_v55, 1 }
  0xd2   :  { %1050 = vrot.lane.b32.xlu0 %v9207_v50, %s8162_s18  ;;  %v9271_v47 = vsel %vm517_vm2, %v814_v3, %v815_v29  ;;  %v826_v3 = vrot.slane %v9095_v33, 1  ;;  %v410_v33 = vld [vmem:[#allocation3 + $0x128] sm:$0x3] }
  0xd3   :  { %v9217_v24 = vpop.permute.xlu1 %872  ;;  %v9247_v55 = vsel %vm517_vm2, %v805_v4, %v806_v19  ;;  %v400_v19 = vld [vmem:[#allocation3 + $0xd8] sm:$0x3]  ;;  %v817_v4 = vrot.slane %v9039_v15, 1  ;;  %14972 = vst [vmem:[#allocation65_spill] sm:$0xff] %v9271_v47 }
  0xd4   :  { %v9227_v61 = vpop.permute.xlu0 %874  ;;  %14969 = vst [vmem:[#allocation62_spill] sm:$0xff] %v9247_v55  ;;  %v821_v22 = vrot.slane %v400_v19, 1 }
  0xd5   :  { %1052 = vrot.lane.b32.xlu1 %v9215_v34, %s8162_s18  ;;  %v812_v34 = vrot.slane %v392_v2, 1 }
  0xd6   :  { %1054 = vrot.lane.b32.xlu0 %v9223_v12, %s8162_s18  ;;  %v9287_v29 = vsel %vm517_vm2, %v820_v51, %v821_v22  ;;  %v832_v51 = vrot.slane %v9103_v0, 1 }
  0xd7   :  { %v9233_v50 = vpop.permute.xlu1 %876  ;;  %v9263_v2 = vsel %vm517_vm2, %v811_v32, %v812_v34  ;;  %v404_v34 = vld [vmem:[#allocation3 + $0xf8] sm:$0x3]  ;;  %v823_v32 = vrot.slane %v9050_v27, 1  ;;  %14974 = vst [vmem:[#allocation67_spill] sm:$0xff] %v9287_v29 }
  0xd8   :  { %v9243_v5 = vpop.permute.xlu0 %878  ;;  %14971 = vst [vmem:[#allocation64_spill] sm:$0xff] %v9263_v2  ;;  %v827_v19 = vrot.slane %v404_v34, 1 }
  0xd9   :  { %1056 = vrot.lane.b32.xlu1 %v9231_v46, %s8162_s18  ;;  %v818_v46 = vrot.slane %v398_v7, 1 }
  0xda   :  { %1058 = vrot.lane.b32.xlu0 %v9239_v40, %s8162_s18  ;;  %v9303_v22 = vsel %vm517_vm2, %v826_v3, %v827_v19 }
  0xdb   :  { %v9249_v12 = vpop.permute.xlu1 %880  ;;  %v9279_v7 = vsel %vm517_vm2, %v817_v4, %v818_v46  ;;  %v408_v46 = vld [vmem:[#allocation3 + $0x118] sm:$0x3]  ;;  %v829_v4 = vrot.slane %v9099_v58, 1  ;;  %14976 = vst [vmem:[#allocation69_spill] sm:$0xff] %v9303_v22 }
  0xdc   :  { %v9259_v9 = vpop.permute.xlu0 %882  ;;  %14973 = vst [vmem:[#allocation66_spill] sm:$0xff] %v9279_v7  ;;  %v833_v34 = vrot.slane %v408_v46, 1  ;;  %v8034_v46 = vld [vmem:[#allocation4 + $0x8] sm:$0x3] }
  0xdd   :  { %1060 = vrot.lane.b32.xlu1 %v9247_v55, %s8162_s18  ;;  %v824_v55 = vrot.slane %v402_v13, 1 }
  0xde   :  { %1062 = vrot.lane.b32.xlu0 %v9255_v36, %s8162_s18  ;;  %v9318_v0 = vsel %vm517_vm2, %v832_v51, %v833_v34 }
  0xdf   :  { %v9265_v40 = vpop.permute.xlu1 %884  ;;  %v9295_v13 = vsel %vm517_vm2, %v823_v32, %v824_v55  ;;  %v835_v55 = vrot.slane %v9107_v39, 1  ;;  %14978 = vst [vmem:[#allocation71_spill] sm:$0xff] %v9318_v0  ;;  %v8033_v39 = vld [vmem:[#allocation4] sm:$0xff] }
  0xe0   :  { %v9275_v15 = vpop.permute.xlu0 %886  ;;  %14975 = vst [vmem:[#allocation68_spill] sm:$0xff] %v9295_v13 }
  0xe1   :  { %1064 = vrot.lane.b32.xlu1 %v9263_v2, %s8162_s18  ;;  %v830_v2 = vrot.slane %v406_v21, 1  ;;  %v836_v21 = vrot.slane %v410_v33, 1 }
  0xe2   :  { %1066 = vrot.lane.b32.xlu0 %v9271_v47, %s8162_s18 }
  0xe3   :  { %v9281_v36 = vpop.permute.xlu1 %888  ;;  %v9311_v32 = vsel %vm517_vm2, %v829_v4, %v830_v2  ;;  %v9325_v19 = vsel %vm517_vm2, %v835_v55, %v836_v21  ;;  %v1604_v2 = vrot.slane %v8033_v39, 2  ;;  %v1605_v4 = vrot.slane %v8034_v46, 2 }
  0xe4   :  { %v9291_v27 = vpop.permute.xlu0 %906  ;;  %14977 = vst [vmem:[#allocation70_spill] sm:$0xff] %v9311_v32  ;;  %14979 = vst [vmem:[#allocation72_spill] sm:$0xff] %v9325_v19 }
  0xe5   :  { %1068 = vrot.lane.b32.xlu1 %v9279_v7, %s8162_s18  ;;  %v9340_v55 = vsel %vm1603_vm4, %v1604_v2, %v1605_v4 }
  0xe6   :  { %1070 = vrot.lane.b32.xlu0 %v9287_v29, %s8162_s18 }
  0xe7   :  { %v9297_v47 = vpop.permute.xlu1 %908 }
  0xe8   :  { %v9307_v58 = vpop.permute.xlu0 %910 }
  0xe9   :  { %1072 = vrot.lane.b32.xlu1 %v9295_v13, %s8162_s18 }
  0xea   :  { %1074 = vrot.lane.b32.xlu0 %v9303_v22, %s8162_s18 }
  0xeb   :  { %v9313_v7 = vpop.permute.xlu1 %912 }
  0xec   :  { %v9322_v3 = vpop.permute.xlu0 %914 }
  0xed   :  { %1076 = vrot.lane.b32.xlu1 %v9311_v32, %s8162_s18  ;;  %v430_v32 = vld [vmem:[#allocation4 + $0x88] sm:$0x3] }
  0xee   :  { %1078 = vrot.lane.b32.xlu0 %v9318_v0, %s8162_s18  ;;  %v843_v29 = vrot.slane %v430_v32, 1 }
  0xef   :  { %v9327_v33 = vpop.permute.xlu1 %916 }
  0xf0   :  { %v9333_v51 = vpop.permute.xlu0 %918 }
  0xf1   :  { %1080 = vrot.lane.b32.xlu1 %v9325_v19, %s8162_s18 }
  0xf2   :  { %1098 = vrot.lane.b32.xlu0 %v8753_v56, %s8163_s19 }
  0xf3   :  { %v9335_v34 = vpop.permute.xlu1 %920 }
  0xf4   :  { %14980 = vst [vmem:[#allocation73_spill] sm:$0xff] %v9335_v34  ;;  %v9344_v21 = vpop.permute.xlu0 %922  ;;  %v15032_v34 = vld [vmem:[#allocation23_spill] sm:$0xff] }
  0xf5   :  { %1100 = vrot.lane.b32.xlu1 %v8806_v14, %s8163_s19  ;;  %14981 = vst [vmem:[#allocation74_spill] sm:$0xff] %v9344_v21  ;;  %v9362_v14 = vld [vmem:[#allocation5 + $0x80] sm:$0xff] }
  0xf6   :  { %1102 = vrot.lane.b32.xlu0 %v8814_v20, %s8163_s19 }
  0xf7   :  { %v9346_v39 = vpop.permute.xlu1 %924 }
  0xf8   :  { %14982 = vst [vmem:[#allocation75_spill] sm:$0xff] %v9346_v39  ;;  %v9352_v46 = vpop.permute.xlu0 %926 }
  0xf9   :  { %1104 = vrot.lane.b32.xlu1 %v8822_v26, %s8163_s19  ;;  %14983 = vst [vmem:[#allocation76_spill] sm:$0xff] %v9352_v46 }
  0xfa   :  { %1106 = vrot.lane.b32.xlu0 %v8830_v31, %s8163_s19 }
  0xfb   :  { %v9354_v19 = vpop.permute.xlu1 %928 }
  0xfc   :  { %14984 = vst [vmem:[#allocation77_spill] sm:$0xff] %v9354_v19  ;;  %v9360_v56 = vpop.permute.xlu0 %930  ;;  %v15014_v19 = vld [vmem:[#allocation29_spill] sm:$0xff] }
  0xfd   :  { %1108 = vrot.lane.b32.xlu1 %v8838_v38, %s8163_s19  ;;  %14985 = vst [vmem:[#allocation78_spill] sm:$0xff] %v9360_v56 }
  0xfe   :  { %1110 = vrot.lane.b32.xlu0 %v8844_v45, %s8163_s19 }
  0xff   :  { %v9364_v2 = vpop.permute.xlu1 %932 }
 0x100   :  { %14986 = vst [vmem:[#allocation79_spill] sm:$0xff] %v9364_v2  ;;  %v9370_v20 = vpop.permute.xlu0 %934  ;;  %v852_v2 = vrot.slane %v9362_v14, 1 }
 0x101   :  { %1112 = vrot.lane.b32.xlu1 %v9362_v14, %s8163_s19  ;;  %14987 = vst [vmem:[#allocation80_spill] sm:$0xff] %v9370_v20 }
 0x102   :  { %1114 = vrot.lane.b32.xlu0 %v8864_v60, %s8163_s19 }
 0x103   :  { %v9372_v26 = vpop.permute.xlu1 %936 }
 0x104   :  { %14988 = vst [vmem:[#allocation81_spill] sm:$0xff] %v9372_v26  ;;  %v9378_v31 = vpop.permute.xlu0 %954 }
 0x105   :  { %1116 = vrot.lane.b32.xlu1 %v8924_v30, %s8163_s19  ;;  %v9396_v30 = vld [vmem:[#allocation5 + $0x120] sm:$0xff] }
 0x106   :  { %1118 = vrot.lane.b32.xlu0 %v8938_v44, %s8163_s19 }
 0x107   :  { %v9380_v38 = vpop.permute.xlu1 %956 }
 0x108   :  { %v9386_v45 = vpop.permute.xlu0 %958 }
 0x109   :  { %1120 = vrot.lane.b32.xlu1 %v8947_v53, %s8163_s19 }
 0x10a   :  { %1122 = vrot.lane.b32.xlu0 %v8955_v63, %s8163_s19 }
 0x10b   :  { %v9388_v4 = vpop.permute.xlu1 %960 }
 0x10c   :  { %v9394_v60 = vpop.permute.xlu0 %962 }
 0x10d   :  { %1124 = vrot.lane.b32.xlu1 %v8963_v8, %s8163_s19 }
 0x10e   :  { %1126 = vrot.lane.b32.xlu0 %v8971_v18, %s8163_s19  ;;  %v429_v18 = vld [vmem:[#allocation4 + $0x80] sm:$0xff] }
 0x10f   :  { %v9398_v0 = vpop.permute.xlu1 %964  ;;  %v842_v13 = vrot.slane %v429_v18, 1 }
 0x110   :  { %v9404_v44 = vpop.permute.xlu0 %966 }
 0x111   :  { %1128 = vrot.lane.b32.xlu1 %v9396_v30, %s8163_s19  ;;  %14989 = vst [vmem:[#allocation82_spill] sm:$0xff] %v9404_v44  ;;  %v9439_v32 = vsel %vm517_vm2, %v842_v13, %v843_v29 }
 0x112   :  { %1146 = vrot.lane.b32.xlu0 %v8632_v43, %s8164_s20  ;;  %14997 = vst [vmem:[#allocation90_spill] sm:$0xff] %v9439_v32 }
 0x113   :  { %v9406_v53 = vpop.permute.xlu1 %968 }
 0x114   :  { %14990 = vst [vmem:[#allocation83_spill] sm:$0xff] %v9406_v53  ;;  %v9412_v63 = vpop.permute.xlu0 %970 }
 0x115   :  { %1148 = vrot.lane.b32.xlu1 %v8629_v42, %s8164_s20  ;;  %14991 = vst [vmem:[#allocation84_spill] sm:$0xff] %v9412_v63  ;;  %v1377_v42 = vld [vmem:[%s14660_s4] sm:$0xff]  ;;  %v15025_v63 = vld [vmem:[#allocation36_spill] sm:$0xff] }
 0x116   :  { %1150 = vrot.lane.b32.xlu0 %v8637_v49, %s8164_s20  ;;  %v1378_v49 = vld [vmem:[%s14660_s4 + $0x8] sm:$0xff] }
 0x117   :  { %v9414_v8 = vpop.permute.xlu1 %972  ;;  %v9436_v18 = vpack.c.bf16 %v1378_v49, %v1377_v42  ;;  %v1380_v42 = vld [vmem:[%s14660_s4 + $0x18] sm:$0xff] }
 0x118   :  { %14992 = vst [vmem:[#allocation85_spill] sm:$0xff] %v9414_v8  ;;  %v9420_v22 = vpop.permute.xlu0 %974  ;;  %v484_v8 = vld [vmem:[#allocation5 + $0x128] sm:$0x3] }
 0x119   :  { %1152 = vrot.lane.b32.xlu1 %v8642_v54, %s8164_s20  ;;  %14993 = vst [vmem:[#allocation86_spill] sm:$0xff] %v9420_v22  ;;  %14996 = vst [vmem:[#allocation89_spill] sm:$0xff] %v9436_v18  ;;  %7387 = vmatprep.subr.bf16.mxu0 %v9436_v18 }
 0x11a   :  { %1154 = vrot.lane.b32.xlu0 %v8647_v59, %s8164_s20  ;;  %7389 = vmatpush3.bf16.msra.mxu0 %v9436_v18 }
 0x11b   :  { %v9422_v43 = vpop.permute.xlu1 %976  ;;  %7478 = vmatprep.subr.bf16.mxu1 %v9436_v18 }
 0x11c   :  { %14994 = vst [vmem:[#allocation87_spill] sm:$0xff] %v9422_v43  ;;  %v9434_v54 = vpop.permute.xlu0 %978  ;;  %7481 = vmatpush3.bf16.msra.mxu1 %v9436_v18  ;;  %v15013_v43 = vld [vmem:[#allocation28_spill] sm:$0xff] }
 0x11d   :  { %1156 = vrot.lane.b32.xlu1 %v8652_v1, %s8164_s20  ;;  %14995 = vst [vmem:[#allocation88_spill] sm:$0xff] %v9434_v54  ;;  %v1379_v1 = vld [vmem:[%s14660_s4 + $0x10] sm:$0xff] }
 0x11e   :  { %1158 = vrot.lane.b32.xlu0 %v8657_v6, %s8164_s20  ;;  %v9458_v29 = vpack.c.bf16 %v1380_v42, %v1379_v1  ;;  %v9475_v1 = vld [vmem:[%s14660_s4 + $0x20] sm:$0xf] }
 0x11f   :  { %v9441_v26 = vpop.permute.xlu1 %980  ;;  %15002 = vst [vmem:[#allocation95_spill] sm:$0xff] %v9475_v1 }
 0x120   :  { %14998 = vst [vmem:[#allocation91_spill] sm:$0xff] %v9441_v26  ;;  %v9456_v49 = vpop.permute.xlu0 %982  ;;  %15000 = vst [vmem:[#allocation93_spill] sm:$0xff] %v9458_v29  ;;  %7391 = vmatprep.subr.bf16.mxu0 %v9458_v29  ;;  %7479 = vmatprep.subr.bf16.mxu1 %v9458_v29 }
 0x121   :  { %1160 = vrot.lane.b32.xlu1 %v9439_v32, %s8164_s20  ;;  %14999 = vst [vmem:[#allocation92_spill] sm:$0xff] %v9456_v49  ;;  %7393 = vmatpush3.bf16.msra.mxu0 %v9458_v29 }
 0x122   :  { %1162 = vrot.lane.b32.xlu0 %v8667_v16, %s8164_s20  ;;  %7482 = vmatpush3.bf16.msra.mxu1 %v9458_v29  ;;  %v448_v16 = vld [vmem:[#allocation4 + $0x128] sm:$0x3] }
 0x123   :  { %v9461_v13 = vpop.permute.xlu1 %984  ;;  %7230 = vmatprep.subr.msk.mxu0 %vm1438_vm5, %v9475_v1  ;;  %7480 = vmatprep.subr.msk.mxu1 %vm1438_vm5, %v9475_v1 }
 0x124   :  { %15001 = vst [vmem:[#allocation94_spill] sm:$0xff] %v9461_v13  ;;  %v9470_v32 = vpop.permute.xlu0 %1002  ;;  %v846_v13 = vrot.slane %v448_v16, 1 }
 0x125   :  { %1164 = vrot.lane.b32.xlu1 %v8676_v23, %s8164_s20  ;;  %v447_v23 = vld [vmem:[#allocation4 + $0x120] sm:$0xff]  ;;  %7231 = vmatpush3.msk.msra.mxu0 %vm1438_vm5, %v9475_v1 }
 0x126   :  { %1166 = vrot.lane.b32.xlu0 %v8706_v35, %s8164_s20  ;;  %7483 = vmatpush3.msk.msra.mxu1 %vm1438_vm5, %v9475_v1  ;;  %v845_v59 = vrot.slane %v447_v23, 1  ;;  %v15026_v1 = vld [vmem:[#allocation37_spill] sm:$0xff] }
 0x127   :  { %v9482_v42 = vpop.permute.xlu1 %1004  ;;  %7395 = vmatprep.subr.bf16.mxu1 %v9436_v18  ;;  %7403 = vmatprep.subr.bf16.mxu0 %v9436_v18 }
 0x128   :  { %v9490_v6 = vpop.permute.xlu0 %1006  ;;  %v9505_v49 = vsel %vm517_vm2, %v845_v59, %v846_v13 }
 0x129   :  { %1168 = vrot.lane.b32.xlu1 %v8735_v48, %s8164_s20  ;;  %15003 = vst [vmem:[#allocation96_spill] sm:$0xff] %v9505_v49 }
 0x12a   :  { %1170 = vrot.lane.b32.xlu0 %v8768_v62, %s8164_s20  ;;  %v466_v62 = vld [vmem:[#allocation5 + $0x88] sm:$0x3] }
 0x12b   :  { %v9496_v35 = vpop.permute.xlu1 %1008  ;;  %v853_v54 = vrot.slane %v466_v62, 1 }
 0x12c   :  { %v9502_v48 = vpop.permute.xlu0 %1010 }
 0x12d   :  { %1172 = vrot.lane.b32.xlu1 %v8799_v10, %s8164_s20  ;;  %v15006_v10 = vld [vmem:[#allocation25_spill] sm:$0xff] }
 0x12e   :  { %1174 = vrot.lane.b32.xlu0 %v8809_v17, %s8164_s20  ;;  %v15009_v17 = vld [vmem:[#allocation26_spill] sm:$0xff] }
 0x12f   :  { %v9507_v20 = vpop.permute.xlu1 %1012 }
 0x130   :  { %v9513_v16 = vpop.permute.xlu0 %1014 }
 0x131   :  { %1176 = vrot.lane.b32.xlu1 %v9505_v49, %s8164_s20  ;;  %15004 = vst [vmem:[#allocation97_spill] sm:$0xff] %v9513_v16  ;;  %v15010_v49 = vld [vmem:[#allocation27_spill] sm:$0xff]  ;;  %v15029_v16 = vld [vmem:[#allocation38_spill] sm:$0xff] }
 0x132   :  { %1194 = vrot.lane.b32.xlu0 %v8825_v28, %s8165_s16 }
 0x133   :  { %v9515_v23 = vpop.permute.xlu1 %1016 }
 0x134   :  { %15005 = vst [vmem:[#allocation98_spill] sm:$0xff] %v9515_v23  ;;  %v9521_v59 = vpop.permute.xlu0 %1018 }
 0x135   :  { %1196 = vrot.lane.b32.xlu1 %v15006_v10, %s8165_s16  ;;  %15007 = vst [vmem:[#allocation99_spill] sm:$0xff] %v9521_v59  ;;  %v856_v59 = vrot.slane %v484_v8, 1 }
 0x136   :  { %1198 = vrot.lane.b32.xlu0 %v15009_v17, %s8165_s16 }
 0x137   :  { %v9523_v13 = vpop.permute.xlu1 %1020 }
 0x138   :  { %15008 = vst [vmem:[#allocation100_spill] sm:$0xff] %v9523_v13  ;;  %v9529_v26 = vpop.permute.xlu0 %1022  ;;  %v9541_v13 = vsel %vm517_vm2, %v852_v2, %v853_v54 }
 0x139   :  { %1200 = vrot.lane.b32.xlu1 %v15010_v49, %s8165_s16  ;;  %15011 = vst [vmem:[#allocation101_spill] sm:$0xff] %v9529_v26  ;;  %15016 = vst [vmem:[#allocation104_spill] sm:$0xff] %v9541_v13  ;;  %v15018_v26 = vld [vmem:[#allocation30_spill] sm:$0xff] }
 0x13a   :  { %1202 = vrot.lane.b32.xlu0 %v15013_v43, %s8165_s16 }
 0x13b   :  { %v9532_v56 = vpop.permute.xlu1 %1024 }
 0x13c   :  { %15012 = vst [vmem:[#allocation102_spill] sm:$0xff] %v9532_v56  ;;  %v9538_v22 = vpop.permute.xlu0 %1026  ;;  %v15021_v56 = vld [vmem:[#allocation32_spill] sm:$0xff] }
 0x13d   :  { %1204 = vrot.lane.b32.xlu1 %v15014_v19, %s8165_s16  ;;  %15015 = vst [vmem:[#allocation103_spill] sm:$0xff] %v9538_v22  ;;  %v15022_v22 = vld [vmem:[#allocation33_spill] sm:$0xff] }
 0x13e   :  { %1206 = vrot.lane.b32.xlu0 %v15018_v26, %s8165_s16 }
 0x13f   :  { %v9543_v46 = vpop.permute.xlu1 %1028 }
 0x140   :  { %15017 = vst [vmem:[#allocation105_spill] sm:$0xff] %v9543_v46  ;;  %v9549_v62 = vpop.permute.xlu0 %1030  ;;  %v15023_v46 = vld [vmem:[#allocation34_spill] sm:$0xff] }
 0x141   :  { %1208 = vrot.lane.b32.xlu1 %v9541_v13, %s8165_s16  ;;  %15019 = vst [vmem:[#allocation106_spill] sm:$0xff] %v9549_v62  ;;  %v15024_v13 = vld [vmem:[#allocation35_spill] sm:$0xff] }
 0x142   :  { %1210 = vrot.lane.b32.xlu0 %v15021_v56, %s8165_s16 }
 0x143   :  { %v9551_v14 = vpop.permute.xlu1 %1032 }
 0x144   :  { %15020 = vst [vmem:[#allocation107_spill] sm:$0xff] %v9551_v14  ;;  %v9557_v54 = vpop.permute.xlu0 %1050  ;;  %v855_v14 = vrot.slane %v9396_v30, 1 }
 0x145   :  { %1212 = vrot.lane.b32.xlu1 %v15022_v22, %s8165_s16 }
 0x146   :  { %1214 = vrot.lane.b32.xlu0 %v15023_v46, %s8165_s16  ;;  %v9577_v21 = vsel %vm517_vm2, %v855_v14, %v856_v59 }
 0x147   :  { %v9559_v2 = vpop.permute.xlu1 %1052  ;;  %15027 = vst [vmem:[#allocation108_spill] sm:$0xff] %v9577_v21 }
 0x148   :  { %v9565_v62 = vpop.permute.xlu0 %1054 }
 0x149   :  { %1216 = vrot.lane.b32.xlu1 %v15024_v13, %s8165_s16 }
 0x14a   :  { %1218 = vrot.lane.b32.xlu0 %v15025_v63, %s8165_s16 }
 0x14b   :  { %v9568_v39 = vpop.permute.xlu1 %1056 }
 0x14c   :  { %v9574_v23 = vpop.permute.xlu0 %1058 }
 0x14d   :  { %1220 = vrot.lane.b32.xlu1 %v15026_v1, %s8165_s16 }
 0x14e   :  { %1222 = vrot.lane.b32.xlu0 %v15029_v16, %s8165_s16 }
 0x14f   :  { %v9579_v53 = vpop.permute.xlu1 %1060 }
 0x150   :  { %15028 = vst [vmem:[#allocation109_spill] sm:$0xff] %v9579_v53  ;;  %v9585_v30 = vpop.permute.xlu0 %1062 }
 0x151   :  { %1224 = vrot.lane.b32.xlu1 %v9577_v21, %s8165_s16  ;;  %15030 = vst [vmem:[#allocation110_spill] sm:$0xff] %v9585_v30 }
 0x152   :  { %1706 = vrot.lane.b32.xlu0 %v15032_v34, %s8158_s23 }
 0x153   :  { %v9587_v8 = vpop.permute.xlu1 %1064 }
 0x154   :  { %15031 = vst [vmem:[#allocation111_spill] sm:$0xff] %v9587_v8  ;;  %v9593_v59 = vpop.permute.xlu0 %1066 }
 0x155   :  { %1708 = vrot.lane.b32.xlu1 %v8825_v28, %s8158_s23  ;;  %15033 = vst [vmem:[#allocation23_spill] sm:$0xff] %v9593_v59 }
 0x156   :  { %1710 = vrot.lane.b32.xlu0 %v15006_v10, %s8158_s23 }
 0x157   :  { %v9595_v14 = vpop.permute.xlu1 %1068 }
 0x158   :  { %15034 = vst [vmem:[#allocation112_spill] sm:$0xff] %v9595_v14  ;;  %v9601_v21 = vpop.permute.xlu0 %1070 }
 0x159   :  { %1712 = vrot.lane.b32.xlu1 %v15009_v17, %s8158_s23  ;;  %15035 = vst [vmem:[#allocation113_spill] sm:$0xff] %v9601_v21  ;;  %v8038_v21 = vld [vmem:[#allocation4 + $0x28] sm:$0x3] }
 0x15a   :  { %1714 = vrot.lane.b32.xlu0 %v15010_v49, %s8158_s23  ;;  %v1611_v14 = vrot.slane %v8038_v21, 2  ;;  %v8041_v21 = vld [vmem:[#allocation4 + $0x40] sm:$0xff] }
 0x15b   :  { %v9603_v30 = vpop.permute.xlu1 %1072 }
 0x15c   :  { %15036 = vst [vmem:[#allocation114_spill] sm:$0xff] %v9603_v30  ;;  %v9609_v34 = vpop.permute.xlu0 %1074  ;;  %v15041_v30 = vld [vmem:[#allocation31_spill] sm:$0xff] }
 0x15d   :  { %1716 = vrot.lane.b32.xlu1 %v15013_v43, %s8158_s23  ;;  %15037 = vst [vmem:[#allocation115_spill] sm:$0xff] %v9609_v34 }
 0x15e   :  { %1718 = vrot.lane.b32.xlu0 %v15014_v19, %s8158_s23 }
 0x15f   :  { %v9611_v28 = vpop.permute.xlu1 %1076 }
 0x160   :  { %15038 = vst [vmem:[#allocation116_spill] sm:$0xff] %v9611_v28  ;;  %v9617_v17 = vpop.permute.xlu0 %1078 }
 0x161   :  { %1720 = vrot.lane.b32.xlu1 %v15018_v26, %s8158_s23  ;;  %15039 = vst [vmem:[#allocation117_spill] sm:$0xff] %v9617_v17  ;;  %v8036_v17 = vld [vmem:[#allocation4 + $0x18] sm:$0x3] }
 0x162   :  { %1722 = vrot.lane.b32.xlu0 %v15041_v30, %s8158_s23  ;;  %v1608_v28 = vrot.slane %v8036_v17, 2  ;;  %v8040_v17 = vld [vmem:[#allocation4 + $0x38] sm:$0x3] }
 0x163   :  { %v9619_v10 = vpop.permute.xlu1 %1080  ;;  %v1614_v8 = vrot.slane %v8040_v17, 2 }
 0x164   :  { %15040 = vst [vmem:[#allocation118_spill] sm:$0xff] %v9619_v10  ;;  %v9625_v43 = vpop.permute.xlu0 %1098 }
 0x165   :  { %1724 = vrot.lane.b32.xlu1 %v15021_v56, %s8158_s23  ;;  %v8035_v56 = vld [vmem:[#allocation4 + $0x10] sm:$0xff] }
 0x166   :  { %1726 = vrot.lane.b32.xlu0 %v15022_v22, %s8158_s23  ;;  %v1607_v10 = vrot.slane %v8035_v56, 2  ;;  %v8039_v56 = vld [vmem:[#allocation4 + $0x30] sm:$0xff] }
 0x167   :  { %v9627_v49 = vpop.permute.xlu1 %1100  ;;  %v1613_v59 = vrot.slane %v8039_v56, 2  ;;  %v8043_v56 = vld [vmem:[#allocation4 + $0x50] sm:$0xff] }
 0x168   :  { %v9633_v26 = vpop.permute.xlu0 %1102  ;;  %v1619_v17 = vrot.slane %v8043_v56, 2 }
 0x169   :  { %1728 = vrot.lane.b32.xlu1 %v15023_v46, %s8158_s23  ;;  %v8037_v46 = vld [vmem:[#allocation4 + $0x20] sm:$0xff] }
 0x16a   :  { %1730 = vrot.lane.b32.xlu0 %v15024_v13, %s8158_s23  ;;  %v1610_v34 = vrot.slane %v8037_v46, 2 }
 0x16b   :  { %v9635_v19 = vpop.permute.xlu1 %1104 }
 0x16c   :  { %v9641_v30 = vpop.permute.xlu0 %1106  ;;  %v9659_v46 = vsel %vm1603_vm4, %v1610_v34, %v1611_v14 }
 0x16d   :  { %1732 = vrot.lane.b32.xlu1 %v15025_v63, %s8158_s23  ;;  %v9652_v63 = vsel %vm1603_vm4, %v1607_v10, %v1608_v28  ;;  %15046 = vst [vmem:[#allocation122_spill] sm:$0xff] %v9659_v46  ;;  %v9666_v28 = vsel %vm1603_vm4, %v1613_v59, %v1614_v8 }
 0x16e   :  { %1734 = vrot.lane.b32.xlu0 %v15026_v1, %s8158_s23  ;;  %15044 = vst [vmem:[#allocation120_spill] sm:$0xff] %v9652_v63  ;;  %v1616_v1 = vrot.slane %v8041_v21, 2  ;;  %15048 = vst [vmem:[#allocation124_spill] sm:$0xff] %v9666_v28  ;;  %v8046_v21 = vld [vmem:[#allocation4 + $0x68] sm:$0x3] }
 0x16f   :  { %v9643_v22 = vpop.permute.xlu1 %1108 }
 0x170   :  { %15042 = vst [vmem:[#allocation31_spill] sm:$0xff] %v9643_v22  ;;  %v9649_v13 = vpop.permute.xlu0 %1110 }
 0x171   :  { %1736 = vrot.lane.b32.xlu1 %v15029_v16, %s8158_s23  ;;  %15043 = vst [vmem:[#allocation119_spill] sm:$0xff] %v9649_v13  ;;  %v8042_v16 = vld [vmem:[#allocation4 + $0x48] sm:$0x3] }
 0x172   :  { %1754 = vrot.lane.b32.xlu0 %v9340_v55, %s8159_s1  ;;  %v1617_v53 = vrot.slane %v8042_v16, 2  ;;  %v8045_v16 = vld [vmem:[#allocation4 + $0x60] sm:$0xff] }
 0x173   :  { %v9654_v22 = vpop.permute.xlu1 %1112  ;;  %v1622_v34 = vrot.slane %v8045_v16, 2 }
 0x174   :  { %15045 = vst [vmem:[#allocation121_spill] sm:$0xff] %v9654_v22  ;;  %v9663_v10 = vpop.permute.xlu0 %1114  ;;  %v8044_v22 = vld [vmem:[#allocation4 + $0x58] sm:$0x3]  ;;  %v9673_v14 = vsel %vm1603_vm4, %v1616_v1, %v1617_v53  ;;  %v8049_v1 = vld [vmem:[#allocation4 + $0xa0] sm:$0xff] }
 0x175   :  { %1756 = vrot.lane.b32.xlu1 %v9652_v63, %s8159_s1  ;;  %15047 = vst [vmem:[#allocation123_spill] sm:$0xff] %v9663_v10  ;;  %v1620_v13 = vrot.slane %v8044_v22, 2  ;;  %15050 = vst [vmem:[#allocation126_spill] sm:$0xff] %v9673_v14  ;;  %v1623_v63 = vrot.slane %v8046_v21, 2  ;;  %v8047_v22 = vld [vmem:[#allocation4 + $0x70] sm:$0xff]  ;;  %v1628_v16 = vrot.slane %v8049_v1, 2 }
 0x176   :  { %1758 = vrot.lane.b32.xlu0 %v9659_v46, %s8159_s1  ;;  %v1625_v56 = vrot.slane %v8047_v22, 2  ;;  %v8050_v21 = vld [vmem:[#allocation4 + $0xa8] sm:$0x3] }
 0x177   :  { %v9668_v55 = vpop.permute.xlu1 %1116  ;;  %v9680_v59 = vsel %vm1603_vm4, %v1619_v17, %v1620_v13  ;;  %v9687_v53 = vsel %vm1603_vm4, %v1622_v34, %v1623_v63  ;;  %v8053_v34 = vld [vmem:[#allocation4 + $0xc0] sm:$0xff] }
 0x178   :  { %15049 = vst [vmem:[#allocation125_spill] sm:$0xff] %v9668_v55  ;;  %v9677_v8 = vpop.permute.xlu0 %1118  ;;  %15052 = vst [vmem:[#allocation128_spill] sm:$0xff] %v9680_v59  ;;  %v8048_v55 = vld [vmem:[#allocation4 + $0x78] sm:$0x3]  ;;  %v1634_v1 = vrot.slane %v8053_v34, 2 }
 0x179   :  { %1760 = vrot.lane.b32.xlu1 %v9666_v28, %s8159_s1  ;;  %15051 = vst [vmem:[#allocation127_spill] sm:$0xff] %v9677_v8  ;;  %v1626_v10 = vrot.slane %v8048_v55, 2  ;;  %15054 = vst [vmem:[#allocation130_spill] sm:$0xff] %v9687_v53  ;;  %v1629_v28 = vrot.slane %v8050_v21, 2  ;;  %v8051_v55 = vld [vmem:[#allocation4 + $0xb0] sm:$0xff] }
 0x17a   :  { %1762 = vrot.lane.b32.xlu0 %v9673_v14, %s8159_s1  ;;  %v1631_v22 = vrot.slane %v8051_v55, 2  ;;  %v8054_v21 = vld [vmem:[#allocation4 + $0xc8] sm:$0x3] }
 0x17b   :  { %v9682_v46 = vpop.permute.xlu1 %1120  ;;  %v9694_v17 = vsel %vm1603_vm4, %v1625_v56, %v1626_v10  ;;  %v1630_v63 = vsel %vm1603_vm4, %v1628_v16, %v1629_v28  ;;  %v8057_v16 = vld [vmem:[#allocation4 + $0xe0] sm:$0xff] }
 0x17c   :  { %15053 = vst [vmem:[#allocation129_spill] sm:$0xff] %v9682_v46  ;;  %v9691_v13 = vpop.permute.xlu0 %1122  ;;  %15056 = vst [vmem:[#allocation132_spill] sm:$0xff] %v9694_v17  ;;  %v8052_v46 = vld [vmem:[#allocation4 + $0xb8] sm:$0x3]  ;;  %v1640_v34 = vrot.slane %v8057_v16, 2 }
 0x17d   :  { %1764 = vrot.lane.b32.xlu1 %v9680_v59, %s8159_s1  ;;  %15055 = vst [vmem:[#allocation131_spill] sm:$0xff] %v9691_v13  ;;  %v1632_v8 = vrot.slane %v8052_v46, 2  ;;  %v1635_v59 = vrot.slane %v8054_v21, 2  ;;  %v8055_v46 = vld [vmem:[#allocation4 + $0xd0] sm:$0xff]  ;;  %v8058_v21 = vld [vmem:[#allocation4 + $0xe8] sm:$0x3] }
 0x17e   :  { %1766 = vrot.lane.b32.xlu0 %v9687_v53, %s8159_s1  ;;  %v1637_v55 = vrot.slane %v8055_v46, 2  ;;  %v8060_v53 = vld [vmem:[#allocation4 + $0xf8] sm:$0x3] }
 0x17f   :  { %v9696_v14 = vpop.permute.xlu1 %1124  ;;  %v9706_v56 = vsel %vm1603_vm4, %v1631_v22, %v1632_v8  ;;  %v9712_v28 = vsel %vm1603_vm4, %v1634_v1, %v1635_v59  ;;  %v8061_v1 = vld [vmem:[#allocation4 + $0x100] sm:$0xff] }
 0x180   :  { %15057 = vst [vmem:[#allocation133_spill] sm:$0xff] %v9696_v14  ;;  %v9703_v10 = vpop.permute.xlu0 %1126  ;;  %15059 = vst [vmem:[#allocation135_spill] sm:$0xff] %v9706_v56  ;;  %v8056_v14 = vld [vmem:[#allocation4 + $0xd8] sm:$0x3]  ;;  %v1646_v16 = vrot.slane %v8061_v1, 2  ;;  %v15069_v1 = vld [vmem:[#allocation39_spill] sm:$0xff] }
 0x181   :  { %1768 = vrot.lane.b32.xlu1 %v9694_v17, %s8159_s1  ;;  %15058 = vst [vmem:[#allocation134_spill] sm:$0xff] %v9703_v10  ;;  %v1638_v13 = vrot.slane %v8056_v14, 2  ;;  %15061 = vst [vmem:[#allocation137_spill] sm:$0xff] %v9712_v28  ;;  %v1641_v17 = vrot.slane %v8058_v21, 2  ;;  %v8059_v14 = vld [vmem:[#allocation4 + $0xf0] sm:$0xff] }
 0x182   :  { %1770 = vrot.lane.b32.xlu0 %v1630_v63, %s8159_s1  ;;  %v1643_v46 = vrot.slane %v8059_v14, 2  ;;  %v8062_v21 = vld [vmem:[#allocation4 + $0x108] sm:$0x3]  ;;  %v8064_v10 = vld [vmem:[#allocation4 + $0x118] sm:$0x3] }
 0x183   :  { %v9708_v44 = vpop.permute.xlu1 %1128  ;;  %v9719_v22 = vsel %vm1603_vm4, %v1637_v55, %v1638_v13  ;;  %v9726_v59 = vsel %vm1603_vm4, %v1640_v34, %v1641_v17  ;;  %v1650_v29 = vrot.slane %v8064_v10, 2 }
 0x184   :  { %15060 = vst [vmem:[#allocation136_spill] sm:$0xff] %v9708_v44  ;;  %v9716_v8 = vpop.permute.xlu0 %1146  ;;  %15062 = vst [vmem:[#allocation138_spill] sm:$0xff] %v9719_v22  ;;  %v1644_v44 = vrot.slane %v8060_v53, 2  ;;  %v8063_v53 = vld [vmem:[#allocation4 + $0x110] sm:$0xff] }
 0x185   :  { %1772 = vrot.lane.b32.xlu1 %v9706_v56, %s8159_s1  ;;  %15063 = vst [vmem:[#allocation139_spill] sm:$0xff] %v9726_v59  ;;  %v1647_v56 = vrot.slane %v8062_v21, 2  ;;  %v1649_v14 = vrot.slane %v8063_v53, 2  ;;  %v15073_v53 = vld [vmem:[#allocation41_spill] sm:$0xff] }
 0x186   :  { %1774 = vrot.lane.b32.xlu0 %v9712_v28, %s8159_s1  ;;  %v9733_v55 = vsel %vm1603_vm4, %v1643_v46, %v1644_v44 }
 0x187   :  { %v9721_v63 = vpop.permute.xlu1 %1148  ;;  %15064 = vst [vmem:[#allocation140_spill] sm:$0xff] %v9733_v55  ;;  %v9740_v17 = vsel %vm1603_vm4, %v1646_v16, %v1647_v56  ;;  %v9747_v44 = vsel %vm1603_vm4, %v1649_v14, %v1650_v29  ;;  %v15070_v16 = vld [vmem:[#allocation40_spill] sm:$0xff]  ;;  %v15074_v14 = vld [vmem:[#allocation42_spill] sm:$0xff] }
 0x188   :  { %v9730_v13 = vpop.permute.xlu0 %1150  ;;  %15065 = vst [vmem:[#allocation141_spill] sm:$0xff] %v9740_v17  ;;  %15066 = vst [vmem:[#allocation142_spill] sm:$0xff] %v9747_v44 }
 0x189   :  { %1776 = vrot.lane.b32.xlu1 %v9719_v22, %s8159_s1 }
 0x18a   :  { %1778 = vrot.lane.b32.xlu0 %v9726_v59, %s8159_s1  ;;  %v8065_v59 = vld [vmem:[#allocation5] sm:$0xff] }
 0x18b   :  { %v9735_v28 = vpop.permute.xlu1 %1152 }
 0x18c   :  { %v9744_v34 = vpop.permute.xlu0 %1154 }
 0x18d   :  { %1780 = vrot.lane.b32.xlu1 %v9733_v55, %s8159_s1  ;;  %v15077_v55 = vld [vmem:[#allocation43_spill] sm:$0xff] }
 0x18e   :  { %1782 = vrot.lane.b32.xlu0 %v9740_v17, %s8159_s1 }
 0x18f   :  { %v9749_v46 = vpop.permute.xlu1 %1156 }
 0x190   :  { %v9755_v10 = vpop.permute.xlu0 %1158 }
 0x191   :  { %1784 = vrot.lane.b32.xlu1 %v9747_v44, %s8159_s1  ;;  %15067 = vst [vmem:[#allocation143_spill] sm:$0xff] %v9755_v10  ;;  %v8072_v10 = vld [vmem:[#allocation5 + $0x70] sm:$0xff] }
 0x192   :  { %1802 = vrot.lane.b32.xlu0 %v15069_v1, %s8160_s30 }
 0x193   :  { %v9757_v56 = vpop.permute.xlu1 %1160 }
 0x194   :  { %15068 = vst [vmem:[#allocation144_spill] sm:$0xff] %v9757_v56  ;;  %v9763_v29 = vpop.permute.xlu0 %1162 }
 0x195   :  { %1804 = vrot.lane.b32.xlu1 %v15070_v16, %s8160_s30  ;;  %15071 = vst [vmem:[#allocation145_spill] sm:$0xff] %v9763_v29  ;;  %v15078_v16 = vld [vmem:[#allocation44_spill] sm:$0xff]  ;;  %v8068_v29 = vld [vmem:[#allocation5 + $0x30] sm:$0xff] }
 0x196   :  { %1806 = vrot.lane.b32.xlu0 %v15073_v53, %s8160_s30  ;;  %v15080_v53 = vld [vmem:[#allocation50_spill] sm:$0xff] }
 0x197   :  { %v9765_v21 = vpop.permute.xlu1 %1164  ;;  %v1242_v22 = vsel %vm47_vm0, %v8065_v59, %v15080_v53  ;;  %v8070_v53 = vld [vmem:[#allocation5 + $0x50] sm:$0xff] }
 0x198   :  { %15072 = vst [vmem:[#allocation146_spill] sm:$0xff] %v9765_v21  ;;  %v9771_v44 = vpop.permute.xlu0 %1166  ;;  %v9788_v21 = vld [vmem:[#allocation5 + $0x10] sm:$0xff]  ;;  %v9799_v56 = vsel %vm47_vm0, %v8070_v53, %v9201_v11  ;;  %v8075_v53 = vld [vmem:[#allocation5 + $0xc0] sm:$0xff] }
 0x199   :  { %1808 = vrot.lane.b32.xlu1 %v15074_v14, %s8160_s30  ;;  %15075 = vst [vmem:[#allocation147_spill] sm:$0xff] %v9771_v44  ;;  %v9783_v14 = vld [vmem:[#allocation5 + $0x20] sm:$0xff]  ;;  %v15082_v44 = vld [vmem:[#allocation52_spill] sm:$0xff] }
 0x19a   :  { %1810 = vrot.lane.b32.xlu0 %v15077_v55, %s8160_s30  ;;  %15081 = vst [vmem:[#allocation50_spill] sm:$0xff] %v9783_v14  ;;  %15083 = vst [vmem:[#allocation52_spill] sm:$0xff] %v9788_v21  ;;  %v1243_v55 = vsel %vm47_vm0, %v9788_v21, %v9180_v25  ;;  %v9807_v25 = vsel %vm47_vm0, %v8072_v10, %v9217_v24  ;;  %v9823_v24 = vsel %vm47_vm0, %v8075_v53, %v9243_v5  ;;  %v15085_v5 = vld [vmem:[#allocation46_spill] sm:$0xff]  ;;  %v8079_v53 = vld [vmem:[#allocation5 + $0x100] sm:$0xff] }
 0x19b   :  { %v9773_v17 = vpop.permute.xlu1 %1168  ;;  %v1259_v10 = vsel %vm1258_vm6, %v1242_v22, %v9291_v27  ;;  %v8078_v27 = vld [vmem:[#allocation5 + $0xf0] sm:$0xff] }
 0x19c   :  { %15076 = vst [vmem:[#allocation148_spill] sm:$0xff] %v9773_v17  ;;  %v9779_v1 = vpop.permute.xlu0 %1170  ;;  %v1244_v17 = vsel %vm47_vm0, %v9783_v14, %v15082_v44  ;;  %v8071_v44 = vld [vmem:[#allocation5 + $0x60] sm:$0xff]  ;;  %v9843_v22 = vsel %vm47_vm0, %v8078_v27, %v9265_v40 }
 0x19d   :  { %1812 = vrot.lane.b32.xlu1 %v15078_v16, %s8160_s30  ;;  %15079 = vst [vmem:[#allocation149_spill] sm:$0xff] %v9779_v1  ;;  %v1245_v16 = vsel %vm47_vm0, %v8068_v29, %v9185_v37  ;;  %v8069_v1 = vld [vmem:[#allocation5 + $0x40] sm:$0xff]  ;;  %v9803_v14 = vsel %vm47_vm0, %v8071_v44, %v9211_v52  ;;  %v15084_v29 = vld [vmem:[#allocation45_spill] sm:$0xff] }
 0x19e   :  { %v1246_v59 = vsel %vm47_vm0, %v8069_v1, %v9195_v57  ;;  %1814 = vrot.lane.b32.xlu0 %v15084_v29, %s8160_s30  ;;  %v8073_v57 = vld [vmem:[#allocation5 + $0xa0] sm:$0xff]  ;;  %v8074_v1 = vld [vmem:[#allocation5 + $0xb0] sm:$0xff] }
 0x19f   :  { %v9809_v37 = vpop.permute.xlu1 %1172  ;;  %v9815_v11 = vsel %vm47_vm0, %v8073_v57, %v9227_v61  ;;  %v9819_v52 = vsel %vm47_vm0, %v8074_v1, %v9233_v50  ;;  %v8076_v44 = vld [vmem:[#allocation5 + $0xd0] sm:$0xff]  ;;  %v8077_v61 = vld [vmem:[#allocation5 + $0xe0] sm:$0xff]  ;;  %v1276_v50 = vsel %vm1275_vm7, %v1259_v10, %v9378_v31  ;;  %v9851_v31 = vsel %vm47_vm0, %v8079_v53, %v9275_v15 }
 0x1a0   :  { %v9829_v21 = vsel %vm47_vm0, %v8076_v44, %v9249_v12  ;;  %v9833_v57 = vsel %vm47_vm0, %v8077_v61, %v9259_v9  ;;  %v9839_v1 = vpop.permute.xlu0 %1174  ;;  %v1260_v12 = vsel %vm1258_vm6, %v1243_v55, %v9297_v47  ;;  %v1293_v9 = vsel %vm1292_vm3, %v1276_v50, %v9470_v32  ;;  %v15086_v61 = vld [vmem:[#allocation47_spill] sm:$0xff] }
 0x1a1   :  { %1816 = vrot.lane.b32.xlu1 %v15085_v5, %s8160_s30  ;;  %v1277_v10 = vsel %vm1275_vm7, %v1260_v12, %v9380_v38  ;;  %v1310_v44 = vsel %vm1309_vm8, %v1293_v9, %v9557_v54  ;;  %v1261_v47 = vsel %vm1258_vm6, %v1244_v17, %v9307_v58  ;;  %v8080_v38 = vld [vmem:[#allocation5 + $0x110] sm:$0xff]  ;;  %v15088_v53 = vld [vmem:[#allocation51_spill] sm:$0xff] }
 0x1a2   :  { %1818 = vrot.lane.b32.xlu0 %v15086_v61, %s8160_s30  ;;  %v1294_v32 = vsel %vm1292_vm3, %v1277_v10, %v9482_v42  ;;  %v1327_v15 = vsel %vm1326_vm9, %v1310_v44, %v9625_v43  ;;  %v9869_v54 = vsel %vm47_vm0, %v8080_v38, %v9281_v36  ;;  %v1278_v55 = vsel %vm1275_vm7, %v1261_v47, %v9386_v45  ;;  %v15087_v42 = vld [vmem:[#allocation48_spill] sm:$0xff]  ;;  %v15090_v44 = vld [vmem:[#allocation93_spill] sm:$0xff] }
 0x1a3   :  { %v9857_v40 = vpop.permute.xlu1 %1176  ;;  %v1311_v50 = vsel %vm1309_vm8, %v1294_v32, %v9559_v2  ;;  %v1344_v58 = vsel %vm1343_vm10, %v1327_v15, %v9716_v8  ;;  %v1262_v43 = vsel %vm1258_vm6, %v1245_v16, %v9313_v7  ;;  %v1295_v36 = vsel %vm1292_vm3, %v1278_v55, %v9490_v6  ;;  %v15092_v32 = vld [vmem:[#allocation109_spill] sm:$0xff] }
 0x1a4   :  { %v1195_v17 = vpop.permute.xlu0 %1194  ;;  %v1328_v27 = vsel %vm1326_vm9, %v1311_v50, %v9627_v49  ;;  %v1279_v2 = vsel %vm1275_vm7, %v1262_v43, %v9388_v4  ;;  %v1312_v8 = vsel %vm1309_vm8, %v1295_v36, %v9565_v62  ;;  %v1263_v6 = vsel %vm1258_vm6, %v1246_v59, %v9322_v3  ;;  %v15095_v55 = vld [vmem:[#allocation97_spill] sm:$0xff] }
 0x1a5   :  { %1820 = vrot.lane.b32.xlu1 %v15087_v42, %s8160_s30  ;;  %v1361_v45 = vsel %vm1360_vm11, %v1344_v58, %v1195_v17  ;;  %v1345_v12 = vsel %vm1343_vm10, %v1328_v27, %v9721_v63  ;;  %v1296_v7 = vsel %vm1292_vm3, %v1279_v2, %v9496_v35  ;;  %v1329_v4 = vsel %vm1326_vm9, %v1312_v8, %v9633_v26  ;;  %v15096_v58 = vld [vmem:[#allocation31_spill] sm:$0xff]  ;;  %v15098_v27 = vld [vmem:[#allocation110_spill] sm:$0xff] }
 0x1a6   :  { %1822 = vrot.lane.b32.xlu0 %v9162_v41, %s8160_s30  ;;  %7232 = vmatprep.mubr.msk.f32.mxu0 %vm1389_vm12, %v1361_v45  ;;  %v1280_v62 = vsel %vm1275_vm7, %v1263_v6, %v9394_v60  ;;  %v1313_v63 = vsel %vm1309_vm8, %v1296_v7, %v9568_v39  ;;  %v1346_v16 = vsel %vm1343_vm10, %v1329_v4, %v9730_v13  ;;  %v15099_v8 = vld [vmem:[#allocation55_spill] sm:$0xff]  ;;  %v15101_v6 = vld [vmem:[#allocation98_spill] sm:$0xff] }
 0x1a7   :  { %v1197_v9 = vpop.permute.xlu1 %1196  ;;  %v1264_v3 = vsel %vm1258_vm6, %v9799_v56, %v9327_v33  ;;  %v1297_v26 = vsel %vm1292_vm3, %v1280_v62, %v9502_v48  ;;  %v1330_v60 = vsel %vm1326_vm9, %v1313_v63, %v9635_v19  ;;  %v15089_v56 = vld [vmem:[#allocation53_spill] sm:$0xff]  ;;  %v1265_v48 = vsel %vm1258_vm6, %v9803_v14, %v9333_v51  ;;  %v15093_v51 = vld [vmem:[#allocation54_spill] sm:$0xff]  ;;  %v15102_v4 = vld [vmem:[#allocation119_spill] sm:$0xff] }
 0x1a8   :  { %v1362_v49 = vsel %vm1360_vm11, %v1345_v12, %v1197_v9  ;;  %v1199_v35 = vpop.permute.xlu0 %1198  ;;  %v1281_v13 = vsel %vm1275_vm7, %v1264_v3, %v9398_v0  ;;  %v1314_v59 = vsel %vm1309_vm8, %v1297_v26, %v9574_v23  ;;  %v1347_v10 = vsel %vm1343_vm10, %v1330_v60, %v9735_v28  ;;  %v15091_v28 = vld [vmem:[#allocation82_spill] sm:$0xff]  ;;  %v15103_v63 = vld [vmem:[#allocation95_spill] sm:$0xff]  ;;  %v15107_v60 = vld [vmem:[#allocation56_spill] sm:$0xff] }
 0x1a9   :  { %1824 = vrot.lane.b32.xlu1 %v15088_v53, %s8160_s30  ;;  %7233 = vmatmul.mubr.msk.f32.vlgmr.msra.gmra.mrb[0].mxu0 %vm1389_vm12, %v1362_v49  ;;  %v1363_v39 = vsel %vm1360_vm11, %v1346_v16, %v1199_v35  ;;  %v1298_v19 = vsel %vm1292_vm3, %v1281_v13, %v9507_v20  ;;  %v1331_v0 = vsel %vm1326_vm9, %v1314_v59, %v9641_v30  ;;  %v15094_v30 = vld [vmem:[#allocation73_spill] sm:$0xff]  ;;  %v15100_v12 = vld [vmem:[#allocation74_spill] sm:$0xff]  ;;  %v15105_v35 = vld [vmem:[#allocation111_spill] sm:$0xff] }
 0x1aa   :  { %7405 = vmatpush3.bf16.msra.mxu0 %v9436_v18  ;;  %1826 = vrot.lane.b32.xlu0 %v15089_v56, %s8160_s30  ;;  %v1282_v47 = vsel %vm1275_vm7, %v1265_v48, %v15091_v28  ;;  %v1315_v15 = vsel %vm1309_vm8, %v1298_v19, %v15092_v32  ;;  %v1348_v38 = vsel %vm1343_vm10, %v1331_v0, %v9744_v34  ;;  %v15097_v34 = vld [vmem:[#allocation83_spill] sm:$0xff]  ;;  %v15110_v48 = vld [vmem:[#allocation121_spill] sm:$0xff] }
 0x1ab   :  { %v1201_v33 = vpop.permute.xlu1 %1200  ;;  %7235 = vmatprep.mubr.msk.f32.mxu0 %vm1389_vm12, %v1363_v39  ;;  %7407 = vmatprep.subr.bf16.mxu0 %v15090_v44  ;;  %v1266_v14 = vsel %vm1258_vm6, %v9807_v25, %v15094_v30  ;;  %v1299_v50 = vsel %vm1292_vm3, %v1282_v47, %v15095_v55  ;;  %v1332_v17 = vsel %vm1326_vm9, %v1315_v15, %v15096_v58  ;;  %v15106_v26 = vld [vmem:[#allocation143_spill] sm:$0xff]  ;;  %v15113_v15 = vld [vmem:[#allocation144_spill] sm:$0xff] }
 0x1ac   :  { %v1364_v23 = vsel %vm1360_vm11, %v1347_v10, %v1201_v33  ;;  %v1203_v20 = vpop.permute.xlu0 %1202  ;;  %v1283_v36 = vsel %vm1275_vm7, %v1266_v14, %v15097_v34  ;;  %v1316_v45 = vsel %vm1309_vm8, %v1299_v50, %v15098_v27  ;;  %v1349_v2 = vsel %vm1343_vm10, %v1332_v17, %v9749_v46  ;;  %v15104_v46 = vld [vmem:[#allocation84_spill] sm:$0xff]  ;;  %v15108_v13 = vld [vmem:[#allocation75_spill] sm:$0xff]  ;;  %v15118_v34 = vld [vmem:[#allocation86_spill] sm:$0xff] }
 0x1ad   :  { %1828 = vrot.lane.b32.xlu1 %v15093_v51, %s8160_s30  ;;  %7236 = vmatmul.mubr.msk.f32.gmra.mrb[2].mxu0 %vm1389_vm12, %v1364_v23  ;;  %v1365_v43 = vsel %vm1360_vm11, %v1348_v38, %v1203_v20  ;;  %v1267_v9 = vsel %vm1258_vm6, %v9815_v11, %v15100_v12  ;;  %v1300_v7 = vsel %vm1292_vm3, %v1283_v36, %v15101_v6  ;;  %v15109_v10 = vld [vmem:[#allocation99_spill] sm:$0xff]  ;;  %v15111_v23 = vld [vmem:[#allocation85_spill] sm:$0xff]  ;;  %v15115_v30 = vld [vmem:[#allocation76_spill] sm:$0xff] }
 0x1ae   :  { %7409 = vmatpush3.bf16.msra.mxu0 %v15090_v44  ;;  %1830 = vrot.lane.b32.xlu0 %v15099_v8, %s8160_s30  ;;  %v1333_v49 = vsel %vm1326_vm9, %v1316_v45, %v15102_v4  ;;  %v1284_v16 = vsel %vm1275_vm7, %v1267_v9, %v15104_v46  ;;  %v1317_v3 = vsel %vm1309_vm8, %v1300_v7, %v15105_v35  ;;  %v15112_v47 = vld [vmem:[#allocation23_spill] sm:$0xff]  ;;  %v15114_v20 = vld [vmem:[#allocation57_spill] sm:$0xff]  ;;  %v15116_v55 = vld [vmem:[#allocation100_spill] sm:$0xff] }
 0x1af   :  { %v1205_v25 = vpop.permute.xlu1 %1204  ;;  %7238 = vmatprep.mubr.msk.f32.mxu0 %vm1389_vm12, %v1365_v43  ;;  %7298 = vmatprep.subr.msk.mxu0 %vm1438_vm5, %v15103_v63  ;;  %v1350_v11 = vsel %vm1343_vm10, %v1333_v49, %v15106_v26  ;;  %v1268_v59 = vsel %vm1258_vm6, %v9819_v52, %v15108_v13  ;;  %v1301_v33 = vsel %vm1292_vm3, %v1284_v16, %v15109_v10  ;;  %v15117_v58 = vld [vmem:[#allocation123_spill] sm:$0xff]  ;;  %v15119_v27 = vld [vmem:[#allocation112_spill] sm:$0xff]  ;;  %v15121_v12 = vld [vmem:[#allocation58_spill] sm:$0xff] }
 0x1b0   :  { %v1366_v62 = vsel %vm1360_vm11, %v1349_v2, %v1205_v25  ;;  %v1207_v39 = vpop.permute.xlu0 %1206  ;;  %v1334_v19 = vsel %vm1326_vm9, %v1317_v3, %v15110_v48  ;;  %v1285_v28 = vsel %vm1275_vm7, %v1268_v59, %v15111_v23  ;;  %v1318_v32 = vsel %vm1309_vm8, %v1301_v33, %v15112_v47  ;;  %v15120_v2 = vld [vmem:[#allocation145_spill] sm:$0xff]  ;;  %v15125_v16 = vld [vmem:[#allocation87_spill] sm:$0xff]  ;;  %v15129_v59 = vld [vmem:[#allocation78_spill] sm:$0xff] }
 0x1b1   :  { %1832 = vrot.lane.b32.xlu1 %v15107_v60, %s8160_s30  ;;  %7239 = vmatmul.mubr.msk.f32.gmra.mrb[4].mxu0 %vm1389_vm12, %v1366_v62  ;;  %v1367_v0 = vsel %vm1360_vm11, %v1350_v11, %v1207_v39  ;;  %v1351_v52 = vsel %vm1343_vm10, %v1334_v19, %v15113_v15  ;;  %v1269_v14 = vsel %vm1258_vm6, %v9823_v24, %v15115_v30  ;;  %v15122_v9 = vld [vmem:[#allocation77_spill] sm:$0xff]  ;;  %v15127_v11 = vld [vmem:[#allocation146_spill] sm:$0xff]  ;;  %v15131_v19 = vld [vmem:[#allocation127_spill] sm:$0xff] }
 0x1b2   :  { %7299 = vmatpush3.msk.msra.mxu0 %vm1438_vm5, %v15103_v63  ;;  %1850 = vrot.lane.b32.xlu0 %v15114_v20, %s8161_s2  ;;  %v1302_v50 = vsel %vm1292_vm3, %v1285_v28, %v15116_v55  ;;  %v1335_v17 = vsel %vm1326_vm9, %v1318_v32, %v15117_v58  ;;  %v1286_v36 = vsel %vm1275_vm7, %v1269_v14, %v15118_v34  ;;  %v15123_v7 = vld [vmem:[#allocation101_spill] sm:$0xff]  ;;  %v15130_v33 = vld [vmem:[#allocation102_spill] sm:$0xff]  ;;  %v15132_v28 = vld [vmem:[#allocation88_spill] sm:$0xff] }
 0x1b3   :  { %v1209_v38 = vpop.permute.xlu1 %1208  ;;  %7241 = vmatprep.mubr.msk.f32.mxu0 %vm1389_vm12, %v1367_v0  ;;  %v1319_v45 = vsel %vm1309_vm8, %v1302_v50, %v15119_v27  ;;  %v1352_v25 = vsel %vm1343_vm10, %v1335_v17, %v15120_v2  ;;  %v1270_v6 = vsel %vm1258_vm6, %v9829_v21, %v15122_v9  ;;  %v1303_v4 = vsel %vm1292_vm3, %v1286_v36, %v15123_v7  ;;  %v15124_v49 = vld [vmem:[#allocation125_spill] sm:$0xff]  ;;  %v15128_v21 = vld [vmem:[#allocation59_spill] sm:$0xff]  ;;  %v15133_v32 = vld [vmem:[#allocation114_spill] sm:$0xff] }
 0x1b4   :  { %v1368_v43 = vsel %vm1360_vm11, %v1351_v52, %v1209_v38  ;;  %v1211_v24 = vpop.permute.xlu0 %1210  ;;  %v1336_v62 = vsel %vm1326_vm9, %v1319_v45, %v15124_v49  ;;  %v1287_v35 = vsel %vm1275_vm7, %v1270_v6, %v15125_v16  ;;  %v15126_v3 = vld [vmem:[#allocation113_spill] sm:$0xff]  ;;  %v1271_v10 = vsel %vm1258_vm6, %v9833_v57, %v15129_v59  ;;  %v15134_v52 = vld [vmem:[#allocation147_spill] sm:$0xff]  ;;  %v15135_v30 = vld [vmem:[#allocation60_spill] sm:$0xff] }
 0x1b5   :  { %1852 = vrot.lane.b32.xlu1 %v15121_v12, %s8161_s2  ;;  %7242 = vmatmul.mubr.msk.f32.gmra.mrb[6].mxu0 %vm1389_vm12, %v1368_v43  ;;  %v1369_v46 = vsel %vm1360_vm11, %v1352_v25, %v1211_v24  ;;  %v1320_v26 = vsel %vm1309_vm8, %v1303_v4, %v15126_v3  ;;  %v1353_v39 = vsel %vm1343_vm10, %v1336_v62, %v15127_v11  ;;  %v15136_v14 = vld [vmem:[#allocation79_spill] sm:$0xff]  ;;  %v15138_v17 = vld [vmem:[#allocation129_spill] sm:$0xff]  ;;  %v15141_v25 = vld [vmem:[#allocation148_spill] sm:$0xff] }
 0x1b6   :  { %1854 = vrot.lane.b32.xlu0 %v15128_v21, %s8161_s2  ;;  %7244 = vmatprep.mubr.msk.f32.mxu1 %vm1389_vm12, %v1369_v46  ;;  %v1304_v48 = vsel %vm1292_vm3, %v1287_v35, %v15130_v33  ;;  %v1337_v0 = vsel %vm1326_vm9, %v1320_v26, %v15131_v19  ;;  %v1288_v47 = vsel %vm1275_vm7, %v1271_v10, %v15132_v28  ;;  %v15137_v50 = vld [vmem:[#allocation103_spill] sm:$0xff]  ;;  %v15142_v9 = vld [vmem:[#allocation61_spill] sm:$0xff]  ;;  %v15143_v6 = vld [vmem:[#allocation80_spill] sm:$0xff] }
 0x1b7   :  { %v1213_v13 = vpop.permute.xlu1 %1212  ;;  %v1321_v15 = vsel %vm1309_vm8, %v1304_v48, %v15133_v32  ;;  %v1354_v38 = vsel %vm1343_vm10, %v1337_v0, %v15134_v52  ;;  %v1272_v55 = vsel %vm1258_vm6, %v9843_v22, %v15136_v14  ;;  %v1305_v58 = vsel %vm1292_vm3, %v1288_v47, %v15137_v50  ;;  %v15139_v36 = vld [vmem:[#allocation91_spill] sm:$0xff]  ;;  %v15144_v4 = vld [vmem:[#allocation105_spill] sm:$0xff]  ;;  %v15146_v35 = vld [vmem:[#allocation92_spill] sm:$0xff] }
 0x1b8   :  { %v1370_v23 = vsel %vm1360_vm11, %v1353_v39, %v1213_v13  ;;  %v1215_v57 = vpop.permute.xlu0 %1214  ;;  %v1338_v43 = vsel %vm1326_vm9, %v1321_v15, %v15138_v17  ;;  %v1289_v27 = vsel %vm1275_vm7, %v1272_v55, %v15139_v36  ;;  %v15140_v45 = vld [vmem:[#allocation115_spill] sm:$0xff]  ;;  %v1273_v7 = vsel %vm1258_vm6, %v9851_v31, %v15143_v6  ;;  %v15147_v26 = vld [vmem:[#allocation116_spill] sm:$0xff]  ;;  %v15148_v39 = vld [vmem:[#allocation149_spill] sm:$0xff] }
 0x1b9   :  { %1856 = vrot.lane.b32.xlu1 %v15135_v30, %s8161_s2  ;;  %7245 = vmatmul.mubr.msk.f32.vlgmr.msra.gmra.mrb[0].mxu1 %vm1389_vm12, %v1370_v23  ;;  %v1371_v34 = vsel %vm1360_vm11, %v1354_v38, %v1215_v57  ;;  %v1322_v2 = vsel %vm1309_vm8, %v1305_v58, %v15140_v45  ;;  %v1355_v24 = vsel %vm1343_vm10, %v1338_v43, %v15141_v25  ;;  %v15145_v62 = vld [vmem:[#allocation131_spill] sm:$0xff]  ;;  %v15149_v31 = vld [vmem:[#allocation62_spill] sm:$0xff]  ;;  %v15150_v10 = vld [vmem:[#allocation81_spill] sm:$0xff] }
 0x1ba   :  { %7397 = vmatpush3.bf16.msra.mxu1 %v9436_v18  ;;  %1858 = vrot.lane.b32.xlu0 %v15142_v9, %s8161_s2  ;;  %v1306_v49 = vsel %vm1292_vm3, %v1289_v27, %v15144_v4  ;;  %v1339_v46 = vsel %vm1326_vm9, %v1322_v2, %v15145_v62  ;;  %v1290_v3 = vsel %vm1275_vm7, %v1273_v7, %v15146_v35  ;;  %v15151_v48 = vld [vmem:[#allocation106_spill] sm:$0xff]  ;;  %v15152_v0 = vld [vmem:[#allocation133_spill] sm:$0xff]  ;;  %v15155_v57 = vld [vmem:[#allocation63_spill] sm:$0xff] }
 0x1bb   :  { %v1217_v22 = vpop.permute.xlu1 %1216  ;;  %7247 = vmatprep.mubr.msk.f32.mxu1 %vm1389_vm12, %v1371_v34  ;;  %7399 = vmatprep.subr.bf16.mxu1 %v15090_v44  ;;  %v1323_v11 = vsel %vm1309_vm8, %v1306_v49, %v15147_v26  ;;  %v1356_v13 = vsel %vm1343_vm10, %v1339_v46, %v15148_v39  ;;  %v1274_v33 = vsel %vm1258_vm6, %v9869_v54, %v15150_v10  ;;  %v15153_v47 = vld [vmem:[#allocation94_spill] sm:$0xff]  ;;  %v15154_v15 = vld [vmem:[#allocation117_spill] sm:$0xff]  ;;  %v15156_v14 = vld [vmem:[#allocation107_spill] sm:$0xff] }
 0x1bc   :  { %v1372_v16 = vsel %vm1360_vm11, %v1355_v24, %v1217_v22  ;;  %v1219_v59 = vpop.permute.xlu0 %1218  ;;  %v1307_v19 = vsel %vm1292_vm3, %v1290_v3, %v15151_v48  ;;  %v1340_v23 = vsel %vm1326_vm9, %v1323_v11, %v15152_v0  ;;  %v1291_v32 = vsel %vm1275_vm7, %v1274_v33, %v15153_v47  ;;  %v15157_v50 = vld [vmem:[#allocation134_spill] sm:$0xff]  ;;  %v15159_v36 = vld [vmem:[#allocation64_spill] sm:$0xff]  ;;  %v8081_v35 = vld [vmem:[#allocation2 + $0x10] sm:$0xff] }
 0x1bd   :  { %1860 = vrot.lane.b32.xlu1 %v15149_v31, %s8161_s2  ;;  %7248 = vmatmul.mubr.msk.f32.gmra.mrb[2].mxu1 %vm1389_vm12, %v1372_v16  ;;  %v1373_v28 = vsel %vm1360_vm11, %v1356_v13, %v1219_v59  ;;  %v1324_v52 = vsel %vm1309_vm8, %v1307_v19, %v15154_v15  ;;  %v1357_v38 = vsel %vm1343_vm10, %v1340_v23, %v9809_v37  ;;  %v15158_v43 = vld [vmem:[#allocation118_spill] sm:$0xff]  ;;  %v15160_v45 = vld [vmem:[#allocation136_spill] sm:$0xff]  ;;  %v15165_v16 = vld [vmem:[#allocation69_spill] sm:$0xff]  ;;  %v1652_v3 = vrot.slane %v8081_v35, 2 }
 0x1be   :  { %7401 = vmatpush3.bf16.msra.mxu1 %v15090_v44  ;;  %1862 = vrot.lane.b32.xlu0 %v15155_v57, %s8161_s2  ;;  %v1308_v55 = vsel %vm1292_vm3, %v1291_v32, %v15156_v14  ;;  %v1341_v58 = vsel %vm1326_vm9, %v1324_v52, %v15157_v50  ;;  %v15162_v7 = vld [vmem:[#allocation66_spill] sm:$0xff]  ;;  %v15164_v49 = vld [vmem:[#allocation68_spill] sm:$0xff]  ;;  %v8083_v59 = vld [vmem:[#allocation2 + $0x20] sm:$0xff] }
 0x1bf   :  { %v1221_v54 = vpop.permute.xlu1 %1220  ;;  %7250 = vmatprep.mubr.msk.f32.mxu1 %vm1389_vm12, %v1373_v28  ;;  %7264 = vmatprep.subr.msk.mxu1 %vm1438_vm5, %v15103_v63  ;;  %v1325_v37 = vsel %vm1309_vm8, %v1308_v55, %v15158_v43  ;;  %v1358_v34 = vsel %vm1343_vm10, %v1341_v58, %v9839_v1  ;;  %v15161_v1 = vld [vmem:[#allocation65_spill] sm:$0xff]  ;;  %v8082_v26 = vld [vmem:[#allocation2 + $0x18] sm:$0x3]  ;;  %v1655_v10 = vrot.slane %v8083_v59, 2  ;;  %v8084_v33 = vld [vmem:[#allocation2 + $0x28] sm:$0x3] }
 0x1c0   :  { %v1374_v17 = vsel %vm1360_vm11, %v1357_v38, %v1221_v54  ;;  %v1223_v27 = vpop.permute.xlu0 %1222  ;;  %v1342_v2 = vsel %vm1326_vm9, %v1325_v37, %v15160_v45  ;;  %v1653_v11 = vrot.slane %v8082_v26, 2  ;;  %v15166_v39 = vld [vmem:[#allocation70_spill] sm:$0xff]  ;;  %v1656_v48 = vrot.slane %v8084_v33, 2  ;;  %v15167_v0 = vld [vmem:[#allocation71_spill] sm:$0xff]  ;;  %v8085_v28 = vld [vmem:[#allocation2 + $0x30] sm:$0xff] }
 0x1c1   :  { %1864 = vrot.lane.b32.xlu1 %v15159_v36, %s8161_s2  ;;  %7251 = vmatmul.mubr.msk.f32.gmra.mrb[4].mxu1 %vm1389_vm12, %v1374_v17  ;;  %v1375_v25 = vsel %vm1360_vm11, %v1358_v34, %v1223_v27  ;;  %v1359_v24 = vsel %vm1343_vm10, %v1342_v2, %v9857_v40  ;;  %v15163_v40 = vld [vmem:[#allocation67_spill] sm:$0xff]  ;;  %v1658_v47 = vrot.slane %v8085_v28, 2  ;;  %v8086_v32 = vld [vmem:[#allocation2 + $0x38] sm:$0x3]  ;;  %v15168_v52 = vld [vmem:[#allocation72_spill] sm:$0xff] }
 0x1c2   :  { %7265 = vmatpush3.msk.msra.mxu1 %vm1438_vm5, %v15103_v63  ;;  %1866 = vrot.lane.b32.xlu0 %v15161_v1, %s8161_s2  ;;  %v10160_v23 = vsel %vm1603_vm4, %v1652_v3, %v1653_v11  ;;  %v1659_v15 = vrot.slane %v8086_v32, 2  ;;  %v10167_v54 = vsel %vm1603_vm4, %v1655_v10, %v1656_v48  ;;  %v8087_v14 = vld [vmem:[#allocation2 + $0x40] sm:$0xff]  ;;  %v8088_v50 = vld [vmem:[#allocation2 + $0x48] sm:$0x3]  ;;  %v8089_v37 = vld [vmem:[#allocation2 + $0x50] sm:$0xff] }
 0x1c3   :  { %v1225_v22 = vpop.permute.xlu1 %1224  ;;  %7253 = vmatprep.mubr.msk.f32.mxu1 %vm1389_vm12, %v1375_v25  ;;  %7411 = vmatprep.subr.bf16.mxu1 %v9436_v18  ;;  %v1661_v55 = vrot.slane %v8087_v14, 2  ;;  %v1662_v58 = vrot.slane %v8088_v50, 2  ;;  %v1664_v34 = vrot.slane %v8089_v37, 2  ;;  %v8090_v27 = vld [vmem:[#allocation2 + $0x58] sm:$0x3]  ;;  %v8093_v11 = vld [vmem:[#allocation2 + $0x70] sm:$0xff] }
 0x1c4   :  { %v1376_v6 = vsel %vm1360_vm11, %v1359_v24, %v1225_v22  ;;  %v10137_v4 = vpop.permute.xlu0 %1706  ;;  %v10174_v43 = vsel %vm1603_vm4, %v1658_v47, %v1659_v15  ;;  %v1665_v45 = vrot.slane %v8090_v27, 2  ;;  %v8091_v24 = vld [vmem:[#allocation2 + $0x60] sm:$0xff]  ;;  %v1670_v59 = vrot.slane %v8093_v11, 2  ;;  %v8094_v10 = vld [vmem:[#allocation2 + $0x78] sm:$0x3]  ;;  %v15206_v31 = vld [vmem:[#allocation17_spill] sm:$0xff] }
 0x1c5   :  { %1868 = vrot.lane.b32.xlu1 %v15162_v7, %s8161_s2  ;;  %7254 = vmatmul.mubr.msk.f32.gmra.mrb[6].mxu1 %vm1389_vm12, %v1376_v6  ;;  %15169 = vst [vmem:[#allocation82_spill] sm:$0xff] %v10174_v43  ;;  %v10181_v25 = vsel %vm1603_vm4, %v1661_v55, %v1662_v58  ;;  %v1667_v22 = vrot.slane %v8091_v24, 2  ;;  %v8092_v6 = vld [vmem:[#allocation2 + $0x68] sm:$0x3]  ;;  %v1671_v33 = vrot.slane %v8094_v10, 2  ;;  %v8095_v47 = vld [vmem:[#allocation2 + $0x80] sm:$0xff] }
 0x1c6   :  { %1870 = vrot.lane.b32.xlu0 %v15163_v40, %s8161_s2  ;;  %15170 = vst [vmem:[#allocation109_spill] sm:$0xff] %v10181_v25  ;;  %v1668_v35 = vrot.slane %v8092_v6, 2  ;;  %v10188_v26 = vsel %vm1603_vm4, %v1664_v34, %v1665_v45  ;;  %v1673_v32 = vrot.slane %v8095_v47, 2  ;;  %v8096_v15 = vld [vmem:[#allocation2 + $0x88] sm:$0x3]  ;;  %v8097_v58 = vld [vmem:[#allocation2 + $0xb0] sm:$0xff] }
 0x1c7   :  { %v10139_v63 = vpop.permute.xlu1 %1708  ;;  %15171 = vst [vmem:[#allocation73_spill] sm:$0xff] %v10188_v26  ;;  %v1674_v14 = vrot.slane %v8096_v15, 2  ;;  %v10202_v50 = vsel %vm1603_vm4, %v1670_v59, %v1671_v33  ;;  %v1676_v37 = vrot.slane %v8097_v58, 2  ;;  %v8098_v34 = vld [vmem:[#allocation2 + $0xb8] sm:$0x3]  ;;  %v8101_v33 = vld [vmem:[#allocation2 + $0xd0] sm:$0xff] }
 0x1c8   :  { %v10145_v62 = vpop.permute.xlu0 %1710  ;;  %v10195_v28 = vsel %vm1603_vm4, %v1667_v22, %v1668_v35  ;;  %15173 = vst [vmem:[#allocation31_spill] sm:$0xff] %v10202_v50  ;;  %v1677_v27 = vrot.slane %v8098_v34, 2  ;;  %v8099_v22 = vld [vmem:[#allocation2 + $0xc0] sm:$0xff]  ;;  %v8100_v35 = vld [vmem:[#allocation2 + $0xc8] sm:$0x3]  ;;  %v1682_v47 = vrot.slane %v8101_v33, 2 }
 0x1c9   :  { %1872 = vrot.lane.b32.xlu1 %v15164_v49, %s8161_s2  ;;  %15172 = vst [vmem:[#allocation97_spill] sm:$0xff] %v10195_v28  ;;  %v10209_v24 = vsel %vm1603_vm4, %v1673_v32, %v1674_v14  ;;  %v1679_v6 = vrot.slane %v8099_v22, 2  ;;  %v1680_v11 = vrot.slane %v8100_v35, 2  ;;  %v8102_v15 = vld [vmem:[#allocation2 + $0xd8] sm:$0x3]  ;;  %v8103_v34 = vld [vmem:[#allocation2 + $0xe0] sm:$0xff] }
 0x1ca   :  { %1874 = vrot.lane.b32.xlu0 %v15165_v16, %s8161_s2  ;;  %15174 = vst [vmem:[#allocation83_spill] sm:$0xff] %v10209_v24  ;;  %v10216_v59 = vsel %vm1603_vm4, %v1676_v37, %v1677_v27  ;;  %v1683_v58 = vrot.slane %v8102_v15, 2  ;;  %v1685_v22 = vrot.slane %v8103_v34, 2  ;;  %v8104_v35 = vld [vmem:[#allocation2 + $0xe8] sm:$0x3]  ;;  %v8105_v27 = vld [vmem:[#allocation2 + $0xf0] sm:$0xff] }
 0x1cb   :  { %v10147_v46 = vpop.permute.xlu1 %1712  ;;  %15175 = vst [vmem:[#allocation110_spill] sm:$0xff] %v10216_v59  ;;  %v10223_v14 = vsel %vm1603_vm4, %v1679_v6, %v1680_v11  ;;  %v1688_v33 = vrot.slane %v8105_v27, 2  ;;  %v8106_v15 = vld [vmem:[#allocation2 + $0xf8] sm:$0x3]  ;;  %v8107_v34 = vld [vmem:[#allocation2 + $0x100] sm:$0xff]  ;;  %v15220_v44 = vld [vmem:[#allocation25_spill] sm:$0xff] }
 0x1cc   :  { %v10153_v13 = vpop.permute.xlu0 %1714  ;;  %15176 = vst [vmem:[#allocation74_spill] sm:$0xff] %v10223_v14  ;;  %v10230_v37 = vsel %vm1603_vm4, %v1682_v47, %v1683_v58  ;;  %v8108_v16 = vld [vmem:[#allocation2 + $0x108] sm:$0x3]  ;;  %v8109_v58 = vld [vmem:[#allocation2 + $0x110] sm:$0xff]  ;;  %v15202_v36 = vld [vmem:[#allocation90_spill] sm:$0xff] }
 0x1cd   :  { %1876 = vrot.lane.b32.xlu1 %v15166_v39, %s8161_s2  ;;  %15178 = vst [vmem:[#allocation119_spill] sm:$0xff] %v10230_v37  ;;  %v1689_v39 = vrot.slane %v8106_v15, 2  ;;  %v1692_v49 = vrot.slane %v8108_v16, 2  ;;  %v1694_v27 = vrot.slane %v8109_v58, 2  ;;  %v8110_v15 = vld [vmem:[#allocation2 + $0x118] sm:$0x3] }
 0x1ce   :  { %1878 = vrot.lane.b32.xlu0 %v15167_v0, %s8161_s2  ;;  %v8111_v16 = vld [vmem:[#allocation2 + $0x120] sm:$0xff]  ;;  %v15189_v58 = vld [vmem:[#allocation9_spill] sm:$0xff] }
 0x1cf   :  { %v10155_v19 = vpop.permute.xlu1 %1716  ;;  %v10244_v47 = vsel %vm1603_vm4, %v1688_v33, %v1689_v39 }
 0x1d0   :  { %v10164_v38 = vpop.permute.xlu0 %1718  ;;  %15180 = vst [vmem:[#allocation84_spill] sm:$0xff] %v10244_v47 }
 0x1d1   :  { %1880 = vrot.lane.b32.xlu1 %v15168_v52, %s8161_s2  ;;  %v1686_v52 = vrot.slane %v8104_v35, 2  ;;  %v1691_v35 = vrot.slane %v8107_v34, 2  ;;  %v1697_v34 = vrot.slane %v8111_v16, 2  ;;  %v15193_v16 = vld [vmem:[#allocation10_spill] sm:$0xff] }
 0x1d2   :  { %1898 = vrot.lane.b32.xlu0 %v10160_v23, %s8162_s18 }
 0x1d3   :  { %v10169_v17 = vpop.permute.xlu1 %1720  ;;  %v10237_v11 = vsel %vm1603_vm4, %v1685_v22, %v1686_v52  ;;  %v10251_v22 = vsel %vm1603_vm4, %v1691_v35, %v1692_v49 }
 0x1d4   :  { %v10178_v2 = vpop.permute.xlu0 %1722  ;;  %15179 = vst [vmem:[#allocation95_spill] sm:$0xff] %v10237_v11  ;;  %15181 = vst [vmem:[#allocation111_spill] sm:$0xff] %v10251_v22 }
 0x1d5   :  { %1900 = vrot.lane.b32.xlu1 %v10167_v54, %s8162_s18 }
 0x1d6   :  { %1902 = vrot.lane.b32.xlu0 %v10174_v43, %s8162_s18 }
 0x1d7   :  { %v10183_v3 = vpop.permute.xlu1 %1724 }
 0x1d8   :  { %v10192_v48 = vpop.permute.xlu0 %1726 }
 0x1d9   :  { %1904 = vrot.lane.b32.xlu1 %v10181_v25, %s8162_s18  ;;  %v15207_v25 = vld [vmem:[#allocation18_spill] sm:$0xff] }
 0x1da   :  { %1906 = vrot.lane.b32.xlu0 %v10188_v26, %s8162_s18 }
 0x1db   :  { %v10197_v55 = vpop.permute.xlu1 %1728 }
 0x1dc   :  { %v10206_v45 = vpop.permute.xlu0 %1730 }
 0x1dd   :  { %1908 = vrot.lane.b32.xlu1 %v10195_v28, %s8162_s18  ;;  %v15205_v28 = vld [vmem:[#allocation16_spill] sm:$0xff] }
 0x1de   :  { %1910 = vrot.lane.b32.xlu0 %v10202_v50, %s8162_s18 }
 0x1df   :  { %v10211_v10 = vpop.permute.xlu1 %1732 }
 0x1e0   :  { %v10220_v32 = vpop.permute.xlu0 %1734 }
 0x1e1   :  { %1912 = vrot.lane.b32.xlu1 %v10209_v24, %s8162_s18  ;;  %v15201_v24 = vld [vmem:[#allocation14_spill] sm:$0xff] }
 0x1e2   :  { %1914 = vrot.lane.b32.xlu0 %v10216_v59, %s8162_s18  ;;  %v8112_v59 = vld [vmem:[#allocation2 + $0x128] sm:$0x3] }
 0x1e3   :  { %v10225_v0 = vpop.permute.xlu1 %1736  ;;  %v1698_v7 = vrot.slane %v8112_v59, 2 }
 0x1e4   :  { %15177 = vst [vmem:[#allocation98_spill] sm:$0xff] %v10225_v0  ;;  %v10234_v6 = vpop.permute.xlu0 %1754  ;;  %v15258_v0 = vld [vmem:[#allocation128_spill] sm:$0xff] }
 0x1e5   :  { %1916 = vrot.lane.b32.xlu1 %v10223_v14, %s8162_s18  ;;  %v1695_v14 = vrot.slane %v8110_v15, 2  ;;  %v10265_v49 = vsel %vm1603_vm4, %v1697_v34, %v1698_v7  ;;  %v15194_v34 = vld [vmem:[#allocation11_spill] sm:$0xff] }
 0x1e6   :  { %1918 = vrot.lane.b32.xlu0 %v10230_v37, %s8162_s18  ;;  %15185 = vst [vmem:[#allocation121_spill] sm:$0xff] %v10265_v49 }
 0x1e7   :  { %v10239_v40 = vpop.permute.xlu1 %1756  ;;  %v10258_v39 = vsel %vm1603_vm4, %v1694_v27, %v1695_v14  ;;  %v15190_v27 = vld [vmem:[#allocation8_spill] sm:$0xff] }
 0x1e8   :  { %v10248_v52 = vpop.permute.xlu0 %1758  ;;  %15183 = vst [vmem:[#allocation75_spill] sm:$0xff] %v10258_v39 }
 0x1e9   :  { %1920 = vrot.lane.b32.xlu1 %v10237_v11, %s8162_s18 }
 0x1ea   :  { %1922 = vrot.lane.b32.xlu0 %v10244_v47, %s8162_s18  ;;  %v15198_v47 = vld [vmem:[#allocation13_spill] sm:$0xff] }
 0x1eb   :  { %v10253_v37 = vpop.permute.xlu1 %1760 }
 0x1ec   :  { %15182 = vst [vmem:[#allocation143_spill] sm:$0xff] %v10253_v37  ;;  %v10262_v33 = vpop.permute.xlu0 %1762  ;;  %v8114_v37 = vld [vmem:[#allocation4 + $0x88] sm:$0x3] }
 0x1ed   :  { %1924 = vrot.lane.b32.xlu1 %v10251_v22, %s8162_s18  ;;  %15184 = vst [vmem:[#allocation99_spill] sm:$0xff] %v10262_v33  ;;  %v15197_v22 = vld [vmem:[#allocation12_spill] sm:$0xff] }
 0x1ee   :  { %1926 = vrot.lane.b32.xlu0 %v10258_v39, %s8162_s18 }
 0x1ef   :  { %v10267_v35 = vpop.permute.xlu1 %1764 }
 0x1f0   :  { %15186 = vst [vmem:[#allocation85_spill] sm:$0xff] %v10267_v35  ;;  %v10273_v59 = vpop.permute.xlu0 %1766  ;;  %v15224_v35 = vld [vmem:[#allocation27_spill] sm:$0xff] }
 0x1f1   :  { %1928 = vrot.lane.b32.xlu1 %v10265_v49, %s8162_s18  ;;  %15187 = vst [vmem:[#allocation23_spill] sm:$0xff] %v10273_v59 }
 0x1f2   :  { %1946 = vrot.lane.b32.xlu0 %v15189_v58, %s8163_s19 }
 0x1f3   :  { %v10275_v14 = vpop.permute.xlu1 %1768 }
 0x1f4   :  { %15188 = vst [vmem:[#allocation144_spill] sm:$0xff] %v10275_v14  ;;  %v10281_v7 = vpop.permute.xlu0 %1770  ;;  %v15219_v14 = vld [vmem:[#allocation24_spill] sm:$0xff] }
 0x1f5   :  { %1948 = vrot.lane.b32.xlu1 %v15190_v27, %s8163_s19  ;;  %15191 = vst [vmem:[#allocation57_spill] sm:$0xff] %v10281_v7 }
 0x1f6   :  { %1950 = vrot.lane.b32.xlu0 %v15193_v16, %s8163_s19 }
 0x1f7   :  { %v10283_v15 = vpop.permute.xlu1 %1772 }
 0x1f8   :  { %15192 = vst [vmem:[#allocation76_spill] sm:$0xff] %v10283_v15  ;;  %v10289_v49 = vpop.permute.xlu0 %1774  ;;  %v15216_v15 = vld [vmem:[#allocation96_spill] sm:$0xff] }
 0x1f9   :  { %1952 = vrot.lane.b32.xlu1 %v15194_v34, %s8163_s19  ;;  %15195 = vst [vmem:[#allocation100_spill] sm:$0xff] %v10289_v49  ;;  %v15215_v49 = vld [vmem:[#allocation22_spill] sm:$0xff] }
 0x1fa   :  { %1954 = vrot.lane.b32.xlu0 %v15197_v22, %s8163_s19 }
 0x1fb   :  { %v10291_v39 = vpop.permute.xlu1 %1776 }
 0x1fc   :  { %15196 = vst [vmem:[#allocation123_spill] sm:$0xff] %v10291_v39  ;;  %v10297_v11 = vpop.permute.xlu0 %1778 }
 0x1fd   :  { %1956 = vrot.lane.b32.xlu1 %v15198_v47, %s8163_s19  ;;  %15199 = vst [vmem:[#allocation86_spill] sm:$0xff] %v10297_v11  ;;  %v15212_v11 = vld [vmem:[#allocation21_spill] sm:$0xff] }
 0x1fe   :  { %1958 = vrot.lane.b32.xlu0 %v15201_v24, %s8163_s19 }
 0x1ff   :  { %v10299_v1 = vpop.permute.xlu1 %1780 }
 0x200   :  { %15200 = vst [vmem:[#allocation112_spill] sm:$0xff] %v10299_v1  ;;  %v10305_v50 = vpop.permute.xlu0 %1782  ;;  %v15208_v1 = vld [vmem:[#allocation19_spill] sm:$0xff] }
 0x201   :  { %1960 = vrot.lane.b32.xlu1 %v15202_v36, %s8163_s19  ;;  %15203 = vst [vmem:[#allocation145_spill] sm:$0xff] %v10305_v50 }
 0x202   :  { %1962 = vrot.lane.b32.xlu0 %v15205_v28, %s8163_s19 }
 0x203   :  { %v10307_v57 = vpop.permute.xlu1 %1784 }
 0x204   :  { %15204 = vst [vmem:[#allocation58_spill] sm:$0xff] %v10307_v57  ;;  %v10313_v26 = vpop.permute.xlu0 %1802  ;;  %v15211_v57 = vld [vmem:[#allocation20_spill] sm:$0xff] }
 0x205   :  { %1964 = vrot.lane.b32.xlu1 %v15206_v31, %s8163_s19 }
 0x206   :  { %1966 = vrot.lane.b32.xlu0 %v15207_v25, %s8163_s19 }
 0x207   :  { %v10315_v9 = vpop.permute.xlu1 %1804 }
 0x208   :  { %v10321_v36 = vpop.permute.xlu0 %1806 }
 0x209   :  { %1968 = vrot.lane.b32.xlu1 %v15208_v1, %s8163_s19  ;;  %15209 = vst [vmem:[#allocation77_spill] sm:$0xff] %v10321_v36  ;;  %v1701_v36 = vrot.slane %v8114_v37, 2 }
 0x20a   :  { %1970 = vrot.lane.b32.xlu0 %v15211_v57, %s8163_s19 }
 0x20b   :  { %v10323_v50 = vpop.permute.xlu1 %1808 }
 0x20c   :  { %15210 = vst [vmem:[#allocation101_spill] sm:$0xff] %v10323_v50  ;;  %v10329_v43 = vpop.permute.xlu0 %1810  ;;  %v15246_v50 = vld [vmem:[#allocation38_spill] sm:$0xff] }
 0x20d   :  { %1972 = vrot.lane.b32.xlu1 %v15212_v11, %s8163_s19  ;;  %15213 = vst [vmem:[#allocation125_spill] sm:$0xff] %v10329_v43  ;;  %v15228_v43 = vld [vmem:[#allocation29_spill] sm:$0xff] }
 0x20e   :  { %1974 = vrot.lane.b32.xlu0 %v15215_v49, %s8163_s19 }
 0x20f   :  { %v10331_v39 = vpop.permute.xlu1 %1812 }
 0x210   :  { %15214 = vst [vmem:[#allocation87_spill] sm:$0xff] %v10331_v39  ;;  %v10337_v30 = vpop.permute.xlu0 %1814  ;;  %v15223_v39 = vld [vmem:[#allocation26_spill] sm:$0xff] }
 0x211   :  { %1976 = vrot.lane.b32.xlu1 %v15216_v15, %s8163_s19  ;;  %15217 = vst [vmem:[#allocation113_spill] sm:$0xff] %v10337_v30 }
 0x212   :  { %1994 = vrot.lane.b32.xlu0 %v15219_v14, %s8164_s20 }
 0x213   :  { %v10339_v7 = vpop.permute.xlu1 %1816 }
 0x214   :  { %15218 = vst [vmem:[#allocation146_spill] sm:$0xff] %v10339_v7  ;;  %v10345_v59 = vpop.permute.xlu0 %1818  ;;  %v15227_v7 = vld [vmem:[#allocation28_spill] sm:$0xff] }
 0x215   :  { %1996 = vrot.lane.b32.xlu1 %v15220_v44, %s8164_s20  ;;  %15221 = vst [vmem:[#allocation78_spill] sm:$0xff] %v10345_v59 }
 0x216   :  { %1998 = vrot.lane.b32.xlu0 %v15223_v39, %s8164_s20  ;;  %v15232_v39 = vld [vmem:[#allocation104_spill] sm:$0xff] }
 0x217   :  { %v10347_v18 = vpop.permute.xlu1 %1820 }
 0x218   :  { %15222 = vst [vmem:[#allocation102_spill] sm:$0xff] %v10347_v18  ;;  %v10353_v15 = vpop.permute.xlu0 %1822  ;;  %v15231_v18 = vld [vmem:[#allocation30_spill] sm:$0xff] }
 0x219   :  { %2000 = vrot.lane.b32.xlu1 %v15224_v35, %s8164_s20  ;;  %15225 = vst [vmem:[#allocation127_spill] sm:$0xff] %v10353_v15 }
 0x21a   :  { %2002 = vrot.lane.b32.xlu0 %v15227_v7, %s8164_s20  ;;  %v15236_v7 = vld [vmem:[#allocation33_spill] sm:$0xff] }
 0x21b   :  { %v10355_v30 = vpop.permute.xlu1 %1824 }
 0x21c   :  { %15226 = vst [vmem:[#allocation88_spill] sm:$0xff] %v10355_v30  ;;  %v10361_v33 = vpop.permute.xlu0 %1826  ;;  %v15235_v30 = vld [vmem:[#allocation32_spill] sm:$0xff] }
 0x21d   :  { %2004 = vrot.lane.b32.xlu1 %v15228_v43, %s8164_s20  ;;  %15229 = vst [vmem:[#allocation114_spill] sm:$0xff] %v10361_v33 }
 0x21e   :  { %2006 = vrot.lane.b32.xlu0 %v15231_v18, %s8164_s20  ;;  %v15239_v18 = vld [vmem:[#allocation35_spill] sm:$0xff] }
 0x21f   :  { %v10363_v59 = vpop.permute.xlu1 %1828 }
 0x220   :  { %15230 = vst [vmem:[#allocation147_spill] sm:$0xff] %v10363_v59  ;;  %v10369_v35 = vpop.permute.xlu0 %1830  ;;  %v15238_v59 = vld [vmem:[#allocation34_spill] sm:$0xff] }
 0x221   :  { %2008 = vrot.lane.b32.xlu1 %v15232_v39, %s8164_s20  ;;  %15233 = vst [vmem:[#allocation79_spill] sm:$0xff] %v10369_v35 }
 0x222   :  { %2010 = vrot.lane.b32.xlu0 %v15235_v30, %s8164_s20  ;;  %v15243_v30 = vld [vmem:[#allocation37_spill] sm:$0xff] }
 0x223   :  { %v10371_v15 = vpop.permute.xlu1 %1832 }
 0x224   :  { %15234 = vst [vmem:[#allocation103_spill] sm:$0xff] %v10371_v15  ;;  %v10377_v43 = vpop.permute.xlu0 %1850  ;;  %v15242_v15 = vld [vmem:[#allocation36_spill] sm:$0xff] }
 0x225   :  { %2012 = vrot.lane.b32.xlu1 %v15236_v7, %s8164_s20 }
 0x226   :  { %2014 = vrot.lane.b32.xlu0 %v15238_v59, %s8164_s20  ;;  %v15247_v59 = vld [vmem:[#allocation108_spill] sm:$0xff] }
 0x227   :  { %v10379_v33 = vpop.permute.xlu1 %1852 }
 0x228   :  { %15237 = vst [vmem:[#allocation129_spill] sm:$0xff] %v10379_v33  ;;  %v10385_v39 = vpop.permute.xlu0 %1854  ;;  %v15273_v33 = vld [vmem:[#allocation141_spill] sm:$0xff] }
 0x229   :  { %2016 = vrot.lane.b32.xlu1 %v15239_v18, %s8164_s20  ;;  %15240 = vst [vmem:[#allocation91_spill] sm:$0xff] %v10385_v39 }
 0x22a   :  { %2018 = vrot.lane.b32.xlu0 %v15242_v15, %s8164_s20  ;;  %v15251_v15 = vld [vmem:[#allocation122_spill] sm:$0xff] }
 0x22b   :  { %v10387_v35 = vpop.permute.xlu1 %1856 }
 0x22c   :  { %15241 = vst [vmem:[#allocation115_spill] sm:$0xff] %v10387_v35  ;;  %v10393_v7 = vpop.permute.xlu0 %1858  ;;  %v15250_v35 = vld [vmem:[#allocation120_spill] sm:$0xff] }
 0x22d   :  { %2020 = vrot.lane.b32.xlu1 %v15243_v30, %s8164_s20  ;;  %15244 = vst [vmem:[#allocation148_spill] sm:$0xff] %v10393_v7 }
 0x22e   :  { %2022 = vrot.lane.b32.xlu0 %v15246_v50, %s8164_s20  ;;  %v15255_v50 = vld [vmem:[#allocation126_spill] sm:$0xff] }
 0x22f   :  { %v10395_v21 = vpop.permute.xlu1 %1860 }
 0x230   :  { %15245 = vst [vmem:[#allocation80_spill] sm:$0xff] %v10395_v21  ;;  %v10401_v18 = vpop.permute.xlu0 %1862  ;;  %v15254_v21 = vld [vmem:[#allocation124_spill] sm:$0xff] }
 0x231   :  { %2024 = vrot.lane.b32.xlu1 %v15247_v59, %s8164_s20  ;;  %15248 = vst [vmem:[#allocation105_spill] sm:$0xff] %v10401_v18  ;;  %v8113_v18 = vld [vmem:[#allocation4 + $0x80] sm:$0xff] }
 0x232   :  { %2042 = vrot.lane.b32.xlu0 %v15250_v35, %s8165_s16 }
 0x233   :  { %v10403_v39 = vpop.permute.xlu1 %1864 }
 0x234   :  { %15249 = vst [vmem:[#allocation131_spill] sm:$0xff] %v10403_v39  ;;  %v10409_v30 = vpop.permute.xlu0 %1866  ;;  %v1700_v39 = vrot.slane %v8113_v18, 2 }
 0x235   :  { %2044 = vrot.lane.b32.xlu1 %v15251_v15, %s8165_s16  ;;  %15252 = vst [vmem:[#allocation92_spill] sm:$0xff] %v10409_v30  ;;  %v15259_v30 = vld [vmem:[#allocation130_spill] sm:$0xff] }
 0x236   :  { %2046 = vrot.lane.b32.xlu0 %v15254_v21, %s8165_s16  ;;  %v10428_v21 = vsel %vm1603_vm4, %v1700_v39, %v1701_v36 }
 0x237   :  { %v10411_v7 = vpop.permute.xlu1 %1868  ;;  %15261 = vst [vmem:[#allocation133_spill] sm:$0xff] %v10428_v21 }
 0x238   :  { %15253 = vst [vmem:[#allocation116_spill] sm:$0xff] %v10411_v7  ;;  %v10417_v59 = vpop.permute.xlu0 %1870 }
 0x239   :  { %2048 = vrot.lane.b32.xlu1 %v15255_v50, %s8165_s16  ;;  %15256 = vst [vmem:[#allocation149_spill] sm:$0xff] %v10417_v59  ;;  %v15263_v59 = vld [vmem:[#allocation132_spill] sm:$0xff] }
 0x23a   :  { %2050 = vrot.lane.b32.xlu0 %v15258_v0, %s8165_s16  ;;  %v15266_v0 = vld [vmem:[#allocation135_spill] sm:$0xff] }
 0x23b   :  { %v10419_v49 = vpop.permute.xlu1 %1872 }
 0x23c   :  { %15257 = vst [vmem:[#allocation81_spill] sm:$0xff] %v10419_v49  ;;  %v10425_v7 = vpop.permute.xlu0 %1874 }
 0x23d   :  { %2052 = vrot.lane.b32.xlu1 %v15259_v30, %s8165_s16  ;;  %15260 = vst [vmem:[#allocation106_spill] sm:$0xff] %v10425_v7  ;;  %v15267_v30 = vld [vmem:[#allocation137_spill] sm:$0xff]  ;;  %v8116_v7 = vld [vmem:[#allocation4 + $0x128] sm:$0x3] }
 0x23e   :  { %2054 = vrot.lane.b32.xlu0 %v15263_v59, %s8165_s16  ;;  %v15270_v59 = vld [vmem:[#allocation139_spill] sm:$0xff]  ;;  %v1704_v49 = vrot.slane %v8116_v7, 2 }
 0x23f   :  { %v10430_v50 = vpop.permute.xlu1 %1876 }
 0x240   :  { %15262 = vst [vmem:[#allocation94_spill] sm:$0xff] %v10430_v50  ;;  %v10436_v18 = vpop.permute.xlu0 %1878  ;;  %v15269_v50 = vld [vmem:[#allocation138_spill] sm:$0xff] }
 0x241   :  { %2056 = vrot.lane.b32.xlu1 %v10428_v21, %s8165_s16  ;;  %15264 = vst [vmem:[#allocation117_spill] sm:$0xff] %v10436_v18  ;;  %v8115_v18 = vld [vmem:[#allocation4 + $0x120] sm:$0xff] }
 0x242   :  { %2058 = vrot.lane.b32.xlu0 %v15266_v0, %s8165_s16 }
 0x243   :  { %v10438_v37 = vpop.permute.xlu1 %1880 }
 0x244   :  { %15265 = vst [vmem:[#allocation107_spill] sm:$0xff] %v10438_v37  ;;  %v10444_v36 = vpop.permute.xlu0 %1898  ;;  %v1703_v37 = vrot.slane %v8115_v18, 2 }
 0x245   :  { %2060 = vrot.lane.b32.xlu1 %v15267_v30, %s8165_s16  ;;  %v15272_v30 = vld [vmem:[#allocation140_spill] sm:$0xff] }
 0x246   :  { %2062 = vrot.lane.b32.xlu0 %v15269_v50, %s8165_s16  ;;  %v10463_v50 = vsel %vm1603_vm4, %v1703_v37, %v1704_v49 }
 0x247   :  { %v10446_v39 = vpop.permute.xlu1 %1900  ;;  %15275 = vst [vmem:[#allocation9_spill] sm:$0xff] %v10463_v50 }
 0x248   :  { %15268 = vst [vmem:[#allocation134_spill] sm:$0xff] %v10446_v39  ;;  %v10452_v21 = vpop.permute.xlu0 %1902 }
 0x249   :  { %2064 = vrot.lane.b32.xlu1 %v15270_v59, %s8165_s16  ;;  %15271 = vst [vmem:[#allocation118_spill] sm:$0xff] %v10452_v21  ;;  %v15277_v21 = vld [vmem:[#allocation142_spill] sm:$0xff] }
 0x24a   :  { %2066 = vrot.lane.b32.xlu0 %v15272_v30, %s8165_s16  ;;  %v15280_v30 = vld [vmem:[#allocation39_spill] sm:$0xff] }
 0x24b   :  { %v10454_v0 = vpop.permute.xlu1 %1904 }
 0x24c   :  { %v10460_v39 = vpop.permute.xlu0 %1906 }
 0x24d   :  { %2068 = vrot.lane.b32.xlu1 %v15273_v33, %s8165_s16  ;;  %15274 = vst [vmem:[#allocation136_spill] sm:$0xff] %v10460_v39  ;;  %v15281_v33 = vld [vmem:[#allocation40_spill] sm:$0xff] }
 0x24e   :  { %2070 = vrot.lane.b32.xlu0 %v15277_v21, %s8165_s16  ;;  %v15285_v21 = vld [vmem:[#allocation42_spill] sm:$0xff] }
 0x24f   :  { %v10465_v59 = vpop.permute.xlu1 %1908 }
 0x250   :  { %15276 = vst [vmem:[#allocation8_spill] sm:$0xff] %v10465_v59  ;;  %v10471_v7 = vpop.permute.xlu0 %1910  ;;  %v15284_v59 = vld [vmem:[#allocation41_spill] sm:$0xff] }
 0x251   :  { %2072 = vrot.lane.b32.xlu1 %v10463_v50, %s8165_s16  ;;  %15278 = vst [vmem:[#allocation10_spill] sm:$0xff] %v10471_v7 }
 0x252   :  { %2447 = vrot.lane.b32.xlu0 %v15280_v30, %s8158_s23  ;;  %v15289_v30 = vld [vmem:[#allocation44_spill] sm:$0xff] }
 0x253   :  { %v10473_v18 = vpop.permute.xlu1 %1912 }
 0x254   :  { %15279 = vst [vmem:[#allocation11_spill] sm:$0xff] %v10473_v18  ;;  %v10479_v49 = vpop.permute.xlu0 %1914  ;;  %v15288_v18 = vld [vmem:[#allocation43_spill] sm:$0xff] }
 0x255   :  { %2449 = vrot.lane.b32.xlu1 %v15281_v33, %s8158_s23  ;;  %15282 = vst [vmem:[#allocation12_spill] sm:$0xff] %v10479_v49 }
 0x256   :  { %2451 = vrot.lane.b32.xlu0 %v15284_v59, %s8158_s23 }
 0x257   :  { %v10481_v37 = vpop.permute.xlu1 %1916 }
 0x258   :  { %15283 = vst [vmem:[#allocation13_spill] sm:$0xff] %v10481_v37  ;;  %v10487_v50 = vpop.permute.xlu0 %1918 }
 0x259   :  { %2453 = vrot.lane.b32.xlu1 %v15285_v21, %s8158_s23  ;;  %15286 = vst [vmem:[#allocation14_spill] sm:$0xff] %v10487_v50 }
 0x25a   :  { %2455 = vrot.lane.b32.xlu0 %v15288_v18, %s8158_s23 }
 0x25b   :  { %v10489_v7 = vpop.permute.xlu1 %1920 }
 0x25c   :  { %15287 = vst [vmem:[#allocation16_spill] sm:$0xff] %v10489_v7  ;;  %v10495_v39 = vpop.permute.xlu0 %1922 }
 0x25d   :  { %2457 = vrot.lane.b32.xlu1 %v15289_v30, %s8158_s23  ;;  %15290 = vst [vmem:[#allocation17_spill] sm:$0xff] %v10495_v39 }
 0x25e   :  { %2459 = vrot.lane.b32.xlu0 %v15084_v29, %s8158_s23 }
 0x25f   :  { %v10497_v49 = vpop.permute.xlu1 %1924 }
 0x260   :  { %15291 = vst [vmem:[#allocation18_spill] sm:$0xff] %v10497_v49  ;;  %v10503_v21 = vpop.permute.xlu0 %1926 }
 0x261   :  { %2461 = vrot.lane.b32.xlu1 %v15085_v5, %s8158_s23  ;;  %15292 = vst [vmem:[#allocation19_spill] sm:$0xff] %v10503_v21 }
 0x262   :  { %2463 = vrot.lane.b32.xlu0 %v15086_v61, %s8158_s23 }
 0x263   :  { %v10505_v50 = vpop.permute.xlu1 %1928 }
 0x264   :  { %15293 = vst [vmem:[#allocation20_spill] sm:$0xff] %v10505_v50  ;;  %v10511_v30 = vpop.permute.xlu0 %1946 }
 0x265   :  { %2465 = vrot.lane.b32.xlu1 %v15087_v42, %s8158_s23 }
 0x266   :  { %2467 = vrot.lane.b32.xlu0 %v9162_v41, %s8158_s23 }
 0x267   :  { %v10513_v18 = vpop.permute.xlu1 %1948 }
 0x268   :  { %v10519_v5 = vpop.permute.xlu0 %1950 }
 0x269   :  { %2469 = vrot.lane.b32.xlu1 %v15088_v53, %s8158_s23 }
 0x26a   :  { %2471 = vrot.lane.b32.xlu0 %v15089_v56, %s8158_s23 }
 0x26b   :  { %v10521_v29 = vpop.permute.xlu1 %1952 }
 0x26c   :  { %v10527_v61 = vpop.permute.xlu0 %1954 }
 0x26d   :  { %2473 = vrot.lane.b32.xlu1 %v15093_v51, %s8158_s23 }
 0x26e   :  { %2475 = vrot.lane.b32.xlu0 %v15099_v8, %s8158_s23  ;;  %v15297_v8 = vld [vmem:[#allocation52_spill] sm:$0xff] }
 0x26f   :  { %v10529_v42 = vpop.permute.xlu1 %1956 }
 0x270   :  { %v10535_v53 = vpop.permute.xlu0 %1958 }
 0x271   :  { %2477 = vrot.lane.b32.xlu1 %v15107_v60, %s8158_s23 }
 0x272   :  { %2495 = vrot.lane.b32.xlu0 %v15114_v20, %s8159_s1 }
 0x273   :  { %v10537_v41 = vpop.permute.xlu1 %1960 }
 0x274   :  { %15294 = vst [vmem:[#allocation21_spill] sm:$0xff] %v10537_v41  ;;  %v10543_v51 = vpop.permute.xlu0 %1962 }
 0x275   :  { %2497 = vrot.lane.b32.xlu1 %v15121_v12, %s8159_s1  ;;  %15295 = vst [vmem:[#allocation24_spill] sm:$0xff] %v10543_v51 }
 0x276   :  { %3174 = vrot.lane.b32.xlu0 %v15114_v20, %s8158_s23 }
 0x277   :  { %v10545_v56 = vpop.permute.xlu1 %1964 }
 0x278   :  { %15296 = vst [vmem:[#allocation25_spill] sm:$0xff] %v10545_v56  ;;  %v10551_v60 = vpop.permute.xlu0 %1966  ;;  %v10619_v56 = vld [vmem:[#allocation3 + $0x20] sm:$0xff] }
 0x279   :  { %2543 = vrot.lane.b32.xlu1 %v15297_v8, %s8160_s30  ;;  %15298 = vst [vmem:[#allocation120_spill] sm:$0xff] %v10551_v60  ;;  %v15304_v8 = vld [vmem:[#allocation50_spill] sm:$0xff]  ;;  %15316 = vst [vmem:[#allocation161_spill] sm:$0xff] %v10619_v56 }
 0x27a   :  { %3176 = vrot.lane.b32.xlu0 %v15121_v12, %s8158_s23 }
 0x27b   :  { %v10553_v50 = vpop.permute.xlu1 %1968 }
 0x27c   :  { %15299 = vst [vmem:[#allocation122_spill] sm:$0xff] %v10553_v50  ;;  %v10557_v21 = vpop.f32.mrb[0].mxu0  ;;  %v10563_v39 = vpop.permute.xlu0 %1970 }
 0x27d   :  { %15300 = vst [vmem:[#allocation40_spill] sm:$0xff] %v10557_v21  ;;  %3222 = vrot.lane.b32.xlu1 %v10160_v23, %s8159_s1  ;;  %v10561_v49 = vpop.f32.mrb[1].mxu0  ;;  %15302 = vst [vmem:[#allocation52_spill] sm:$0xff] %v10563_v39 }
 0x27e   :  { %15301 = vst [vmem:[#allocation41_spill] sm:$0xff] %v10561_v49  ;;  %2545 = vrot.lane.b32.xlu0 %v15304_v8, %s8160_s30 }
 0x27f   :  { %v10565_v20 = vpop.permute.xlu1 %1972 }
 0x280   :  { %15303 = vst [vmem:[#allocation150_spill] sm:$0xff] %v10565_v20  ;;  %v10569_v7 = vpop.f32.mrb[2].mxu0  ;;  %v10575_v21 = vpop.permute.xlu0 %1974 }
 0x281   :  { %15305 = vst [vmem:[#allocation50_spill] sm:$0xff] %v10569_v7  ;;  %2591 = vrot.lane.b32.xlu1 %v15189_v58, %s8161_s2  ;;  %v10573_v50 = vpop.f32.mrb[3].mxu0  ;;  %15307 = vst [vmem:[#allocation152_spill] sm:$0xff] %v10575_v21 }
 0x282   :  { %15306 = vst [vmem:[#allocation151_spill] sm:$0xff] %v10573_v50  ;;  %3224 = vrot.lane.b32.xlu0 %v10167_v54, %s8159_s1 }
 0x283   :  { %v10577_v60 = vpop.permute.xlu1 %1976 }
 0x284   :  { %15308 = vst [vmem:[#allocation153_spill] sm:$0xff] %v10577_v60  ;;  %v10581_v23 = vpop.f32.mrb[4].mxu0  ;;  %v10587_v7 = vpop.permute.xlu0 %1994 }
 0x285   :  { %15309 = vst [vmem:[#allocation154_spill] sm:$0xff] %v10581_v23  ;;  %3270 = vrot.lane.b32.xlu1 %v15189_v58, %s8160_s30  ;;  %v10585_v8 = vpop.f32.mrb[5].mxu0 }
 0x286   :  { %15310 = vst [vmem:[#allocation155_spill] sm:$0xff] %v10585_v8  ;;  %2593 = vrot.lane.b32.xlu0 %v15190_v27, %s8161_s2 }
 0x287   :  { %v10589_v49 = vpop.permute.xlu1 %1996 }
 0x288   :  { %v10593_v50 = vpop.f32.mrb[6].mxu0  ;;  %v10599_v23 = vpop.permute.xlu0 %1998 }
 0x289   :  { %15311 = vst [vmem:[#allocation156_spill] sm:$0xff] %v10593_v50  ;;  %2639 = vrot.lane.b32.xlu1 %v15219_v14, %s8162_s18  ;;  %v10597_v60 = vpop.f32.mrb[7].mxu0 }
 0x28a   :  { %15312 = vst [vmem:[#allocation157_spill] sm:$0xff] %v10597_v60  ;;  %3272 = vrot.lane.b32.xlu0 %v15190_v27, %s8160_s30 }
 0x28b   :  { %v10601_v21 = vpop.permute.xlu1 %2000 }
 0x28c   :  { %v10605_v8 = vpop.f32.mrb[0].mxu1  ;;  %v10611_v50 = vpop.permute.xlu0 %2002 }
 0x28d   :  { %15313 = vst [vmem:[#allocation158_spill] sm:$0xff] %v10605_v8  ;;  %3318 = vrot.lane.b32.xlu1 %v15219_v14, %s8161_s2  ;;  %v10609_v20 = vpop.f32.mrb[1].mxu1 }
 0x28e   :  { %15314 = vst [vmem:[#allocation159_spill] sm:$0xff] %v10609_v20  ;;  %2641 = vrot.lane.b32.xlu0 %v15220_v44, %s8162_s18 }
 0x28f   :  { %v10613_v39 = vpop.permute.xlu1 %2004 }
 0x290   :  { %v10617_v60 = vpop.f32.mrb[2].mxu1  ;;  %v10625_v37 = vpop.permute.xlu0 %2006 }
 0x291   :  { %15315 = vst [vmem:[#allocation160_spill] sm:$0xff] %v10617_v60  ;;  %2687 = vrot.lane.b32.xlu1 %v10619_v56, %s8163_s19  ;;  %v10623_v8 = vpop.f32.mrb[3].mxu1  ;;  %v10641_v56 = vld [vmem:[#allocation3 + $0x30] sm:$0xff] }
 0x292   :  { %15317 = vst [vmem:[#allocation162_spill] sm:$0xff] %v10623_v8  ;;  %3320 = vrot.lane.b32.xlu0 %v15220_v44, %s8161_s2  ;;  %15320 = vst [vmem:[#allocation165_spill] sm:$0xff] %v10641_v56 }
 0x293   :  { %v10627_v14 = vpop.permute.xlu1 %2008 }
 0x294   :  { %v10631_v20 = vpop.f32.mrb[4].mxu1  ;;  %v10637_v51 = vpop.permute.xlu0 %2010 }
 0x295   :  { %15318 = vst [vmem:[#allocation163_spill] sm:$0xff] %v10631_v20  ;;  %3366 = vrot.lane.b32.xlu1 %v15250_v35, %s8162_s18  ;;  %v10635_v60 = vpop.f32.mrb[5].mxu1 }
 0x296   :  { %15319 = vst [vmem:[#allocation164_spill] sm:$0xff] %v10635_v60  ;;  %2689 = vrot.lane.b32.xlu0 %v10641_v56, %s8163_s19  ;;  %v15325_v56 = vld [vmem:[#allocation7_spill] sm:$0xff] }
 0x297   :  { %v10639_v41 = vpop.permute.xlu1 %2012 }
 0x298   :  { %v10645_v8 = vpop.f32.mrb[6].mxu1  ;;  %v10651_v20 = vpop.permute.xlu0 %2014 }
 0x299   :  { %15321 = vst [vmem:[#allocation166_spill] sm:$0xff] %v10645_v8  ;;  %2735 = vrot.lane.b32.xlu1 %v15281_v33, %s8164_s20  ;;  %v10649_v44 = vpop.f32.mrb[7].mxu1  ;;  %15323 = vst [vmem:[#allocation168_spill] sm:$0xff] %v10651_v20  ;;  %v2090_v8 = vsel %vm47_vm0, %v15325_v56, %v10137_v4  ;;  %v2094_v56 = vsel %vm47_vm0, %v15194_v34, %v10153_v13  ;;  %v2095_v4 = vsel %vm47_vm0, %v15197_v22, %v10155_v19 }
 0x29a   :  { %15322 = vst [vmem:[#allocation167_spill] sm:$0xff] %v10649_v44  ;;  %3368 = vrot.lane.b32.xlu0 %v15251_v15, %s8162_s18  ;;  %v2091_v44 = vsel %vm47_vm0, %v15189_v58, %v10139_v63  ;;  %v2093_v15 = vsel %vm47_vm0, %v15193_v16, %v10147_v46  ;;  %v2096_v63 = vsel %vm47_vm0, %v15198_v47, %v10164_v38  ;;  %v15326_v58 = vld [vmem:[#allocation15_spill] sm:$0xff] }
 0x29b   :  { %v10653_v35 = vpop.permute.xlu1 %2016  ;;  %v10691_v46 = vsel %vm47_vm0, %v15201_v24, %v10169_v17  ;;  %v10696_v13 = vsel %vm47_vm0, %v15326_v58, %v10178_v2  ;;  %v10701_v19 = vsel %vm47_vm0, %v15205_v28, %v10183_v3  ;;  %v10712_v17 = vsel %vm47_vm0, %v15206_v31, %v10192_v48 }
 0x29c   :  { %15324 = vst [vmem:[#allocation169_spill] sm:$0xff] %v10653_v35  ;;  %v10659_v60 = vpop.permute.xlu0 %2018  ;;  %v2092_v35 = vsel %vm47_vm0, %v15190_v27, %v10145_v62  ;;  %v2106_v62 = vsel %vm1258_vm6, %v2090_v8, %v10234_v6  ;;  %v10717_v2 = vsel %vm47_vm0, %v15207_v25, %v10197_v55  ;;  %v2107_v3 = vsel %vm1258_vm6, %v2091_v44, %v10239_v40 }
 0x29d   :  { %3414 = vrot.lane.b32.xlu1 %v15281_v33, %s8163_s19  ;;  %v2122_v38 = vsel %vm1275_vm7, %v2106_v62, %v10313_v26  ;;  %v10726_v27 = vsel %vm47_vm0, %v15208_v1, %v10206_v45  ;;  %v10731_v48 = vsel %vm47_vm0, %v15211_v57, %v10211_v10  ;;  %v2123_v55 = vsel %vm1275_vm7, %v2107_v3, %v10315_v9  ;;  %v15327_v10 = vld [vmem:[#allocation129_spill] sm:$0xff]  ;;  %v15329_v62 = vld [vmem:[#allocation22_spill] sm:$0xff] }
 0x29e   :  { %2737 = vrot.lane.b32.xlu0 %v15284_v59, %s8164_s20  ;;  %v2138_v26 = vsel %vm1292_vm3, %v2122_v38, %v10377_v43  ;;  %v10744_v43 = vsel %vm47_vm0, %v15212_v11, %v10220_v32  ;;  %v2108_v45 = vsel %vm1258_vm6, %v2092_v35, %v10248_v52  ;;  %v2139_v44 = vsel %vm1292_vm3, %v2123_v55, %v15327_v10  ;;  %v15330_v38 = vld [vmem:[#allocation77_spill] sm:$0xff]  ;;  %v15332_v55 = vld [vmem:[#allocation143_spill] sm:$0xff] }
 0x29f   :  { %v10673_v20 = vpop.permute.xlu1 %2020  ;;  %v2154_v8 = vsel %vm1309_vm8, %v2138_v26, %v10444_v36  ;;  %v15328_v36 = vld [vmem:[#allocation98_spill] sm:$0xff]  ;;  %v2124_v3 = vsel %vm1275_vm7, %v2108_v45, %v15330_v38  ;;  %v15334_v38 = vld [vmem:[#allocation101_spill] sm:$0xff] }
 0x2a0   :  { %v10707_v6 = vpop.permute.xlu0 %2022  ;;  %v2170_v9 = vsel %vm1326_vm9, %v2154_v8, %v10511_v30  ;;  %v10755_v58 = vsel %vm47_vm0, %v15329_v62, %v15328_v36  ;;  %v15331_v26 = vld [vmem:[#allocation134_spill] sm:$0xff]  ;;  %v2109_v30 = vsel %vm1258_vm6, %v2093_v15, %v15332_v55  ;;  %v15333_v8 = vld [vmem:[#allocation91_spill] sm:$0xff] }
 0x2a1   :  { %2783 = vrot.lane.b32.xlu1 %v15121_v12, %s8165_s16  ;;  %v2155_v32 = vsel %vm1309_vm8, %v2139_v44, %v15331_v26  ;;  %v2186_v52 = vsel %vm1343_vm10, %v2170_v9, %v10587_v7  ;;  %v2140_v10 = vsel %vm1292_vm3, %v2124_v3, %v15333_v8  ;;  %v2125_v44 = vsel %vm1275_vm7, %v2109_v30, %v15334_v38  ;;  %v15335_v26 = vld [vmem:[#allocation118_spill] sm:$0xff]  ;;  %v15336_v15 = vld [vmem:[#allocation59_spill] sm:$0xff]  ;;  %v15339_v30 = vld [vmem:[#allocation125_spill] sm:$0xff] }
 0x2a2   :  { %3416 = vrot.lane.b32.xlu0 %v15284_v59, %s8163_s19  ;;  %v2171_v36 = vsel %vm1326_vm9, %v2155_v32, %v10513_v18  ;;  %v2156_v7 = vsel %vm1309_vm8, %v2140_v10, %v15335_v26  ;;  %v15337_v3 = vld [vmem:[#allocation99_spill] sm:$0xff]  ;;  %v15342_v26 = vld [vmem:[#allocation89_spill] sm:$0xff] }
 0x2a3   :  { %v10737_v40 = vpop.permute.xlu1 %2024  ;;  %v2110_v18 = vsel %vm1258_vm6, %v2094_v56, %v15337_v3  ;;  %v15338_v32 = vld [vmem:[#allocation115_spill] sm:$0xff] }
 0x2a4   :  { %v2043_v35 = vpop.permute.xlu0 %2042 }
 0x2a5   :  { %3462 = vrot.lane.b32.xlu1 %v15121_v12, %s8164_s20  ;;  %v2202_v45 = vsel %vm1360_vm11, %v2186_v52, %v2043_v35  ;;  %v2187_v12 = vsel %vm1343_vm10, %v2171_v36, %v10589_v49  ;;  %v2141_v52 = vsel %vm1292_vm3, %v2125_v44, %v15338_v32  ;;  %v2172_v35 = vsel %vm1326_vm9, %v2156_v7, %v10519_v5  ;;  %v15340_v36 = vld [vmem:[#allocation85_spill] sm:$0xff]  ;;  %v15346_v32 = vld [vmem:[#allocation80_spill] sm:$0xff] }
 0x2a6   :  { %2499 = vrot.lane.b32.xlu0 %v15336_v15, %s8159_s1  ;;  %7266 = vmatprep.mubr.msk.f32.mxu1 %vm1389_vm12, %v2202_v45  ;;  %v2126_v49 = vsel %vm1275_vm7, %v2110_v18, %v15339_v30  ;;  %v2157_v8 = vsel %vm1309_vm8, %v2141_v52, %v10454_v0  ;;  %v2188_v10 = vsel %vm1343_vm10, %v2172_v35, %v10599_v23  ;;  %v15341_v45 = vld [vmem:[#allocation148_spill] sm:$0xff]  ;;  %v15343_v23 = vld [vmem:[#allocation87_spill] sm:$0xff]  ;;  %v15347_v30 = vld [vmem:[#allocation93_spill] sm:$0xff] }
 0x2a7   :  { %v2045_v9 = vpop.permute.xlu1 %2044  ;;  %v2111_v5 = vsel %vm1258_vm6, %v2095_v4, %v15340_v36  ;;  %v2142_v38 = vsel %vm1292_vm3, %v2126_v49, %v15341_v45  ;;  %v2173_v44 = vsel %vm1326_vm9, %v2157_v8, %v10521_v29  ;;  %v15345_v29 = vld [vmem:[#allocation23_spill] sm:$0xff]  ;;  %v15349_v8 = vld [vmem:[#allocation8_spill] sm:$0xff] }
 0x2a8   :  { %v2203_v55 = vsel %vm1360_vm11, %v2187_v12, %v2045_v9  ;;  %v2047_v56 = vpop.permute.xlu0 %2046  ;;  %v2127_v7 = vsel %vm1275_vm7, %v2111_v5, %v15343_v23  ;;  %v15344_v12 = vld [vmem:[#allocation136_spill] sm:$0xff]  ;;  %v2189_v3 = vsel %vm1343_vm10, %v2173_v44, %v10601_v21  ;;  %v2112_v18 = vsel %vm1258_vm6, %v2096_v63, %v15345_v29  ;;  %v15348_v21 = vld [vmem:[#allocation113_spill] sm:$0xff] }
 0x2a9   :  { %2785 = vrot.lane.b32.xlu1 %v15336_v15, %s8165_s16  ;;  %7267 = vmatmul.mubr.msk.f32.vlgmr.msra.gmra.mrb[8].mxu1 %vm1389_vm12, %v2203_v55  ;;  %v2204_v0 = vsel %vm1360_vm11, %v2188_v10, %v2047_v56  ;;  %v2158_v9 = vsel %vm1309_vm8, %v2142_v38, %v15344_v12  ;;  %v2143_v52 = vsel %vm1292_vm3, %v2127_v7, %v15346_v32  ;;  %v15351_v5 = vld [vmem:[#allocation105_spill] sm:$0xff]  ;;  %v15355_v12 = vld [vmem:[#allocation131_spill] sm:$0xff] }
 0x2aa   :  { %7413 = vmatpush3.bf16.msra.mxu1 %v15342_v26  ;;  %3178 = vrot.lane.b32.xlu0 %v15336_v15, %s8158_s23  ;;  %v2174_v35 = vsel %vm1326_vm9, %v2158_v9, %v10527_v61  ;;  %v2128_v49 = vsel %vm1275_vm7, %v2112_v18, %v15348_v21  ;;  %v2159_v10 = vsel %vm1309_vm8, %v2143_v52, %v15349_v8  ;;  %v15350_v61 = vld [vmem:[#allocation144_spill] sm:$0xff]  ;;  %v15357_v18 = vld [vmem:[#allocation11_spill] sm:$0xff] }
 0x2ab   :  { %v2049_v4 = vpop.permute.xlu1 %2048  ;;  %7269 = vmatprep.mubr.msk.f32.mxu1 %vm1389_vm12, %v2204_v0  ;;  %7415 = vmatprep.subr.bf16.mxu1 %v15347_v30  ;;  %v2190_v56 = vsel %vm1343_vm10, %v2174_v35, %v10611_v50  ;;  %v2113_v36 = vsel %vm1258_vm6, %v10691_v46, %v15350_v61  ;;  %v2144_v45 = vsel %vm1292_vm3, %v2128_v49, %v15351_v5  ;;  %v15352_v50 = vld [vmem:[#allocation146_spill] sm:$0xff]  ;;  %v15358_v52 = vld [vmem:[#allocation60_spill] sm:$0xff]  ;;  %v15361_v49 = vld [vmem:[#allocation21_spill] sm:$0xff] }
 0x2ac   :  { %v2205_v55 = vsel %vm1360_vm11, %v2189_v3, %v2049_v4  ;;  %v2051_v63 = vpop.permute.xlu0 %2050  ;;  %v2175_v38 = vsel %vm1326_vm9, %v2159_v10, %v10529_v42  ;;  %v15353_v0 = vld [vmem:[#allocation10_spill] sm:$0xff]  ;;  %v15354_v42 = vld [vmem:[#allocation57_spill] sm:$0xff]  ;;  %v15359_v35 = vld [vmem:[#allocation76_spill] sm:$0xff] }
 0x2ad   :  { %3464 = vrot.lane.b32.xlu1 %v15336_v15, %s8164_s20  ;;  %7270 = vmatmul.mubr.msk.f32.gmra.mrb[10].mxu1 %vm1389_vm12, %v2205_v55  ;;  %v2206_v44 = vsel %vm1360_vm11, %v2190_v56, %v2051_v63  ;;  %v2129_v15 = vsel %vm1275_vm7, %v2113_v36, %v15352_v50  ;;  %v2160_v26 = vsel %vm1309_vm8, %v2144_v45, %v15353_v0  ;;  %v15363_v63 = vld [vmem:[#allocation12_spill] sm:$0xff]  ;;  %v8120_v5 = vld [vmem:[#allocation5 + $0x30] sm:$0xff] }
 0x2ae   :  { %7417 = vmatpush3.bf16.msra.mxu1 %v15347_v30  ;;  %v2191_v23 = vsel %vm1343_vm10, %v2175_v38, %v10613_v39  ;;  %3510 = vrot.lane.b32.xlu0 %v10167_v54, %s8165_s16  ;;  %v2114_v7 = vsel %vm1258_vm6, %v10696_v13, %v15354_v42  ;;  %v2145_v9 = vsel %vm1292_vm3, %v2129_v15, %v15355_v12  ;;  %v8119_v39 = vld [vmem:[%s14660_s4 + $0x20] sm:$0xf]  ;;  %v15356_v54 = vld [vmem:[#allocation78_spill] sm:$0xff]  ;;  %v15360_v30 = vld [vmem:[#allocation92_spill] sm:$0xff] }
 0x2af   :  { %v2053_v46 = vpop.permute.xlu1 %2052  ;;  %7272 = vmatprep.mubr.msk.f32.mxu1 %vm1389_vm12, %v2206_v44  ;;  %v2176_v3 = vsel %vm1326_vm9, %v2160_v26, %v10535_v53  ;;  %7332 = vmatprep.subr.msk.mxu1 %vm1438_vm5, %v8119_v39  ;;  %v2130_v29 = vsel %vm1275_vm7, %v2114_v7, %v15356_v54  ;;  %v2161_v13 = vsel %vm1309_vm8, %v2145_v9, %v15357_v18  ;;  %v15364_v45 = vld [vmem:[#allocation100_spill] sm:$0xff]  ;;  %v15369_v12 = vld [vmem:[#allocation123_spill] sm:$0xff] }
 0x2b0   :  { %v2207_v4 = vsel %vm1360_vm11, %v2191_v23, %v2053_v46  ;;  %v2192_v32 = vsel %vm1343_vm10, %v2176_v3, %v10625_v37  ;;  %v2055_v53 = vpop.permute.xlu0 %2054  ;;  %v2115_v55 = vsel %vm1258_vm6, %v10701_v19, %v15359_v35  ;;  %v2146_v21 = vsel %vm1292_vm3, %v2130_v29, %v15360_v30  ;;  %v15362_v37 = vld [vmem:[#allocation102_spill] sm:$0xff]  ;;  %v15365_v44 = vld [vmem:[#allocation116_spill] sm:$0xff]  ;;  %v15367_v23 = vld [vmem:[#allocation127_spill] sm:$0xff] }
 0x2b1   :  { %2501 = vrot.lane.b32.xlu1 %v15358_v52, %s8159_s1  ;;  %7273 = vmatmul.mubr.msk.f32.gmra.mrb[12].mxu1 %vm1389_vm12, %v2207_v4  ;;  %v2177_v8 = vsel %vm1326_vm9, %v2161_v13, %v15361_v49  ;;  %v2208_v10 = vsel %vm1360_vm11, %v2192_v32, %v2055_v53  ;;  %v2131_v56 = vsel %vm1275_vm7, %v2115_v55, %v15362_v37  ;;  %v15366_v15 = vld [vmem:[#allocation24_spill] sm:$0xff]  ;;  %v15368_v46 = vld [vmem:[#allocation13_spill] sm:$0xff]  ;;  %v15373_v13 = vld [vmem:[#allocation14_spill] sm:$0xff] }
 0x2b2   :  { %7333 = vmatpush3.msk.msra.mxu1 %vm1438_vm5, %v8119_v39  ;;  %v2162_v61 = vsel %vm1309_vm8, %v2146_v21, %v15363_v63  ;;  %v2193_v36 = vsel %vm1343_vm10, %v2177_v8, %v10627_v14  ;;  %2547 = vrot.lane.b32.xlu0 %v8120_v5, %s8160_s30  ;;  %v2116_v38 = vsel %vm1258_vm6, %v10712_v17, %v15364_v45  ;;  %v15370_v3 = vld [vmem:[#allocation149_spill] sm:$0xff]  ;;  %v15372_v18 = vld [vmem:[#allocation88_spill] sm:$0xff]  ;;  %v15375_v55 = vld [vmem:[#allocation86_spill] sm:$0xff]  ;;  %vm4360_vm5 = vcmask 123904  }
 0x2b3   :  { %v2057_v19 = vpop.permute.xlu1 %2056  ;;  %7275 = vmatprep.mubr.msk.f32.mxu1 %vm1389_vm12, %v2208_v10  ;;  %v2147_v50 = vsel %vm1292_vm3, %v2131_v56, %v15365_v44  ;;  %v2178_v0 = vsel %vm1326_vm9, %v2162_v61, %v15366_v15  ;;  %v2132_v14 = vsel %vm1275_vm7, %v2116_v38, %v15367_v23  ;;  %v2117_v9 = vsel %vm1258_vm6, %v10717_v2, %v15369_v12  ;;  %v15371_v39 = vld [vmem:[#allocation25_spill] sm:$0xff]  ;;  %v15374_v2 = vld [vmem:[#allocation82_spill] sm:$0xff]  ;;  %v15377_v8 = vld [vmem:[#allocation120_spill] sm:$0xff] }
 0x2b4   :  { %v2209_v26 = vsel %vm1360_vm11, %v2193_v36, %v2057_v19  ;;  %v2163_v42 = vsel %vm1309_vm8, %v2147_v50, %v15368_v46  ;;  %v2194_v7 = vsel %vm1343_vm10, %v2178_v0, %v10637_v51  ;;  %v2059_v17 = vpop.permute.xlu0 %2058  ;;  %v2148_v4 = vsel %vm1292_vm3, %v2132_v14, %v15370_v3  ;;  %v15376_v21 = vld [vmem:[#allocation81_spill] sm:$0xff]  ;;  %v15378_v56 = vld [vmem:[#allocation114_spill] sm:$0xff]  ;;  %v15379_v63 = vld [vmem:[#allocation16_spill] sm:$0xff] }
 0x2b5   :  { %3180 = vrot.lane.b32.xlu1 %v15358_v52, %s8158_s23  ;;  %7276 = vmatmul.mubr.msk.f32.gmra.mrb[14].mxu1 %vm1389_vm12, %v2209_v26  ;;  %v2179_v54 = vsel %vm1326_vm9, %v2163_v42, %v15371_v39  ;;  %v2210_v29 = vsel %vm1360_vm11, %v2194_v7, %v2059_v17  ;;  %v2133_v51 = vsel %vm1275_vm7, %v2117_v9, %v15372_v18  ;;  %v15380_v36 = vld [vmem:[#allocation168_spill] sm:$0xff]  ;;  %v15382_v38 = vld [vmem:[#allocation106_spill] sm:$0xff]  ;;  %v15384_v26 = vld [vmem:[#allocation147_spill] sm:$0xff] }
 0x2b6   :  { %v2164_v32 = vsel %vm1309_vm8, %v2148_v4, %v15373_v13  ;;  %v2195_v53 = vsel %vm1343_vm10, %v2179_v54, %v10639_v41  ;;  %3226 = vrot.lane.b32.xlu0 %v15374_v2, %s8159_s1  ;;  %7278 = vmatprep.mubr.msk.f32.mxu1 %vm1389_vm12, %v2210_v29  ;;  %v2118_v30 = vsel %vm1258_vm6, %v10726_v27, %v15375_v55  ;;  %v15381_v5 = vld [vmem:[#allocation112_spill] sm:$0xff]  ;;  %v15383_v50 = vld [vmem:[#allocation122_spill] sm:$0xff]  ;;  %v15385_v14 = vld [vmem:[#allocation17_spill] sm:$0xff] }
 0x2b7   :  { %v2061_v35 = vpop.permute.xlu1 %2060  ;;  %v2149_v49 = vsel %vm1292_vm3, %v2133_v51, %v15376_v21  ;;  %v2180_v10 = vsel %vm1326_vm9, %v2164_v32, %v15377_v8  ;;  %v2134_v41 = vsel %vm1275_vm7, %v2118_v30, %v15378_v56  ;;  %v2119_v45 = vsel %vm1258_vm6, %v10731_v48, %v15381_v5  ;;  %v15386_v42 = vld [vmem:[#allocation169_spill] sm:$0xff]  ;;  %v8121_v12 = vld [vmem:[#allocation5 + $0x40] sm:$0xff]  ;;  %v15388_v3 = vld [vmem:[#allocation94_spill] sm:$0xff] }
 0x2b8   :  { %v2211_v37 = vsel %vm1360_vm11, %v2195_v53, %v2061_v35  ;;  %v2165_v61 = vsel %vm1309_vm8, %v2149_v49, %v15379_v63  ;;  %v2196_v19 = vsel %vm1343_vm10, %v2180_v10, %v15380_v36  ;;  %v2063_v27 = vpop.permute.xlu0 %2062  ;;  %v2150_v44 = vsel %vm1292_vm3, %v2134_v41, %v15382_v38  ;;  %v15387_v48 = vld [vmem:[#allocation145_spill] sm:$0xff]  ;;  %v15389_v39 = vld [vmem:[#allocation52_spill] sm:$0xff]  ;;  %v15390_v18 = vld [vmem:[#allocation79_spill] sm:$0xff] }
 0x2b9   :  { %3512 = vrot.lane.b32.xlu1 %v15374_v2, %s8165_s16  ;;  %7279 = vmatmul.mubr.msk.f32.gmra.mrb[16].mxu1 %vm1389_vm12, %v2211_v37  ;;  %v2181_v15 = vsel %vm1326_vm9, %v2165_v61, %v15383_v50  ;;  %v2212_v0 = vsel %vm1360_vm11, %v2196_v19, %v2063_v27  ;;  %v2135_v23 = vsel %vm1275_vm7, %v2119_v45, %v15384_v26  ;;  %v15391_v13 = vld [vmem:[#allocation18_spill] sm:$0xff]  ;;  %v15393_v55 = vld [vmem:[#allocation117_spill] sm:$0xff]  ;;  %v15395_v10 = vld [vmem:[#allocation103_spill] sm:$0xff] }
 0x2ba   :  { %v2166_v46 = vsel %vm1309_vm8, %v2150_v44, %v15385_v14  ;;  %v2197_v7 = vsel %vm1343_vm10, %v2181_v15, %v15386_v42  ;;  %2549 = vrot.lane.b32.xlu0 %v8121_v12, %s8160_s30  ;;  %7281 = vmatprep.mubr.msk.f32.mxu1 %vm1389_vm12, %v2212_v0  ;;  %v2120_v9 = vsel %vm1258_vm6, %v10744_v43, %v15387_v48  ;;  %v15392_v35 = vld [vmem:[#allocation58_spill] sm:$0xff]  ;;  %v15396_v37 = vld [vmem:[#allocation19_spill] sm:$0xff]  ;;  %v15399_v19 = vld [vmem:[#allocation152_spill] sm:$0xff] }
 0x2bb   :  { %v2065_v17 = vpop.permute.xlu1 %2064  ;;  %v2151_v4 = vsel %vm1292_vm3, %v2135_v23, %v15388_v3  ;;  %v2182_v54 = vsel %vm1326_vm9, %v2166_v46, %v15389_v39  ;;  %v2136_v51 = vsel %vm1275_vm7, %v2120_v9, %v15390_v18  ;;  %v2121_v2 = vsel %vm1258_vm6, %v10755_v58, %v15392_v35  ;;  %v15394_v21 = vld [vmem:[#allocation150_spill] sm:$0xff]  ;;  %v15397_v58 = vld [vmem:[#allocation109_spill] sm:$0xff]  ;;  %v15398_v61 = vld [vmem:[#allocation107_spill] sm:$0xff] }
 0x2bc   :  { %v2213_v29 = vsel %vm1360_vm11, %v2197_v7, %v2065_v17  ;;  %v2167_v32 = vsel %vm1309_vm8, %v2151_v4, %v15391_v13  ;;  %v2198_v53 = vsel %vm1343_vm10, %v2182_v54, %v10659_v60  ;;  %v2067_v43 = vpop.permute.xlu0 %2066  ;;  %v2152_v30 = vsel %vm1292_vm3, %v2136_v51, %v15393_v55  ;;  %v15400_v45 = vld [vmem:[#allocation20_spill] sm:$0xff]  ;;  %v15401_v50 = vld [vmem:[#allocation153_spill] sm:$0xff]  ;;  %v15403_v7 = vld [vmem:[#allocation27_spill] sm:$0xff] }
 0x2bd   :  { %2595 = vrot.lane.b32.xlu1 %v15193_v16, %s8161_s2  ;;  %7282 = vmatmul.mubr.msk.f32.gmra.mrb[18].mxu1 %vm1389_vm12, %v2213_v29  ;;  %v2183_v49 = vsel %vm1326_vm9, %v2167_v32, %v15394_v21  ;;  %v2214_v8 = vsel %vm1360_vm11, %v2198_v53, %v2067_v43  ;;  %v2137_v60 = vsel %vm1275_vm7, %v2121_v2, %v15395_v10  ;;  %v11026_v17 = vld [vmem:[#allocation3 + $0x40] sm:$0xff]  ;;  %v11042_v4 = vld [vmem:[#allocation3 + $0x50] sm:$0xff]  ;;  %v15405_v39 = vld [vmem:[#allocation42_spill] sm:$0xff] }
 0x2be   :  { %v2168_v56 = vsel %vm1309_vm8, %v2152_v30, %v15396_v37  ;;  %v2199_v41 = vsel %vm1343_vm10, %v2183_v49, %v10673_v20  ;;  %3228 = vrot.lane.b32.xlu0 %v15397_v58, %s8159_s1  ;;  %7284 = vmatprep.mubr.msk.f32.mxu1 %vm1389_vm12, %v2214_v8  ;;  %v2153_v36 = vsel %vm1292_vm3, %v2137_v60, %v15398_v61  ;;  %v15406_v18 = vld [vmem:[#allocation126_spill] sm:$0xff]  ;;  %v15407_v32 = vld [vmem:[#allocation43_spill] sm:$0xff]  ;;  %v15411_v55 = vld [vmem:[#allocation61_spill] sm:$0xff] }
 0x2bf   :  { %v2069_v63 = vpop.permute.xlu1 %2068  ;;  %v2184_v27 = vsel %vm1326_vm9, %v2168_v56, %v15399_v19  ;;  %v2169_v38 = vsel %vm1309_vm8, %v2153_v36, %v15400_v45  ;;  %v15412_v8 = vld [vmem:[#allocation73_spill] sm:$0xff]  ;;  %v15413_v37 = vld [vmem:[#allocation62_spill] sm:$0xff]  ;;  %v8125_v36 = vld [vmem:[#allocation5 + $0x60] sm:$0xff] }
 0x2c0   :  { %v2215_v5 = vsel %vm1360_vm11, %v2199_v41, %v2069_v63  ;;  %v2200_v20 = vsel %vm1343_vm10, %v2184_v27, %v10707_v6  ;;  %v2071_v44 = vpop.permute.xlu0 %2070  ;;  %v2185_v15 = vsel %vm1326_vm9, %v2169_v38, %v15401_v50  ;;  %v8124_v56 = vld [vmem:[#allocation5 + $0x50] sm:$0xff] }
 0x2c1   :  { %3274 = vrot.lane.b32.xlu1 %v15193_v16, %s8160_s30  ;;  %7285 = vmatmul.mubr.msk.f32.gmra.mrb[20].mxu1 %vm1389_vm12, %v2215_v5  ;;  %v2216_v0 = vsel %vm1360_vm11, %v2200_v20, %v2071_v44  ;;  %v2201_v26 = vsel %vm1343_vm10, %v2185_v15, %v10737_v40  ;;  %v15402_v16 = vld [vmem:[#allocation26_spill] sm:$0xff]  ;;  %v15414_v5 = vld [vmem:[#allocation97_spill] sm:$0xff]  ;;  %v15415_v20 = vld [vmem:[#allocation28_spill] sm:$0xff] }
 0x2c2   :  { %2597 = vrot.lane.b32.xlu0 %v15194_v34, %s8161_s2  ;;  %7287 = vmatprep.mubr.msk.f32.mxu1 %vm1389_vm12, %v2216_v0  ;;  %v15416_v0 = vld [vmem:[#allocation29_spill] sm:$0xff] }
 0x2c3   :  { %v2073_v23 = vpop.permute.xlu1 %2072 }
 0x2c4   :  { %v2217_v6 = vsel %vm1360_vm11, %v2201_v26, %v2073_v23  ;;  %v11012_v14 = vpop.permute.xlu0 %2447  ;;  %v11126_v26 = vld [vmem:[#allocation3 + $0x60] sm:$0xff] }
 0x2c5   :  { %2643 = vrot.lane.b32.xlu1 %v15402_v16, %s8162_s18  ;;  %7288 = vmatmul.mubr.msk.f32.gmra.mrb[22].mxu1 %vm1389_vm12, %v2217_v6 }
 0x2c6   :  { %3276 = vrot.lane.b32.xlu0 %v15194_v34, %s8160_s30  ;;  %v15404_v34 = vld [vmem:[#allocation124_spill] sm:$0xff] }
 0x2c7   :  { %v11014_v46 = vpop.permute.xlu1 %2449 }
 0x2c8   :  { %v11020_v40 = vpop.permute.xlu0 %2451 }
 0x2c9   :  { %3322 = vrot.lane.b32.xlu1 %v15402_v16, %s8161_s2 }
 0x2ca   :  { %2645 = vrot.lane.b32.xlu0 %v15403_v7, %s8162_s18 }
 0x2cb   :  { %v11022_v42 = vpop.permute.xlu1 %2453 }
 0x2cc   :  { %v11030_v12 = vpop.permute.xlu0 %2455 }
 0x2cd   :  { %2691 = vrot.lane.b32.xlu1 %v11026_v17, %s8163_s19 }
 0x2ce   :  { %3324 = vrot.lane.b32.xlu0 %v15403_v7, %s8161_s2  ;;  %v15417_v7 = vld [vmem:[#allocation128_spill] sm:$0xff] }
 0x2cf   :  { %v11032_v48 = vpop.permute.xlu1 %2457 }
 0x2d0   :  { %v11038_v9 = vpop.permute.xlu0 %2459 }
 0x2d1   :  { %3370 = vrot.lane.b32.xlu1 %v15404_v34, %s8162_s18 }
 0x2d2   :  { %2693 = vrot.lane.b32.xlu0 %v11042_v4, %s8163_s19 }
 0x2d3   :  { %v11040_v3 = vpop.permute.xlu1 %2461 }
 0x2d4   :  { %v11048_v54 = vpop.permute.xlu0 %2463 }
 0x2d5   :  { %2739 = vrot.lane.b32.xlu1 %v15405_v39, %s8164_s20 }
 0x2d6   :  { %3372 = vrot.lane.b32.xlu0 %v15406_v18, %s8162_s18 }
 0x2d7   :  { %v11050_v29 = vpop.permute.xlu1 %2465 }
 0x2d8   :  { %v11056_v51 = vpop.permute.xlu0 %2467 }
 0x2d9   :  { %3418 = vrot.lane.b32.xlu1 %v15405_v39, %s8163_s19 }
 0x2da   :  { %2741 = vrot.lane.b32.xlu0 %v15407_v32, %s8164_s20 }
 0x2db   :  { %v11058_v13 = vpop.permute.xlu1 %2469 }
 0x2dc   :  { %v11064_v53 = vpop.permute.xlu0 %2471 }
 0x2dd   :  { %2787 = vrot.lane.b32.xlu1 %v15358_v52, %s8165_s16 }
 0x2de   :  { %3420 = vrot.lane.b32.xlu0 %v15407_v32, %s8163_s19 }
 0x2df   :  { %v11066_v43 = vpop.permute.xlu1 %2473 }
 0x2e0   :  { %15408 = vst [vmem:[#allocation7_spill] sm:$0xff] %v11066_v43  ;;  %v11072_v35 = vpop.permute.xlu0 %2475 }
 0x2e1   :  { %3466 = vrot.lane.b32.xlu1 %v15358_v52, %s8164_s20  ;;  %15409 = vst [vmem:[#allocation15_spill] sm:$0xff] %v11072_v35 }
 0x2e2   :  { %2789 = vrot.lane.b32.xlu0 %v15411_v55, %s8165_s16 }
 0x2e3   :  { %v11074_v2 = vpop.permute.xlu1 %2477 }
 0x2e4   :  { %15410 = vst [vmem:[#allocation129_spill] sm:$0xff] %v11074_v2  ;;  %v2496_v30 = vpop.permute.xlu0 %2495  ;;  %v15432_v2 = vld [vmem:[#allocation46_spill] sm:$0xff] }
 0x2e5   :  { %3468 = vrot.lane.b32.xlu1 %v15411_v55, %s8164_s20 }
 0x2e6   :  { %3514 = vrot.lane.b32.xlu0 %v15397_v58, %s8165_s16 }
 0x2e7   :  { %v11080_v21 = vpop.permute.xlu1 %2497 }
 0x2e8   :  { %v11086_v52 = vpop.permute.xlu0 %3174 }
 0x2e9   :  { %2503 = vrot.lane.b32.xlu1 %v15411_v55, %s8159_s1 }
 0x2ea   :  { %3182 = vrot.lane.b32.xlu0 %v15411_v55, %s8158_s23 }
 0x2eb   :  { %v2544_v49 = vpop.permute.xlu1 %2543 }
 0x2ec   :  { %v11092_v10 = vpop.permute.xlu0 %3176 }
 0x2ed   :  { %3516 = vrot.lane.b32.xlu1 %v15412_v8, %s8165_s16 }
 0x2ee   :  { %2505 = vrot.lane.b32.xlu0 %v15413_v37, %s8159_s1 }
 0x2ef   :  { %v11094_v60 = vpop.permute.xlu1 %3222 }
 0x2f0   :  { %v2546_v41 = vpop.permute.xlu0 %2545 }
 0x2f1   :  { %2551 = vrot.lane.b32.xlu1 %v8124_v56, %s8160_s30  ;;  %v11138_v56 = vld [vmem:[#allocation3 + $0x70] sm:$0xff] }
 0x2f2   :  { %3184 = vrot.lane.b32.xlu0 %v15413_v37, %s8158_s23 }
 0x2f3   :  { %v2592_v63 = vpop.permute.xlu1 %2591 }
 0x2f4   :  { %v11103_v58 = vpop.permute.xlu0 %3224 }
 0x2f5   :  { %3230 = vrot.lane.b32.xlu1 %v15412_v8, %s8159_s1 }
 0x2f6   :  { %2553 = vrot.lane.b32.xlu0 %v8125_v36, %s8160_s30 }
 0x2f7   :  { %v3271_v61 = vpop.permute.xlu1 %3270 }
 0x2f8   :  { %v2594_v19 = vpop.permute.xlu0 %2593 }
 0x2f9   :  { %2599 = vrot.lane.b32.xlu1 %v15197_v22, %s8161_s2 }
 0x2fa   :  { %3232 = vrot.lane.b32.xlu0 %v15414_v5, %s8159_s1 }
 0x2fb   :  { %v2640_v27 = vpop.permute.xlu1 %2639 }
 0x2fc   :  { %v11112_v45 = vpop.permute.xlu0 %3272 }
 0x2fd   :  { %3278 = vrot.lane.b32.xlu1 %v15197_v22, %s8160_s30 }
 0x2fe   :  { %2601 = vrot.lane.b32.xlu0 %v15198_v47, %s8161_s2 }
 0x2ff   :  { %v3319_v38 = vpop.permute.xlu1 %3318 }
 0x300   :  { %v2642_v44 = vpop.permute.xlu0 %2641 }
 0x301   :  { %2647 = vrot.lane.b32.xlu1 %v15415_v20, %s8162_s18 }
 0x302   :  { %3280 = vrot.lane.b32.xlu0 %v15198_v47, %s8160_s30  ;;  %v8127_v47 = vld [vmem:[#allocation3 + $0x10] sm:$0xff] }
 0x303   :  { %v2688_v50 = vpop.permute.xlu1 %2687  ;;  %v2831_v16 = vsel %vm47_vm0, %v8127_v47, %v11012_v14  ;;  %v15418_v14 = vld [vmem:[#allocation44_spill] sm:$0xff] }
 0x304   :  { %v11122_v15 = vpop.permute.xlu0 %3320  ;;  %v2847_v18 = vsel %vm1258_vm6, %v2831_v16, %v2496_v30 }
 0x305   :  { %3326 = vrot.lane.b32.xlu1 %v15415_v20, %s8161_s2  ;;  %v2863_v55 = vsel %vm1275_vm7, %v2847_v18, %v2544_v49  ;;  %v15419_v49 = vld [vmem:[#allocation130_spill] sm:$0xff]  ;;  %v15420_v18 = vld [vmem:[#allocation161_spill] sm:$0xff] }
 0x306   :  { %2649 = vrot.lane.b32.xlu0 %v15416_v0, %s8162_s18  ;;  %v2879_v36 = vsel %vm1292_vm3, %v2863_v55, %v2592_v63  ;;  %v2832_v63 = vsel %vm47_vm0, %v15420_v18, %v11014_v46 }
 0x307   :  { %v3367_v22 = vpop.permute.xlu1 %3366  ;;  %v2895_v20 = vsel %vm1309_vm8, %v2879_v36, %v2640_v27  ;;  %v15421_v36 = vld [vmem:[#allocation45_spill] sm:$0xff] }
 0x308   :  { %v2690_v23 = vpop.permute.xlu0 %2689  ;;  %v2911_v47 = vsel %vm1326_vm9, %v2895_v20, %v2688_v50  ;;  %v2848_v50 = vsel %vm1258_vm6, %v2832_v63, %v11080_v21  ;;  %v15423_v63 = vld [vmem:[#allocation63_spill] sm:$0xff] }
 0x309   :  { %2695 = vrot.lane.b32.xlu1 %v11126_v26, %s8163_s19 }
 0x30a   :  { %3328 = vrot.lane.b32.xlu0 %v15416_v0, %s8161_s2 }
 0x30b   :  { %v2736_v6 = vpop.permute.xlu1 %2735 }
 0x30c   :  { %v3369_v34 = vpop.permute.xlu0 %3368  ;;  %v2927_v30 = vsel %vm1343_vm10, %v2911_v47, %v2736_v6  ;;  %v2864_v6 = vsel %vm1275_vm7, %v2848_v50, %v2546_v41 }
 0x30d   :  { %3374 = vrot.lane.b32.xlu1 %v15417_v7, %s8162_s18  ;;  %v2880_v20 = vsel %vm1292_vm3, %v2864_v6, %v2594_v19 }
 0x30e   :  { %2697 = vrot.lane.b32.xlu0 %v11138_v56, %s8163_s19  ;;  %v2896_v47 = vsel %vm1309_vm8, %v2880_v20, %v2642_v44 }
 0x30f   :  { %v3415_v8 = vpop.permute.xlu1 %3414 }
 0x310   :  { %v2738_v0 = vpop.permute.xlu0 %2737 }
 0x311   :  { %2743 = vrot.lane.b32.xlu1 %v15418_v14, %s8164_s20 }
 0x312   :  { %3376 = vrot.lane.b32.xlu0 %v15419_v49, %s8162_s18 }
 0x313   :  { %v2784_v16 = vpop.permute.xlu1 %2783 }
 0x314   :  { %v2943_v7 = vsel %vm1360_vm11, %v2927_v30, %v2784_v16  ;;  %v3417_v27 = vpop.permute.xlu0 %3416  ;;  %v2912_v30 = vsel %vm1326_vm9, %v2896_v47, %v2690_v23  ;;  %v15422_v16 = vld [vmem:[#allocation39_spill] sm:$0xff] }
 0x315   :  { %3422 = vrot.lane.b32.xlu1 %v15418_v14, %s8163_s19  ;;  %7300 = vmatprep.mubr.msk.f32.mxu0 %vm1389_vm12, %v2943_v7  ;;  %v3558_v21 = vsel %vm47_vm0, %v15422_v16, %v11086_v52  ;;  %v2928_v41 = vsel %vm1343_vm10, %v2912_v30, %v2738_v0  ;;  %v15425_v16 = vld [vmem:[#allocation64_spill] sm:$0xff] }
 0x316   :  { %2745 = vrot.lane.b32.xlu0 %v15421_v36, %s8164_s20  ;;  %v3574_v19 = vsel %vm1258_vm6, %v3558_v21, %v11094_v60 }
 0x317   :  { %v3463_v55 = vpop.permute.xlu1 %3462  ;;  %v3590_v7 = vsel %vm1275_vm7, %v3574_v19, %v3271_v61  ;;  %v8130_v19 = vld [vmem:[#allocation5 + $0x80] sm:$0xff] }
 0x318   :  { %v11166_v46 = vpop.permute.xlu0 %2499  ;;  %v3606_v52 = vsel %vm1292_vm3, %v3590_v7, %v3319_v38  ;;  %v3559_v38 = vsel %vm47_vm0, %v15281_v33, %v11092_v10  ;;  %v15424_v10 = vld [vmem:[#allocation31_spill] sm:$0xff] }
 0x319   :  { %2791 = vrot.lane.b32.xlu1 %v15413_v37, %s8165_s16  ;;  %v3622_v0 = vsel %vm1309_vm8, %v3606_v52, %v3367_v22  ;;  %v15426_v52 = vld [vmem:[#allocation83_spill] sm:$0xff] }
 0x31a   :  { %3424 = vrot.lane.b32.xlu0 %v15421_v36, %s8163_s19  ;;  %v3638_v60 = vsel %vm1326_vm9, %v3622_v0, %v3415_v8  ;;  %v3575_v8 = vsel %vm1258_vm6, %v3559_v38, %v11103_v58  ;;  %v15429_v38 = vld [vmem:[#allocation104_spill] sm:$0xff] }
 0x31b   :  { %v2786_v49 = vpop.permute.xlu1 %2785  ;;  %v3654_v50 = vsel %vm1343_vm10, %v3638_v60, %v3463_v55  ;;  %v3591_v55 = vsel %vm1275_vm7, %v3575_v8, %v11112_v45  ;;  %v15428_v60 = vld [vmem:[#allocation30_spill] sm:$0xff]  ;;  %v11254_v8 = vld [vmem:[#allocation3 + $0x80] sm:$0xff] }
 0x31c   :  { %v2944_v44 = vsel %vm1360_vm11, %v2928_v41, %v2786_v49  ;;  %v11182_v23 = vpop.permute.xlu0 %3178  ;;  %v8129_v41 = vld [vmem:[#allocation5 + $0x70] sm:$0xff] }
 0x31d   :  { %3470 = vrot.lane.b32.xlu1 %v15413_v37, %s8164_s20  ;;  %7301 = vmatmul.mubr.msk.f32.vlgmr.msra.gmra.mrb[8].mxu0 %vm1389_vm12, %v2944_v44 }
 0x31e   :  { %2793 = vrot.lane.b32.xlu0 %v15423_v63, %s8165_s16 }
 0x31f   :  { %v3465_v18 = vpop.permute.xlu1 %3464 }
 0x320   :  { %v3511_v37 = vpop.permute.xlu0 %3510 }
 0x321   :  { %3472 = vrot.lane.b32.xlu1 %v15423_v63, %s8164_s20  ;;  %v3670_v61 = vsel %vm1360_vm11, %v3654_v50, %v3511_v37 }
 0x322   :  { %3518 = vrot.lane.b32.xlu0 %v15414_v5, %s8165_s16  ;;  %7334 = vmatprep.mubr.msk.f32.mxu1 %vm1389_vm12, %v3670_v61  ;;  %v3607_v5 = vsel %vm1292_vm3, %v3591_v55, %v11122_v15 }
 0x323   :  { %v11193_v6 = vpop.permute.xlu1 %2501  ;;  %v3623_v33 = vsel %vm1309_vm8, %v3607_v5, %v3369_v34 }
 0x324   :  { %v2548_v22 = vpop.permute.xlu0 %2547  ;;  %v3639_v58 = vsel %vm1326_vm9, %v3623_v33, %v3417_v27  ;;  %v393_v33 = vld [vmem:[#allocation3 + $0x90] sm:$0xff] }
 0x325   :  { %2507 = vrot.lane.b32.xlu1 %v15423_v63, %s8159_s1  ;;  %v3655_v30 = vsel %vm1343_vm10, %v3639_v58, %v3465_v18 }
 0x326   :  { %3186 = vrot.lane.b32.xlu0 %v15423_v63, %s8158_s23  ;;  %v15427_v63 = vld [vmem:[#allocation90_spill] sm:$0xff] }
 0x327   :  { %v11207_v20 = vpop.permute.xlu1 %3180 }
 0x328   :  { %v11216_v47 = vpop.permute.xlu0 %3226 }
 0x329   :  { %3520 = vrot.lane.b32.xlu1 %v15424_v10, %s8165_s16 }
 0x32a   :  { %2509 = vrot.lane.b32.xlu0 %v15425_v16, %s8159_s1 }
 0x32b   :  { %v3513_v45 = vpop.permute.xlu1 %3512 }
 0x32c   :  { %v3671_v21 = vsel %vm1360_vm11, %v3655_v30, %v3513_v45  ;;  %v2550_v15 = vpop.permute.xlu0 %2549  ;;  %v15431_v30 = vld [vmem:[#allocation132_spill] sm:$0xff] }
 0x32d   :  { %2555 = vrot.lane.b32.xlu1 %v8129_v41, %s8160_s30  ;;  %7335 = vmatmul.mubr.msk.f32.vlgmr.msra.gmra.mrb[24].mxu1 %vm1389_vm12, %v3671_v21  ;;  %v11265_v21 = vld [vmem:[#allocation2 + $0x90] sm:$0xff]  ;;  %v11267_v41 = vld [vmem:[#allocation2 + $0x98] sm:$0x3] }
 0x32e   :  { %3188 = vrot.lane.b32.xlu0 %v15425_v16, %s8158_s23 }
 0x32f   :  { %v2596_v34 = vpop.permute.xlu1 %2595 }
 0x330   :  { %v11229_v27 = vpop.permute.xlu0 %3228 }
 0x331   :  { %3234 = vrot.lane.b32.xlu1 %v15424_v10, %s8159_s1  ;;  %v15430_v10 = vld [vmem:[#allocation165_spill] sm:$0xff] }
 0x332   :  { %2557 = vrot.lane.b32.xlu0 %v8130_v19, %s8160_s30  ;;  %v2833_v58 = vsel %vm47_vm0, %v15430_v10, %v11020_v40  ;;  %v2431_v40 = vrot.slane %v11265_v21, 1  ;;  %v2432_v10 = vrot.slane %v11267_v41, 1 }
 0x333   :  { %v11231_v49 = vpop.permute.xlu1 %3274  ;;  %v2849_v19 = vsel %vm1258_vm6, %v2833_v58, %v11166_v46  ;;  %v2834_v46 = vsel %vm47_vm0, %v11026_v17, %v11022_v42  ;;  %v394_v17 = vld [vmem:[#allocation3 + $0x98] sm:$0x3] }
 0x334   :  { %v2598_v44 = vpop.permute.xlu0 %2597 }
 0x335   :  { %2603 = vrot.lane.b32.xlu1 %v15201_v24, %s8161_s2 }
 0x336   :  { %3236 = vrot.lane.b32.xlu0 %v15426_v52, %s8159_s1 }
 0x337   :  { %v2644_v7 = vpop.permute.xlu1 %2643 }
 0x338   :  { %v11240_v0 = vpop.permute.xlu0 %3276 }
 0x339   :  { %3282 = vrot.lane.b32.xlu1 %v15201_v24, %s8160_s30 }
 0x33a   :  { %2605 = vrot.lane.b32.xlu0 %v15427_v63, %s8161_s2 }
 0x33b   :  { %v3323_v18 = vpop.permute.xlu1 %3322 }
 0x33c   :  { %v2646_v50 = vpop.permute.xlu0 %2645 }
 0x33d   :  { %2651 = vrot.lane.b32.xlu1 %v15428_v60, %s8162_s18 }
 0x33e   :  { %3284 = vrot.lane.b32.xlu0 %v15427_v63, %s8160_s30  ;;  %v2865_v63 = vsel %vm1275_vm7, %v2849_v19, %v2548_v22  ;;  %v2850_v19 = vsel %vm1258_vm6, %v2834_v46, %v11193_v6 }
 0x33f   :  { %v2692_v37 = vpop.permute.xlu1 %2691 }
 0x340   :  { %v11250_v61 = vpop.permute.xlu0 %3324 }
 0x341   :  { %3330 = vrot.lane.b32.xlu1 %v15428_v60, %s8161_s2 }
 0x342   :  { %2653 = vrot.lane.b32.xlu0 %v15429_v38, %s8162_s18 }
 0x343   :  { %v3371_v24 = vpop.permute.xlu1 %3370 }
 0x344   :  { %v2694_v55 = vpop.permute.xlu0 %2693 }
 0x345   :  { %2699 = vrot.lane.b32.xlu1 %v11254_v8, %s8163_s19 }
 0x346   :  { %3332 = vrot.lane.b32.xlu0 %v15429_v38, %s8161_s2  ;;  %v2881_v38 = vsel %vm1292_vm3, %v2865_v63, %v2596_v34  ;;  %v15433_v34 = vld [vmem:[#allocation133_spill] sm:$0xff]  ;;  %v2433_v63 = vsel %vm517_vm2, %v2431_v40, %v2432_v10  ;;  %v2441_v10 = vrot.slane %v393_v33, 1 }
 0x347   :  { %v2740_v5 = vpop.permute.xlu1 %2739 }
 0x348   :  { %v3373_v45 = vpop.permute.xlu0 %3372 }
 0x349   :  { %3378 = vrot.lane.b32.xlu1 %v15431_v30, %s8162_s18  ;;  %v2897_v30 = vsel %vm1309_vm8, %v2881_v38, %v2644_v7  ;;  %v2866_v38 = vsel %vm1275_vm7, %v2850_v19, %v2550_v15 }
 0x34a   :  { %2701 = vrot.lane.b32.xlu0 %v393_v33, %s8163_s19  ;;  %v2913_v43 = vsel %vm1326_vm9, %v2897_v30, %v2692_v37  ;;  %v3560_v37 = vsel %vm47_vm0, %v15284_v59, %v11182_v23  ;;  %v2442_v30 = vrot.slane %v394_v17, 1 }
 0x34b   :  { %v3419_v60 = vpop.permute.xlu1 %3418  ;;  %v2929_v22 = vsel %vm1343_vm10, %v2913_v43, %v2740_v5  ;;  %v2882_v43 = vsel %vm1292_vm3, %v2866_v38, %v2598_v44  ;;  %v3576_v15 = vsel %vm1258_vm6, %v3560_v37, %v11216_v47  ;;  %v15434_v38 = vld [vmem:[#allocation65_spill] sm:$0xff] }
 0x34c   :  { %v2742_v35 = vpop.permute.xlu0 %2741  ;;  %v2898_v6 = vsel %vm1309_vm8, %v2882_v43, %v2646_v50  ;;  %v3592_v46 = vsel %vm1275_vm7, %v3576_v15, %v11231_v49  ;;  %v2443_v49 = vsel %vm517_vm2, %v2441_v10, %v2442_v30  ;;  %v8132_v43 = vld [vmem:[#allocation5 + $0xb0] sm:$0xff]  ;;  %v8133_v10 = vld [vmem:[#allocation5 + $0xc0] sm:$0xff] }
 0x34d   :  { %2747 = vrot.lane.b32.xlu1 %v15432_v2, %s8164_s20  ;;  %v2914_v40 = vsel %vm1326_vm9, %v2898_v6, %v2694_v55  ;;  %v3608_v23 = vsel %vm1292_vm3, %v3592_v46, %v3323_v18 }
 0x34e   :  { %3380 = vrot.lane.b32.xlu0 %v15433_v34, %s8162_s18  ;;  %v2930_v44 = vsel %vm1343_vm10, %v2914_v40, %v2742_v35  ;;  %v3561_v35 = vsel %vm47_vm0, %v15405_v39, %v11207_v20  ;;  %v3168_v34 = vrot.slane %v11265_v21, 2 }
 0x34f   :  { %v2788_v58 = vpop.permute.xlu1 %2787 }
 0x350   :  { %v2945_v7 = vsel %vm1360_vm11, %v2929_v22, %v2788_v58  ;;  %v3421_v42 = vpop.permute.xlu0 %3420  ;;  %v3624_v22 = vsel %vm1309_vm8, %v3608_v23, %v3371_v24  ;;  %v3577_v24 = vsel %vm1258_vm6, %v3561_v35, %v11229_v27 }
 0x351   :  { %3426 = vrot.lane.b32.xlu1 %v15432_v2, %s8163_s19  ;;  %7303 = vmatprep.mubr.msk.f32.mxu0 %vm1389_vm12, %v2945_v7  ;;  %v3640_v55 = vsel %vm1326_vm9, %v3624_v22, %v3419_v60  ;;  %v3169_v60 = vrot.slane %v11267_v41, 2  ;;  %v3593_v19 = vsel %vm1275_vm7, %v3577_v24, %v11240_v0  ;;  %v11394_v24 = vld [vmem:[#allocation3 + $0xc0] sm:$0xff] }
 0x352   :  { %2749 = vrot.lane.b32.xlu0 %v2433_v63, %s8164_s20  ;;  %v3609_v39 = vsel %vm1292_vm3, %v3593_v19, %v11250_v61  ;;  %v2835_v19 = vsel %vm47_vm0, %v11042_v4, %v11030_v12 }
 0x353   :  { %v3467_v5 = vpop.permute.xlu1 %3466  ;;  %v3625_v20 = vsel %vm1309_vm8, %v3609_v39, %v3373_v45  ;;  %v3170_v21 = vsel %vm1603_vm4, %v3168_v34, %v3169_v60  ;;  %v15440_v39 = vld [vmem:[#allocation135_spill] sm:$0xff] }
 0x354   :  { %v2790_v59 = vpop.permute.xlu0 %2789  ;;  %v3656_v33 = vsel %vm1343_vm10, %v3640_v55, %v3467_v5  ;;  %v3641_v27 = vsel %vm1326_vm9, %v3625_v20, %v3421_v42  ;;  %v15436_v5 = vld [vmem:[#allocation110_spill] sm:$0xff] }
 0x355   :  { %2795 = vrot.lane.b32.xlu1 %v15425_v16, %s8165_s16  ;;  %v2946_v50 = vsel %vm1360_vm11, %v2930_v44, %v2790_v59  ;;  %v15437_v44 = vld [vmem:[#allocation74_spill] sm:$0xff] }
 0x356   :  { %3428 = vrot.lane.b32.xlu0 %v2433_v63, %s8163_s19  ;;  %7304 = vmatmul.mubr.msk.f32.gmra.mrb[10].mxu0 %vm1389_vm12, %v2946_v50  ;;  %v15438_v50 = vld [vmem:[#allocation32_spill] sm:$0xff] }
 0x357   :  { %v3469_v47 = vpop.permute.xlu1 %3468 }
 0x358   :  { %v3515_v18 = vpop.permute.xlu0 %3514  ;;  %v3657_v0 = vsel %vm1343_vm10, %v3641_v27, %v3469_v47 }
 0x359   :  { %3474 = vrot.lane.b32.xlu1 %v15425_v16, %s8164_s20  ;;  %v3672_v58 = vsel %vm1360_vm11, %v3656_v33, %v3515_v18  ;;  %v15439_v33 = vld [vmem:[#allocation33_spill] sm:$0xff] }
 0x35a   :  { %2797 = vrot.lane.b32.xlu0 %v2443_v49, %s8165_s16  ;;  %7337 = vmatprep.mubr.msk.f32.mxu1 %vm1389_vm12, %v3672_v58 }
 0x35b   :  { %v11328_v7 = vpop.permute.xlu1 %2503 }
 0x35c   :  { %v11336_v16 = vpop.permute.xlu0 %3182 }
 0x35d   :  { %3476 = vrot.lane.b32.xlu1 %v2443_v49, %s8164_s20 }
 0x35e   :  { %3522 = vrot.lane.b32.xlu0 %v15426_v52, %s8165_s16  ;;  %v15435_v52 = vld [vmem:[#allocation66_spill] sm:$0xff] }
 0x35f   :  { %v3517_v41 = vpop.permute.xlu1 %3516 }
 0x360   :  { %v3673_v63 = vsel %vm1360_vm11, %v3657_v0, %v3517_v41  ;;  %v11346_v61 = vpop.permute.xlu0 %2505 }
 0x361   :  { %3524 = vrot.lane.b32.xlu1 %v3170_v21, %s8165_s16  ;;  %7338 = vmatmul.mubr.msk.f32.gmra.mrb[26].mxu1 %vm1389_vm12, %v3673_v63  ;;  %v2851_v21 = vsel %vm1258_vm6, %v2835_v19, %v11328_v7  ;;  %v11414_v63 = vld [vmem:[#allocation3 + $0xd0] sm:$0xff] }
 0x362   :  { %2511 = vrot.lane.b32.xlu0 %v15434_v38, %s8159_s1 }
 0x363   :  { %v2552_v45 = vpop.permute.xlu1 %2551 }
 0x364   :  { %v11352_v42 = vpop.permute.xlu0 %3184  ;;  %v2867_v0 = vsel %vm1275_vm7, %v2851_v21, %v2552_v45 }
 0x365   :  { %3190 = vrot.lane.b32.xlu1 %v15434_v38, %s8158_s23 }
 0x366   :  { %2513 = vrot.lane.b32.xlu0 %v15435_v52, %s8159_s1 }
 0x367   :  { %v11354_v17 = vpop.permute.xlu1 %3230 }
 0x368   :  { %v2554_v37 = vpop.permute.xlu0 %2553 }
 0x369   :  { %2559 = vrot.lane.b32.xlu1 %v8132_v43, %s8160_s30  ;;  %v15441_v43 = vld [vmem:[#allocation48_spill] sm:$0xff] }
 0x36a   :  { %3192 = vrot.lane.b32.xlu0 %v15435_v52, %s8158_s23 }
 0x36b   :  { %v2600_v6 = vpop.permute.xlu1 %2599 }
 0x36c   :  { %v11363_v15 = vpop.permute.xlu0 %3232  ;;  %v2883_v38 = vsel %vm1292_vm3, %v2867_v0, %v2600_v6  ;;  %v15442_v6 = vld [vmem:[#allocation137_spill] sm:$0xff] }
 0x36d   :  { %3238 = vrot.lane.b32.xlu1 %v15436_v5, %s8159_s1 }
 0x36e   :  { %2561 = vrot.lane.b32.xlu0 %v8133_v10, %s8160_s30  ;;  %v2836_v10 = vsel %vm47_vm0, %v11126_v26, %v11032_v48 }
 0x36f   :  { %v11365_v40 = vpop.permute.xlu1 %3278 }
 0x370   :  { %v2602_v30 = vpop.permute.xlu0 %2601 }
 0x371   :  { %2607 = vrot.lane.b32.xlu1 %v15205_v28, %s8161_s2 }
 0x372   :  { %3240 = vrot.lane.b32.xlu0 %v15437_v44, %s8159_s1 }
 0x373   :  { %v2648_v46 = vpop.permute.xlu1 %2647 }
 0x374   :  { %v11374_v59 = vpop.permute.xlu0 %3280  ;;  %v2899_v4 = vsel %vm1309_vm8, %v2883_v38, %v2648_v46  ;;  %v2852_v46 = vsel %vm1258_vm6, %v2836_v10, %v11346_v61  ;;  %v3562_v61 = vsel %vm47_vm0, %v15407_v32, %v11336_v16  ;;  %v15443_v38 = vld [vmem:[#allocation49_spill] sm:$0xff] }
 0x375   :  { %3286 = vrot.lane.b32.xlu1 %v15205_v28, %s8160_s30  ;;  %v2868_v21 = vsel %vm1275_vm7, %v2852_v46, %v2554_v37  ;;  %v3578_v37 = vsel %vm1258_vm6, %v3562_v61, %v11354_v17 }
 0x376   :  { %2609 = vrot.lane.b32.xlu0 %v15206_v31, %s8161_s2  ;;  %v2884_v26 = vsel %vm1292_vm3, %v2868_v21, %v2602_v30  ;;  %v3594_v30 = vsel %vm1275_vm7, %v3578_v37, %v11365_v40 }
 0x377   :  { %v3327_v23 = vpop.permute.xlu1 %3326 }
 0x378   :  { %v2650_v22 = vpop.permute.xlu0 %2649 }
 0x379   :  { %2655 = vrot.lane.b32.xlu1 %v15438_v50, %s8162_s18 }
 0x37a   :  { %3288 = vrot.lane.b32.xlu0 %v15206_v31, %s8160_s30 }
 0x37b   :  { %v2696_v47 = vpop.permute.xlu1 %2695 }
 0x37c   :  { %v11382_v55 = vpop.f32.mrb[8].mxu1  ;;  %v11388_v49 = vpop.permute.xlu0 %3328  ;;  %v2915_v45 = vsel %vm1326_vm9, %v2899_v4, %v2696_v47 }
 0x37d   :  { %3334 = vrot.lane.b32.xlu1 %v15438_v50, %s8161_s2  ;;  %v11386_v28 = vpop.f32.mrb[9].mxu1 }
 0x37e   :  { %2657 = vrot.lane.b32.xlu0 %v15439_v33, %s8162_s18 }
 0x37f   :  { %v3375_v35 = vpop.permute.xlu1 %3374 }
 0x380   :  { %v11392_v18 = vpop.f32.mrb[10].mxu1  ;;  %v2698_v58 = vpop.permute.xlu0 %2697 }
 0x381   :  { %2703 = vrot.lane.b32.xlu1 %v11394_v24, %s8163_s19  ;;  %v11398_v31 = vpop.f32.mrb[11].mxu1 }
 0x382   :  { %3336 = vrot.lane.b32.xlu0 %v15439_v33, %s8161_s2 }
 0x383   :  { %v2744_v34 = vpop.permute.xlu1 %2743 }
 0x384   :  { %v11402_v60 = vpop.f32.mrb[12].mxu1  ;;  %v3377_v27 = vpop.permute.xlu0 %3376  ;;  %v2931_v50 = vsel %vm1343_vm10, %v2915_v45, %v2744_v34  ;;  %v2900_v34 = vsel %vm1309_vm8, %v2884_v26, %v2650_v22  ;;  %v3610_v22 = vsel %vm1292_vm3, %v3594_v30, %v3327_v23  ;;  %v15448_v26 = vld [vmem:[#allocation67_spill] sm:$0xff] }
 0x385   :  { %3382 = vrot.lane.b32.xlu1 %v15440_v39, %s8162_s18  ;;  %v11409_v20 = vpop.f32.mrb[13].mxu1  ;;  %v2916_v4 = vsel %vm1326_vm9, %v2900_v34, %v2698_v58  ;;  %v3626_v17 = vsel %vm1309_vm8, %v3610_v22, %v3375_v35 }
 0x386   :  { %2705 = vrot.lane.b32.xlu0 %v11414_v63, %s8163_s19 }
 0x387   :  { %v3423_v41 = vpop.permute.xlu1 %3422 }
 0x388   :  { %v11419_v12 = vpop.f32.mrb[14].mxu1  ;;  %v2746_v7 = vpop.permute.xlu0 %2745  ;;  %v3642_v40 = vsel %vm1326_vm9, %v3626_v17, %v3423_v41 }
 0x389   :  { %2751 = vrot.lane.b32.xlu1 %v15441_v43, %s8164_s20  ;;  %v11424_v5 = vpop.f32.mrb[15].mxu1  ;;  %v2932_v10 = vsel %vm1343_vm10, %v2916_v4, %v2746_v7 }
 0x38a   :  { %3384 = vrot.lane.b32.xlu0 %v15442_v6, %s8162_s18 }
 0x38b   :  { %v2792_v33 = vpop.permute.xlu1 %2791 }
 0x38c   :  { %v2947_v19 = vsel %vm1360_vm11, %v2931_v50, %v2792_v33  ;;  %v11436_v39 = vpop.f32.mrb[16].mxu1  ;;  %v3425_v48 = vpop.permute.xlu0 %3424  ;;  %v3563_v33 = vsel %vm47_vm0, %v15418_v14, %v11352_v42 }
 0x38d   :  { %3430 = vrot.lane.b32.xlu1 %v15441_v43, %s8163_s19  ;;  %v11441_v47 = vpop.f32.mrb[17].mxu1  ;;  %7306 = vmatprep.mubr.msk.f32.mxu0 %vm1389_vm12, %v2947_v19  ;;  %v3579_v46 = vsel %vm1258_vm6, %v3563_v33, %v11363_v15 }
 0x38e   :  { %2753 = vrot.lane.b32.xlu0 %v15443_v38, %s8164_s20  ;;  %v3595_v41 = vsel %vm1275_vm7, %v3579_v46, %v11374_v59 }
 0x38f   :  { %v3471_v0 = vpop.permute.xlu1 %3470  ;;  %v3611_v14 = vsel %vm1292_vm3, %v3595_v41, %v11388_v49 }
 0x390   :  { %v11454_v45 = vpop.f32.mrb[18].mxu1  ;;  %v2794_v16 = vpop.permute.xlu0 %2793  ;;  %v3658_v23 = vsel %vm1343_vm10, %v3642_v40, %v3471_v0 }
 0x391   :  { %15444 = vst [vmem:[#allocation98_spill] sm:$0xff] %v11454_v45  ;;  %2799 = vrot.lane.b32.xlu1 %v15435_v52, %s8165_s16  ;;  %v11461_v32 = vpop.f32.mrb[19].mxu1  ;;  %v2948_v50 = vsel %vm1360_vm11, %v2932_v10, %v2794_v16  ;;  %v8136_v10 = vld [vmem:[#allocation5 + $0xd0] sm:$0xff] }
 0x392   :  { %15445 = vst [vmem:[#allocation22_spill] sm:$0xff] %v11461_v32  ;;  %3432 = vrot.lane.b32.xlu0 %v15443_v38, %s8163_s19  ;;  %7307 = vmatmul.mubr.msk.f32.gmra.mrb[12].mxu0 %vm1389_vm12, %v2948_v50  ;;  %v15452_v50 = vld [vmem:[#allocation119_spill] sm:$0xff] }
 0x393   :  { %v3473_v58 = vpop.permute.xlu1 %3472 }
 0x394   :  { %v11470_v7 = vpop.f32.mrb[20].mxu1  ;;  %v3519_v6 = vpop.permute.xlu0 %3518 }
 0x395   :  { %15446 = vst [vmem:[#allocation77_spill] sm:$0xff] %v11470_v7  ;;  %3478 = vrot.lane.b32.xlu1 %v15435_v52, %s8164_s20  ;;  %v11478_v35 = vpop.f32.mrb[21].mxu1  ;;  %v3674_v19 = vsel %vm1360_vm11, %v3658_v23, %v3519_v6  ;;  %v3627_v52 = vsel %vm1309_vm8, %v3611_v14, %v3377_v27  ;;  %v15453_v23 = vld [vmem:[#allocation95_spill] sm:$0xff] }
 0x396   :  { %15447 = vst [vmem:[#allocation134_spill] sm:$0xff] %v11478_v35  ;;  %2515 = vrot.lane.b32.xlu0 %v15448_v26, %s8159_s1  ;;  %7340 = vmatprep.mubr.msk.f32.mxu1 %vm1389_vm12, %v3674_v19  ;;  %v3643_v59 = vsel %vm1326_vm9, %v3627_v52, %v3425_v48  ;;  %v15451_v48 = vld [vmem:[#allocation68_spill] sm:$0xff]  ;;  %v15454_v19 = vld [vmem:[#allocation34_spill] sm:$0xff] }
 0x397   :  { %v2508_v21 = vpop.permute.xlu1 %2507  ;;  %v3659_v34 = vsel %vm1343_vm10, %v3643_v59, %v3473_v58  ;;  %v8137_v58 = vld [vmem:[#allocation5 + $0xe0] sm:$0xff]  ;;  %v11819_v35 = vld [vmem:[#allocation2 + $0x138] sm:$0x3] }
 0x398   :  { %v11490_v42 = vpop.f32.mrb[22].mxu1  ;;  %v11497_v61 = vpop.permute.xlu0 %3186  ;;  %v11537_v59 = vld [vmem:[#allocation3 + $0xe0] sm:$0xff] }
 0x399   :  { %15449 = vst [vmem:[#allocation143_spill] sm:$0xff] %v11490_v42  ;;  %2801 = vrot.lane.b32.xlu1 %v15448_v26, %s8165_s16  ;;  %v11495_v15 = vpop.f32.mrb[23].mxu1 }
 0x39a   :  { %15450 = vst [vmem:[#allocation91_spill] sm:$0xff] %v11495_v15  ;;  %3194 = vrot.lane.b32.xlu0 %v15448_v26, %s8158_s23  ;;  %v11550_v15 = vld [vmem:[#allocation3 + $0xf0] sm:$0xff] }
 0x39b   :  { %v3521_v0 = vpop.permute.xlu1 %3520 }
 0x39c   :  { %v3675_v49 = vsel %vm1360_vm11, %v3659_v34, %v3521_v0  ;;  %v2510_v27 = vpop.permute.xlu0 %2509 }
 0x39d   :  { %3480 = vrot.lane.b32.xlu1 %v15448_v26, %s8164_s20  ;;  %7341 = vmatmul.mubr.msk.f32.gmra.mrb[28].mxu1 %vm1389_vm12, %v3675_v49  ;;  %v15456_v49 = vld [vmem:[#allocation138_spill] sm:$0xff] }
 0x39e   :  { %3526 = vrot.lane.b32.xlu0 %v15437_v44, %s8165_s16 }
 0x39f   :  { %v2556_v37 = vpop.permute.xlu1 %2555 }
 0x3a0   :  { %v11511_v4 = vpop.permute.xlu0 %3188 }
 0x3a1   :  { %2517 = vrot.lane.b32.xlu1 %v15451_v48, %s8159_s1 }
 0x3a2   :  { %2563 = vrot.lane.b32.xlu0 %v8136_v10, %s8160_s30 }
 0x3a3   :  { %v3235_v30 = vpop.permute.xlu1 %3234 }
 0x3a4   :  { %v2558_v16 = vpop.permute.xlu0 %2557 }
 0x3a5   :  { %3196 = vrot.lane.b32.xlu1 %v15451_v48, %s8158_s23 }
 0x3a6   :  { %3242 = vrot.lane.b32.xlu0 %v15452_v50, %s8159_s1 }
 0x3a7   :  { %v2604_v22 = vpop.permute.xlu1 %2603 }
 0x3a8   :  { %v3237_v44 = vpop.permute.xlu0 %3236 }
 0x3a9   :  { %3528 = vrot.lane.b32.xlu1 %v15452_v50, %s8165_s16 }
 0x3aa   :  { %2565 = vrot.lane.b32.xlu0 %v8137_v58, %s8160_s30 }
 0x3ab   :  { %v3283_v17 = vpop.permute.xlu1 %3282 }
 0x3ac   :  { %v2606_v40 = vpop.permute.xlu0 %2605 }
 0x3ad   :  { %2611 = vrot.lane.b32.xlu1 %v15207_v25, %s8161_s2 }
 0x3ae   :  { %3244 = vrot.lane.b32.xlu0 %v15453_v23, %s8159_s1 }
 0x3af   :  { %v2652_v33 = vpop.permute.xlu1 %2651 }
 0x3b0   :  { %v3285_v6 = vpop.permute.xlu0 %3284 }
 0x3b1   :  { %3290 = vrot.lane.b32.xlu1 %v15207_v25, %s8160_s30  ;;  %v15455_v25 = vld [vmem:[#allocation35_spill] sm:$0xff] }
 0x3b2   :  { %2613 = vrot.lane.b32.xlu0 %v15208_v1, %s8161_s2 }
 0x3b3   :  { %v3331_v46 = vpop.permute.xlu1 %3330 }
 0x3b4   :  { %v2654_v41 = vpop.permute.xlu0 %2653 }
 0x3b5   :  { %2659 = vrot.lane.b32.xlu1 %v15454_v19, %s8162_s18 }
 0x3b6   :  { %3292 = vrot.lane.b32.xlu0 %v15208_v1, %s8160_s30  ;;  %v2837_v1 = vsel %vm47_vm0, %v11138_v56, %v11038_v9  ;;  %v15457_v9 = vld [vmem:[#allocation51_spill] sm:$0xff] }
 0x3b7   :  { %v2700_v26 = vpop.permute.xlu1 %2699  ;;  %v2853_v50 = vsel %vm1258_vm6, %v2837_v1, %v2508_v21  ;;  %v2838_v21 = vsel %vm47_vm0, %v11254_v8, %v11040_v3  ;;  %v3564_v8 = vsel %vm47_vm0, %v15421_v36, %v11497_v61 }
 0x3b8   :  { %v3333_v14 = vpop.permute.xlu0 %3332  ;;  %v2869_v58 = vsel %vm1275_vm7, %v2853_v50, %v2556_v37  ;;  %v15458_v50 = vld [vmem:[#allocation139_spill] sm:$0xff] }
 0x3b9   :  { %3338 = vrot.lane.b32.xlu1 %v15454_v19, %s8161_s2 }
 0x3ba   :  { %2661 = vrot.lane.b32.xlu0 %v15455_v25, %s8162_s18 }
 0x3bb   :  { %v3379_v52 = vpop.permute.xlu1 %3378 }
 0x3bc   :  { %v2702_v34 = vpop.permute.xlu0 %2701 }
 0x3bd   :  { %2707 = vrot.lane.b32.xlu1 %v11537_v59, %s8163_s19 }
 0x3be   :  { %3340 = vrot.lane.b32.xlu0 %v15455_v25, %s8161_s2  ;;  %v2885_v25 = vsel %vm1292_vm3, %v2869_v58, %v2604_v22  ;;  %v2854_v22 = vsel %vm1258_vm6, %v2838_v21, %v2510_v27  ;;  %v15459_v27 = vld [vmem:[#allocation53_spill] sm:$0xff] }
 0x3bf   :  { %v2748_v0 = vpop.permute.xlu1 %2747  ;;  %v2901_v42 = vsel %vm1309_vm8, %v2885_v25, %v2652_v33  ;;  %v2870_v58 = vsel %vm1275_vm7, %v2854_v22, %v2558_v16  ;;  %v3580_v16 = vsel %vm1258_vm6, %v3564_v8, %v3235_v30  ;;  %v15460_v22 = vld [vmem:[#allocation69_spill] sm:$0xff]  ;;  %v15462_v8 = vld [vmem:[#allocation70_spill] sm:$0xff] }
 0x3c0   :  { %v3381_v10 = vpop.permute.xlu0 %3380  ;;  %v2886_v3 = vsel %vm1292_vm3, %v2870_v58, %v2606_v40  ;;  %v3596_v40 = vsel %vm1275_vm7, %v3580_v16, %v3283_v17  ;;  %v15461_v58 = vld [vmem:[#allocation84_spill] sm:$0xff] }
 0x3c1   :  { %3386 = vrot.lane.b32.xlu1 %v15456_v49, %s8162_s18  ;;  %v2917_v49 = vsel %vm1326_vm9, %v2901_v42, %v2700_v26  ;;  %v2902_v26 = vsel %vm1309_vm8, %v2886_v3, %v2654_v41  ;;  %v3612_v41 = vsel %vm1292_vm3, %v3596_v40, %v3331_v46 }
 0x3c2   :  { %2709 = vrot.lane.b32.xlu0 %v11550_v15, %s8163_s19  ;;  %v2933_v37 = vsel %vm1343_vm10, %v2917_v49, %v2748_v0  ;;  %v2918_v25 = vsel %vm1326_vm9, %v2902_v26, %v2702_v34  ;;  %v3565_v49 = vsel %vm47_vm0, %v15432_v2, %v11511_v4 }
 0x3c3   :  { %v3427_v19 = vpop.permute.xlu1 %3426  ;;  %v3581_v61 = vsel %vm1258_vm6, %v3565_v49, %v3237_v44  ;;  %v8141_v49 = vld [vmem:[#allocation5 + $0x100] sm:$0xff] }
 0x3c4   :  { %v2750_v56 = vpop.permute.xlu0 %2749  ;;  %v3597_v34 = vsel %vm1275_vm7, %v3581_v61, %v3285_v6 }
 0x3c5   :  { %2755 = vrot.lane.b32.xlu1 %v15457_v9, %s8164_s20  ;;  %v2934_v21 = vsel %vm1343_vm10, %v2918_v25, %v2750_v56  ;;  %v3613_v2 = vsel %vm1292_vm3, %v3597_v34, %v3333_v14  ;;  %v15464_v34 = vld [vmem:[#allocation36_spill] sm:$0xff] }
 0x3c6   :  { %3388 = vrot.lane.b32.xlu0 %v15458_v50, %s8162_s18  ;;  %v3629_v44 = vsel %vm1309_vm8, %v3613_v2, %v3381_v10 }
 0x3c7   :  { %v2796_v1 = vpop.permute.xlu1 %2795 }
 0x3c8   :  { %v2949_v33 = vsel %vm1360_vm11, %v2933_v37, %v2796_v1  ;;  %v3429_v42 = vpop.permute.xlu0 %3428  ;;  %v3628_v37 = vsel %vm1309_vm8, %v3612_v41, %v3379_v52 }
 0x3c9   :  { %3434 = vrot.lane.b32.xlu1 %v15457_v9, %s8163_s19  ;;  %7309 = vmatprep.mubr.msk.f32.mxu0 %vm1389_vm12, %v2949_v33  ;;  %v3644_v4 = vsel %vm1326_vm9, %v3628_v37, %v3427_v19  ;;  %v3645_v46 = vsel %vm1326_vm9, %v3629_v44, %v3429_v42  ;;  %v15465_v44 = vld [vmem:[#allocation37_spill] sm:$0xff] }
 0x3ca   :  { %2757 = vrot.lane.b32.xlu0 %v15459_v27, %s8164_s20 }
 0x3cb   :  { %v3475_v0 = vpop.permute.xlu1 %3474 }
 0x3cc   :  { %v2798_v36 = vpop.permute.xlu0 %2797  ;;  %v3660_v17 = vsel %vm1343_vm10, %v3644_v4, %v3475_v0 }
 0x3cd   :  { %2803 = vrot.lane.b32.xlu1 %v15451_v48, %s8165_s16  ;;  %v2950_v30 = vsel %vm1360_vm11, %v2934_v21, %v2798_v36  ;;  %v15463_v36 = vld [vmem:[#allocation111_spill] sm:$0xff] }
 0x3ce   :  { %3436 = vrot.lane.b32.xlu0 %v15459_v27, %s8163_s19  ;;  %7310 = vmatmul.mubr.msk.f32.gmra.mrb[14].mxu0 %vm1389_vm12, %v2950_v30 }
 0x3cf   :  { %v3477_v1 = vpop.permute.xlu1 %3476 }
 0x3d0   :  { %v3523_v6 = vpop.permute.xlu0 %3522  ;;  %v3661_v56 = vsel %vm1343_vm10, %v3645_v46, %v3477_v1 }
 0x3d1   :  { %3482 = vrot.lane.b32.xlu1 %v15451_v48, %s8164_s20  ;;  %v3676_v52 = vsel %vm1360_vm11, %v3660_v17, %v3523_v6  ;;  %v11663_v17 = vld [vmem:[#allocation3 + $0x100] sm:$0xff] }
 0x3d2   :  { %2805 = vrot.lane.b32.xlu0 %v15460_v22, %s8165_s16  ;;  %7343 = vmatprep.mubr.msk.f32.mxu1 %vm1389_vm12, %v3676_v52 }
 0x3d3   :  { %v3525_v50 = vpop.permute.xlu1 %3524 }
 0x3d4   :  { %v3677_v14 = vsel %vm1360_vm11, %v3661_v56, %v3525_v50  ;;  %v2512_v48 = vpop.permute.xlu0 %2511  ;;  %v15466_v56 = vld [vmem:[#allocation140_spill] sm:$0xff] }
 0x3d5   :  { %3484 = vrot.lane.b32.xlu1 %v15460_v22, %s8164_s20  ;;  %7344 = vmatmul.mubr.msk.f32.gmra.mrb[30].mxu1 %vm1389_vm12, %v3677_v14 }
 0x3d6   :  { %3530 = vrot.lane.b32.xlu0 %v15453_v23, %s8165_s16  ;;  %v8140_v23 = vld [vmem:[#allocation5 + $0xf0] sm:$0xff] }
 0x3d7   :  { %v11611_v10 = vpop.permute.xlu1 %3190 }
 0x3d8   :  { %v11617_v19 = vpop.permute.xlu0 %2513 }
 0x3d9   :  { %2519 = vrot.lane.b32.xlu1 %v15460_v22, %s8159_s1 }
 0x3da   :  { %3198 = vrot.lane.b32.xlu0 %v15460_v22, %s8158_s23 }
 0x3db   :  { %v2560_v33 = vpop.permute.xlu1 %2559 }
 0x3dc   :  { %v11623_v42 = vpop.permute.xlu0 %3192 }
 0x3dd   :  { %3532 = vrot.lane.b32.xlu1 %v15461_v58, %s8165_s16 }
 0x3de   :  { %2521 = vrot.lane.b32.xlu0 %v15462_v8, %s8159_s1 }
 0x3df   :  { %v11625_v3 = vpop.permute.xlu1 %3238 }
 0x3e0   :  { %v2562_v26 = vpop.permute.xlu0 %2561 }
 0x3e1   :  { %2567 = vrot.lane.b32.xlu1 %v8140_v23, %s8160_s30  ;;  %v11675_v23 = vld [vmem:[#allocation3 + $0x110] sm:$0xff] }
 0x3e2   :  { %3200 = vrot.lane.b32.xlu0 %v15462_v8, %s8158_s23  ;;  %15467 = vst [vmem:[#allocation101_spill] sm:$0xff] %v11675_v23 }
 0x3e3   :  { %v2608_v0 = vpop.permute.xlu1 %2607 }
 0x3e4   :  { %v11634_v16 = vpop.permute.xlu0 %3240 }
 0x3e5   :  { %3246 = vrot.lane.b32.xlu1 %v15461_v58, %s8159_s1 }
 0x3e6   :  { %2569 = vrot.lane.b32.xlu0 %v8141_v49, %s8160_s30 }
 0x3e7   :  { %v11636_v25 = vpop.permute.xlu1 %3286 }
 0x3e8   :  { %v2610_v40 = vpop.permute.xlu0 %2609 }
 0x3e9   :  { %2615 = vrot.lane.b32.xlu1 %v15211_v57, %s8161_s2 }
 0x3ea   :  { %3248 = vrot.lane.b32.xlu0 %v15463_v36, %s8159_s1 }
 0x3eb   :  { %v2656_v21 = vpop.permute.xlu1 %2655 }
 0x3ec   :  { %v11645_v61 = vpop.permute.xlu0 %3288 }
 0x3ed   :  { %3294 = vrot.lane.b32.xlu1 %v15211_v57, %s8160_s30 }
 0x3ee   :  { %2617 = vrot.lane.b32.xlu0 %v15212_v11, %s8161_s2 }
 0x3ef   :  { %v3335_v41 = vpop.permute.xlu1 %3334 }
 0x3f0   :  { %v11649_v30 = vpop.f32.mrb[8].mxu0  ;;  %v2658_v1 = vpop.permute.xlu0 %2657 }
 0x3f1   :  { %2663 = vrot.lane.b32.xlu1 %v15464_v34, %s8162_s18  ;;  %v11653_v37 = vpop.f32.mrb[9].mxu0 }
 0x3f2   :  { %3296 = vrot.lane.b32.xlu0 %v15212_v11, %s8160_s30  ;;  %v8143_v11 = vld [vmem:[#allocation3 + $0xb0] sm:$0xff] }
 0x3f3   :  { %v2704_v2 = vpop.permute.xlu1 %2703  ;;  %v2839_v52 = vsel %vm47_vm0, %v8143_v11, %v11048_v54 }
 0x3f4   :  { %v11659_v57 = vpop.permute.xlu0 %3336  ;;  %v2855_v22 = vsel %vm1258_vm6, %v2839_v52, %v2512_v48 }
 0x3f5   :  { %3342 = vrot.lane.b32.xlu1 %v15464_v34, %s8161_s2  ;;  %v2871_v14 = vsel %vm1275_vm7, %v2855_v22, %v2560_v33  ;;  %v15469_v22 = vld [vmem:[#allocation141_spill] sm:$0xff] }
 0x3f6   :  { %2665 = vrot.lane.b32.xlu0 %v15465_v44, %s8162_s18  ;;  %v2887_v49 = vsel %vm1292_vm3, %v2871_v14, %v2608_v0 }
 0x3f7   :  { %v3383_v4 = vpop.permute.xlu1 %3382  ;;  %v2903_v54 = vsel %vm1309_vm8, %v2887_v49, %v2656_v21  ;;  %v2840_v21 = vsel %vm47_vm0, %v11394_v24, %v11050_v29 }
 0x3f8   :  { %v2706_v6 = vpop.permute.xlu0 %2705  ;;  %v2919_v33 = vsel %vm1326_vm9, %v2903_v54, %v2704_v2  ;;  %v2856_v2 = vsel %vm1258_vm6, %v2840_v21, %v11617_v19  ;;  %v15470_v54 = vld [vmem:[#allocation55_spill] sm:$0xff] }
 0x3f9   :  { %2711 = vrot.lane.b32.xlu1 %v11663_v17, %s8163_s19 }
 0x3fa   :  { %3344 = vrot.lane.b32.xlu0 %v15465_v44, %s8161_s2  ;;  %v15468_v44 = vld [vmem:[#allocation54_spill] sm:$0xff] }
 0x3fb   :  { %v2752_v46 = vpop.permute.xlu1 %2751 }
 0x3fc   :  { %v3385_v50 = vpop.permute.xlu0 %3384  ;;  %v2935_v52 = vsel %vm1343_vm10, %v2919_v33, %v2752_v46  ;;  %v2872_v46 = vsel %vm1275_vm7, %v2856_v2, %v2562_v26  ;;  %v15472_v2 = vld [vmem:[#allocation71_spill] sm:$0xff] }
 0x3fd   :  { %3390 = vrot.lane.b32.xlu1 %v15466_v56, %s8162_s18  ;;  %v2888_v33 = vsel %vm1292_vm3, %v2872_v46, %v2610_v40 }
 0x3fe   :  { %2713 = vrot.lane.b32.xlu0 %v11675_v23, %s8163_s19 }
 0x3ff   :  { %v3431_v58 = vpop.permute.xlu1 %3430 }
 0x400   :  { %v11680_v34 = vpop.f32.mrb[24].mxu1  ;;  %v2754_v48 = vpop.permute.xlu0 %2753 }
 0x401   :  { %2759 = vrot.lane.b32.xlu1 %v15468_v44, %s8164_s20  ;;  %v11685_v11 = vpop.f32.mrb[25].mxu1 }
 0x402   :  { %3392 = vrot.lane.b32.xlu0 %v15469_v22, %s8162_s18 }
 0x403   :  { %v2800_v56 = vpop.permute.xlu1 %2799 }
 0x404   :  { %v2951_v0 = vsel %vm1360_vm11, %v2935_v52, %v2800_v56  ;;  %v3433_v14 = vpop.permute.xlu0 %3432  ;;  %v2904_v52 = vsel %vm1309_vm8, %v2888_v33, %v2658_v1  ;;  %v15471_v56 = vld [vmem:[#allocation47_spill] sm:$0xff] }
 0x405   :  { %3438 = vrot.lane.b32.xlu1 %v15468_v44, %s8163_s19  ;;  %7312 = vmatprep.mubr.msk.f32.mxu0 %vm1389_vm12, %v2951_v0  ;;  %v2920_v24 = vsel %vm1326_vm9, %v2904_v52, %v2706_v6  ;;  %v3566_v19 = vsel %vm47_vm0, %v15471_v56, %v11611_v10 }
 0x406   :  { %2761 = vrot.lane.b32.xlu0 %v15470_v54, %s8164_s20  ;;  %v2936_v26 = vsel %vm1343_vm10, %v2920_v24, %v2754_v48  ;;  %v3582_v40 = vsel %vm1258_vm6, %v3566_v19, %v11625_v3  ;;  %v15474_v19 = vld [vmem:[#allocation72_spill] sm:$0xff] }
 0x407   :  { %v3479_v49 = vpop.permute.xlu1 %3478  ;;  %v3598_v0 = vsel %vm1275_vm7, %v3582_v40, %v11636_v25 }
 0x408   :  { %v11707_v29 = vpop.permute.xlu0 %2515  ;;  %v3614_v6 = vsel %vm1292_vm3, %v3598_v0, %v3335_v41  ;;  %v3567_v41 = vsel %vm47_vm0, %v15441_v43, %v11623_v42  ;;  %v15473_v42 = vld [vmem:[#allocation75_spill] sm:$0xff] }
 0x409   :  { %2807 = vrot.lane.b32.xlu1 %v15462_v8, %s8165_s16  ;;  %v3630_v48 = vsel %vm1309_vm8, %v3614_v6, %v3383_v4 }
 0x40a   :  { %3440 = vrot.lane.b32.xlu0 %v15470_v54, %s8163_s19  ;;  %v3646_v3 = vsel %vm1326_vm9, %v3630_v48, %v3431_v58  ;;  %v3583_v58 = vsel %vm1258_vm6, %v3567_v41, %v11634_v16  ;;  %v15475_v48 = vld [vmem:[#allocation121_spill] sm:$0xff]  ;;  %v15481_v54 = vld [vmem:[#allocation56_spill] sm:$0xff] }
 0x40b   :  { %v2802_v22 = vpop.permute.xlu1 %2801  ;;  %v3662_v46 = vsel %vm1343_vm10, %v3646_v3, %v3479_v49  ;;  %v3599_v49 = vsel %vm1275_vm7, %v3583_v58, %v11645_v61 }
 0x40c   :  { %v2952_v1 = vsel %vm1360_vm11, %v2936_v26, %v2802_v22  ;;  %v11724_v10 = vpop.permute.xlu0 %3194  ;;  %v8145_v22 = vld [vmem:[#allocation5 + $0x110] sm:$0xff] }
 0x40d   :  { %3486 = vrot.lane.b32.xlu1 %v15462_v8, %s8164_s20  ;;  %7313 = vmatmul.mubr.msk.f32.gmra.mrb[16].mxu0 %vm1389_vm12, %v2952_v1  ;;  %v8146_v1 = vld [vmem:[#allocation5 + $0x120] sm:$0xff] }
 0x40e   :  { %2809 = vrot.lane.b32.xlu0 %v15472_v2, %s8165_s16 }
 0x40f   :  { %v3481_v21 = vpop.permute.xlu1 %3480 }
 0x410   :  { %v3527_v8 = vpop.permute.xlu0 %3526 }
 0x411   :  { %3488 = vrot.lane.b32.xlu1 %v15472_v2, %s8164_s20  ;;  %v3678_v25 = vsel %vm1360_vm11, %v3662_v46, %v3527_v8  ;;  %v15476_v8 = vld [vmem:[#allocation96_spill] sm:$0xff] }
 0x412   :  { %3534 = vrot.lane.b32.xlu0 %v15463_v36, %s8165_s16  ;;  %7346 = vmatprep.mubr.msk.f32.mxu1 %vm1389_vm12, %v3678_v25  ;;  %v3615_v36 = vsel %vm1292_vm3, %v3599_v49, %v11659_v57  ;;  %v15477_v25 = vld [vmem:[#allocation38_spill] sm:$0xff] }
 0x413   :  { %v11735_v33 = vpop.permute.xlu1 %2517  ;;  %v3631_v43 = vsel %vm1309_vm8, %v3615_v36, %v3385_v50  ;;  %v15478_v36 = vld [vmem:[#allocation108_spill] sm:$0xff] }
 0x414   :  { %v2564_v4 = vpop.permute.xlu0 %2563  ;;  %v3647_v16 = vsel %vm1326_vm9, %v3631_v43, %v3433_v14 }
 0x415   :  { %2523 = vrot.lane.b32.xlu1 %v15472_v2, %s8159_s1  ;;  %v3663_v56 = vsel %vm1343_vm10, %v3647_v16, %v3481_v21 }
 0x416   :  { %3202 = vrot.lane.b32.xlu0 %v15472_v2, %s8158_s23 }
 0x417   :  { %v11749_v52 = vpop.permute.xlu1 %3196 }
 0x418   :  { %v11758_v24 = vpop.permute.xlu0 %3242 }
 0x419   :  { %3536 = vrot.lane.b32.xlu1 %v15473_v42, %s8165_s16 }
 0x41a   :  { %2525 = vrot.lane.b32.xlu0 %v15474_v19, %s8159_s1 }
 0x41b   :  { %v3529_v61 = vpop.permute.xlu1 %3528 }
 0x41c   :  { %v3679_v26 = vsel %vm1360_vm11, %v3663_v56, %v3529_v61  ;;  %v2566_v57 = vpop.permute.xlu0 %2565 }
 0x41d   :  { %2571 = vrot.lane.b32.xlu1 %v8145_v22, %s8160_s30  ;;  %7347 = vmatmul.mubr.msk.f32.gmra.mrb[32].mxu1 %vm1389_vm12, %v3679_v26  ;;  %v411_v26 = vld [vmem:[#allocation3 + $0x130] sm:$0xff]  ;;  %v2841_v22 = vsel %vm47_vm0, %v11414_v63, %v11056_v51  ;;  %v2435_v63 = vrot.slane %v11819_v35, 1 }
 0x41e   :  { %3204 = vrot.lane.b32.xlu0 %v15474_v19, %s8158_s23  ;;  %v2857_v7 = vsel %vm1258_vm6, %v2841_v22, %v11707_v29 }
 0x41f   :  { %v2612_v50 = vpop.permute.xlu1 %2611  ;;  %v2873_v32 = vsel %vm1275_vm7, %v2857_v7, %v2564_v4  ;;  %v2842_v7 = vsel %vm47_vm0, %v11537_v59, %v11058_v13  ;;  %v412_v59 = vld [vmem:[#allocation3 + $0x138] sm:$0x3] }
 0x420   :  { %v11771_v14 = vpop.permute.xlu0 %3244  ;;  %v2889_v45 = vsel %vm1292_vm3, %v2873_v32, %v2612_v50  ;;  %v15482_v32 = vld [vmem:[#allocation9_spill] sm:$0xff]  ;;  %v2858_v50 = vsel %vm1258_vm6, %v2842_v7, %v11735_v33 }
 0x421   :  { %3250 = vrot.lane.b32.xlu1 %v15473_v42, %s8159_s1  ;;  %v11802_v42 = vld [vmem:[#allocation3 + $0x120] sm:$0xff]  ;;  %v2874_v22 = vsel %vm1275_vm7, %v2858_v50, %v2566_v57 }
 0x422   :  { %2573 = vrot.lane.b32.xlu0 %v8146_v1, %s8160_s30  ;;  %15479 = vst [vmem:[#allocation118_spill] sm:$0xff] %v11802_v42  ;;  %v15480_v1 = vld [vmem:[#allocation142_spill] sm:$0xff]  ;;  %v4138_v50 = vld [vmem:[%s14662_s6] sm:$0xff] }
 0x423   :  { %v11773_v40 = vpop.permute.xlu1 %3290 }
 0x424   :  { %v2614_v0 = vpop.permute.xlu0 %2613 }
 0x425   :  { %2619 = vrot.lane.b32.xlu1 %v15329_v62, %s8161_s2 }
 0x426   :  { %3252 = vrot.lane.b32.xlu0 %v15475_v48, %s8159_s1 }
 0x427   :  { %v2660_v6 = vpop.permute.xlu1 %2659 }
 0x428   :  { %v11782_v21 = vpop.permute.xlu0 %3292 }
 0x429   :  { %3298 = vrot.lane.b32.xlu1 %v15329_v62, %s8160_s30  ;;  %v11784_v2 = vpop.f32.mrb[10].mxu0 }
 0x42a   :  { %v11786_v46 = vpop.f32.mrb[11].mxu0  ;;  %2621 = vrot.lane.b32.xlu0 %v15476_v8, %s8161_s2 }
 0x42b   :  { %v3339_v3 = vpop.permute.xlu1 %3338 }
 0x42c   :  { %v2662_v41 = vpop.permute.xlu0 %2661 }
 0x42d   :  { %2667 = vrot.lane.b32.xlu1 %v15477_v25, %s8162_s18 }
 0x42e   :  { %3300 = vrot.lane.b32.xlu0 %v15476_v8, %s8160_s30 }
 0x42f   :  { %v2708_v58 = vpop.permute.xlu1 %2707 }
 0x430   :  { %v11796_v62 = vpop.permute.xlu0 %3340 }
 0x431   :  { %3346 = vrot.lane.b32.xlu1 %v15477_v25, %s8161_s2  ;;  %v11817_v25 = vld [vmem:[#allocation2 + $0x130] sm:$0xff] }
 0x432   :  { %2669 = vrot.lane.b32.xlu0 %v15478_v36, %s8162_s18  ;;  %v2434_v51 = vrot.slane %v11817_v25, 1 }
 0x433   :  { %v3387_v49 = vpop.permute.xlu1 %3386 }
 0x434   :  { %v11800_v43 = vpop.f32.mrb[26].mxu1  ;;  %v2710_v56 = vpop.permute.xlu0 %2709 }
 0x435   :  { %2715 = vrot.lane.b32.xlu1 %v11802_v42, %s8163_s19  ;;  %v11806_v16 = vpop.f32.mrb[27].mxu1 }
 0x436   :  { %3348 = vrot.lane.b32.xlu0 %v15478_v36, %s8161_s2 }
 0x437   :  { %v2756_v61 = vpop.permute.xlu1 %2755 }
 0x438   :  { %v11815_v8 = vpop.permute.xlu0 %3388 }
 0x439   :  { %3394 = vrot.lane.b32.xlu1 %v15480_v1, %s8162_s18  ;;  %v2905_v1 = vsel %vm1309_vm8, %v2889_v45, %v2660_v6  ;;  %v2436_v6 = vsel %vm517_vm2, %v2434_v51, %v2435_v63  ;;  %v2444_v63 = vrot.slane %v411_v26, 1 }
 0x43a   :  { %2717 = vrot.lane.b32.xlu0 %v411_v26, %s8163_s19  ;;  %v2921_v23 = vsel %vm1326_vm9, %v2905_v1, %v2708_v58  ;;  %v3568_v58 = vsel %vm47_vm0, %v15443_v38, %v11724_v10  ;;  %v2445_v1 = vrot.slane %v412_v59, 1 }
 0x43b   :  { %v3435_v36 = vpop.permute.xlu1 %3434  ;;  %v2937_v29 = vsel %vm1343_vm10, %v2921_v23, %v2756_v61  ;;  %v2890_v23 = vsel %vm1292_vm3, %v2874_v22, %v2614_v0  ;;  %v3584_v57 = vsel %vm1258_vm6, %v3568_v58, %v11758_v24 }
 0x43c   :  { %v2758_v42 = vpop.permute.xlu0 %2757  ;;  %v2906_v33 = vsel %vm1309_vm8, %v2890_v23, %v2662_v41  ;;  %v3600_v7 = vsel %vm1275_vm7, %v3584_v57, %v11773_v40  ;;  %v2446_v40 = vsel %vm517_vm2, %v2444_v63, %v2445_v1 }
 0x43d   :  { %2763 = vrot.lane.b32.xlu1 %v15481_v54, %s8164_s20  ;;  %v2922_v51 = vsel %vm1326_vm9, %v2906_v33, %v2710_v56  ;;  %v3616_v10 = vsel %vm1292_vm3, %v3600_v7, %v3339_v3 }
 0x43e   :  { %3396 = vrot.lane.b32.xlu0 %v15482_v32, %s8162_s18  ;;  %v2938_v0 = vsel %vm1343_vm10, %v2922_v51, %v2758_v42  ;;  %v3569_v42 = vsel %vm47_vm0, %v15457_v9, %v11749_v52  ;;  %v3171_v32 = vrot.slane %v11817_v25, 2  ;;  %v4139_v9 = vld [vmem:[%s14662_s6 + $0x8] sm:$0xf]  ;;  %s8167_s6 = smov 3  }
 0x43f   :  { %v2804_v4 = vpop.permute.xlu1 %2803 }
 0x440   :  { %v2953_v45 = vsel %vm1360_vm11, %v2937_v29, %v2804_v4  ;;  %v3437_v13 = vpop.permute.xlu0 %3436  ;;  %v3632_v29 = vsel %vm1309_vm8, %v3616_v10, %v3387_v49  ;;  %v3585_v49 = vsel %vm1258_vm6, %v3569_v42, %v11771_v14  ;;  %v7418_v14 = vpack.c.bf16 %v4139_v9, %v4138_v50 }
 0x441   :  { %3442 = vrot.lane.b32.xlu1 %v15481_v54, %s8163_s19  ;;  %7315 = vmatprep.mubr.msk.f32.mxu0 %vm1389_vm12, %v2953_v45  ;;  %v3648_v56 = vsel %vm1326_vm9, %v3632_v29, %v3435_v36  ;;  %v3172_v36 = vrot.slane %v11819_v35, 2  ;;  %v3601_v52 = vsel %vm1275_vm7, %v3585_v49, %v11782_v21  ;;  %v11893_v35 = vld [vmem:[%s14661_s5] ss:$0 sm:$0xff] }
 0x442   :  { %2765 = vrot.lane.b32.xlu0 %v2436_v6, %s8164_s20  ;;  %v3617_v25 = vsel %vm1292_vm3, %v3601_v52, %v11796_v62  ;;  %v2333_v21 = vadd.f32 %v11893_v35, %v11386_v28  ;;  %7420 = vmatprep.subr.msk.bf16.mxu0 %vm7419_vm14, %v7418_v14  ;;  %v2338_v62 = vadd.f32 %v11382_v55, %v11893_v35 }
 0x443   :  { %v3483_v61 = vpop.permute.xlu1 %3482  ;;  %v3633_v45 = vsel %vm1309_vm8, %v3617_v25, %v11815_v8  ;;  %v3173_v59 = vsel %vm1603_vm4, %v3171_v32, %v3172_v36  ;;  %7423 = vmatpush3.bf16.msk.msra.mxu0 %vm7419_vm14, %v7418_v14  ;;  %v3074_v33 = vadd.f32 %v11893_v35, %v11653_v37  ;;  %v3079_v55 = vadd.f32 %v11649_v30, %v11893_v35 }
 0x444   :  { %v2806_v38 = vpop.permute.xlu0 %2805  ;;  %v3664_v26 = vsel %vm1343_vm10, %v3648_v56, %v3483_v61  ;;  %v3649_v22 = vsel %vm1326_vm9, %v3633_v45, %v3437_v13  ;;  %v2411_v8 = vmax.f32 %v2333_v21, 0.0  ;;  %v2412_v61 = vmax.f32 %v2338_v62, 0.0 }
 0x445   :  { %2811 = vrot.lane.b32.xlu1 %v15474_v19, %s8165_s16  ;;  %v2954_v41 = vsel %vm1360_vm11, %v2938_v0, %v2806_v38  ;;  %v3801_v51 = vadd.f32 %v11893_v35, %v11685_v11  ;;  %v3153_v63 = vmax.f32 %v3079_v55, 0.0  ;;  %v3806_v1 = vadd.f32 %v11680_v34, %v11893_v35 }
 0x446   :  { %3444 = vrot.lane.b32.xlu0 %v2436_v6, %s8163_s19  ;;  %7316 = vmatmul.mubr.msk.f32.gmra.mrb[18].mxu0 %vm1389_vm12, %v2954_v41  ;;  %v2343_v30 = vadd.f32 %v11893_v35, %v11398_v31  ;;  %v2348_v38 = vadd.f32 %v11392_v18, %v11893_v35  ;;  %v3084_v29 = vadd.f32 %v11893_v35, %v11786_v46 }
 0x447   :  { %v3485_v24 = vpop.permute.xlu1 %3484  ;;  %v3879_v0 = vmax.f32 %v3801_v51, 0.0  ;;  %v3880_v10 = vmax.f32 %v3806_v1, 0.0  ;;  %v3089_v56 = vadd.f32 %v11784_v2, %v11893_v35  ;;  %v3811_v42 = vadd.f32 %v11893_v35, %v11806_v16 }
 0x448   :  { %v3531_v3 = vpop.permute.xlu0 %3530  ;;  %v3665_v23 = vsel %vm1343_vm10, %v3649_v22, %v3485_v24  ;;  %v2413_v34 = vmax.f32 %v2343_v30, 0.0  ;;  %v2414_v24 = vmax.f32 %v2348_v38, 0.0  ;;  %v3154_v18 = vmax.f32 %v3084_v29, 0.0 }
 0x449   :  { %3490 = vrot.lane.b32.xlu1 %v15474_v19, %s8164_s20  ;;  %v3680_v4 = vsel %vm1360_vm11, %v3664_v26, %v3531_v3  ;;  %v3155_v46 = vmax.f32 %v3089_v56, 0.0  ;;  %v3816_v3 = vadd.f32 %v11800_v43, %v11893_v35  ;;  %v2353_v2 = vadd.f32 %v11893_v35, %v11409_v20 }
 0x44a   :  { %2813 = vrot.lane.b32.xlu0 %v2446_v40, %s8165_s16  ;;  %7349 = vmatprep.mubr.msk.f32.mxu1 %vm1389_vm12, %v3680_v4  ;;  %v3881_v4 = vmax.f32 %v3811_v42, 0.0  ;;  %v2358_v36 = vadd.f32 %v11402_v60, %v11893_v35  ;;  %v2363_v51 = vadd.f32 %v11893_v35, %v11424_v5  ;;  %v2843_v1 = vsel %vm47_vm0, %v11550_v15, %v11064_v53 }
 0x44b   :  { %v11886_v19 = vpop.permute.xlu1 %2519  ;;  %v3882_v50 = vmax.f32 %v3816_v3, 0.0  ;;  %v2415_v43 = vmax.f32 %v2353_v2, 0.0 }
 0x44c   :  { %v11903_v6 = vpop.permute.xlu0 %3198  ;;  %v2416_v25 = vmax.f32 %v2358_v36, 0.0 }
 0x44d   :  { %3492 = vrot.lane.b32.xlu1 %v2446_v40, %s8164_s20  ;;  %s8168_s20 = smov 6  }
 0x44e   :  { %3538 = vrot.lane.b32.xlu0 %v15475_v48, %s8165_s16  ;;  %v3152_v48 = vmax.f32 %v3074_v33, 0.0 }
 0x44f   :  { %v3533_v58 = vpop.permute.xlu1 %3532 }
 0x450   :  { %v3681_v28 = vsel %vm1360_vm11, %v3665_v23, %v3533_v58  ;;  %v11917_v13 = vpop.permute.xlu0 %2521 }
 0x451   :  { %3540 = vrot.lane.b32.xlu1 %v3173_v59, %s8165_s16  ;;  %7350 = vmatmul.mubr.msk.f32.gmra.mrb[34].mxu1 %vm1389_vm12, %v3681_v28 }
 0x452   :  { %3911 = vrot.lane.b32.xlu0 %v2411_v8, %s8167_s6 }
 0x453   :  { %v11921_v57 = vpop.permute.xlu1 %2567 }
 0x454   :  { %v11927_v37 = vpop.permute.xlu0 %3200 }
 0x455   :  { %3913 = vrot.lane.b32.xlu1 %v2412_v61, %s8167_s6  ;;  %v2368_v61 = vadd.f32 %v11419_v12, %v11893_v35 }
 0x456   :  { %3975 = vrot.lane.b32.xlu0 %v3152_v48, %s8168_s20 }
 0x457   :  { %v11931_v7 = vpop.permute.xlu1 %3246  ;;  %v2418_v38 = vmax.f32 %v2368_v61, 0.0 }
 0x458   :  { %v11937_v11 = vpop.permute.xlu0 %2569 }
 0x459   :  { %3977 = vrot.lane.b32.xlu1 %v3153_v63, %s8168_s20 }
 0x45a   :  { %4039 = vrot.lane.b32.xlu0 %v3879_v0, %s8169_s21  ;;  %v2859_v0 = vsel %vm1258_vm6, %v2843_v1, %v11886_v19  ;;  %v15483_v19 = vld [vmem:[#allocation7_spill] sm:$0xff] }
 0x45b   :  { %v11941_v41 = vpop.permute.xlu1 %2615  ;;  %v2875_v12 = vsel %vm1275_vm7, %v2859_v0, %v11921_v57 }
 0x45c   :  { %v11947_v31 = vpop.permute.xlu0 %3248  ;;  %v2891_v5 = vsel %vm1292_vm3, %v2875_v12, %v11941_v41 }
 0x45d   :  { %4041 = vrot.lane.b32.xlu1 %v3880_v10, %s8169_s21 }
 0x45e   :  { %3915 = vrot.lane.b32.xlu0 %v2413_v34, %s8167_s6  ;;  %v2417_v34 = vmax.f32 %v2363_v51, 0.0 }
 0x45f   :  { %v11951_v40 = vpop.permute.xlu1 %3294 }
 0x460   :  { %v11957_v26 = vpop.permute.xlu0 %2617 }
 0x461   :  { %3917 = vrot.lane.b32.xlu1 %v2414_v24, %s8167_s6  ;;  %v2844_v24 = vsel %vm47_vm0, %v11663_v17, %v15483_v19  ;;  %v3570_v17 = vsel %vm47_vm0, %v15459_v27, %v11903_v6 }
 0x462   :  { %3979 = vrot.lane.b32.xlu0 %v3154_v18, %s8168_s20  ;;  %v2860_v18 = vsel %vm1258_vm6, %v2844_v24, %v11917_v13  ;;  %v3586_v13 = vsel %vm1258_vm6, %v3570_v17, %v11931_v7  ;;  %v3571_v7 = vsel %vm47_vm0, %v15468_v44, %v11927_v37  ;;  %v2378_v24 = vadd.f32 %v11436_v39, %v11893_v35 }
 0x463   :  { %v2664_v49 = vpop.permute.xlu1 %2663  ;;  %v2876_v42 = vsel %vm1275_vm7, %v2860_v18, %v11937_v11  ;;  %v3602_v11 = vsel %vm1275_vm7, %v3586_v13, %v11951_v40  ;;  %v2373_v18 = vadd.f32 %v11893_v35, %v11441_v47 }
 0x464   :  { %v11965_v32 = vpop.permute.xlu0 %3296  ;;  %v2907_v29 = vsel %vm1309_vm8, %v2891_v5, %v2664_v49  ;;  %v2892_v3 = vsel %vm1292_vm3, %v2876_v42, %v11957_v26 }
 0x465   :  { %3981 = vrot.lane.b32.xlu1 %v3155_v46, %s8168_s20  ;;  %v7308_v16 = vpop.f32.mrb[12].mxu0  ;;  %v2419_v17 = vmax.f32 %v2373_v18, 0.0 }
 0x466   :  { %v3093_v52 = vpop.f32.mrb[13].mxu0  ;;  %4043 = vrot.lane.b32.xlu0 %v3881_v4, %s8169_s21  ;;  %v3099_v21 = vadd.f32 %v7308_v16, %v11893_v35 }
 0x467   :  { %v3343_v9 = vpop.permute.xlu1 %3342  ;;  %v3094_v14 = vadd.f32 %v11893_v35, %v3093_v52 }
 0x468   :  { %v2666_v20 = vpop.permute.xlu0 %2665  ;;  %v3157_v59 = vmax.f32 %v3099_v21, 0.0  ;;  %v3618_v26 = vsel %vm1292_vm3, %v3602_v11, %v3343_v9 }
 0x469   :  { %4045 = vrot.lane.b32.xlu1 %v3882_v50, %s8169_s21  ;;  %v3156_v22 = vmax.f32 %v3094_v14, 0.0  ;;  %v2908_v49 = vsel %vm1309_vm8, %v2892_v3, %v2666_v20  ;;  %v3587_v14 = vsel %vm1258_vm6, %v3571_v7, %v11947_v31 }
 0x46a   :  { %3919 = vrot.lane.b32.xlu0 %v2415_v43, %s8167_s6  ;;  %v3603_v20 = vsel %vm1275_vm7, %v3587_v14, %v11965_v32 }
 0x46b   :  { %v2712_v45 = vpop.permute.xlu1 %2711 }
 0x46c   :  { %v3345_v60 = vpop.permute.xlu0 %3344  ;;  %v2923_v15 = vsel %vm1326_vm9, %v2907_v29, %v2712_v45 }
 0x46d   :  { %3921 = vrot.lane.b32.xlu1 %v2416_v25, %s8167_s6  ;;  %v3619_v21 = vsel %vm1292_vm3, %v3603_v20, %v3345_v60 }
 0x46e   :  { %3983 = vrot.lane.b32.xlu0 %v3156_v22, %s8168_s20 }
 0x46f   :  { %v3391_v62 = vpop.permute.xlu1 %3390 }
 0x470   :  { %v7342_v23 = vpop.f32.mrb[28].mxu1  ;;  %v2714_v8 = vpop.permute.xlu0 %2713  ;;  %v3634_v27 = vsel %vm1309_vm8, %v3618_v26, %v3391_v62 }
 0x471   :  { %v3826_v58 = vadd.f32 %v7342_v23, %v11893_v35  ;;  %3985 = vrot.lane.b32.xlu1 %v3157_v59, %s8168_s20  ;;  %v3820_v28 = vpop.f32.mrb[29].mxu1  ;;  %v2924_v4 = vsel %vm1326_vm9, %v2908_v49, %v2714_v8  ;;  %v15484_v49 = vld [vmem:[#allocation15_spill] sm:$0xff] }
 0x472   :  { %v3821_v33 = vadd.f32 %v11893_v35, %v3820_v28 }
 0x473   :  { %v3884_v55 = vmax.f32 %v3826_v58, 0.0  ;;  %v2760_v48 = vpop.permute.xlu1 %2759 }
 0x474   :  { %v3883_v63 = vmax.f32 %v3821_v33, 0.0  ;;  %v3393_v30 = vpop.permute.xlu0 %3392  ;;  %v2939_v57 = vsel %vm1343_vm10, %v2923_v15, %v2760_v48 }
 0x475   :  { %4049 = vrot.lane.b32.xlu1 %v3884_v55, %s8169_s21  ;;  %v3635_v45 = vsel %vm1309_vm8, %v3619_v21, %v3393_v30  ;;  %v15488_v21 = vld [vmem:[#allocation55_spill] sm:$0xff] }
 0x476   :  { %4047 = vrot.lane.b32.xlu0 %v3883_v63, %s8169_s21 }
 0x477   :  { %v3439_v10 = vpop.permute.xlu1 %3438 }
 0x478   :  { %v2762_v53 = vpop.permute.xlu0 %2761  ;;  %v3650_v52 = vsel %vm1326_vm9, %v3634_v27, %v3439_v10  ;;  %v15486_v27 = vld [vmem:[#allocation129_spill] sm:$0xff] }
 0x479   :  { %3925 = vrot.lane.b32.xlu1 %v2418_v38, %s8167_s6  ;;  %v2940_v16 = vsel %vm1343_vm10, %v2924_v4, %v2762_v53 }
 0x47a   :  { %3923 = vrot.lane.b32.xlu0 %v2417_v34, %s8167_s6 }
 0x47b   :  { %v2808_v56 = vpop.permute.xlu1 %2807 }
 0x47c   :  { %v2955_v41 = vsel %vm1360_vm11, %v2939_v57, %v2808_v56  ;;  %v3441_v46 = vpop.permute.xlu0 %3440 }
 0x47d   :  { %7318 = vmatprep.mubr.msk.f32.mxu0 %vm1389_vm12, %v2955_v41  ;;  %v3651_v44 = vsel %vm1326_vm9, %v3635_v45, %v3441_v46  ;;  %v2420_v46 = vmax.f32 %v2378_v24, 0.0 }
 0x47f   :  { %v3487_v2 = vpop.permute.xlu1 %3486 }
 0x480   :  { %v2810_v36 = vpop.permute.xlu0 %2809  ;;  %v3666_v40 = vsel %vm1343_vm10, %v3650_v52, %v3487_v2  ;;  %v15485_v2 = vld [vmem:[#allocation101_spill] sm:$0xff] }
 0x481   :  { %v2956_v50 = vsel %vm1360_vm11, %v2940_v16, %v2810_v36  ;;  %v2845_v13 = vsel %vm47_vm0, %v15485_v2, %v15484_v49 }
 0x482   :  { %7319 = vmatmul.mubr.msk.f32.gmra.mrb[20].mxu0 %vm1389_vm12, %v2956_v50 }
 0x483   :  { %v3489_v6 = vpop.permute.xlu1 %3488 }
 0x484   :  { %v3535_v43 = vpop.permute.xlu0 %3534  ;;  %v3667_v37 = vsel %vm1343_vm10, %v3651_v44, %v3489_v6  ;;  %v15487_v6 = vld [vmem:[#allocation118_spill] sm:$0xff] }
 0x485   :  { %v3682_v9 = vsel %vm1360_vm11, %v3666_v40, %v3535_v43  ;;  %v2846_v52 = vsel %vm47_vm0, %v15487_v6, %v15486_v27 }
 0x486   :  { %7352 = vmatprep.mubr.msk.f32.mxu1 %vm1389_vm12, %v3682_v9 }
 0x487   :  { %v2524_v25 = vpop.permute.xlu1 %2523 }
 0x488   :  { %v12037_v22 = vpop.permute.xlu0 %3202  ;;  %v2861_v4 = vsel %vm1258_vm6, %v2845_v13, %v2524_v25 }
 0x489   :  { %v3572_v45 = vsel %vm47_vm0, %v15488_v21, %v12037_v22 }
 0x48b   :  { %v3537_v59 = vpop.permute.xlu1 %3536 }
 0x48c   :  { %v3683_v31 = vsel %vm1360_vm11, %v3667_v37, %v3537_v59  ;;  %v2526_v62 = vpop.permute.xlu0 %2525 }
 0x48d   :  { %7353 = vmatmul.mubr.msk.f32.gmra.mrb[36].mxu1 %vm1389_vm12, %v3683_v31  ;;  %v2862_v43 = vsel %vm1258_vm6, %v2846_v52, %v2526_v62 }
 0x48f   :  { %v2572_v32 = vpop.permute.xlu1 %2571 }
 0x490   :  { %v3205_v23 = vpop.permute.xlu0 %3204  ;;  %v2877_v47 = vsel %vm1275_vm7, %v2861_v4, %v2572_v32 }
 0x491   :  { %v3573_v62 = vsel %vm47_vm0, %v15481_v54, %v3205_v23  ;;  %vm4104_vm0 = vcmask 48128  }
 0x493   :  { %v3251_v58 = vpop.permute.xlu1 %3250 }
 0x494   :  { %v2574_v28 = vpop.permute.xlu0 %2573  ;;  %v3588_v59 = vsel %vm1258_vm6, %v3572_v45, %v3251_v58 }
 0x495   :  { %v2878_v9 = vsel %vm1275_vm7, %v2862_v43, %v2574_v28 }
 0x497   :  { %v2620_v8 = vpop.permute.xlu1 %2619 }
 0x498   :  { %v3253_v60 = vpop.permute.xlu0 %3252  ;;  %v2893_v16 = vsel %vm1292_vm3, %v2877_v47, %v2620_v8 }
 0x49b   :  { %v3299_v33 = vpop.permute.xlu1 %3298 }
 0x49c   :  { %v2622_v61 = vpop.permute.xlu0 %2621  ;;  %v3604_v32 = vsel %vm1275_vm7, %v3588_v59, %v3299_v33 }
 0x49d   :  { %v2894_v25 = vsel %vm1292_vm3, %v2878_v9, %v2622_v61  ;;  %v3589_v61 = vsel %vm1258_vm6, %v3573_v62, %v3253_v60  ;;  %v15494_v62 = vld [vmem:[#allocation154_spill] sm:$0xff]  ;;  %vm4985_vm6 = vcmask 392192  }
 0x49f   :  { %v2668_v55 = vpop.permute.xlu1 %2667 }
 0x4a0   :  { %v3301_v48 = vpop.permute.xlu0 %3300  ;;  %v2909_v36 = vsel %vm1309_vm8, %v2893_v16, %v2668_v55 }
 0x4a1   :  { %v7311_v51 = vpop.f32.mrb[14].mxu0 }
 0x4a2   :  { %v3109_v1 = vadd.f32 %v7311_v51, %v11893_v35  ;;  %v3103_v30 = vpop.f32.mrb[15].mxu0  ;;  %v3605_v51 = vsel %vm1275_vm7, %v3589_v61, %v3301_v48 }
 0x4a3   :  { %v3347_v63 = vpop.permute.xlu1 %3346  ;;  %v3104_v0 = vadd.f32 %v11893_v35, %v3103_v30 }
 0x4a4   :  { %v3159_v38 = vmax.f32 %v3109_v1, 0.0  ;;  %v2670_v12 = vpop.permute.xlu0 %2669  ;;  %v3620_v55 = vsel %vm1292_vm3, %v3604_v32, %v3347_v63  ;;  %v1534_v32 = vadd.f32 %v15494_v62, %v11893_v35  ;;  %v15501_v62 = vmov 0.0  }
 0x4a5   :  { %v3158_v10 = vmax.f32 %v3104_v0, 0.0  ;;  %v2910_v44 = vsel %vm1309_vm8, %v2894_v25, %v2670_v12  ;;  %4365 = vst.msk [vmem:[#allocation6 + $0x28] sm:$0x3] %vm4360_vm5, %v15501_v62  ;;  %4361 = vst.msk [vmem:[#allocation6 + $0x8] sm:$0x3] %vm4360_vm5, %v15501_v62 }
 0x4a6   :  { %3989 = vrot.lane.b32.xlu1 %v3159_v38, %s8168_s20  ;;  %4363 = vst.msk [vmem:[#allocation6 + $0x18] sm:$0x3] %vm4360_vm5, %v15501_v62  ;;  %4367 = vst.msk [vmem:[#allocation6 + $0x38] sm:$0x3] %vm4360_vm5, %v15501_v62 }
 0x4a7   :  { %v2716_v34 = vpop.permute.xlu1 %2715  ;;  %3987 = vrot.lane.b32.xlu0 %v3158_v10, %s8168_s20  ;;  %4369 = vst.msk [vmem:[#allocation6 + $0x48] sm:$0x3] %vm4360_vm5, %v15501_v62  ;;  %4371 = vst.msk [vmem:[#allocation6 + $0x58] sm:$0x3] %vm4360_vm5, %v15501_v62 }
 0x4a8   :  { %v7345_v5 = vpop.f32.mrb[30].mxu1  ;;  %v3349_v15 = vpop.permute.xlu0 %3348  ;;  %v2925_v50 = vsel %vm1326_vm9, %v2909_v36, %v2716_v34  ;;  %v15489_v34 = vld [vmem:[#allocation41_spill] sm:$0xff]  ;;  %4373 = vst.msk [vmem:[#allocation6 + $0x68] sm:$0x3] %vm4360_vm5, %v15501_v62  ;;  %4375 = vst.msk [vmem:[#allocation6 + $0x78] sm:$0x3] %vm4360_vm5, %v15501_v62 }
 0x4a9   :  { %v3836_v29 = vadd.f32 %v7345_v5, %v11893_v35  ;;  %v3830_v53 = vpop.f32.mrb[31].mxu1  ;;  %v3621_v54 = vsel %vm1292_vm3, %v3605_v51, %v3349_v15  ;;  %v1509_v5 = vadd.f32 %v11893_v35, %v15489_v34  ;;  %v15495_v34 = vld [vmem:[#allocation98_spill] sm:$0xff]  ;;  %4377 = vst.msk [vmem:[#allocation6 + $0x88] sm:$0x3] %vm4360_vm5, %v15501_v62  ;;  %4379 = vst.msk [vmem:[#allocation6 + $0x98] sm:$0x3] %vm4360_vm5, %v15501_v62 }
 0x4aa   :  { %v3831_v19 = vadd.f32 %v11893_v35, %v3830_v53  ;;  %v15490_v53 = vld [vmem:[#allocation40_spill] sm:$0xff]  ;;  %4381 = vst.msk [vmem:[#allocation6 + $0xa8] sm:$0x3] %vm4360_vm5, %v15501_v62  ;;  %4383 = vst.msk [vmem:[#allocation6 + $0xb8] sm:$0x3] %vm4360_vm5, %v15501_v62 }
 0x4ab   :  { %v3886_v57 = vmax.f32 %v3836_v29, 0.0  ;;  %v3395_v56 = vpop.permute.xlu1 %3394  ;;  %v1514_v15 = vadd.f32 %v15490_v53, %v11893_v35  ;;  %v1587_v24 = vmax.f32 %v1509_v5, 0.0  ;;  %v2388_v5 = vadd.f32 %v15495_v34, %v11893_v35  ;;  %v15496_v53 = vld [vmem:[#allocation22_spill] sm:$0xff]  ;;  %4385 = vst.msk [vmem:[#allocation6 + $0xc8] sm:$0x3] %vm4360_vm5, %v15501_v62 }
 0x4ac   :  { %v3885_v41 = vmax.f32 %v3831_v19, 0.0  ;;  %v2718_v42 = vpop.permute.xlu0 %2717  ;;  %v3636_v58 = vsel %vm1309_vm8, %v3620_v55, %v3395_v56  ;;  %4387 = vst.msk [vmem:[#allocation6 + $0xd8] sm:$0x3] %vm4360_vm5, %v15501_v62  ;;  %4389 = vst.msk [vmem:[#allocation6 + $0xe8] sm:$0x3] %vm4360_vm5, %v15501_v62 }
 0x4ad   :  { %4053 = vrot.lane.b32.xlu1 %v3886_v57, %s8169_s21  ;;  %v2926_v31 = vsel %vm1326_vm9, %v2910_v44, %v2718_v42  ;;  %v1588_v56 = vmax.f32 %v1514_v15, 0.0  ;;  %v15493_v44 = vld [vmem:[#allocation155_spill] sm:$0xff]  ;;  %v2383_v15 = vadd.f32 %v11893_v35, %v15496_v53  ;;  %4391 = vst.msk [vmem:[#allocation6 + $0xf8] sm:$0x3] %vm4360_vm5, %v15501_v62  ;;  %4393 = vst.msk [vmem:[#allocation6 + $0x108] sm:$0x3] %vm4360_vm5, %v15501_v62 }
 0x4ae   :  { %4051 = vrot.lane.b32.xlu0 %v3885_v41, %s8169_s21  ;;  %4395 = vst.msk [vmem:[#allocation6 + $0x118] sm:$0x3] %vm4360_vm5, %v15501_v62  ;;  %4397 = vst.msk [vmem:[#allocation6 + $0x128] sm:$0x3] %vm4360_vm5, %v15501_v62 }
 0x4af   :  { %v2764_v3 = vpop.permute.xlu1 %2763  ;;  %4399 = vst.msk [vmem:[#allocation6 + $0x138] sm:$0x3] %vm4360_vm5, %v15501_v62 }
 0x4b0   :  { %v3397_v39 = vpop.permute.xlu0 %3396  ;;  %v2941_v7 = vsel %vm1343_vm10, %v2925_v50, %v2764_v3 }
 0x4b1   :  { %3929 = vrot.lane.b32.xlu1 %v2420_v46, %s8167_s6  ;;  %v3637_v33 = vsel %vm1309_vm8, %v3621_v54, %v3397_v39  ;;  %v15491_v39 = vld [vmem:[#allocation151_spill] sm:$0xff]  ;;  %vm5019_vm8 = vcmask 654336  }
 0x4b2   :  { %3927 = vrot.lane.b32.xlu0 %v2419_v17, %s8167_s6  ;;  %v1519_v4 = vadd.f32 %v11893_v35, %v15491_v39 }
 0x4b3   :  { %v3443_v11 = vpop.permute.xlu1 %3442 }
 0x4b4   :  { %v2766_v26 = vpop.permute.xlu0 %2765  ;;  %v3652_v23 = vsel %vm1326_vm9, %v3636_v58, %v3443_v11  ;;  %v15492_v11 = vld [vmem:[#allocation50_spill] sm:$0xff]  ;;  %v1592_v58 = vmax.f32 %v1534_v32, 0.0 }
 0x4b5   :  { %v2942_v28 = vsel %vm1343_vm10, %v2926_v31, %v2766_v26  ;;  %v1524_v16 = vadd.f32 %v15492_v11, %v11893_v35  ;;  %v1589_v26 = vmax.f32 %v1519_v4, 0.0 }
 0x4b7   :  { %v2812_v40 = vpop.permute.xlu1 %2811  ;;  %v1590_v27 = vmax.f32 %v1524_v16, 0.0 }
 0x4b8   :  { %v2957_v14 = vsel %vm1360_vm11, %v2941_v7, %v2812_v40  ;;  %v3445_v20 = vpop.permute.xlu0 %3444 }
 0x4b9   :  { %7321 = vmatprep.mubr.msk.f32.mxu0 %vm1389_vm12, %v2957_v14  ;;  %v3653_v63 = vsel %vm1326_vm9, %v3637_v33, %v3445_v20  ;;  %vm5036_vm9 = vcmask 785408  }
 0x4bb   :  { %v3491_v37 = vpop.permute.xlu1 %3490 }
 0x4bc   :  { %v2814_v8 = vpop.permute.xlu0 %2813  ;;  %v3668_v30 = vsel %vm1343_vm10, %v3652_v23, %v3491_v37  ;;  %v1529_v37 = vadd.f32 %v11893_v35, %v15493_v44 }
 0x4bd   :  { %v2958_v22 = vsel %vm1360_vm11, %v2942_v28, %v2814_v8 }
 0x4be   :  { %7322 = vmatmul.mubr.msk.f32.gmra.mrb[22].mxu0 %vm1389_vm12, %v2958_v22  ;;  %v1591_v51 = vmax.f32 %v1529_v37, 0.0  ;;  %v15500_v37 = vld [vmem:[#allocation134_spill] sm:$0xff] }
 0x4bf   :  { %v3493_v1 = vpop.permute.xlu1 %3492 }
 0x4c0   :  { %v3539_v60 = vpop.permute.xlu0 %3538  ;;  %v3669_v48 = vsel %vm1343_vm10, %v3653_v63, %v3493_v1  ;;  %vm5053_vm10 = vcmask 916480  }
 0x4c1   :  { %v3684_v0 = vsel %vm1360_vm11, %v3668_v30, %v3539_v60 }
 0x4c2   :  { %7355 = vmatprep.mubr.msk.f32.mxu1 %vm1389_vm12, %v3684_v0 }
 0x4c3   :  { %v3541_v38 = vpop.permute.xlu1 %3540 }
 0x4c4   :  { %v3685_v12 = vsel %vm1360_vm11, %v3669_v48, %v3541_v38  ;;  %v3912_v10 = vpop.permute.xlu0 %3911 }
 0x4c5   :  { %7356 = vmatmul.mubr.msk.f32.gmra.mrb[38].mxu1 %vm1389_vm12, %v3685_v12  ;;  %v4088_v18 = vsel %vm4087_vm15, %v1587_v24, %v3912_v10  ;;  %v2422_v24 = vmax.f32 %v2388_v5, 0.0 }
 0x4c7   :  { %v3914_v29 = vpop.permute.xlu1 %3913 }
 0x4c8   :  { %v3976_v19 = vpop.permute.xlu0 %3975  ;;  %v4089_v46 = vsel %vm4087_vm15, %v1588_v56, %v3914_v29 }
 0x4c9   :  { %v4105_v41 = vsel %vm4104_vm0, %v4088_v18, %v3976_v19 }
 0x4cb   :  { %v3978_v57 = vpop.permute.xlu1 %3977 }
 0x4cc   :  { %v4040_v42 = vpop.permute.xlu0 %4039  ;;  %v4106_v17 = vsel %vm4104_vm0, %v4089_v46, %v3978_v57  ;;  %v2421_v57 = vmax.f32 %v2383_v15, 0.0 }
 0x4cd   :  { %v4122_v3 = vsel %vm4121_vm1, %v4105_v41, %v4040_v42  ;;  %v15497_v41 = vld [vmem:[#allocation157_spill] sm:$0xff] }
 0x4ce   :  { %7362 = vmatprep.mubr.msk.f32.mxu0 %vm1275_vm7, %v4122_v3  ;;  %v1539_v42 = vadd.f32 %v11893_v35, %v15497_v41  ;;  %v15498_v3 = vld [vmem:[#allocation156_spill] sm:$0xff] }
 0x4cf   :  { %v4042_v49 = vpop.permute.xlu1 %4041 }
 0x4d0   :  { %v4123_v2 = vsel %vm4121_vm1, %v4106_v17, %v4042_v49  ;;  %v3916_v13 = vpop.permute.xlu0 %3915  ;;  %v1544_v17 = vadd.f32 %v15498_v3, %v11893_v35 }
 0x4d1   :  { %7363 = vmatmul.mubr.msk.f32.vlgmr.msra.gmra.mrb[24].mxu0 %vm1275_vm7, %v4123_v2  ;;  %v4090_v6 = vsel %vm4087_vm15, %v1589_v26, %v3916_v13 }
 0x4d2   :  { %v1594_v16 = vmax.f32 %v1544_v17, 0.0 }
 0x4d3   :  { %v3918_v47 = vpop.permute.xlu1 %3917 }
 0x4d4   :  { %v3980_v36 = vpop.permute.xlu0 %3979  ;;  %v4091_v40 = vsel %vm4087_vm15, %v1590_v27, %v3918_v47  ;;  %v1593_v47 = vmax.f32 %v1539_v42, 0.0 }
 0x4d5   :  { %v4107_v52 = vsel %vm4104_vm0, %v4090_v6, %v3980_v36 }
 0x4d7   :  { %v3982_v50 = vpop.permute.xlu1 %3981 }
 0x4d8   :  { %v4044_v7 = vpop.permute.xlu0 %4043  ;;  %v4108_v14 = vsel %vm4104_vm0, %v4091_v40, %v3982_v50 }
 0x4d9   :  { %v4124_v43 = vsel %vm4121_vm1, %v4107_v52, %v4044_v7 }
 0x4da   :  { %7365 = vmatprep.mubr.msk.f32.mxu0 %vm1275_vm7, %v4124_v43 }
 0x4db   :  { %v4046_v9 = vpop.permute.xlu1 %4045 }
 0x4dc   :  { %v4125_v20 = vsel %vm4121_vm1, %v4108_v14, %v4046_v9  ;;  %v3920_v25 = vpop.permute.xlu0 %3919 }
 0x4dd   :  { %7366 = vmatmul.mubr.msk.f32.gmra.mrb[26].mxu0 %vm1275_vm7, %v4125_v20  ;;  %v4092_v1 = vsel %vm4087_vm15, %v1591_v51, %v3920_v25 }
 0x4df   :  { %v3922_v21 = vpop.permute.xlu1 %3921 }
 0x4e0   :  { %v7314_v45 = vpop.f32.mrb[16].mxu0  ;;  %v3984_v22 = vpop.permute.xlu0 %3983  ;;  %v4093_v23 = vsel %vm4087_vm15, %v1592_v58, %v3922_v21  ;;  %v15499_v21 = vld [vmem:[#allocation77_spill] sm:$0xff] }
 0x4e1   :  { %v3119_v59 = vadd.f32 %v7314_v45, %v11893_v35  ;;  %v3113_v31 = vpop.f32.mrb[17].mxu0  ;;  %v4109_v33 = vsel %vm4104_vm0, %v4092_v1, %v3984_v22  ;;  %v2398_v45 = vadd.f32 %v15499_v21, %v11893_v35  ;;  %v5073_v21 = vld [vmem:[%s14663_s8 + $0x18] sm:$0xff] }
 0x4e2   :  { %v3114_v28 = vadd.f32 %v11893_v35, %v3113_v31 }
 0x4e3   :  { %v3161_v8 = vmax.f32 %v3119_v59, 0.0  ;;  %v3986_v61 = vpop.permute.xlu1 %3985  ;;  %v2393_v59 = vadd.f32 %v11893_v35, %v15500_v37  ;;  %v2424_v32 = vmax.f32 %v2398_v45, 0.0 }
 0x4e4   :  { %v3160_v55 = vmax.f32 %v3114_v28, 0.0  ;;  %v4110_v60 = vsel %vm4104_vm0, %v4093_v23, %v3986_v61 }
 0x4e5   :  { %3993 = vrot.lane.b32.xlu1 %v3161_v8, %s8168_s20  ;;  %v2423_v28 = vmax.f32 %v2393_v59, 0.0 }
 0x4e6   :  { %3991 = vrot.lane.b32.xlu0 %v3160_v55, %s8168_s20 }
 0x4e7   :  { %v4050_v54 = vpop.permute.xlu1 %4049 }
 0x4e8   :  { %v4048_v30 = vpop.permute.xlu0 %4047  ;;  %v4127_v0 = vsel %vm4121_vm1, %v4110_v60, %v4050_v54 }
 0x4e9   :  { %v4126_v63 = vsel %vm4121_vm1, %v4109_v33, %v4048_v30  ;;  %v15502_v33 = vld [vmem:[#allocation159_spill] sm:$0xff] }
 0x4ea   :  { %7368 = vmatprep.mubr.msk.f32.mxu0 %vm1275_vm7, %v4126_v63  ;;  %v1549_v30 = vadd.f32 %v11893_v35, %v15502_v33 }
 0x4eb   :  { %7369 = vmatmul.mubr.msk.f32.gmra.mrb[28].mxu0 %vm1275_vm7, %v4127_v0  ;;  %v3926_v56 = vpop.permute.xlu1 %3925  ;;  %v15503_v0 = vld [vmem:[#allocation158_spill] sm:$0xff] }
 0x4ec   :  { %v3924_v18 = vpop.permute.xlu0 %3923  ;;  %v4095_v27 = vsel %vm4087_vm15, %v1594_v16, %v3926_v56 }
 0x4ed   :  { %v4094_v26 = vsel %vm4087_vm15, %v1593_v47, %v3924_v18 }
 0x4f0   :  { %v7348_v48 = vpop.f32.mrb[32].mxu1 }
 0x4f1   :  { %v3846_v38 = vadd.f32 %v7348_v48, %v11893_v35  ;;  %v3840_v12 = vpop.f32.mrb[33].mxu1  ;;  %v1554_v48 = vadd.f32 %v15503_v0, %v11893_v35  ;;  %v5077_v0 = vld [vmem:[%s14663_s8 + $0x38] sm:$0xff] }
 0x4f2   :  { %v3841_v10 = vadd.f32 %v11893_v35, %v3840_v12  ;;  %v15504_v12 = vld [vmem:[#allocation143_spill] sm:$0xff] }
 0x4f3   :  { %v3888_v29 = vmax.f32 %v3846_v38, 0.0 }
 0x4f4   :  { %v3887_v19 = vmax.f32 %v3841_v10, 0.0  ;;  %v2408_v10 = vadd.f32 %v15504_v12, %v11893_v35  ;;  %v5078_v12 = vld [vmem:[%s14663_s8 + $0x40] sm:$0xff] }
 0x4f5   :  { %4057 = vrot.lane.b32.xlu1 %v3888_v29, %s8169_s21  ;;  %v15505_v29 = vld [vmem:[#allocation91_spill] sm:$0xff] }
 0x4f6   :  { %4055 = vrot.lane.b32.xlu0 %v3887_v19, %s8169_s21  ;;  %v2403_v53 = vadd.f32 %v11893_v35, %v15505_v29  ;;  %v2426_v56 = vmax.f32 %v2408_v10, 0.0  ;;  %v5079_v10 = vld [vmem:[%s14663_s8 + $0x48] sm:$0xff] }
 0x4f8   :  { %v2425_v42 = vmax.f32 %v2403_v53, 0.0  ;;  %v7437_v53 = vpack.c.bf16 %v5079_v10, %v5078_v12 }
 0x4f9   :  { %3933 = vrot.lane.b32.xlu1 %v2422_v24, %s8167_s6  ;;  %v1595_v24 = vmax.f32 %v1549_v30, 0.0 }
 0x4fa   :  { %3931 = vrot.lane.b32.xlu0 %v2421_v57, %s8167_s6  ;;  %v1596_v57 = vmax.f32 %v1554_v48, 0.0 }
 0x518   :  { %v3990_v46 = vpop.permute.xlu1 %3989 }
 0x519   :  { %v7317_v49 = vpop.f32.mrb[18].mxu0  ;;  %v3988_v2 = vpop.permute.xlu0 %3987  ;;  %v4112_v7 = vsel %vm4104_vm0, %v4095_v27, %v3990_v46 }
 0x51a   :  { %v3129_v13 = vadd.f32 %v7317_v49, %v11893_v35  ;;  %v3123_v39 = vpop.f32.mrb[19].mxu0  ;;  %v4111_v6 = vsel %vm4104_vm0, %v4094_v26, %v3988_v2  ;;  %v8170_v26 = vmov 0.0|0.0  }
 0x51b   :  { %v3124_v4 = vadd.f32 %v11893_v35, %v3123_v39  ;;  %7424 = vmatprep.subr.bf16.mxu1 %v8170_v26  ;;  %7451 = vmatprep.subr.bf16.mxu0 %v8170_v26 }
 0x51c   :  { %v3163_v11 = vmax.f32 %v3129_v13, 0.0 }
 0x51d   :  { %v3162_v36 = vmax.f32 %v3124_v4, 0.0 }
 0x51e   :  { %3997 = vrot.lane.b32.xlu1 %v3163_v11, %s8168_s20 }
 0x51f   :  { %v4054_v50 = vpop.permute.xlu1 %4053  ;;  %3995 = vrot.lane.b32.xlu0 %v3162_v36, %s8168_s20 }
 0x520   :  { %v4052_v52 = vpop.permute.xlu0 %4051  ;;  %v4129_v43 = vsel %vm4121_vm1, %v4112_v7, %v4054_v50  ;;  %v15506_v50 = vld [vmem:[#allocation162_spill] sm:$0xff] }
 0x521   :  { %v4128_v40 = vsel %vm4121_vm1, %v4111_v6, %v4052_v52  ;;  %v1559_v27 = vadd.f32 %v11893_v35, %v15506_v50  ;;  %v15507_v52 = vld [vmem:[#allocation160_spill] sm:$0xff] }
 0x522   :  { %7371 = vmatprep.mubr.msk.f32.mxu0 %vm1275_vm7, %v4128_v40  ;;  %v1564_v7 = vadd.f32 %v15507_v52, %v11893_v35 }
 0x523   :  { %7372 = vmatmul.mubr.msk.f32.gmra.mrb[30].mxu0 %vm1275_vm7, %v4129_v43  ;;  %v3930_v1 = vpop.permute.xlu1 %3929  ;;  %v5070_v43 = vld [vmem:[%s14663_s8] sm:$0xff]  ;;  %v1597_v37 = vmax.f32 %v1559_v27, 0.0 }
 0x524   :  { %v7351_v14 = vpop.f32.mrb[34].mxu1  ;;  %v3928_v54 = vpop.permute.xlu0 %3927  ;;  %v4097_v46 = vsel %vm4087_vm15, %v1596_v57, %v3930_v1  ;;  %v12306_v57 = vld [vmem:[#allocation6] sm:$0xff] }
 0x525   :  { %v3856_v9 = vadd.f32 %v7351_v14, %v11893_v35  ;;  %v3850_v20 = vpop.f32.mrb[35].mxu1  ;;  %v4096_v18 = vsel %vm4087_vm15, %v1595_v24, %v3928_v54  ;;  %v5071_v14 = vld [vmem:[%s14663_s8 + $0x8] sm:$0xff] }
 0x526   :  { %v3851_v25 = vadd.f32 %v11893_v35, %v3850_v20 }
 0x527   :  { %v3890_v44 = vmax.f32 %v3856_v9, 0.0  ;;  %v5072_v9 = vld [vmem:[%s14663_s8 + $0x10] sm:$0xff] }
 0x528   :  { %v3889_v31 = vmax.f32 %v3851_v25, 0.0  ;;  %v7425_v25 = vpack.c.bf16 %v5071_v14, %v5070_v43  ;;  %v7428_v62 = vpack.c.bf16 %v5073_v21, %v5072_v9 }
 0x529   :  { %4061 = vrot.lane.b32.xlu1 %v3890_v44, %s8169_s21 }
 0x52a   :  { %4059 = vrot.lane.b32.xlu0 %v3889_v31, %s8169_s21  ;;  %7426 = vmatpush1.bf16.msra.mxu1 %v7425_v25 }
 0x52b   :  { %7427 = vmatprep.subr.bf16.mxu1 %v8170_v26 }
 0x52d   :  { %3937 = vrot.lane.b32.xlu1 %v2424_v32, %s8167_s6  ;;  %v1598_v32 = vmax.f32 %v1564_v7, 0.0 }
 0x52e   :  { %3935 = vrot.lane.b32.xlu0 %v2423_v28, %s8167_s6  ;;  %7429 = vmatpush1.bf16.msra.mxu1 %v7428_v62  ;;  %v5084_v62 = vld [vmem:[%s14663_s8 + $0x70] sm:$0xff] }
 0x52f   :  { %7430 = vmatprep.subr.bf16.mxu1 %v8170_v26 }
 0x555   :  { %v7320_v8 = vpop.f32.mrb[20].mxu0 }
 0x556   :  { %v3139_v61 = vadd.f32 %v7320_v8, %v11893_v35  ;;  %v3133_v55 = vpop.f32.mrb[21].mxu0  ;;  %v5074_v8 = vld [vmem:[%s14663_s8 + $0x20] sm:$0xff] }
 0x557   :  { %v3134_v22 = vadd.f32 %v11893_v35, %v3133_v55  ;;  %v3994_v34 = vpop.permute.xlu1 %3993 }
 0x558   :  { %v3165_v51 = vmax.f32 %v3139_v61, 0.0  ;;  %v3992_v15 = vpop.permute.xlu0 %3991  ;;  %v4114_v49 = vsel %vm4104_vm0, %v4097_v46, %v3994_v34  ;;  %v5075_v61 = vld [vmem:[%s14663_s8 + $0x28] sm:$0xff] }
 0x559   :  { %v3164_v58 = vmax.f32 %v3134_v22, 0.0  ;;  %v4113_v3 = vsel %vm4104_vm0, %v4096_v18, %v3992_v15  ;;  %v7431_v30 = vpack.c.bf16 %v5075_v61, %v5074_v8  ;;  %v5080_v18 = vld [vmem:[%s14663_s8 + $0x50] sm:$0xff] }
 0x55a   :  { %4001 = vrot.lane.b32.xlu1 %v3165_v51, %s8168_s20 }
 0x55b   :  { %3999 = vrot.lane.b32.xlu0 %v3164_v58, %s8168_s20  ;;  %7432 = vmatpush1.bf16.msra.mxu1 %v7431_v30 }
 0x55c   :  { %7433 = vmatprep.subr.bf16.mxu1 %v8170_v26 }
 0x560   :  { %v7354_v23 = vpop.f32.mrb[36].mxu1 }
 0x561   :  { %v3866_v60 = vadd.f32 %v7354_v23, %v11893_v35  ;;  %v3860_v63 = vpop.f32.mrb[37].mxu1 }
 0x562   :  { %v3861_v38 = vadd.f32 %v11893_v35, %v3860_v63  ;;  %v5076_v63 = vld [vmem:[%s14663_s8 + $0x30] sm:$0xff] }
 0x563   :  { %v3892_v5 = vmax.f32 %v3866_v60, 0.0  ;;  %v7434_v48 = vpack.c.bf16 %v5077_v0, %v5076_v63 }
 0x564   :  { %v3891_v19 = vmax.f32 %v3861_v38, 0.0  ;;  %v12293_v38 = vld [vmem:[%s14664_s7] ss:$0 sm:$0xff] }
 0x565   :  { %4065 = vrot.lane.b32.xlu1 %v3892_v5, %s8169_s21  ;;  %7435 = vmatpush1.bf16.msra.mxu1 %v7434_v48 }
 0x566   :  { %4063 = vrot.lane.b32.xlu0 %v3891_v19, %s8169_s21  ;;  %7436 = vmatprep.subr.bf16.mxu1 %v8170_v26 }
 0x567   :  { %v4058_v41 = vpop.permute.xlu1 %4057 }
 0x568   :  { %v4056_v17 = vpop.permute.xlu0 %4055  ;;  %v4131_v13 = vsel %vm4121_vm1, %v4114_v49, %v4058_v41  ;;  %v5081_v41 = vld [vmem:[%s14663_s8 + $0x58] sm:$0xff] }
 0x569   :  { %v4130_v2 = vsel %vm4121_vm1, %v4113_v3, %v4056_v17  ;;  %3941 = vrot.lane.b32.xlu1 %v2426_v56, %s8167_s6  ;;  %v4418_v56 = vld [vmem:[#allocation6 + $0x8] sm:$0x3]  ;;  %7438 = vmatpush1.bf16.msra.mxu1 %v7437_v53  ;;  %v7440_v3 = vpack.c.bf16 %v5081_v41, %v5080_v18  ;;  %v4489_v17 = vrot.slane %v12306_v57, 1 }
 0x56a   :  { %3939 = vrot.lane.b32.xlu0 %v2425_v42, %s8167_s6  ;;  %7374 = vmatprep.mubr.msk.f32.mxu0 %vm1275_vm7, %v4130_v2  ;;  %v4537_v42 = vrot.slane %v12306_v57, 2  ;;  %v4538_v46 = vrot.slane %v4418_v56, 2  ;;  %v4490_v49 = vrot.slane %v4418_v56, 1  ;;  %v5082_v2 = vld [vmem:[%s14663_s8 + $0x60] sm:$0xff] }
 0x56b   :  { %7375 = vmatmul.mubr.msk.f32.gmra.mrb[32].mxu0 %vm1275_vm7, %v4131_v13  ;;  %v3934_v4 = vpop.permute.xlu1 %3933  ;;  %7439 = vmatprep.subr.bf16.mxu1 %v8170_v26  ;;  %v5083_v13 = vld [vmem:[%s14663_s8 + $0x68] sm:$0xff] }
 0x56c   :  { %v3932_v16 = vpop.permute.xlu0 %3931  ;;  %v4099_v58 = vsel %vm4087_vm15, %v1598_v32, %v3934_v4  ;;  %v5085_v32 = vld [vmem:[%s14663_s8 + $0x78] sm:$0xff] }
 0x56d   :  { %v4098_v55 = vsel %vm4087_vm15, %v1597_v37, %v3932_v16  ;;  %7441 = vmatpush1.bf16.msra.mxu1 %v7440_v3  ;;  %v7443_v16 = vpack.c.bf16 %v5083_v13, %v5082_v2 }
 0x56e   :  { %7442 = vmatprep.subr.bf16.mxu1 %v8170_v26 }
 0x571   :  { %7444 = vmatpush1.bf16.msra.mxu1 %v7443_v16 }
 0x572   :  { %7445 = vmatprep.subr.bf16.mxu1 %v8170_v26 }
 0x590   :  { %v3998_v20 = vpop.permute.xlu1 %3997 }
 0x591   :  { %v7323_v39 = vpop.f32.mrb[22].mxu0  ;;  %v3996_v45 = vpop.permute.xlu0 %3995  ;;  %v4116_v23 = vsel %vm4104_vm0, %v4099_v58, %v3998_v20  ;;  %v5087_v58 = vld [vmem:[%s14663_s8 + $0x88] sm:$0xff] }
 0x592   :  { %v3149_v47 = vadd.f32 %v7323_v39, %v11893_v35  ;;  %v3143_v11 = vpop.f32.mrb[23].mxu0  ;;  %v4115_v1 = vsel %vm4104_vm0, %v4098_v55, %v3996_v45 }
 0x593   :  { %v3144_v36 = vadd.f32 %v11893_v35, %v3143_v11  ;;  %v4539_v11 = vsel %vm1603_vm4, %v4537_v42, %v4538_v46 }
 0x594   :  { %v3167_v6 = vmax.f32 %v3149_v47, 0.0 }
 0x595   :  { %v3166_v40 = vmax.f32 %v3144_v36, 0.0 }
 0x596   :  { %4005 = vrot.lane.b32.xlu1 %v3167_v6, %s8168_s20 }
 0x597   :  { %4003 = vrot.lane.b32.xlu0 %v3166_v40, %s8168_s20  ;;  %v4491_v40 = vsel %vm517_vm2, %v4489_v17, %v4490_v49  ;;  %s8171_s20 = smov 64  }
 0x598   :  { %v7357_v44 = vpop.f32.mrb[38].mxu1 }
 0x599   :  { %v3876_v59 = vadd.f32 %v7357_v44, %v11893_v35  ;;  %v3870_v31 = vpop.f32.mrb[39].mxu1 }
 0x59a   :  { %v3871_v28 = vadd.f32 %v11893_v35, %v3870_v31 }
 0x59b   :  { %v3894_v22 = vmax.f32 %v3876_v59, 0.0  ;;  %v4062_v51 = vpop.permute.xlu1 %4061 }
 0x59c   :  { %v3893_v54 = vmax.f32 %v3871_v28, 0.0  ;;  %v4060_v35 = vpop.permute.xlu0 %4059  ;;  %v4133_v60 = vsel %vm4121_vm1, %v4116_v23, %v4062_v51  ;;  %v5086_v51 = vld [vmem:[%s14663_s8 + $0x80] sm:$0xff]  ;;  %s8173_s8 = smov 80  }
 0x59d   :  { %v4132_v33 = vsel %vm4121_vm1, %v4115_v1, %v4060_v35  ;;  %4069 = vrot.lane.b32.xlu1 %v3894_v22, %s8169_s21  ;;  %v7446_v22 = vpack.c.bf16 %v5085_v32, %v5084_v62  ;;  %v15509_v32 = vld [vmem:[#allocation163_spill] sm:$0xff] }
 0x59e   :  { %4067 = vrot.lane.b32.xlu0 %v3893_v54, %s8169_s21  ;;  %7377 = vmatprep.mubr.msk.f32.mxu0 %vm1275_vm7, %v4132_v33  ;;  %v7449_v54 = vpack.c.bf16 %v5087_v58, %v5086_v51  ;;  %s8172_s21 = smov 48  }
 0x59f   :  { %7378 = vmatmul.mubr.msk.f32.gmra.mrb[34].mxu0 %vm1275_vm7, %v4133_v60  ;;  %7447 = vmatpush1.bf16.msra.mxu1 %v7446_v22 }
 0x5a0   :  { %7448 = vmatprep.subr.bf16.mxu1 %v8170_v26 }
 0x5a3   :  { %7450 = vmatpush1.bf16.msra.mxu1 %v7449_v54 }
 0x5a4   :  { %v7364_v34 = vpop.f32.mrb[24].mxu0 }
 0x5a5   :  { %v4270_v5 = vadd.f32 %v7364_v34, %v12293_v38  ;;  %v4264_v29 = vpop.f32.mrb[25].mxu0 }
 0x5a6   :  { %v4265_v15 = vadd.f32 %v12293_v38, %v4264_v29 }
 0x5a7   :  { %v4344_v19 = vmax.f32 %v4270_v5, 0.0 }
 0x5a8   :  { %v4343_v24 = vmax.f32 %v4265_v15, 0.0 }
 0x5a9   :  { %4402 = vst.msk [vmem:[#allocation6 + $0x21] sm:$0xff] %vm1292_vm3, %v4344_v19 }
 0x5aa   :  { %4401 = vst.msk [vmem:[#allocation6 + $0x11] sm:$0xff] %vm1292_vm3, %v4343_v24 }
 0x5b0   :  { %v7367_v39 = vpop.f32.mrb[26].mxu0  ;;  %v12325_v4 = vld [vmem:[#allocation6 + $0x20] sm:$0xff]  ;;  %v4422_v47 = vld [vmem:[#allocation6 + $0x28] sm:$0x3] }
 0x5b1   :  { %v4280_v36 = vadd.f32 %v7367_v39, %v12293_v38  ;;  %v4274_v50 = vpop.f32.mrb[27].mxu0  ;;  %v12329_v27 = vld [vmem:[#allocation6 + $0x10] sm:$0xff]  ;;  %v4420_v6 = vld [vmem:[#allocation6 + $0x18] sm:$0x3]  ;;  %v4496_v52 = vrot.slane %v4422_v47, 1  ;;  %v4543_v7 = vrot.slane %v12325_v4, 2 }
 0x5b2   :  { %v4275_v43 = vadd.f32 %v12293_v38, %v4274_v50  ;;  %v4540_v14 = vrot.slane %v12329_v27, 2  ;;  %v4541_v9 = vrot.slane %v4420_v6, 2  ;;  %v4544_v20 = vrot.slane %v4422_v47, 2 }
 0x5b3   :  { %v4346_v25 = vmax.f32 %v4280_v36, 0.0  ;;  %v4492_v21 = vrot.slane %v12329_v27, 1  ;;  %v4493_v45 = vrot.slane %v4420_v6, 1  ;;  %v4495_v44 = vrot.slane %v12325_v4, 1 }
 0x5b4   :  { %v4345_v37 = vmax.f32 %v4275_v43, 0.0  ;;  %v4542_v59 = vsel %vm1603_vm4, %v4540_v14, %v4541_v9  ;;  %v4545_v31 = vsel %vm1603_vm4, %v4543_v7, %v4544_v20  ;;  %v7513_v35 = vpack.i.bf16 %v12325_v4, %v12329_v27  ;;  %v3938_v20 = vpop.permute.xlu1 %3937 }
 0x5b5   :  { %4404 = vst.msk [vmem:[#allocation6 + $0x41] sm:$0xff] %vm1292_vm3, %v4346_v25  ;;  %7087 = vmatprep.mubr.msk.f32.mxu1 %vm1292_vm3, %v4545_v31  ;;  %v7508_v28 = vpack.i.bf16 %v4542_v59, %v4539_v11  ;;  %v4494_v8 = vsel %vm517_vm2, %v4492_v21, %v4493_v45  ;;  %v4497_v55 = vsel %vm517_vm2, %v4495_v44, %v4496_v52  ;;  %v3936_v21 = vpop.permute.xlu0 %3935 }
 0x5b6   :  { %4403 = vst.msk [vmem:[#allocation6 + $0x31] sm:$0xff] %vm1292_vm3, %v4345_v37  ;;  %v7503_v61 = vpack.i.bf16 %v4494_v8, %v4491_v40  ;;  %v7518_v1 = vpack.i.bf16 %v4497_v55, %v4494_v8  ;;  %v7523_v30 = vpack.i.bf16 %v4545_v31, %v4542_v59  ;;  %v8148_v59 = vld [vmem:[%s14661_s5] ss:$0 sm:$0xff] }
 0x5b7   :  { %7509 = vrot.lane.b32.xlu1 %v7508_v28, %s8165_s16  ;;  %v1574_v28 = vadd.f32 %v8148_v59, %v15509_v32 }
 0x5b8   :  { %7504 = vrot.lane.b32.xlu0 %v7503_v61, %s8161_s2 }
 0x5b9   :  { %v1600_v54 = vmax.f32 %v1574_v28, 0.0  ;;  %v12462_v28 = vld [vmem:[#allocation6 + $0x90] sm:$0xff] }
 0x5bb   :  { %7519 = vrot.lane.b32.xlu1 %v7518_v1, %s8171_s20 }
 0x5bc   :  { %7514 = vrot.lane.b32.xlu0 %v7513_v35, %s8172_s21  ;;  %v12371_v29 = vld [vmem:[#allocation6 + $0x40] sm:$0xff]  ;;  %v4426_v15 = vld [vmem:[#allocation6 + $0x48] sm:$0x3] }
 0x5bd   :  { %v12364_v23 = vld [vmem:[#allocation6 + $0x30] sm:$0xff]  ;;  %v4424_v33 = vld [vmem:[#allocation6 + $0x38] sm:$0x3]  ;;  %v4501_v41 = vrot.slane %v12371_v29, 1  ;;  %v4502_v46 = vrot.slane %v4426_v15, 1  ;;  %v4549_v3 = vrot.slane %v12371_v29, 2 }
 0x5be   :  { %v7370_v60 = vpop.f32.mrb[28].mxu0  ;;  %v7528_v63 = vpack.i.bf16 %v12364_v23, %v12325_v4  ;;  %v4498_v0 = vrot.slane %v12364_v23, 1  ;;  %v4546_v48 = vrot.slane %v12364_v23, 2  ;;  %v4547_v12 = vrot.slane %v4424_v33, 2 }
 0x5bf   :  { %v4290_v10 = vadd.f32 %v7370_v60, %v12293_v38  ;;  %v4284_v34 = vpop.f32.mrb[29].mxu0  ;;  %v4499_v5 = vrot.slane %v4424_v33, 1  ;;  %v4550_v17 = vrot.slane %v4426_v15, 2  ;;  %v7548_v2 = vpack.i.bf16 %v12371_v29, %v12364_v23 }
 0x5c0   :  { %7524 = vrot.lane.b32.xlu0 %v7523_v30, %s8173_s8  ;;  %v4285_v53 = vadd.f32 %v12293_v38, %v4284_v34  ;;  %7529 = vrot.lane.b32.xlu1 %v7528_v63, %s8174_s22  ;;  %v12379_v42 = vsel %vm1603_vm4, %v4546_v48, %v4547_v12  ;;  %v4503_v13 = vsel %vm517_vm2, %v4501_v41, %v4502_v46 }
 0x5c1   :  { %v4348_v19 = vmax.f32 %v4290_v10, 0.0  ;;  %v4500_v24 = vsel %vm517_vm2, %v4498_v0, %v4499_v5  ;;  %v7543_v49 = vpack.i.bf16 %v12379_v42, %v4545_v31  ;;  %v12391_v39 = vsel %vm1603_vm4, %v4549_v3, %v4550_v17  ;;  %v15508_v31 = vld [vmem:[#allocation164_spill] sm:$0xff] }
 0x5c2   :  { %v4347_v56 = vmax.f32 %v4285_v53, 0.0  ;;  %v7533_v18 = vpack.i.bf16 %v4500_v24, %v4497_v55  ;;  %v7553_v47 = vpack.i.bf16 %v4503_v13, %v4500_v24  ;;  %v7558_v11 = vpack.i.bf16 %v12391_v39, %v12379_v42 }
 0x5c3   :  { %4406 = vst.msk [vmem:[#allocation6 + $0x61] sm:$0xff] %vm1292_vm3, %v4348_v19  ;;  %v1569_v62 = vadd.f32 %v8148_v59, %v15508_v31  ;;  %v4101_v0 = vsel %vm4087_vm15, %v1600_v54, %v3938_v20  ;;  %v15510_v20 = vld [vmem:[#allocation167_spill] sm:$0xff]  ;;  %v15511_v31 = vld [vmem:[#allocation166_spill] sm:$0xff] }
 0x5c4   :  { %4405 = vst.msk [vmem:[#allocation6 + $0x51] sm:$0xff] %vm1292_vm3, %v4347_v56  ;;  %7534 = vrot.lane.b32.xlu0 %v7533_v18, %s8175_s24  ;;  %7539 = vrot.lane.b32.xlu1 %v7533_v18, %s8161_s2 }
 0x5c5   :  { %v1599_v1 = vmax.f32 %v1569_v62, 0.0  ;;  %v1584_v62 = vadd.f32 %v8148_v59, %v15511_v31 }
 0x5c7   :  { %v4100_v33 = vsel %vm4087_vm15, %v1599_v1, %v3936_v21  ;;  %v1602_v54 = vmax.f32 %v1584_v62, 0.0 }
 0x5c8   :  { %7544 = vrot.lane.b32.xlu0 %v7543_v49, %s8165_s16  ;;  %7549 = vrot.lane.b32.xlu1 %v7548_v2, %s8172_s21 }
 0x5ca   :  { %v12405_v43 = vld [vmem:[#allocation6 + $0x60] sm:$0xff]  ;;  %v4430_v14 = vld [vmem:[#allocation6 + $0x68] sm:$0x3] }
 0x5cb   :  { %v12397_v16 = vld [vmem:[#allocation6 + $0x50] sm:$0xff]  ;;  %v4428_v36 = vld [vmem:[#allocation6 + $0x58] sm:$0x3]  ;;  %v4507_v44 = vrot.slane %v12405_v43, 1  ;;  %v4508_v37 = vrot.slane %v4430_v14, 1  ;;  %v4555_v55 = vrot.slane %v12405_v43, 2 }
 0x5cc   :  { %7554 = vrot.lane.b32.xlu0 %v7553_v47, %s8171_s20  ;;  %7559 = vrot.lane.b32.xlu1 %v7558_v11, %s8173_s8  ;;  %v7563_v50 = vpack.i.bf16 %v12397_v16, %v12371_v29  ;;  %v4504_v6 = vrot.slane %v12397_v16, 1  ;;  %v4505_v52 = vrot.slane %v4428_v36, 1  ;;  %v4552_v7 = vrot.slane %v12397_v16, 2  ;;  %v4002_v8 = vpop.permute.xlu1 %4001 }
 0x5cd   :  { %v4553_v40 = vrot.slane %v4428_v36, 2  ;;  %v4556_v22 = vrot.slane %v4430_v14, 2  ;;  %v4000_v51 = vpop.permute.xlu0 %3999  ;;  %v4509_v58 = vsel %vm517_vm2, %v4507_v44, %v4508_v37  ;;  %v7583_v35 = vpack.i.bf16 %v12405_v43, %v12397_v16 }
 0x5ce   :  { %v4506_v9 = vsel %vm517_vm2, %v4504_v6, %v4505_v52  ;;  %v4117_v48 = vsel %vm4104_vm0, %v4100_v33, %v4000_v51  ;;  %v4118_v10 = vsel %vm4104_vm0, %v4101_v0, %v4002_v8  ;;  %v12464_v8 = vld [vmem:[#allocation6 + $0x98] sm:$0x3] }
 0x5cf   :  { %v7568_v25 = vpack.i.bf16 %v4506_v9, %v4503_v13  ;;  %v12410_v45 = vsel %vm1603_vm4, %v4552_v7, %v4553_v40  ;;  %v7588_v60 = vpack.i.bf16 %v4509_v58, %v4506_v9  ;;  %v12429_v63 = vsel %vm1603_vm4, %v4555_v55, %v4556_v22 }
 0x5d0   :  { %7564 = vrot.lane.b32.xlu0 %v7563_v50, %s8174_s22  ;;  %v7578_v61 = vpack.i.bf16 %v12410_v45, %v12391_v39  ;;  %v7593_v53 = vpack.i.bf16 %v12429_v63, %v12410_v45  ;;  %v4606_v1 = vrot.slane %v12464_v8, 1 }
 0x5d1   :  { %7569 = vrot.lane.b32.xlu1 %v7568_v25, %s8175_s24 }
 0x5d4   :  { %7574 = vrot.lane.b32.xlu0 %v7568_v25, %s8161_s2  ;;  %v1579_v25 = vadd.f32 %v8148_v59, %v15510_v20  ;;  %v4605_v59 = vrot.slane %v12462_v28, 1 }
 0x5d5   :  { %7579 = vrot.lane.b32.xlu1 %v7578_v61, %s8165_s16 }
 0x5d6   :  { %v1601_v51 = vmax.f32 %v1579_v25, 0.0 }
 0x5d7   :  { %v4066_v30 = vpop.permute.xlu1 %4065 }
 0x5d8   :  { %7584 = vrot.lane.b32.xlu0 %v7583_v35, %s8172_s21  ;;  %v4064_v12 = vpop.permute.xlu0 %4063  ;;  %v4135_v5 = vsel %vm4121_vm1, %v4118_v10, %v4066_v30 }
 0x5d9   :  { %v4134_v34 = vsel %vm4121_vm1, %v4117_v48, %v4064_v12  ;;  %7589 = vrot.lane.b32.xlu1 %v7588_v60, %s8171_s20 }
 0x5da   :  { %7380 = vmatprep.mubr.msk.f32.mxu0 %vm1275_vm7, %v4134_v34 }
 0x5db   :  { %7381 = vmatmul.mubr.msk.f32.gmra.mrb[36].mxu0 %vm1275_vm7, %v4135_v5  ;;  %v3942_v47 = vpop.permute.xlu1 %3941  ;;  %v4607_v5 = vsel %vm517_vm2, %v4605_v59, %v4606_v1 }
 0x5dc   :  { %7594 = vrot.lane.b32.xlu0 %v7593_v53, %s8173_s8  ;;  %v3940_v6 = vpop.permute.xlu0 %3939  ;;  %v4103_v60 = vsel %vm4087_vm15, %v1602_v54, %v3942_v47 }
 0x5dd   :  { %v4102_v35 = vsel %vm4087_vm15, %v1601_v51, %v3940_v6 }
 0x5f6   :  { %v7373_v15 = vpop.f32.mrb[30].mxu0 }
 0x5f7   :  { %v4300_v19 = vadd.f32 %v7373_v15, %v12293_v38  ;;  %v4294_v24 = vpop.f32.mrb[31].mxu0 }
 0x5f8   :  { %v4295_v56 = vadd.f32 %v12293_v38, %v4294_v24 }
 0x5f9   :  { %v4350_v18 = vmax.f32 %v4300_v19, 0.0 }
 0x5fa   :  { %v4349_v41 = vmax.f32 %v4295_v56, 0.0 }
 0x5fb   :  { %4408 = vst.msk [vmem:[#allocation6 + $0x81] sm:$0xff] %vm1292_vm3, %v4350_v18 }
 0x5fc   :  { %4407 = vst.msk [vmem:[#allocation6 + $0x71] sm:$0xff] %vm1292_vm3, %v4349_v41 }
 0x602   :  { %v4433_v36 = vld [vmem:[#allocation6 + $0x80] sm:$0xff]  ;;  %v4434_v50 = vld [vmem:[#allocation6 + $0x88] sm:$0x3] }
 0x603   :  { %v12447_v46 = vld [vmem:[#allocation6 + $0x70] sm:$0xff]  ;;  %v4432_v3 = vld [vmem:[#allocation6 + $0x78] sm:$0x3]  ;;  %v4589_v14 = vrot.slane %v4433_v36, 1  ;;  %v4590_v9 = vrot.slane %v4434_v50, 1  ;;  %v4595_v44 = vrot.slane %v4433_v36, 2  ;;  %v7633_v15 = vpack.i.bf16 %v12462_v28, %v4433_v36 }
 0x604   :  { %v7598_v17 = vpack.i.bf16 %v12447_v46, %v12405_v43  ;;  %v4510_v49 = vrot.slane %v12447_v46, 1  ;;  %v4511_v2 = vrot.slane %v4432_v3, 1  ;;  %v4558_v13 = vrot.slane %v12447_v46, 2 }
 0x605   :  { %v4559_v11 = vrot.slane %v4432_v3, 2  ;;  %v4596_v37 = vrot.slane %v4434_v50, 2  ;;  %v7618_v55 = vpack.i.bf16 %v4433_v36, %v12447_v46  ;;  %v4591_v22 = vsel %vm517_vm2, %v4589_v14, %v4590_v9 }
 0x606   :  { %7599 = vrot.lane.b32.xlu1 %v7598_v17, %s8174_s22  ;;  %v4512_v52 = vsel %vm517_vm2, %v4510_v49, %v4511_v2  ;;  %v7638_v19 = vpack.i.bf16 %v4607_v5, %v4591_v22 }
 0x607   :  { %v7603_v7 = vpack.i.bf16 %v4512_v52, %v4509_v58  ;;  %v12456_v40 = vsel %vm1603_vm4, %v4558_v13, %v4559_v11  ;;  %v12472_v58 = vsel %vm1603_vm4, %v4595_v44, %v4596_v37  ;;  %v7623_v30 = vpack.i.bf16 %v4591_v22, %v4512_v52 }
 0x608   :  { %v4006_v21 = vpop.permute.xlu1 %4005  ;;  %v7613_v61 = vpack.i.bf16 %v12456_v40, %v12429_v63  ;;  %v7628_v12 = vpack.i.bf16 %v12472_v58, %v12456_v40 }
 0x609   :  { %7604 = vrot.lane.b32.xlu0 %v7603_v7, %s8175_s24  ;;  %v4004_v32 = vpop.permute.xlu0 %4003  ;;  %v4120_v10 = vsel %vm4104_vm0, %v4103_v60, %v4006_v21 }
 0x60a   :  { %7609 = vrot.lane.b32.xlu1 %v7603_v7, %s8161_s2  ;;  %v4119_v0 = vsel %vm4104_vm0, %v4102_v35, %v4004_v32 }
 0x60d   :  { %7614 = vrot.lane.b32.xlu0 %v7613_v61, %s8165_s16 }
 0x60e   :  { %7619 = vrot.lane.b32.xlu1 %v7618_v55, %s8172_s21 }
 0x60f   :  { %v4070_v33 = vpop.permute.xlu1 %4069 }
 0x610   :  { %v4068_v48 = vpop.permute.xlu0 %4067  ;;  %v4137_v53 = vsel %vm4121_vm1, %v4120_v10, %v4070_v33 }
 0x611   :  { %v4136_v34 = vsel %vm4121_vm1, %v4119_v0, %v4068_v48  ;;  %7624 = vrot.lane.b32.xlu0 %v7623_v30, %s8171_s20 }
 0x612   :  { %7629 = vrot.lane.b32.xlu1 %v7628_v12, %s8173_s8  ;;  %7383 = vmatprep.mubr.msk.f32.mxu0 %vm1275_vm7, %v4136_v34 }
 0x613   :  { %7384 = vmatmul.mubr.msk.f32.gmra.mrb[38].mxu0 %vm1275_vm7, %v4137_v53  ;;  %vm5002_vm7 = vcmask 523264  }
 0x615   :  { %7634 = vrot.lane.b32.xlu0 %v7633_v15, %s8174_s22 }
 0x616   :  { %7639 = vrot.lane.b32.xlu1 %v7638_v19, %s8175_s24 }
 0x629   :  { %v7510_v24 = vpop.permute.xlu1 %7509 }
 0x62a   :  { %v7505_v56 = vpop.permute.xlu0 %7504  ;;  %v7511_v41 = vunpack.i.l.bf16 %v7510_v24  ;;  %v7512_v47 = vunpack.i.h.bf16 %v7510_v24 }
 0x62b   :  { %v7506_v18 = vunpack.i.l.bf16 %v7505_v56  ;;  %v7507_v3 = vunpack.i.h.bf16 %v7505_v56 }
 0x62d   :  { %v4953_v17 = vsel %vm1292_vm3, %v12306_v57, %v7506_v18  ;;  %v7520_v49 = vpop.permute.xlu1 %7519  ;;  %v4954_v50 = vsel %vm1292_vm3, %v12329_v27, %v7507_v3 }
 0x62e   :  { %v7515_v2 = vpop.permute.xlu0 %7514  ;;  %v7521_v11 = vunpack.i.l.bf16 %v7520_v49  ;;  %v4969_v36 = vsel %vm1360_vm11, %v4953_v17, %v7511_v41  ;;  %v7522_v57 = vunpack.i.h.bf16 %v7520_v49  ;;  %v4970_v20 = vsel %vm1360_vm11, %v4954_v50, %v7512_v47 }
 0x62f   :  { %v7516_v13 = vunpack.i.l.bf16 %v7515_v2  ;;  %v7517_v6 = vunpack.i.h.bf16 %v7515_v2 }
 0x631   :  { %v4986_v52 = vsel %vm4985_vm6, %v4969_v36, %v7516_v13  ;;  %v4987_v44 = vsel %vm4985_vm6, %v4970_v20, %v7517_v6  ;;  %v12529_v20 = vld [vmem:[#allocation6 + $0xa0] sm:$0xff] }
 0x632   :  { %v7525_v7 = vpop.permute.xlu0 %7524  ;;  %v7530_v14 = vpop.permute.xlu1 %7529  ;;  %v5003_v25 = vsel %vm5002_vm7, %v4986_v52, %v7521_v11  ;;  %v5004_v51 = vsel %vm5002_vm7, %v4987_v44, %v7522_v57 }
 0x633   :  { %v7526_v9 = vunpack.i.l.bf16 %v7525_v7  ;;  %v7531_v21 = vunpack.i.l.bf16 %v7530_v14  ;;  %v7527_v37 = vunpack.i.h.bf16 %v7525_v7  ;;  %v7532_v61 = vunpack.i.h.bf16 %v7530_v14 }
 0x635   :  { %v5020_v31 = vsel %vm5019_vm8, %v5003_v25, %v7526_v9  ;;  %v5021_v54 = vsel %vm5019_vm8, %v5004_v51, %v7527_v37  ;;  %v4438_v25 = vld [vmem:[#allocation6 + $0xa8] sm:$0x3] }
 0x636   :  { %v7535_v27 = vpop.permute.xlu0 %7534  ;;  %v7540_v62 = vpop.permute.xlu1 %7539  ;;  %v5037_v22 = vsel %vm5036_vm9, %v5020_v31, %v7531_v21  ;;  %v5038_v10 = vsel %vm5036_vm9, %v5021_v54, %v7532_v61  ;;  %v4513_v61 = vrot.slane %v12529_v20, 1 }
 0x637   :  { %v7536_v32 = vunpack.i.l.bf16 %v7535_v27  ;;  %v7541_v55 = vunpack.i.l.bf16 %v7540_v62  ;;  %v7537_v59 = vunpack.i.h.bf16 %v7535_v27  ;;  %v7542_v35 = vunpack.i.h.bf16 %v7540_v62 }
 0x638   :  { %v4561_v27 = vrot.slane %v12529_v20, 2  ;;  %v4562_v62 = vrot.slane %v4438_v25, 2 }
 0x639   :  { %v5054_v1 = vsel %vm5053_vm10, %v5037_v22, %v7536_v32  ;;  %v4955_v48 = vsel %vm1292_vm3, %v12325_v4, %v7541_v55  ;;  %v5055_v5 = vsel %vm5053_vm10, %v5038_v10, %v7537_v59  ;;  %v4956_v53 = vsel %vm1292_vm3, %v12364_v23, %v7542_v35 }
 0x63a   :  { %v7545_v33 = vpop.permute.xlu0 %7544  ;;  %5192 = vmatmul.mubr.f32.vlgmr.msra.gmra.mrb[40].mxu1 %v5054_v1  ;;  %v7550_v30 = vpop.permute.xlu1 %7549  ;;  %v4514_v55 = vrot.slane %v4438_v25, 1 }
 0x63b   :  { %v7547_v60 = vunpack.i.h.bf16 %v7545_v33  ;;  %v7546_v0 = vunpack.i.l.bf16 %v7545_v33  ;;  %7088 = vmatprep.mubr.msk.f32.mxu1 %vm1292_vm3, %v12379_v42  ;;  %v7551_v12 = vunpack.i.l.bf16 %v7550_v30  ;;  %v7552_v15 = vunpack.i.h.bf16 %v7550_v30 }
 0x63d   :  { %v4971_v34 = vsel %vm1360_vm11, %v4955_v48, %v7546_v0  ;;  %v4972_v56 = vsel %vm1360_vm11, %v4956_v53, %v7547_v60  ;;  %v4515_v60 = vsel %vm517_vm2, %v4513_v61, %v4514_v55 }
 0x63e   :  { %v7555_v19 = vpop.permute.xlu0 %7554  ;;  %5197 = vmatmul.mubr.f32.gmra.mrb[42].mxu1 %v5055_v5  ;;  %v7560_v24 = vpop.permute.xlu1 %7559  ;;  %v4988_v4 = vsel %vm4985_vm6, %v4971_v34, %v7551_v12  ;;  %v4989_v13 = vsel %vm4985_vm6, %v4972_v56, %v7552_v15 }
 0x63f   :  { %v7557_v42 = vunpack.i.h.bf16 %v7555_v19  ;;  %v7556_v18 = vunpack.i.l.bf16 %v7555_v19  ;;  %v7376_v41 = vpop.f32.mrb[32].mxu0  ;;  %7089 = vmatprep.mubr.msk.f32.mxu1 %vm1292_vm3, %v12391_v39  ;;  %v7561_v3 = vunpack.i.l.bf16 %v7560_v24  ;;  %v7562_v47 = vunpack.i.h.bf16 %v7560_v24 }
 0x640   :  { %v4310_v17 = vadd.f32 %v7376_v41, %v12293_v38  ;;  %v4304_v49 = vpop.f32.mrb[33].mxu0 }
 0x641   :  { %v5005_v23 = vsel %vm5002_vm7, %v4988_v4, %v7556_v18  ;;  %v4305_v2 = vadd.f32 %v12293_v38, %v4304_v49  ;;  %v5006_v50 = vsel %vm5002_vm7, %v4989_v13, %v7557_v42 }
 0x642   :  { %v4352_v11 = vmax.f32 %v4310_v17, 0.0  ;;  %v7565_v36 = vpop.permute.xlu0 %7564  ;;  %v5022_v9 = vsel %vm5019_vm8, %v5005_v23, %v7561_v3  ;;  %v5023_v37 = vsel %vm5019_vm8, %v5006_v50, %v7562_v47 }
 0x643   :  { %v4351_v6 = vmax.f32 %v4305_v2, 0.0  ;;  %v7567_v52 = vunpack.i.h.bf16 %v7565_v36  ;;  %v7566_v39 = vunpack.i.l.bf16 %v7565_v36  ;;  %v7570_v7 = vpop.permute.xlu1 %7569 }
 0x644   :  { %4410 = vst.msk [vmem:[#allocation6 + $0xc1] sm:$0xff] %vm1292_vm3, %v4352_v11  ;;  %v7571_v14 = vunpack.i.l.bf16 %v7570_v7  ;;  %v7572_v21 = vunpack.i.h.bf16 %v7570_v7 }
 0x645   :  { %4409 = vst.msk [vmem:[#allocation6 + $0xb1] sm:$0xff] %vm1292_vm3, %v4351_v6  ;;  %v5039_v57 = vsel %vm5036_vm9, %v5022_v9, %v7566_v39  ;;  %v5040_v31 = vsel %vm5036_vm9, %v5023_v37, %v7567_v52 }
 0x646   :  { %v5056_v44 = vsel %vm5053_vm10, %v5039_v57, %v7571_v14  ;;  %v5057_v32 = vsel %vm5053_vm10, %v5040_v31, %v7572_v21  ;;  %v7575_v18 = vpop.permute.xlu0 %7574 }
 0x647   :  { %5202 = vmatmul.mubr.f32.gmra.mrb[44].mxu1 %v5056_v44  ;;  %v7576_v41 = vunpack.i.l.bf16 %v7575_v18  ;;  %v7580_v4 = vpop.permute.xlu1 %7579  ;;  %v7577_v3 = vunpack.i.h.bf16 %v7575_v18 }
 0x648   :  { %7090 = vmatprep.mubr.msk.f32.mxu1 %vm1292_vm3, %v12410_v45  ;;  %v4563_v45 = vsel %vm1603_vm4, %v4561_v27, %v4562_v62  ;;  %v7581_v17 = vunpack.i.l.bf16 %v7580_v4  ;;  %v7582_v2 = vunpack.i.h.bf16 %v7580_v4 }
 0x649   :  { %v4957_v23 = vsel %vm1292_vm3, %v12371_v29, %v7576_v41  ;;  %v4958_v13 = vsel %vm1292_vm3, %v12397_v16, %v7577_v3 }
 0x64a   :  { %v7585_v49 = vpop.permute.xlu0 %7584  ;;  %v4973_v50 = vsel %vm1360_vm11, %v4957_v23, %v7581_v17  ;;  %v4974_v14 = vsel %vm1360_vm11, %v4958_v13, %v7582_v2 }
 0x64b   :  { %5207 = vmatmul.mubr.f32.gmra.mrb[46].mxu1 %v5057_v32  ;;  %v12539_v22 = vld [vmem:[#allocation6 + $0xc0] sm:$0xff]  ;;  %v4442_v51 = vld [vmem:[#allocation6 + $0xc8] sm:$0x3]  ;;  %v7586_v47 = vunpack.i.l.bf16 %v7585_v49  ;;  %v7590_v11 = vpop.permute.xlu1 %7589  ;;  %v7587_v39 = vunpack.i.h.bf16 %v7585_v49 }
 0x64c   :  { %7091 = vmatprep.mubr.msk.f32.mxu1 %vm1292_vm3, %v12429_v63  ;;  %v12543_v59 = vld [vmem:[#allocation6 + $0xb0] sm:$0xff]  ;;  %v4440_v1 = vld [vmem:[#allocation6 + $0xb8] sm:$0x3]  ;;  %v4519_v33 = vrot.slane %v12539_v22, 1  ;;  %v4520_v30 = vrot.slane %v4442_v51, 1  ;;  %v4567_v53 = vrot.slane %v12539_v22, 2  ;;  %v7591_v9 = vunpack.i.l.bf16 %v7590_v11 }
 0x64d   :  { %v4564_v54 = vrot.slane %v12543_v59, 2  ;;  %v4565_v35 = vrot.slane %v4440_v1, 2  ;;  %v4516_v0 = vrot.slane %v12543_v59, 1  ;;  %v4517_v48 = vrot.slane %v4440_v1, 1 }
 0x64e   :  { %v12555_v5 = vsel %vm517_vm2, %v4519_v33, %v4520_v30  ;;  %v4568_v15 = vrot.slane %v4442_v51, 2  ;;  %v7653_v24 = vpack.i.bf16 %v12539_v22, %v12543_v59  ;;  %v7595_v57 = vpop.permute.xlu0 %7594  ;;  %v4990_v25 = vsel %vm4985_vm6, %v4973_v50, %v7586_v47 }
 0x64f   :  { %v4566_v63 = vsel %vm1603_vm4, %v4564_v54, %v4565_v35  ;;  %v4518_v10 = vsel %vm517_vm2, %v4516_v0, %v4517_v48  ;;  %v7592_v16 = vunpack.i.h.bf16 %v7590_v11  ;;  %v4991_v44 = vsel %vm4985_vm6, %v4974_v14, %v7587_v39 }
 0x650   :  { %v7648_v12 = vpack.i.bf16 %v4566_v63, %v4563_v45  ;;  %v7643_v34 = vpack.i.bf16 %v4518_v10, %v4515_v60  ;;  %v7658_v19 = vpack.i.bf16 %v12555_v5, %v4518_v10  ;;  %v12565_v56 = vsel %vm1603_vm4, %v4567_v53, %v4568_v15 }
 0x651   :  { %v7663_v42 = vpack.i.bf16 %v12565_v56, %v4566_v63  ;;  %v7596_v37 = vunpack.i.l.bf16 %v7595_v57  ;;  %v5007_v27 = vsel %vm5002_vm7, %v4990_v25, %v7591_v9  ;;  %v7597_v32 = vunpack.i.h.bf16 %v7595_v57 }
 0x652   :  { %7649 = vrot.lane.b32.xlu1 %v7648_v12, %s8165_s16  ;;  %7644 = vrot.lane.b32.xlu0 %v7643_v34, %s8161_s2  ;;  %v5008_v55 = vsel %vm5002_vm7, %v4991_v44, %v7592_v16  ;;  %v4611_v16 = vrot.slane %v12462_v28, 2 }
 0x653   :  { %v5024_v35 = vsel %vm5019_vm8, %v5007_v27, %v7596_v37  ;;  %v5025_v63 = vsel %vm5019_vm8, %v5008_v55, %v7597_v32 }
 0x656   :  { %7659 = vrot.lane.b32.xlu1 %v7658_v19, %s8171_s20  ;;  %7654 = vrot.lane.b32.xlu0 %v7653_v24, %s8172_s21 }
 0x65a   :  { %7664 = vrot.lane.b32.xlu0 %v7663_v42, %s8173_s8 }
 0x672   :  { %v7379_v36 = vpop.f32.mrb[34].mxu0 }
 0x673   :  { %v4320_v6 = vadd.f32 %v7379_v36, %v12293_v38  ;;  %v4314_v52 = vpop.f32.mrb[35].mxu0 }
 0x674   :  { %v4315_v7 = vadd.f32 %v12293_v38, %v4314_v52 }
 0x675   :  { %v4354_v29 = vmax.f32 %v4320_v6, 0.0 }
 0x676   :  { %v4353_v21 = vmax.f32 %v4315_v7, 0.0 }
 0x677   :  { %4412 = vst.msk [vmem:[#allocation6 + $0xe1] sm:$0xff] %vm1292_vm3, %v4354_v29 }
 0x678   :  { %4411 = vst.msk [vmem:[#allocation6 + $0xd1] sm:$0xff] %vm1292_vm3, %v4353_v21  ;;  %v7600_v31 = vpop.permute.xlu1 %7599 }
 0x679   :  { %v7601_v62 = vunpack.i.l.bf16 %v7600_v31  ;;  %v7602_v51 = vunpack.i.h.bf16 %v7600_v31 }
 0x67b   :  { %v7605_v1 = vpop.permute.xlu0 %7604  ;;  %v5041_v30 = vsel %vm5036_vm9, %v5024_v35, %v7601_v62  ;;  %v5042_v34 = vsel %vm5036_vm9, %v5025_v63, %v7602_v51 }
 0x67c   :  { %v7606_v45 = vunpack.i.l.bf16 %v7605_v1  ;;  %v7610_v54 = vpop.permute.xlu1 %7609  ;;  %v7607_v60 = vunpack.i.h.bf16 %v7605_v1 }
 0x67d   :  { %v7611_v33 = vunpack.i.l.bf16 %v7610_v54  ;;  %v7612_v0 = vunpack.i.h.bf16 %v7610_v54 }
 0x67e   :  { %v5058_v48 = vsel %vm5053_vm10, %v5041_v30, %v7606_v45  ;;  %v12596_v41 = vld [vmem:[#allocation6 + $0xe0] sm:$0xff]  ;;  %v4446_v47 = vld [vmem:[#allocation6 + $0xe8] sm:$0x3] }
 0x67f   :  { %v7615_v12 = vpop.permute.xlu0 %7614  ;;  %5212 = vmatmul.mubr.f32.gmra.mrb[48].mxu1 %v5058_v48  ;;  %v12588_v10 = vld [vmem:[#allocation6 + $0xd0] sm:$0xff]  ;;  %v4444_v53 = vld [vmem:[#allocation6 + $0xd8] sm:$0x3]  ;;  %v4959_v4 = vsel %vm1292_vm3, %v12405_v43, %v7611_v33  ;;  %v4960_v23 = vsel %vm1292_vm3, %v12447_v46, %v7612_v0  ;;  %v4525_v6 = vrot.slane %v12596_v41, 1  ;;  %v4526_v29 = vrot.slane %v4446_v47, 1 }
 0x680   :  { %v7617_v15 = vunpack.i.h.bf16 %v7615_v12  ;;  %v7616_v19 = vunpack.i.l.bf16 %v7615_v12  ;;  %v7620_v24 = vpop.permute.xlu1 %7619  ;;  %7092 = vmatprep.mubr.msk.f32.mxu1 %vm1292_vm3, %v12456_v40  ;;  %v7668_v42 = vpack.i.bf16 %v12588_v10, %v12539_v22  ;;  %v4522_v18 = vrot.slane %v12588_v10, 1 }
 0x681   :  { %v7621_v3 = vunpack.i.l.bf16 %v7620_v24  ;;  %v4523_v17 = vrot.slane %v4444_v53, 1  ;;  %v4570_v49 = vrot.slane %v12588_v10, 2  ;;  %v5059_v40 = vsel %vm5053_vm10, %v5042_v34, %v7607_v60 }
 0x682   :  { %v4975_v2 = vsel %vm1360_vm11, %v4959_v4, %v7616_v19  ;;  %7669 = vrot.lane.b32.xlu1 %v7668_v42, %s8174_s22  ;;  %v4571_v13 = vrot.slane %v4444_v53, 2  ;;  %v4976_v11 = vsel %vm1360_vm11, %v4960_v23, %v7617_v15  ;;  %v7622_v36 = vunpack.i.h.bf16 %v7620_v24 }
 0x683   :  { %v7625_v50 = vpop.permute.xlu0 %7624  ;;  %5217 = vmatmul.mubr.f32.gmra.mrb[50].mxu1 %v5059_v40  ;;  %v4524_v43 = vsel %vm517_vm2, %v4522_v18, %v4523_v17  ;;  %v4992_v14 = vsel %vm4985_vm6, %v4975_v2, %v7621_v3  ;;  %v4573_v21 = vrot.slane %v12596_v41, 2  ;;  %v7688_v31 = vpack.i.bf16 %v12596_v41, %v12588_v10 }
 0x684   :  { %v7627_v52 = vunpack.i.h.bf16 %v7625_v50  ;;  %v7626_v39 = vunpack.i.l.bf16 %v7625_v50  ;;  %v7630_v46 = vpop.permute.xlu1 %7629  ;;  %7093 = vmatprep.mubr.msk.f32.mxu1 %vm1292_vm3, %v12472_v58  ;;  %v7673_v7 = vpack.i.bf16 %v4524_v43, %v12555_v5  ;;  %v12614_v57 = vsel %vm1603_vm4, %v4570_v49, %v4571_v13 }
 0x685   :  { %v7631_v9 = vunpack.i.l.bf16 %v7630_v46  ;;  %v4612_v58 = vrot.slane %v12464_v8, 2  ;;  %v4993_v5 = vsel %vm4985_vm6, %v4976_v11, %v7622_v36  ;;  %v7632_v44 = vunpack.i.h.bf16 %v7630_v46 }
 0x686   :  { %v5009_v25 = vsel %vm5002_vm7, %v4992_v14, %v7626_v39  ;;  %7674 = vrot.lane.b32.xlu0 %v7673_v7, %s8175_s24  ;;  %7679 = vrot.lane.b32.xlu1 %v7673_v7, %s8161_s2  ;;  %v4574_v27 = vrot.slane %v4446_v47, 2  ;;  %v5010_v62 = vsel %vm5002_vm7, %v4993_v5, %v7627_v52  ;;  %v7683_v1 = vpack.i.bf16 %v12614_v57, %v12565_v56 }
 0x687   :  { %v7635_v37 = vpop.permute.xlu0 %7634  ;;  %v5026_v28 = vsel %vm5019_vm8, %v5009_v25, %v7631_v9  ;;  %v4527_v8 = vsel %vm517_vm2, %v4525_v6, %v4526_v29  ;;  %v4613_v33 = vsel %vm1603_vm4, %v4611_v16, %v4612_v58  ;;  %v5027_v0 = vsel %vm5019_vm8, %v5010_v62, %v7632_v44 }
 0x688   :  { %v7637_v32 = vunpack.i.h.bf16 %v7635_v37  ;;  %v7636_v55 = vunpack.i.l.bf16 %v7635_v37  ;;  %v7640_v51 = vpop.permute.xlu1 %7639  ;;  %v12631_v54 = vsel %vm1603_vm4, %v4573_v21, %v4574_v27  ;;  %v7693_v48 = vpack.i.bf16 %v4527_v8, %v4524_v43  ;;  %v8149_v21 = vld [vmem:[%s14664_s7] ss:$0 sm:$0xff] }
 0x689   :  { %v7641_v45 = vunpack.i.l.bf16 %v7640_v51  ;;  %v7642_v30 = vunpack.i.h.bf16 %v7640_v51  ;;  %v7698_v63 = vpack.i.bf16 %v12631_v54, %v12614_v57 }
 0x68a   :  { %7684 = vrot.lane.b32.xlu0 %v7683_v1, %s8165_s16  ;;  %7689 = vrot.lane.b32.xlu1 %v7688_v31, %s8172_s21  ;;  %v5043_v35 = vsel %vm5036_vm9, %v5026_v28, %v7636_v55  ;;  %v5044_v12 = vsel %vm5036_vm9, %v5027_v0, %v7637_v32 }
 0x68b   :  { %v5060_v60 = vsel %vm5053_vm10, %v5043_v35, %v7641_v45  ;;  %v5061_v34 = vsel %vm5053_vm10, %v5044_v12, %v7642_v30 }
 0x68c   :  { %5222 = vmatmul.mubr.f32.gmra.mrb[52].mxu1 %v5060_v60 }
 0x68d   :  { %7094 = vmatprep.mubr.msk.f32.mxu1 %vm1292_vm3, %v4613_v33 }
 0x68e   :  { %7694 = vrot.lane.b32.xlu0 %v7693_v48, %s8171_s20  ;;  %7699 = vrot.lane.b32.xlu1 %v7698_v63, %s8173_s8 }
 0x690   :  { %5227 = vmatmul.mubr.f32.gmra.mrb[54].mxu1 %v5061_v34 }
 0x691   :  { %7095 = vmatprep.mubr.msk.f32.mxu1 %vm1292_vm3, %v12565_v56 }
 0x6ae   :  { %v7382_v53 = vpop.f32.mrb[36].mxu0 }
 0x6af   :  { %v4330_v15 = vadd.f32 %v7382_v53, %v12293_v38  ;;  %v4324_v19 = vpop.f32.mrb[37].mxu0 }
 0x6b0   :  { %v4325_v24 = vadd.f32 %v12293_v38, %v4324_v19 }
 0x6b1   :  { %v4356_v42 = vmax.f32 %v4330_v15, 0.0 }
 0x6b2   :  { %v4355_v18 = vmax.f32 %v4325_v24, 0.0 }
 0x6b3   :  { %4414 = vst.msk [vmem:[#allocation6 + $0x101] sm:$0xff] %vm1292_vm3, %v4356_v42 }
 0x6b4   :  { %4413 = vst.msk [vmem:[#allocation6 + $0xf1] sm:$0xff] %vm1292_vm3, %v4355_v18 }
 0x6ba   :  { %v12658_v40 = vld [vmem:[#allocation6 + $0x100] sm:$0xff]  ;;  %v4450_v38 = vld [vmem:[#allocation6 + $0x108] sm:$0x3] }
 0x6bb   :  { %v12652_v4 = vld [vmem:[#allocation6 + $0xf0] sm:$0xff]  ;;  %v4448_v3 = vld [vmem:[#allocation6 + $0xf8] sm:$0x3]  ;;  %v4531_v36 = vrot.slane %v12658_v40, 1  ;;  %v4532_v50 = vrot.slane %v4450_v38, 1  ;;  %v4579_v43 = vrot.slane %v12658_v40, 2 }
 0x6bc   :  { %v7703_v17 = vpack.i.bf16 %v12652_v4, %v12596_v41  ;;  %v4528_v56 = vrot.slane %v12652_v4, 1  ;;  %v4529_v49 = vrot.slane %v4448_v3, 1  ;;  %v4576_v23 = vrot.slane %v12652_v4, 2 }
 0x6bd   :  { %v4577_v2 = vrot.slane %v4448_v3, 2  ;;  %v4580_v6 = vrot.slane %v4450_v38, 2  ;;  %v7723_v39 = vpack.i.bf16 %v12658_v40, %v12652_v4  ;;  %v4533_v46 = vsel %vm517_vm2, %v4531_v36, %v4532_v50 }
 0x6be   :  { %7704 = vrot.lane.b32.xlu0 %v7703_v17, %s8174_s22  ;;  %v4530_v13 = vsel %vm517_vm2, %v4528_v56, %v4529_v49 }
 0x6bf   :  { %v7708_v47 = vpack.i.bf16 %v4530_v13, %v4527_v8  ;;  %v12663_v11 = vsel %vm1603_vm4, %v4576_v23, %v4577_v2  ;;  %v12676_v7 = vsel %vm1603_vm4, %v4579_v43, %v4580_v6  ;;  %v7728_v14 = vpack.i.bf16 %v4533_v46, %v4530_v13 }
 0x6c0   :  { %v7718_v52 = vpack.i.bf16 %v12663_v11, %v12631_v54  ;;  %v7733_v9 = vpack.i.bf16 %v12676_v7, %v12663_v11 }
 0x6c1   :  { %7709 = vrot.lane.b32.xlu1 %v7708_v47, %s8175_s24 }
 0x6c2   :  { %7714 = vrot.lane.b32.xlu0 %v7708_v47, %s8161_s2 }
 0x6c4   :  { %v7645_v29 = vpop.permute.xlu0 %7644  ;;  %v7650_v37 = vpop.permute.xlu1 %7649 }
 0x6c5   :  { %7719 = vrot.lane.b32.xlu1 %v7718_v52, %s8165_s16  ;;  %v7646_v27 = vunpack.i.l.bf16 %v7645_v29  ;;  %v7651_v32 = vunpack.i.l.bf16 %v7650_v37  ;;  %v7647_v55 = vunpack.i.h.bf16 %v7645_v29  ;;  %v7652_v8 = vunpack.i.h.bf16 %v7650_v37 }
 0x6c6   :  { %7724 = vrot.lane.b32.xlu0 %v7723_v39, %s8172_s21 }
 0x6c7   :  { %v4961_v51 = vsel %vm1292_vm3, %v12529_v20, %v7646_v27  ;;  %v4962_v35 = vsel %vm1292_vm3, %v12543_v59, %v7647_v55 }
 0x6c8   :  { %v7655_v62 = vpop.permute.xlu0 %7654  ;;  %v7660_v1 = vpop.permute.xlu1 %7659  ;;  %v4977_v30 = vsel %vm1360_vm11, %v4961_v51, %v7651_v32  ;;  %v4978_v49 = vsel %vm1360_vm11, %v4962_v35, %v7652_v8 }
 0x6c9   :  { %7729 = vrot.lane.b32.xlu1 %v7728_v14, %s8171_s20  ;;  %v7656_v45 = vunpack.i.l.bf16 %v7655_v62  ;;  %v7661_v33 = vunpack.i.l.bf16 %v7660_v1  ;;  %v7657_v15 = vunpack.i.h.bf16 %v7655_v62  ;;  %v7662_v56 = vunpack.i.h.bf16 %v7660_v1  ;;  %v12751_v1 = vld [vmem:[%s14665_s9] ss:$0 sm:$0xff] }
 0x6ca   :  { %7734 = vrot.lane.b32.xlu0 %v7733_v9, %s8173_s8 }
 0x6cb   :  { %v4994_v19 = vsel %vm4985_vm6, %v4977_v30, %v7656_v45  ;;  %v4995_v50 = vsel %vm4985_vm6, %v4978_v49, %v7657_v15 }
 0x6cc   :  { %v7665_v28 = vpop.permute.xlu0 %7664  ;;  %v5011_v38 = vsel %vm5002_vm7, %v4994_v19, %v7661_v33 }
 0x6cd   :  { %v7666_v24 = vunpack.i.l.bf16 %v7665_v28  ;;  %v7667_v43 = vunpack.i.h.bf16 %v7665_v28 }
 0x6cf   :  { %v5028_v52 = vsel %vm5019_vm8, %v5011_v38, %v7666_v24 }
 0x6e6   :  { %v7385_v25 = vpop.f32.mrb[38].mxu0 }
 0x6e7   :  { %v4340_v16 = vadd.f32 %v8149_v21, %v7385_v25  ;;  %v4334_v58 = vpop.f32.mrb[39].mxu0 }
 0x6e8   :  { %v4335_v5 = vadd.f32 %v8149_v21, %v4334_v58  ;;  %v5012_v21 = vsel %vm5002_vm7, %v4995_v50, %v7662_v56 }
 0x6e9   :  { %v4358_v44 = vmax.f32 %v4340_v16, 0.0  ;;  %v5029_v58 = vsel %vm5019_vm8, %v5012_v21, %v7667_v43 }
 0x6ea   :  { %v4357_v31 = vmax.f32 %v4335_v5, 0.0 }
 0x6eb   :  { %4416 = vst.msk [vmem:[#allocation6 + $0x121] sm:$0xff] %vm1292_vm3, %v4358_v44 }
 0x6ec   :  { %4415 = vst.msk [vmem:[#allocation6 + $0x111] sm:$0xff] %vm1292_vm3, %v4357_v31  ;;  %v12732_v31 = vld [vmem:[#allocation6 + $0x138] sm:$0x3] }
 0x6ed   :  { %v4609_v55 = vrot.slane %v12732_v31, 1 }
 0x6f2   :  { %v4453_v42 = vld [vmem:[#allocation6 + $0x120] sm:$0xff]  ;;  %v4454_v18 = vld [vmem:[#allocation6 + $0x128] sm:$0x3] }
 0x6f3   :  { %v12693_v60 = vld [vmem:[#allocation6 + $0x110] sm:$0xff]  ;;  %v4452_v0 = vld [vmem:[#allocation6 + $0x118] sm:$0x3]  ;;  %v4592_v47 = vrot.slane %v4453_v42, 1  ;;  %v4593_v36 = vrot.slane %v4454_v18, 1  ;;  %v4598_v27 = vrot.slane %v4453_v42, 2 }
 0x6f4   :  { %v7670_v48 = vpop.permute.xlu1 %7669  ;;  %v7738_v63 = vpack.i.bf16 %v12693_v60, %v12658_v40  ;;  %v4534_v12 = vrot.slane %v12693_v60, 1  ;;  %v4535_v34 = vrot.slane %v4452_v0, 1  ;;  %v4582_v53 = vrot.slane %v12693_v60, 2 }
 0x6f5   :  { %v4583_v59 = vrot.slane %v4452_v0, 2  ;;  %v7671_v3 = vunpack.i.l.bf16 %v7670_v48  ;;  %v7672_v39 = vunpack.i.h.bf16 %v7670_v48  ;;  %v7758_v25 = vpack.i.bf16 %v4453_v42, %v12693_v60  ;;  %v5304_v48 = vld [vmem:[#allocation6] sm:$0xff] }
 0x6f6   :  { %7739 = vrot.lane.b32.xlu1 %v7738_v63, %s8174_s22  ;;  %v4536_v17 = vsel %vm517_vm2, %v4534_v12, %v4535_v34  ;;  %v4594_v16 = vsel %vm517_vm2, %v4592_v47, %v4593_v36  ;;  %v4599_v62 = vrot.slane %v4454_v18, 2  ;;  %v5305_v63 = vld [vmem:[#allocation6 + $0x8] sm:$0x3]  ;;  %v5376_v34 = vrot.slane %v5304_v48, 1 }
 0x6f7   :  { %v7743_v23 = vpack.i.bf16 %v4536_v17, %v4533_v46  ;;  %v12705_v13 = vsel %vm1603_vm4, %v4582_v53, %v4583_v59  ;;  %v5045_v46 = vsel %vm5036_vm9, %v5028_v52, %v7671_v3  ;;  %v5046_v5 = vsel %vm5036_vm9, %v5029_v58, %v7672_v39 }
 0x6f8   :  { %v7675_v2 = vpop.permute.xlu0 %7674  ;;  %v7753_v29 = vpack.i.bf16 %v12705_v13, %v12676_v7  ;;  %v7763_v37 = vpack.i.bf16 %v4594_v16, %v4536_v17  ;;  %v5377_v53 = vrot.slane %v5305_v63, 1  ;;  %v5424_v15 = vrot.slane %v5304_v48, 2 }
 0x6f9   :  { %v7676_v6 = vunpack.i.l.bf16 %v7675_v2  ;;  %7744 = vrot.lane.b32.xlu0 %v7743_v23, %s8175_s24  ;;  %v7677_v14 = vunpack.i.h.bf16 %v7675_v2  ;;  %v5425_v19 = vrot.slane %v5305_v63, 2 }
 0x6fa   :  { %7749 = vrot.lane.b32.xlu1 %v7743_v23, %s8161_s2 }
 0x6fb   :  { %v5062_v9 = vsel %vm5053_vm10, %v5045_v46, %v7676_v6  ;;  %v5063_v44 = vsel %vm5053_vm10, %v5046_v5, %v7677_v14  ;;  %v12762_v18 = vsel %vm1603_vm4, %v5424_v15, %v5425_v19 }
 0x6fc   :  { %5232 = vmatmul.mubr.f32.gmra.mrb[56].mxu1 %v5062_v9 }
 0x6fd   :  { %7096 = vmatprep.mubr.msk.f32.mxu1 %vm1292_vm3, %v12614_v57  ;;  %7754 = vrot.lane.b32.xlu0 %v7753_v29, %s8165_s16  ;;  %v12730_v57 = vld [vmem:[#allocation6 + $0x130] sm:$0xff] }
 0x6fe   :  { %7759 = vrot.lane.b32.xlu1 %v7758_v25, %s8172_s21  ;;  %15512 = vst [vmem:[#allocation59_spill] sm:$0xff] %v12730_v57  ;;  %v14898_v32 = vrot.slane %v12730_v57, 1 }
 0x700   :  { %5237 = vmatmul.mubr.f32.gmra.mrb[58].mxu1 %v5063_v44  ;;  %v4610_v51 = vsel %vm517_vm2, %v14898_v32, %v4609_v55  ;;  %v7680_v44 = vpop.permute.xlu1 %7679  ;;  %v7685_v55 = vpop.permute.xlu0 %7684 }
 0x701   :  { %7097 = vmatprep.mubr.msk.f32.mxu1 %vm1292_vm3, %v12631_v54  ;;  %7764 = vrot.lane.b32.xlu0 %v7763_v37, %s8171_s20  ;;  %v12739_v54 = vsel %vm1603_vm4, %v4598_v27, %v4599_v62  ;;  %v7682_v19 = vunpack.i.h.bf16 %v7680_v44  ;;  %v5957_v62 = vld [vmem:[%s14666_s10 + $0x28] sm:$0xff] }
 0x702   :  { %4837 = vrot.lane.b32.xlu1 %v12705_v13, %s8173_s8 }
 0x704   :  { %v7695_v48 = vpop.permute.xlu0 %7694 }
 0x705   :  { %4885 = vrot.lane.b32.xlu0 %v4453_v42, %s8174_s22  ;;  %v5378_v42 = vsel %vm517_vm2, %v5376_v34, %v5377_v53 }
 0x706   :  { %4933 = vrot.lane.b32.xlu1 %v4594_v16, %s8175_s24 }
 0x709   :  { %4839 = vrot.lane.b32.xlu0 %v12739_v54, %s8173_s8 }
 0x70a   :  { %4887 = vrot.lane.b32.xlu1 %v12730_v57, %s8174_s22 }
 0x70d   :  { %v5193_v45 = vpop.f32.mrb[40].mxu1  ;;  %4935 = vrot.lane.b32.xlu0 %v4610_v51, %s8175_s24 }
 0x70e   :  { %v5194_v28 = vadd.f32 %v12751_v1, %v5193_v45  ;;  %v5195_v8 = vpop.f32.mrb[41].mxu1 }
 0x710   :  { %v5272_v35 = vmax.f32 %v5194_v28, 0.0  ;;  %v7690_v28 = vpop.permute.xlu1 %7689 }
 0x711   :  { %v5198_v33 = vpop.f32.mrb[42].mxu1 }
 0x712   :  { %5288 = vst.msk [vmem:[#allocation6 + $0x11] sm:$0xff] %vm1292_vm3, %v5272_v35  ;;  %v5199_v30 = vadd.f32 %v12751_v1, %v5198_v33  ;;  %v5200_v0 = vpop.f32.mrb[43].mxu1  ;;  %v7681_v33 = vunpack.i.l.bf16 %v7680_v44 }
 0x714   :  { %v5273_v12 = vmax.f32 %v5199_v30, 0.0  ;;  %v7686_v30 = vunpack.i.l.bf16 %v7685_v55 }
 0x716   :  { %5289 = vst.msk [vmem:[#allocation6 + $0x21] sm:$0xff] %vm1292_vm3, %v5273_v12 }
 0x719   :  { %v12758_v24 = vld [vmem:[#allocation6 + $0x10] sm:$0xff]  ;;  %v5307_v59 = vld [vmem:[#allocation6 + $0x18] sm:$0x3] }
 0x71a   :  { %v5203_v3 = vpop.f32.mrb[44].mxu1  ;;  %v5379_v17 = vrot.slane %v12758_v24, 1  ;;  %v5380_v56 = vrot.slane %v5307_v59, 1  ;;  %v5427_v49 = vrot.slane %v12758_v24, 2  ;;  %v5428_v23 = vrot.slane %v5307_v59, 2 }
 0x71b   :  { %v5204_v2 = vadd.f32 %v12751_v1, %v5203_v3  ;;  %v5205_v38 = vpop.f32.mrb[45].mxu1  ;;  %v4963_v59 = vsel %vm1292_vm3, %v12539_v22, %v7681_v33  ;;  %v7687_v3 = vunpack.i.h.bf16 %v7685_v55 }
 0x71c   :  { %v12768_v47 = vsel %vm517_vm2, %v5379_v17, %v5380_v56  ;;  %v12771_v36 = vsel %vm1603_vm4, %v5427_v49, %v5428_v23  ;;  %v4979_v17 = vsel %vm1360_vm11, %v4963_v59, %v7686_v30  ;;  %v7696_v56 = vunpack.i.l.bf16 %v7695_v48  ;;  %v7700_v49 = vpop.permute.xlu1 %7699 }
 0x71d   :  { %v5274_v50 = vmax.f32 %v5204_v2, 0.0  ;;  %v7768_v43 = vpack.i.bf16 %v12768_v47, %v5378_v42  ;;  %v12774_v6 = vld [vmem:[#allocation6 + $0x20] sm:$0xff]  ;;  %v5309_v52 = vld [vmem:[#allocation6 + $0x28] sm:$0x3]  ;;  %v7808_v39 = vpack.i.bf16 %v12771_v36, %v12762_v18  ;;  %v7691_v42 = vunpack.i.l.bf16 %v7690_v28 }
 0x71e   :  { %v5208_v46 = vpop.f32.mrb[46].mxu1  ;;  %v5383_v14 = vrot.slane %v5309_v52, 1  ;;  %v5430_v9 = vrot.slane %v12774_v6, 2  ;;  %v5431_v29 = vrot.slane %v5309_v52, 2  ;;  %v5382_v25 = vrot.slane %v12774_v6, 1 }
 0x71f   :  { %5290 = vst.msk [vmem:[#allocation6 + $0x31] sm:$0xff] %vm1292_vm3, %v5274_v50  ;;  %v5209_v21 = vadd.f32 %v12751_v1, %v5208_v46  ;;  %7769 = vrot.lane.b32.xlu1 %v7768_v43, %s8161_s2  ;;  %v5210_v16 = vpop.f32.mrb[47].mxu1  ;;  %v4964_v38 = vsel %vm1292_vm3, %v12588_v10, %v7682_v19  ;;  %v7692_v50 = vunpack.i.h.bf16 %v7690_v28  ;;  %v4996_v22 = vsel %vm4985_vm6, %v4979_v17, %v7691_v42 }
 0x720   :  { %v12784_v58 = vsel %vm1603_vm4, %v5430_v9, %v5431_v29  ;;  %v12787_v5 = vsel %vm517_vm2, %v5382_v25, %v5383_v14  ;;  %v7701_v43 = vunpack.i.l.bf16 %v7700_v49  ;;  %v4980_v46 = vsel %vm1360_vm11, %v4964_v38, %v7687_v3 }
 0x721   :  { %v5275_v37 = vmax.f32 %v5209_v21, 0.0  ;;  %7104 = vmatprep.mubr.msk.f32.mxu0 %vm1292_vm3, %v12784_v58  ;;  %v7697_v14 = vunpack.i.h.bf16 %v7695_v48  ;;  %v5013_v9 = vsel %vm5002_vm7, %v4996_v22, %v7696_v56  ;;  %v4997_v21 = vsel %vm4985_vm6, %v4980_v46, %v7692_v50 }
 0x722   :  { %v7702_v16 = vunpack.i.h.bf16 %v7700_v49 }
 0x723   :  { %5291 = vst.msk [vmem:[#allocation6 + $0x41] sm:$0xff] %vm1292_vm3, %v5275_v37  ;;  %v5030_v37 = vsel %vm5019_vm8, %v5013_v9, %v7701_v43  ;;  %v5014_v10 = vsel %vm5002_vm7, %v4997_v21, %v7697_v14 }
 0x724   :  { %v5031_v33 = vsel %vm5019_vm8, %v5014_v10, %v7702_v16 }
 0x726   :  { %v12796_v51 = vld [vmem:[#allocation6 + $0x30] sm:$0xff]  ;;  %v12798_v45 = vld [vmem:[#allocation6 + $0x38] sm:$0x3] }
 0x727   :  { %v5385_v8 = vrot.slane %v12796_v51, 1  ;;  %v5386_v35 = vrot.slane %v12798_v45, 1 }
 0x729   :  { %v12803_v0 = vsel %vm517_vm2, %v5385_v8, %v5386_v35 }
 0x72a   :  { %v12807_v63 = vpack.i.bf16 %v12803_v0, %v12787_v5  ;;  %v12809_v12 = vld [vmem:[#allocation6 + $0x40] sm:$0xff]  ;;  %v12811_v34 = vld [vmem:[#allocation6 + $0x48] sm:$0x3] }
 0x72b   :  { %v5388_v53 = vrot.slane %v12809_v12, 1  ;;  %v5389_v15 = vrot.slane %v12811_v34, 1 }
 0x72c   :  { %7774 = vrot.lane.b32.xlu0 %v12807_v63, %s8161_s2 }
 0x72d   :  { %v12821_v23 = vsel %vm517_vm2, %v5388_v53, %v5389_v15 }
 0x730   :  { %v7705_v52 = vpop.permute.xlu0 %7704 }
 0x731   :  { %v7706_v29 = vunpack.i.l.bf16 %v7705_v52  ;;  %v7707_v55 = vunpack.i.h.bf16 %v7705_v52 }
 0x733   :  { %v7710_v25 = vpop.permute.xlu1 %7709  ;;  %v5047_v28 = vsel %vm5036_vm9, %v5030_v37, %v7706_v29  ;;  %v5048_v30 = vsel %vm5036_vm9, %v5031_v33, %v7707_v55 }
 0x734   :  { %v7711_v44 = vunpack.i.l.bf16 %v7710_v25  ;;  %v7712_v8 = vunpack.i.h.bf16 %v7710_v25  ;;  %v7715_v17 = vpop.permute.xlu0 %7714 }
 0x735   :  { %v7716_v46 = vunpack.i.l.bf16 %v7715_v17  ;;  %v7717_v55 = vunpack.i.h.bf16 %v7715_v17 }
 0x736   :  { %v5064_v35 = vsel %vm5053_vm10, %v5047_v28, %v7711_v44  ;;  %v5065_v48 = vsel %vm5053_vm10, %v5048_v30, %v7712_v8 }
 0x737   :  { %5242 = vmatmul.mubr.f32.gmra.mrb[60].mxu1 %v5064_v35  ;;  %v7720_v49 = vpop.permute.xlu1 %7719  ;;  %v4965_v33 = vsel %vm1292_vm3, %v12596_v41, %v7716_v46  ;;  %v4966_v17 = vsel %vm1292_vm3, %v12652_v4, %v7717_v55 }
 0x738   :  { %7098 = vmatprep.mubr.msk.f32.mxu1 %vm1292_vm3, %v12663_v11  ;;  %v7721_v29 = vunpack.i.l.bf16 %v7720_v49  ;;  %v7722_v30 = vunpack.i.h.bf16 %v7720_v49 }
 0x73a   :  { %v4982_v49 = vsel %vm1360_vm11, %v4966_v17, %v7722_v30 }
 0x73b   :  { %5247 = vmatmul.mubr.f32.gmra.mrb[62].mxu1 %v5065_v48  ;;  %v7730_v21 = vpop.permute.xlu1 %7729 }
 0x73c   :  { %7099 = vmatprep.mubr.msk.f32.mxu1 %vm1292_vm3, %v12676_v7  ;;  %v7725_v7 = vpop.permute.xlu0 %7724  ;;  %v7732_v46 = vunpack.i.h.bf16 %v7730_v21 }
 0x73d   :  { %v7726_v48 = vunpack.i.l.bf16 %v7725_v7 }
 0x752   :  { %v5213_v53 = vpop.f32.mrb[48].mxu1 }
 0x753   :  { %v5214_v15 = vadd.f32 %v12751_v1, %v5213_v53  ;;  %v5215_v19 = vpop.f32.mrb[49].mxu1 }
 0x754   :  { %v4981_v19 = vsel %vm1360_vm11, %v4965_v33, %v7721_v29 }
 0x755   :  { %v5276_v59 = vmax.f32 %v5214_v15, 0.0 }
 0x756   :  { %v5218_v42 = vpop.f32.mrb[50].mxu1 }
 0x757   :  { %5292 = vst.msk [vmem:[#allocation6 + $0x51] sm:$0xff] %vm1292_vm3, %v5276_v59  ;;  %v5219_v11 = vadd.f32 %v12751_v1, %v5218_v42  ;;  %v5220_v3 = vpop.f32.mrb[51].mxu1  ;;  %v7731_v59 = vunpack.i.l.bf16 %v7730_v21  ;;  %v7735_v42 = vpop.permute.xlu0 %7734 }
 0x759   :  { %v5277_v56 = vmax.f32 %v5219_v11, 0.0 }
 0x75b   :  { %5293 = vst.msk [vmem:[#allocation6 + $0x61] sm:$0xff] %vm1292_vm3, %v5277_v56  ;;  %v7727_v56 = vunpack.i.h.bf16 %v7725_v7 }
 0x75d   :  { %v4999_v29 = vsel %vm4985_vm6, %v4982_v49, %v7727_v56 }
 0x75e   :  { %v12846_v38 = vld [vmem:[#allocation6 + $0x50] sm:$0xff]  ;;  %v12848_v50 = vld [vmem:[#allocation6 + $0x58] sm:$0x3]  ;;  %v5016_v21 = vsel %vm5002_vm7, %v4999_v29, %v7732_v46 }
 0x75f   :  { %v5223_v22 = vpop.f32.mrb[52].mxu1  ;;  %v5391_v43 = vrot.slane %v12846_v38, 1  ;;  %v5392_v52 = vrot.slane %v12848_v50, 1 }
 0x760   :  { %v5224_v14 = vadd.f32 %v12751_v1, %v5223_v22  ;;  %v5225_v9 = vpop.f32.mrb[53].mxu1  ;;  %v4998_v22 = vsel %vm4985_vm6, %v4981_v19, %v7726_v48 }
 0x761   :  { %v12854_v25 = vsel %vm517_vm2, %v5391_v43, %v5392_v52  ;;  %v7736_v43 = vunpack.i.l.bf16 %v7735_v42 }
 0x762   :  { %v5278_v16 = vmax.f32 %v5224_v14, 0.0  ;;  %v12858_v44 = vpack.i.bf16 %v12854_v25, %v12821_v23  ;;  %v12860_v37 = vld [vmem:[#allocation6 + $0x60] sm:$0xff]  ;;  %v12862_v10 = vld [vmem:[#allocation6 + $0x68] sm:$0x3]  ;;  %v5015_v14 = vsel %vm5002_vm7, %v4998_v22, %v7731_v59 }
 0x763   :  { %v5228_v28 = vpop.f32.mrb[54].mxu1  ;;  %v5394_v8 = vrot.slane %v12860_v37, 1  ;;  %v5395_v35 = vrot.slane %v12862_v10, 1 }
 0x764   :  { %5294 = vst.msk [vmem:[#allocation6 + $0x71] sm:$0xff] %vm1292_vm3, %v5278_v16  ;;  %v5229_v53 = vadd.f32 %v12751_v1, %v5228_v28  ;;  %v5230_v15 = vpop.f32.mrb[55].mxu1  ;;  %7779 = vrot.lane.b32.xlu1 %v12858_v44, %s8161_s2  ;;  %v7737_v16 = vunpack.i.h.bf16 %v7735_v42 }
 0x765   :  { %v12874_v11 = vsel %vm517_vm2, %v5394_v8, %v5395_v35  ;;  %v5032_v35 = vsel %vm5019_vm8, %v5015_v14, %v7736_v43 }
 0x766   :  { %v5279_v3 = vmax.f32 %v5229_v53, 0.0  ;;  %v5033_v22 = vsel %vm5019_vm8, %v5016_v21, %v7737_v16 }
 0x768   :  { %5295 = vst.msk [vmem:[#allocation6 + $0x81] sm:$0xff] %vm1292_vm3, %v5279_v3  ;;  %v7740_v52 = vpop.permute.xlu1 %7739 }
 0x769   :  { %v7741_v9 = vunpack.i.l.bf16 %v7740_v52  ;;  %v7742_v48 = vunpack.i.h.bf16 %v7740_v52 }
 0x76b   :  { %v7745_v28 = vpop.permute.xlu0 %7744  ;;  %v12885_v8 = vld [vmem:[#allocation6 + $0x70] sm:$0xff]  ;;  %v12887_v4 = vld [vmem:[#allocation6 + $0x78] sm:$0x3]  ;;  %v5049_v15 = vsel %vm5036_vm9, %v5032_v35, %v7741_v9  ;;  %v5050_v46 = vsel %vm5036_vm9, %v5033_v22, %v7742_v48 }
 0x76c   :  { %v7746_v7 = vunpack.i.l.bf16 %v7745_v28  ;;  %v7750_v55 = vpop.permute.xlu1 %7749  ;;  %v5397_v33 = vrot.slane %v12885_v8, 1  ;;  %v5398_v30 = vrot.slane %v12887_v4, 1  ;;  %v7747_v19 = vunpack.i.h.bf16 %v7745_v28 }
 0x76d   :  { %v7751_v53 = vunpack.i.l.bf16 %v7750_v55  ;;  %v7752_v14 = vunpack.i.h.bf16 %v7750_v55 }
 0x76e   :  { %v5066_v59 = vsel %vm5053_vm10, %v5049_v15, %v7746_v7  ;;  %v12896_v42 = vsel %vm517_vm2, %v5397_v33, %v5398_v30  ;;  %v5067_v29 = vsel %vm5053_vm10, %v5050_v46, %v7747_v19 }
 0x76f   :  { %v7755_v3 = vpop.permute.xlu0 %7754  ;;  %5252 = vmatmul.mubr.f32.gmra.mrb[64].mxu1 %v5066_v59  ;;  %v12900_v17 = vpack.i.bf16 %v12896_v42, %v12874_v11  ;;  %v4967_v43 = vsel %vm1292_vm3, %v12658_v40, %v7751_v53  ;;  %v4615_v40 = vrot.slane %v12732_v31, 2  ;;  %v4968_v55 = vsel %vm1292_vm3, %v12693_v60, %v7752_v14 }
 0x770   :  { %v7756_v56 = vunpack.i.l.bf16 %v7755_v3  ;;  %v7760_v49 = vpop.permute.xlu1 %7759  ;;  %7100 = vmatprep.mubr.msk.f32.mxu1 %vm1292_vm3, %v12705_v13  ;;  %v7757_v28 = vunpack.i.h.bf16 %v7755_v3  ;;  %v14897_v13 = vrot.slane %v12730_v57, 2 }
 0x771   :  { %v7761_v52 = vunpack.i.l.bf16 %v7760_v49  ;;  %7784 = vrot.lane.b32.xlu0 %v12900_v17, %s8161_s2  ;;  %v7762_v30 = vunpack.i.h.bf16 %v7760_v49 }
 0x772   :  { %v4983_v9 = vsel %vm1360_vm11, %v4967_v43, %v7756_v56  ;;  %v4984_v48 = vsel %vm1360_vm11, %v4968_v55, %v7757_v28  ;;  %v4616_v31 = vsel %vm1603_vm4, %v14897_v13, %v4615_v40 }
 0x773   :  { %v7765_v7 = vpop.permute.xlu0 %7764  ;;  %5257 = vmatmul.mubr.f32.gmra.mrb[66].mxu1 %v5067_v29  ;;  %v5000_v33 = vsel %vm4985_vm6, %v4983_v9, %v7761_v52  ;;  %v5001_v60 = vsel %vm4985_vm6, %v4984_v48, %v7762_v30 }
 0x774   :  { %v7766_v16 = vunpack.i.l.bf16 %v7765_v7  ;;  %v4838_v35 = vpop.permute.xlu1 %4837  ;;  %7101 = vmatprep.mubr.msk.f32.mxu1 %vm1292_vm3, %v12739_v54  ;;  %v7767_v53 = vunpack.i.h.bf16 %v7765_v7 }
 0x776   :  { %v5017_v21 = vsel %vm5002_vm7, %v5000_v33, %v7766_v16  ;;  %v5018_v49 = vsel %vm5002_vm7, %v5001_v60, %v7767_v53  ;;  %v5325_v33 = vld [vmem:[#allocation6 + $0xa8] sm:$0x3] }
 0x777   :  { %v5034_v15 = vsel %vm5019_vm8, %v5017_v21, %v4838_v35  ;;  %v4886_v19 = vpop.permute.xlu0 %4885  ;;  %v5401_v30 = vrot.slane %v5325_v33, 1  ;;  %v12936_v21 = vld [vmem:[#allocation6 + $0xa0] sm:$0xff]  ;;  %v5449_v53 = vrot.slane %v5325_v33, 2 }
 0x778   :  { %v5051_v59 = vsel %vm5036_vm9, %v5034_v15, %v4886_v19  ;;  %v4934_v3 = vpop.permute.xlu1 %4933  ;;  %v5448_v48 = vrot.slane %v12936_v21, 2 }
 0x779   :  { %v5068_v54 = vsel %vm5053_vm10, %v5051_v59, %v4934_v3  ;;  %v5402_v59 = vsel %vm517_vm2, %v4513_v61, %v5401_v30 }
 0x77a   :  { %5262 = vmatmul.mubr.f32.gmra.mrb[68].mxu1 %v5068_v54  ;;  %v12946_v3 = vsel %vm1603_vm4, %v5448_v48, %v5449_v53 }
 0x77b   :  { %v4840_v56 = vpop.permute.xlu0 %4839  ;;  %7102 = vmatprep.mubr.msk.f32.mxu1 %vm1292_vm3, %v4616_v31 }
 0x77c   :  { %v5035_v22 = vsel %vm5019_vm8, %v5018_v49, %v4840_v56  ;;  %v4888_v43 = vpop.permute.xlu1 %4887 }
 0x77d   :  { %v5052_v52 = vsel %vm5036_vm9, %v5035_v22, %v4888_v43 }
 0x77f   :  { %v4936_v46 = vpop.permute.xlu0 %4935 }
 0x780   :  { %v5069_v14 = vsel %vm5053_vm10, %v5052_v52, %v4936_v46 }
 0x781   :  { %5267 = vmatmul.mubr.f32.gmra.mrb[70].mxu1 %v5069_v14 }
 0x7cf   :  { %v5233_v9 = vpop.f32.mrb[56].mxu1 }
 0x7d0   :  { %v5234_v29 = vadd.f32 %v12751_v1, %v5233_v9  ;;  %v5235_v28 = vpop.f32.mrb[57].mxu1 }
 0x7d2   :  { %v5280_v7 = vmax.f32 %v5234_v29, 0.0 }
 0x7d3   :  { %v5238_v16 = vpop.f32.mrb[58].mxu1 }
 0x7d4   :  { %5296 = vst.msk [vmem:[#allocation6 + $0xb1] sm:$0xff] %vm1292_vm3, %v5280_v7  ;;  %v5239_v35 = vadd.f32 %v12751_v1, %v5238_v16  ;;  %v5240_v40 = vpop.f32.mrb[59].mxu1 }
 0x7d6   :  { %v5281_v55 = vmax.f32 %v5239_v35, 0.0 }
 0x7d8   :  { %5297 = vst.msk [vmem:[#allocation6 + $0xc1] sm:$0xff] %vm1292_vm3, %v5281_v55 }
 0x7db   :  { %v12940_v15 = vld [vmem:[#allocation6 + $0xb0] sm:$0xff]  ;;  %v5327_v19 = vld [vmem:[#allocation6 + $0xb8] sm:$0x3] }
 0x7dc   :  { %v5403_v31 = vrot.slane %v12940_v15, 1  ;;  %v5404_v54 = vrot.slane %v5327_v19, 1  ;;  %v5451_v60 = vrot.slane %v12940_v15, 2  ;;  %v5452_v56 = vrot.slane %v5327_v19, 2 }
 0x7de   :  { %v12951_v49 = vsel %vm517_vm2, %v5403_v31, %v5404_v54  ;;  %v12954_v22 = vsel %vm1603_vm4, %v5451_v60, %v5452_v56 }
 0x7df   :  { %v7788_v43 = vpack.i.bf16 %v12951_v49, %v5402_v59  ;;  %v12957_v20 = vld [vmem:[#allocation6 + $0xc0] sm:$0xff]  ;;  %v12959_v61 = vld [vmem:[#allocation6 + $0xc8] sm:$0x3] }
 0x7e0   :  { %v5406_v46 = vrot.slane %v12957_v20, 1  ;;  %v5407_v14 = vrot.slane %v12959_v61, 1 }
 0x7e1   :  { %7789 = vrot.lane.b32.xlu1 %v7788_v43, %s8161_s2 }
 0x7e2   :  { %v12967_v9 = vsel %vm517_vm2, %v5406_v46, %v5407_v14 }
 0x80a   :  { %v5243_v28 = vpop.f32.mrb[60].mxu1 }
 0x80b   :  { %v5244_v7 = vadd.f32 %v12751_v1, %v5243_v28  ;;  %v5245_v16 = vpop.f32.mrb[61].mxu1 }
 0x80d   :  { %v5282_v35 = vmax.f32 %v5244_v7, 0.0 }
 0x80e   :  { %v5248_v40 = vpop.f32.mrb[62].mxu1 }
 0x80f   :  { %5298 = vst.msk [vmem:[#allocation6 + $0xd1] sm:$0xff] %vm1292_vm3, %v5282_v35  ;;  %v5249_v33 = vadd.f32 %v12751_v1, %v5248_v40  ;;  %v5250_v55 = vpop.f32.mrb[63].mxu1 }
 0x811   :  { %v5283_v30 = vmax.f32 %v5249_v33, 0.0 }
 0x813   :  { %5299 = vst.msk [vmem:[#allocation6 + $0xe1] sm:$0xff] %vm1292_vm3, %v5283_v30 }
 0x816   :  { %v12975_v48 = vld [vmem:[#allocation6 + $0xd0] sm:$0xff]  ;;  %v12977_v53 = vld [vmem:[#allocation6 + $0xd8] sm:$0x3] }
 0x817   :  { %v5409_v19 = vrot.slane %v12975_v48, 1  ;;  %v5410_v59 = vrot.slane %v12977_v53, 1 }
 0x819   :  { %v12982_v31 = vsel %vm517_vm2, %v5409_v19, %v5410_v59 }
 0x81a   :  { %v12986_v54 = vpack.i.bf16 %v12982_v31, %v12967_v9  ;;  %v12988_v60 = vld [vmem:[#allocation6 + $0xe0] sm:$0xff]  ;;  %v12990_v56 = vld [vmem:[#allocation6 + $0xe8] sm:$0x3] }
 0x81b   :  { %v5412_v43 = vrot.slane %v12988_v60, 1  ;;  %v5413_v46 = vrot.slane %v12990_v56, 1  ;;  %v5460_v52 = vrot.slane %v12988_v60, 2 }
 0x81c   :  { %7794 = vrot.lane.b32.xlu0 %v12986_v54, %s8161_s2 }
 0x81d   :  { %v12997_v14 = vsel %vm517_vm2, %v5412_v43, %v5413_v46 }
 0x842   :  { %v5253_v7 = vpop.f32.mrb[64].mxu1 }
 0x843   :  { %v5254_v16 = vadd.f32 %v12751_v1, %v5253_v7  ;;  %v5255_v35 = vpop.f32.mrb[65].mxu1  ;;  %v5952_v7 = vld [vmem:[%s14666_s10] sm:$0xff] }
 0x845   :  { %v5284_v40 = vmax.f32 %v5254_v16, 0.0 }
 0x846   :  { %v5258_v33 = vpop.f32.mrb[66].mxu1 }
 0x847   :  { %5300 = vst.msk [vmem:[#allocation6 + $0xf1] sm:$0xff] %vm1292_vm3, %v5284_v40  ;;  %v5259_v55 = vadd.f32 %v12751_v1, %v5258_v33  ;;  %v5260_v30 = vpop.f32.mrb[67].mxu1  ;;  %v5953_v40 = vld [vmem:[%s14666_s10 + $0x8] sm:$0xff] }
 0x849   :  { %v5285_v19 = vmax.f32 %v5259_v55, 0.0  ;;  %v7452_v55 = vpack.c.bf16 %v5953_v40, %v5952_v7 }
 0x84b   :  { %5301 = vst.msk [vmem:[#allocation6 + $0x101] sm:$0xff] %vm1292_vm3, %v5285_v19  ;;  %v5954_v19 = vld [vmem:[%s14666_s10 + $0x10] sm:$0xff]  ;;  %7453 = vmatpush1.bf16.msra.mxu0 %v7452_v55  ;;  %v5436_v55 = vrot.slane %v12809_v12, 2 }
 0x84c   :  { %7454 = vmatprep.subr.bf16.mxu0 %v8170_v26 }
 0x84d   :  { %v5263_v59 = vpop.f32.mrb[68].mxu1 }
 0x84e   :  { %v5264_v43 = vadd.f32 %v12751_v1, %v5263_v59  ;;  %v5265_v46 = vpop.f32.mrb[69].mxu1  ;;  %v13006_v13 = vld [vmem:[#allocation6 + $0xf0] sm:$0xff]  ;;  %v13008_v32 = vld [vmem:[#allocation6 + $0xf8] sm:$0x3] }
 0x84f   :  { %v5415_v16 = vrot.slane %v13006_v13, 1  ;;  %v5416_v35 = vrot.slane %v13008_v32, 1  ;;  %v5955_v59 = vld [vmem:[%s14666_s10 + $0x18] sm:$0xff] }
 0x850   :  { %v5286_v33 = vmax.f32 %v5264_v43, 0.0  ;;  %v7455_v7 = vpack.c.bf16 %v5955_v59, %v5954_v19  ;;  %v5437_v19 = vrot.slane %v12811_v34, 2 }
 0x851   :  { %v13019_v30 = vsel %vm517_vm2, %v5415_v16, %v5416_v35  ;;  %v5439_v16 = vrot.slane %v12846_v38, 2  ;;  %v5440_v35 = vrot.slane %v12848_v50, 2  ;;  %v5956_v50 = vld [vmem:[%s14666_s10 + $0x20] sm:$0xff] }
 0x852   :  { %5302 = vst.msk [vmem:[#allocation6 + $0x111] sm:$0xff] %vm1292_vm3, %v5286_v33  ;;  %v13030_v46 = vpack.i.bf16 %v13019_v30, %v12997_v14  ;;  %v13032_v28 = vld [vmem:[#allocation6 + $0x100] sm:$0xff]  ;;  %v13034_v43 = vld [vmem:[#allocation6 + $0x108] sm:$0x3]  ;;  %7456 = vmatpush1.bf16.msra.mxu0 %v7455_v7  ;;  %v7458_v34 = vpack.c.bf16 %v5957_v62, %v5956_v50  ;;  %v5958_v62 = vld [vmem:[%s14666_s10 + $0x30] sm:$0xff] }
 0x853   :  { %v5418_v40 = vrot.slane %v13032_v28, 1  ;;  %v5419_v29 = vrot.slane %v13034_v43, 1  ;;  %7457 = vmatprep.subr.bf16.mxu0 %v8170_v26 }
 0x854   :  { %v5268_v33 = vpop.f32.mrb[70].mxu1  ;;  %7799 = vrot.lane.b32.xlu1 %v13030_v46, %s8161_s2 }
 0x855   :  { %v5269_v41 = vadd.f32 %v12751_v1, %v5268_v33  ;;  %v5270_v2 = vpop.f32.mrb[71].mxu1  ;;  %v13047_v59 = vsel %vm517_vm2, %v5418_v40, %v5419_v29  ;;  %v5433_v29 = vrot.slane %v12796_v51, 2  ;;  %v13068_v40 = vsel %vm1603_vm4, %v5436_v55, %v5437_v19  ;;  %v5959_v33 = vld [vmem:[%s14666_s10 + $0x38] sm:$0xff] }
 0x856   :  { %v13058_v2 = vsel %vm1603_vm4, %v5439_v16, %v5440_v35  ;;  %v5434_v16 = vrot.slane %v12798_v45, 2  ;;  %7459 = vmatpush1.bf16.msra.mxu0 %v7458_v34  ;;  %v5463_v55 = vrot.slane %v13006_v13, 2  ;;  %v5464_v19 = vrot.slane %v13008_v32, 2 }
 0x857   :  { %v5287_v1 = vmax.f32 %v5269_v41, 0.0  ;;  %v7818_v18 = vpack.i.bf16 %v13058_v2, %v13068_v40  ;;  %7460 = vmatprep.subr.bf16.mxu0 %v8170_v26  ;;  %v7461_v50 = vpack.c.bf16 %v5959_v33, %v5958_v62  ;;  %v5446_v34 = vrot.slane %v12887_v4, 2  ;;  %v5960_v62 = vld [vmem:[%s14666_s10 + $0x40] sm:$0xff] }
 0x858   :  { %7809 = vrot.lane.b32.xlu1 %v7808_v39, %s8165_s16  ;;  %v5461_v32 = vrot.slane %v12990_v56, 2  ;;  %v15513_v56 = vpack.i.bf16 %v12954_v22, %v12946_v3  ;;  %v5442_v33 = vrot.slane %v12860_v37, 2  ;;  %v5963_v3 = vld [vmem:[%s14666_s10 + $0x58] sm:$0xff] }
 0x859   :  { %5303 = vst.msk [vmem:[#allocation6 + $0x121] sm:$0xff] %vm1292_vm3, %v5287_v1  ;;  %v13070_v7 = vld [vmem:[#allocation6 + $0x110] sm:$0xff]  ;;  %v13072_v41 = vld [vmem:[#allocation6 + $0x118] sm:$0x3]  ;;  %v5445_v1 = vrot.slane %v12885_v8, 2 }
 0x85a   :  { %v5421_v39 = vrot.slane %v13070_v7, 1  ;;  %v5422_v35 = vrot.slane %v13072_v41, 1  ;;  %7462 = vmatpush1.bf16.msra.mxu0 %v7461_v50 }
 0x85b   :  { %7463 = vmatprep.subr.bf16.mxu0 %v8170_v26 }
 0x85c   :  { %7819 = vrot.lane.b32.xlu1 %v7818_v18, %s8165_s16  ;;  %v13090_v45 = vsel %vm517_vm2, %v5421_v39, %v5422_v35  ;;  %v5961_v18 = vld [vmem:[%s14666_s10 + $0x48] sm:$0xff]  ;;  %v13107_v39 = vsel %vm1603_vm4, %v5433_v29, %v5434_v16  ;;  %v13112_v35 = vsel %vm1603_vm4, %v5463_v55, %v5464_v19  ;;  %v5443_v29 = vrot.slane %v12862_v10, 2  ;;  %v5962_v16 = vld [vmem:[%s14666_s10 + $0x50] sm:$0xff] }
 0x85d   :  { %v13096_v27 = vpack.i.bf16 %v13090_v45, %v13047_v59  ;;  %v7464_v4 = vpack.c.bf16 %v5961_v18, %v5960_v62  ;;  %v7813_v50 = vpack.i.bf16 %v13107_v39, %v12784_v58  ;;  %v13127_v55 = vsel %vm1603_vm4, %v5460_v52, %v5461_v32  ;;  %v5964_v32 = vld [vmem:[%s14666_s10 + $0x60] sm:$0xff] }
 0x85e   :  { %v13130_v19 = vsel %vm1603_vm4, %v5445_v1, %v5446_v34  ;;  %v7838_v10 = vpack.i.bf16 %v13112_v35, %v13127_v55  ;;  %v5457_v62 = vrot.slane %v12975_v48, 2  ;;  %v5458_v18 = vrot.slane %v12977_v53, 2  ;;  %v5965_v53 = vld [vmem:[%s14666_s10 + $0x68] sm:$0xff] }
 0x85f   :  { %7804 = vrot.lane.b32.xlu0 %v13096_v27, %s8161_s2  ;;  %7465 = vmatpush1.bf16.msra.mxu0 %v7464_v4  ;;  %v13143_v52 = vsel %vm1603_vm4, %v5442_v33, %v5443_v29  ;;  %v5454_v1 = vrot.slane %v12957_v20, 2  ;;  %v5455_v34 = vrot.slane %v12959_v61, 2  ;;  %v5469_v29 = vrot.slane %v13070_v7, 2 }
 0x860   :  { %7829 = vrot.lane.b32.xlu1 %v15513_v56, %s8165_s16  ;;  %v7467_v56 = vpack.c.bf16 %v5963_v3, %v5962_v16  ;;  %7466 = vmatprep.subr.bf16.mxu0 %v8170_v26  ;;  %v7823_v4 = vpack.i.bf16 %v13130_v19, %v13143_v52  ;;  %v7848_v16 = vpack.i.bf16 %v12774_v6, %v12758_v24  ;;  %v5470_v61 = vrot.slane %v13072_v41, 2  ;;  %v5967_v41 = vld [vmem:[%s14666_s10 + $0x78] sm:$0xff] }
 0x861   :  { %v13158_v33 = vsel %vm1603_vm4, %v5457_v62, %v5458_v18  ;;  %v13166_v3 = vsel %vm1603_vm4, %v5454_v1, %v5455_v34  ;;  %v5466_v24 = vrot.slane %v13032_v28, 2  ;;  %v5966_v62 = vld [vmem:[%s14666_s10 + $0x70] sm:$0xff]  ;;  %v5969_v34 = vld [vmem:[%s14666_s10 + $0x88] sm:$0xff] }
 0x862   :  { %v7833_v18 = vpack.i.bf16 %v13158_v33, %v13166_v3  ;;  %v7473_v1 = vpack.c.bf16 %v5967_v41, %v5966_v62  ;;  %v7913_v62 = vpack.i.bf16 %v12885_v8, %v12860_v37 }
 0x863   :  { %7814 = vrot.lane.b32.xlu0 %v7813_v50, %s8165_s16  ;;  %7468 = vmatpush1.bf16.msra.mxu0 %v7467_v56  ;;  %v7470_v50 = vpack.c.bf16 %v5965_v53, %v5964_v32  ;;  %v13179_v56 = vsel %vm1603_vm4, %v5469_v29, %v5470_v61  ;;  %v15514_v32 = vpack.i.bf16 %v12784_v58, %v12771_v36 }
 0x864   :  { %7839 = vrot.lane.b32.xlu1 %v7838_v10, %s8165_s16  ;;  %7469 = vmatprep.subr.bf16.mxu0 %v8170_v26  ;;  %v5467_v10 = vrot.slane %v13034_v43, 2  ;;  %v5968_v43 = vld [vmem:[%s14666_s10 + $0x80] sm:$0xff]  ;;  %v15515_v36 = vpack.i.bf16 %v12787_v5, %v12768_v47  ;;  %v15516_v58 = vpack.i.bf16 %v12821_v23, %v12803_v0  ;;  %v7863_v29 = vpack.i.bf16 %v12796_v51, %v12774_v6  ;;  %v5321_v0 = vld [vmem:[#allocation6 + $0x88] sm:$0x3] }
 0x865   :  { %v7898_v47 = vpack.i.bf16 %v12860_v37, %v12846_v38  ;;  %v5320_v5 = vld [vmem:[#allocation6 + $0x80] sm:$0xff]  ;;  %v7883_v6 = vpack.i.bf16 %v13068_v40, %v13107_v39  ;;  %v7908_v23 = vpack.i.bf16 %v13143_v52, %v13058_v2 }
 0x866   :  { %v13194_v53 = vsel %vm1603_vm4, %v5466_v24, %v5467_v10  ;;  %v5476_v61 = vrot.slane %v5320_v5, 1  ;;  %v15517_v24 = vpack.i.bf16 %v12874_v11, %v12854_v25  ;;  %v13238_v10 = vld [vmem:[#allocation6 + $0x90] sm:$0xff]  ;;  %v5482_v41 = vrot.slane %v5320_v5, 2 }
 0x867   :  { %7824 = vrot.lane.b32.xlu0 %v7823_v4, %s8165_s16  ;;  %7471 = vmatpush1.bf16.msra.mxu0 %v7470_v50  ;;  %v7843_v4 = vpack.i.bf16 %v13179_v56, %v13194_v53  ;;  %v5477_v50 = vrot.slane %v5321_v0, 1  ;;  %v7923_v25 = vpack.i.bf16 %v5320_v5, %v12885_v8  ;;  %v5492_v11 = vrot.slane %v13238_v10, 1 }
 0x868   :  { %7849 = vrot.lane.b32.xlu1 %v7848_v16, %s8172_s21  ;;  %7472 = vmatprep.subr.bf16.mxu0 %v8170_v26  ;;  %v7476_v16 = vpack.c.bf16 %v5969_v34, %v5968_v43 }
 0x86b   :  { %7834 = vrot.lane.b32.xlu0 %v7833_v18, %s8165_s16  ;;  %7474 = vmatpush1.bf16.msra.mxu0 %v7473_v1  ;;  %v5483_v18 = vrot.slane %v5321_v0, 2 }
 0x86c   :  { %7859 = vrot.lane.b32.xlu1 %v15514_v32, %s8173_s8  ;;  %7475 = vmatprep.subr.bf16.mxu0 %v8170_v26  ;;  %v7888_v26 = vpack.i.bf16 %v12846_v38, %v12809_v12  ;;  %v7958_v32 = vpack.i.bf16 %v13166_v3, %v12954_v22  ;;  %v15519_v22 = vpack.i.bf16 %v12997_v14, %v12982_v31  ;;  %v5341_v31 = vld [vmem:[#allocation6 + $0x128] sm:$0x3] }
 0x86d   :  { %v13253_v1 = vsel %vm1603_vm4, %v5482_v41, %v5483_v18  ;;  %v7983_v14 = vpack.i.bf16 %v13127_v55, %v13158_v33  ;;  %v13331_v41 = vpop.permute.xlu0 %7774 }
 0x86e   :  { %v7933_v34 = vpack.i.bf16 %v13253_v1, %v13130_v19 }
 0x86f   :  { %7844 = vrot.lane.b32.xlu0 %v7843_v4, %s8165_s16  ;;  %7477 = vmatpush1.bf16.msra.mxu0 %v7476_v16 }
 0x870   :  { %7869 = vrot.lane.b32.xlu1 %v12807_v63, %s8175_s24  ;;  %v7873_v63 = vpack.i.bf16 %v12809_v12, %v12796_v51  ;;  %v5478_v51 = vsel %vm517_vm2, %v5476_v61, %v5477_v50  ;;  %v13307_v61 = vld [vmem:[#allocation6 + $0x138] sm:$0x3]  ;;  %v5486_v50 = vrot.slane %v5341_v31, 2 }
 0x871   :  { %v7928_v12 = vpack.i.bf16 %v5478_v51, %v12896_v42  ;;  %v7948_v42 = vpack.i.bf16 %v12957_v20, %v12940_v15 }
 0x873   :  { %7854 = vrot.lane.b32.xlu0 %v15515_v36, %s8171_s20  ;;  %v15518_v36 = vpack.i.bf16 %v12967_v9, %v12951_v49  ;;  %v7998_v49 = vpack.i.bf16 %v13032_v28, %v13006_v13  ;;  %v5340_v9 = vld [vmem:[#allocation6 + $0x120] sm:$0xff] }
 0x874   :  { %7879 = vrot.lane.b32.xlu1 %v15516_v58, %s8171_s20  ;;  %v7963_v58 = vpack.i.bf16 %v12975_v48, %v12957_v20 }
 0x877   :  { %7864 = vrot.lane.b32.xlu0 %v7863_v29, %s8174_s22  ;;  %v7988_v29 = vpack.i.bf16 %v13006_v13, %v12988_v60 }
 0x878   :  { %7889 = vrot.lane.b32.xlu1 %v7888_v26, %s8174_s22  ;;  %v8008_v26 = vpack.i.bf16 %v13194_v53, %v13112_v35 }
 0x87b   :  { %7874 = vrot.lane.b32.xlu0 %v7873_v63, %s8172_s21  ;;  %v5479_v63 = vrot.slane %v5340_v9, 1 }
 0x87c   :  { %7899 = vrot.lane.b32.xlu1 %v7898_v47, %s8172_s21  ;;  %v5480_v47 = vrot.slane %v5341_v31, 1 }
 0x87f   :  { %7884 = vrot.lane.b32.xlu0 %v7883_v6, %s8173_s8  ;;  %v15520_v6 = vpack.i.bf16 %v13047_v59, %v13019_v30  ;;  %v15522_v59 = vrot.slane %v12730_v57, 1 }
 0x880   :  { %7909 = vrot.lane.b32.xlu1 %v7908_v23, %s8173_s8  ;;  %v8013_v23 = vpack.i.bf16 %v13070_v7, %v13032_v28 }
 0x883   :  { %7894 = vrot.lane.b32.xlu0 %v12858_v44, %s8175_s24  ;;  %v7938_v44 = vpack.i.bf16 %v13238_v10, %v5320_v5  ;;  %v5481_v5 = vsel %vm517_vm2, %v5479_v63, %v5480_v47  ;;  %v8152_v47 = vld [vmem:[#allocation6] sm:$0xff] }
 0x884   :  { %7919 = vrot.lane.b32.xlu1 %v12900_v17, %s8175_s24  ;;  %v13245_v17 = vld [vmem:[#allocation6 + $0x98] sm:$0x3]  ;;  %v8028_v0 = vpack.i.bf16 %v5481_v5, %v13090_v45  ;;  %v5496_v45 = vrot.slane %v13307_v61, 1 }
 0x885   :  { %v5493_v43 = vrot.slane %v13245_v17, 1 }
 0x887   :  { %7904 = vrot.lane.b32.xlu0 %v15517_v24, %s8171_s20  ;;  %v5494_v4 = vsel %vm517_vm2, %v5492_v11, %v5493_v43 }
 0x888   :  { %7929 = vrot.lane.b32.xlu1 %v7928_v12, %s8171_s20  ;;  %v7943_v16 = vpack.i.bf16 %v5494_v4, %v5478_v51  ;;  %v5497_v51 = vsel %vm517_vm2, %v15522_v59, %v5496_v45  ;;  %v7770_v12 = vpop.permute.xlu1 %7769  ;;  %v8153_v45 = vld [vmem:[#allocation6 + $0x10] sm:$0xff]  ;;  %vm6978_vm2 = vcmask 0  }
 0x88b   :  { %7914 = vrot.lane.b32.xlu0 %v7913_v62, %s8174_s22 }
 0x88c   :  { %7939 = vrot.lane.b32.xlu1 %v7938_v44, %s8174_s22  ;;  %v13325_v24 = vpop.permute.xlu1 %7779  ;;  %v8151_v44 = vld [vmem:[#allocation6 + $0x130] sm:$0xff] }
 0x88f   :  { %7924 = vrot.lane.b32.xlu0 %v7923_v25, %s8172_s21  ;;  %v13335_v25 = vpop.permute.xlu0 %7784 }
 0x890   :  { %7949 = vrot.lane.b32.xlu1 %v7948_v42, %s8172_s21  ;;  %v13328_v62 = vpop.permute.xlu1 %7789 }
 0x893   :  { %7934 = vrot.lane.b32.xlu0 %v7933_v34, %s8173_s8  ;;  %v13337_v42 = vpop.permute.xlu0 %7794 }
 0x894   :  { %7959 = vrot.lane.b32.xlu1 %v7958_v32, %s8173_s8 }
 0x897   :  { %7944 = vrot.lane.b32.xlu0 %v7943_v16, %s8175_s24 }
 0x898   :  { %7969 = vrot.lane.b32.xlu1 %v12986_v54, %s8175_s24  ;;  %v7973_v54 = vpack.i.bf16 %v12988_v60, %v12975_v48 }
 0x89b   :  { %7954 = vrot.lane.b32.xlu0 %v15518_v36, %s8171_s20 }
 0x89c   :  { %7979 = vrot.lane.b32.xlu1 %v15519_v22, %s8171_s20 }
 0x89f   :  { %7964 = vrot.lane.b32.xlu0 %v7963_v58, %s8174_s22 }
 0x8a0   :  { %7989 = vrot.lane.b32.xlu1 %v7988_v29, %s8174_s22 }
 0x8a3   :  { %7974 = vrot.lane.b32.xlu0 %v7973_v54, %s8172_s21  ;;  %v7771_v54 = vunpack.i.l.bf16 %v7770_v12 }
 0x8a4   :  { %7999 = vrot.lane.b32.xlu1 %v7998_v49, %s8172_s21 }
 0x8a7   :  { %7984 = vrot.lane.b32.xlu0 %v7983_v14, %s8173_s8  ;;  %v7772_v14 = vunpack.i.h.bf16 %v7770_v12 }
 0x8a8   :  { %8009 = vrot.lane.b32.xlu1 %v8008_v26, %s8173_s8 }
 0x8a9   :  { %v5841_v59 = vsel %vm1292_vm3, %v8153_v45, %v7772_v14 }
 0x8ab   :  { %7994 = vrot.lane.b32.xlu0 %v13030_v46, %s8175_s24  ;;  %v5485_v46 = vrot.slane %v5340_v9, 2 }
 0x8ac   :  { %8019 = vrot.lane.b32.xlu1 %v13096_v27, %s8175_s24  ;;  %v8023_v27 = vpack.i.bf16 %v5340_v9, %v13070_v7 }
 0x8ad   :  { %v13315_v30 = vsel %vm1603_vm4, %v5485_v46, %v5486_v50 }
 0x8ae   :  { %15521 = vst [vmem:[#allocation99_spill] sm:$0xff] %v13315_v30 }
 0x8af   :  { %8004 = vrot.lane.b32.xlu0 %v15520_v6, %s8171_s20 }
 0x8b0   :  { %8029 = vrot.lane.b32.xlu1 %v8028_v0, %s8171_s20 }
 0x8b3   :  { %8014 = vrot.lane.b32.xlu0 %v8013_v23, %s8174_s22 }
 0x8b4   :  { %5772 = vrot.lane.b32.xlu1 %v5340_v9, %s8174_s22 }
 0x8b7   :  { %8024 = vrot.lane.b32.xlu0 %v8023_v27, %s8172_s21 }
 0x8b8   :  { %5726 = vrot.lane.b32.xlu1 %v13315_v30, %s8173_s8 }
 0x8bb   :  { %5724 = vrot.lane.b32.xlu0 %v13179_v56, %s8173_s8 }
 0x8bc   :  { %5822 = vrot.lane.b32.xlu1 %v5497_v51, %s8175_s24 }
 0x8bf   :  { %5820 = vrot.lane.b32.xlu0 %v5481_v5, %s8175_s24  ;;  %v5840_v5 = vsel %vm1292_vm3, %v8152_v47, %v7771_v54 }
 0x8c3   :  { %5774 = vrot.lane.b32.xlu0 %v8151_v44, %s8174_s22 }
 0x8c6   :  { %v13333_v18 = vpop.permute.xlu1 %7799 }
 0x8ca   :  { %v7810_v11 = vpop.permute.xlu1 %7809 }
 0x8cb   :  { %v7811_v9 = vunpack.i.l.bf16 %v7810_v11  ;;  %v7812_v63 = vunpack.i.h.bf16 %v7810_v11 }
 0x8cd   :  { %v5856_v23 = vsel %vm1360_vm11, %v5840_v5, %v7811_v9  ;;  %v5857_v44 = vsel %vm1360_vm11, %v5841_v59, %v7812_v63 }
 0x8ce   :  { %v13339_v43 = vpop.permute.xlu1 %7819 }
 0x8d1   :  { %v13341_v34 = vpop.permute.xlu0 %7804 }
 0x8d2   :  { %v13343_v32 = vpop.permute.xlu1 %7829 }
 0x8d5   :  { %v13345_v4 = vpop.permute.xlu0 %7814 }
 0x8d6   :  { %v13347_v16 = vpop.permute.xlu1 %7839  ;;  %v7816_v14 = vunpack.i.l.bf16 %v13345_v4  ;;  %v7817_v30 = vunpack.i.h.bf16 %v13345_v4 }
 0x8d9   :  { %v13349_v36 = vpop.permute.xlu0 %7824 }
 0x8da   :  { %v7850_v22 = vpop.permute.xlu1 %7849 }
 0x8db   :  { %v7851_v26 = vunpack.i.l.bf16 %v7850_v22  ;;  %v7852_v0 = vunpack.i.h.bf16 %v7850_v22  ;;  %v7776_v22 = vunpack.i.l.bf16 %v13331_v41 }
 0x8dd   :  { %v13351_v58 = vpop.permute.xlu0 %7834  ;;  %v5872_v51 = vsel %vm4985_vm6, %v5856_v23, %v7851_v26  ;;  %v5873_v11 = vsel %vm4985_vm6, %v5857_v44, %v7852_v0 }
 0x8de   :  { %v7860_v29 = vpop.permute.xlu1 %7859 }
 0x8df   :  { %v7861_v57 = vunpack.i.l.bf16 %v7860_v29  ;;  %v7862_v45 = vunpack.i.h.bf16 %v7860_v29 }
 0x8e1   :  { %v13353_v49 = vpop.permute.xlu0 %7844 }
 0x8e2   :  { %v7870_v31 = vpop.permute.xlu1 %7869 }
 0x8e3   :  { %v7871_v26 = vunpack.i.l.bf16 %v7870_v31 }
 0x8e5   :  { %v7855_v6 = vpop.permute.xlu0 %7854 }
 0x8e6   :  { %v7857_v46 = vunpack.i.h.bf16 %v7855_v6  ;;  %v7856_v50 = vunpack.i.l.bf16 %v7855_v6  ;;  %v7880_v27 = vpop.permute.xlu1 %7879 }
 0x8e8   :  { %v5888_v12 = vsel %vm5002_vm7, %v5872_v51, %v7856_v50  ;;  %v5889_v9 = vsel %vm5002_vm7, %v5873_v11, %v7857_v46  ;;  %v7777_v51 = vunpack.i.h.bf16 %v13331_v41  ;;  %v8154_v46 = vld [vmem:[#allocation6 + $0x20] sm:$0xff]  ;;  %v7881_v41 = vunpack.i.l.bf16 %v7880_v27 }
 0x8e9   :  { %v7865_v54 = vpop.permute.xlu0 %7864  ;;  %v5904_v63 = vsel %vm5019_vm8, %v5888_v12, %v7861_v57  ;;  %v5905_v59 = vsel %vm5019_vm8, %v5889_v9, %v7862_v45  ;;  %v5842_v44 = vsel %vm1292_vm3, %v8154_v46, %v7776_v22  ;;  %v7872_v12 = vunpack.i.h.bf16 %v7870_v31 }
 0x8ea   :  { %v7867_v47 = vunpack.i.h.bf16 %v7865_v54  ;;  %v7866_v5 = vunpack.i.l.bf16 %v7865_v54  ;;  %v13364_v6 = vpop.permute.xlu1 %7889  ;;  %v5858_v57 = vsel %vm1360_vm11, %v5842_v44, %v7816_v14  ;;  %v7821_v44 = vunpack.i.l.bf16 %v13339_v43 }
 0x8ec   :  { %v5920_v23 = vsel %vm5036_vm9, %v5904_v63, %v7866_v5  ;;  %v5921_v29 = vsel %vm5036_vm9, %v5905_v59, %v7867_v47  ;;  %v7882_v59 = vunpack.i.h.bf16 %v7880_v27 }
 0x8ed   :  { %v7875_v50 = vpop.permute.xlu0 %7874  ;;  %v5936_v0 = vsel %vm5053_vm10, %v5920_v23, %v7871_v26  ;;  %v5937_v22 = vsel %vm5053_vm10, %v5921_v29, %v7872_v12  ;;  %v8155_v26 = vld [vmem:[#allocation6 + $0x30] sm:$0xff]  ;;  %v7782_v29 = vunpack.i.h.bf16 %v13325_v24 }
 0x8ee   :  { %v7876_v11 = vunpack.i.l.bf16 %v7875_v50  ;;  %v7900_v54 = vpop.permute.xlu1 %7899  ;;  %6074 = vmatmul.mubr.f32.vlgmr.msra.gmra.mrb[40].mxu0 %v5936_v0  ;;  %v7877_v5 = vunpack.i.h.bf16 %v7875_v50  ;;  %v5843_v63 = vsel %vm1292_vm3, %v8155_v26, %v7777_v51  ;;  %v7781_v0 = vunpack.i.l.bf16 %v13325_v24 }
 0x8ef   :  { %7105 = vmatprep.mubr.msk.f32.mxu0 %vm1292_vm3, %v13107_v39  ;;  %v5859_v4 = vsel %vm1360_vm11, %v5843_v63, %v7817_v30  ;;  %v7891_v51 = vunpack.i.l.bf16 %v13364_v6  ;;  %v7892_v26 = vunpack.i.h.bf16 %v13364_v6  ;;  %v7902_v63 = vunpack.i.h.bf16 %v7900_v54 }
 0x8f0   :  { %v5874_v9 = vsel %vm4985_vm6, %v5858_v57, %v7876_v11  ;;  %v5875_v31 = vsel %vm4985_vm6, %v5859_v4, %v7877_v5  ;;  %v7822_v5 = vunpack.i.h.bf16 %v13339_v43  ;;  %v5845_v43 = vsel %vm1292_vm3, %v12846_v38, %v7782_v29 }
 0x8f1   :  { %v7885_v45 = vpop.permute.xlu0 %7884  ;;  %v5890_v39 = vsel %vm5002_vm7, %v5874_v9, %v7881_v41  ;;  %v5891_v12 = vsel %vm5002_vm7, %v5875_v31, %v7882_v59 }
 0x8f2   :  { %v7886_v23 = vunpack.i.l.bf16 %v7885_v45  ;;  %v7910_v47 = vpop.permute.xlu1 %7909  ;;  %6079 = vmatmul.mubr.f32.gmra.mrb[42].mxu0 %v5937_v22  ;;  %v7887_v14 = vunpack.i.h.bf16 %v7885_v45  ;;  %v8156_v45 = vld [vmem:[#allocation6 + $0x40] sm:$0xff]  ;;  %v5861_v6 = vsel %vm1360_vm11, %v5845_v43, %v7822_v5 }
 0x8f3   :  { %7106 = vmatprep.mubr.msk.f32.mxu0 %vm1292_vm3, %v13068_v40  ;;  %v7901_v40 = vunpack.i.l.bf16 %v7900_v54  ;;  %v5844_v22 = vsel %vm1292_vm3, %v8156_v45, %v7781_v0  ;;  %v5877_v59 = vsel %vm4985_vm6, %v5861_v6, %v7902_v63 }
 0x8f4   :  { %v5906_v50 = vsel %vm5019_vm8, %v5890_v39, %v7886_v23  ;;  %v5907_v27 = vsel %vm5019_vm8, %v5891_v12, %v7887_v14  ;;  %v5860_v24 = vsel %vm1360_vm11, %v5844_v22, %v7821_v44  ;;  %v7787_v22 = vunpack.i.h.bf16 %v13335_v25 }
 0x8f5   :  { %v7895_v46 = vpop.permute.xlu0 %7894  ;;  %v5922_v57 = vsel %vm5036_vm9, %v5906_v50, %v7891_v51  ;;  %v5876_v14 = vsel %vm4985_vm6, %v5860_v24, %v7901_v40  ;;  %v5923_v50 = vsel %vm5036_vm9, %v5907_v27, %v7892_v26  ;;  %v7911_v51 = vunpack.i.l.bf16 %v7910_v47 }
 0x8f6   :  { %v7896_v11 = vunpack.i.l.bf16 %v7895_v46  ;;  %v7920_v30 = vpop.permute.xlu1 %7919  ;;  %v7897_v9 = vunpack.i.h.bf16 %v7895_v46  ;;  %v7826_v40 = vunpack.i.l.bf16 %v13349_v36 }
 0x8f7   :  { %v7921_v12 = vunpack.i.l.bf16 %v7920_v30 }
 0x8f8   :  { %v5938_v41 = vsel %vm5053_vm10, %v5922_v57, %v7896_v11  ;;  %v5939_v0 = vsel %vm5053_vm10, %v5923_v50, %v7897_v9  ;;  %v7912_v57 = vunpack.i.h.bf16 %v7910_v47  ;;  %v5847_v50 = vsel %vm1292_vm3, %v12885_v8, %v7787_v22 }
 0x8f9   :  { %v7905_v23 = vpop.permute.xlu0 %7904  ;;  %6084 = vmatmul.mubr.f32.gmra.mrb[44].mxu0 %v5938_v41  ;;  %v7791_v8 = vunpack.i.l.bf16 %v13328_v62 }
 0x8fa   :  { %v7907_v4 = vunpack.i.h.bf16 %v7905_v23  ;;  %v7906_v39 = vunpack.i.l.bf16 %v7905_v23  ;;  %v13399_v31 = vpop.permute.xlu1 %7929  ;;  %7107 = vmatprep.mubr.msk.f32.mxu0 %vm1292_vm3, %v13058_v2  ;;  %v7786_v2 = vunpack.i.l.bf16 %v13335_v25  ;;  %v7827_v23 = vunpack.i.h.bf16 %v13349_v36 }
 0x8fb   :  { %v7931_v25 = vunpack.i.l.bf16 %v13399_v31 }
 0x8fc   :  { %v5892_v54 = vsel %vm5002_vm7, %v5876_v14, %v7906_v39  ;;  %v5893_v44 = vsel %vm5002_vm7, %v5877_v59, %v7907_v4  ;;  %v5846_v26 = vsel %vm1292_vm3, %v12860_v37, %v7786_v2  ;;  %v7922_v4 = vunpack.i.h.bf16 %v7920_v30 }
 0x8fd   :  { %v7915_v46 = vpop.permute.xlu0 %7914  ;;  %6089 = vmatmul.mubr.f32.gmra.mrb[46].mxu0 %v5939_v0  ;;  %v5908_v5 = vsel %vm5019_vm8, %v5892_v54, %v7911_v51  ;;  %v5909_v45 = vsel %vm5019_vm8, %v5893_v44, %v7912_v57  ;;  %v5862_v24 = vsel %vm1360_vm11, %v5846_v26, %v7826_v40  ;;  %v5863_v36 = vsel %vm1360_vm11, %v5847_v50, %v7827_v23 }
 0x8fe   :  { %v7917_v38 = vunpack.i.h.bf16 %v7915_v46  ;;  %v7916_v11 = vunpack.i.l.bf16 %v7915_v46  ;;  %v13413_v29 = vpop.permute.xlu1 %7939  ;;  %7108 = vmatprep.mubr.msk.f32.mxu0 %vm1292_vm3, %v13143_v52  ;;  %v5498_v30 = vrot.slane %v13238_v10, 2  ;;  %v5499_v0 = vrot.slane %v13245_v17, 2 }
 0x8ff   :  { %v7932_v2 = vunpack.i.h.bf16 %v13399_v31  ;;  %v7941_v44 = vunpack.i.l.bf16 %v13413_v29 }
 0x900   :  { %v5924_v9 = vsel %vm5036_vm9, %v5908_v5, %v7916_v11  ;;  %v5925_v47 = vsel %vm5036_vm9, %v5909_v45, %v7917_v38  ;;  %v7831_v11 = vunpack.i.l.bf16 %v13343_v32  ;;  %v7942_v45 = vunpack.i.h.bf16 %v13413_v29 }
 0x901   :  { %v7925_v41 = vpop.permute.xlu0 %7924  ;;  %v5940_v27 = vsel %vm5053_vm10, %v5924_v9, %v7921_v12  ;;  %v5941_v37 = vsel %vm5053_vm10, %v5925_v47, %v7922_v4  ;;  %v5500_v12 = vsel %vm1603_vm4, %v5498_v30, %v5499_v0  ;;  %v7832_v9 = vunpack.i.h.bf16 %v13343_v32 }
 0x902   :  { %v7926_v63 = vunpack.i.l.bf16 %v7925_v41  ;;  %v7950_v52 = vpop.permute.xlu1 %7949  ;;  %6094 = vmatmul.mubr.f32.gmra.mrb[48].mxu0 %v5940_v27  ;;  %v7927_v39 = vunpack.i.h.bf16 %v7925_v41 }
 0x903   :  { %7109 = vmatprep.mubr.msk.f32.mxu0 %vm1292_vm3, %v13130_v19  ;;  %v7951_v57 = vunpack.i.l.bf16 %v7950_v52  ;;  %v7952_v22 = vunpack.i.h.bf16 %v7950_v52 }
 0x904   :  { %v5878_v43 = vsel %vm4985_vm6, %v5862_v24, %v7926_v63  ;;  %v5879_v59 = vsel %vm4985_vm6, %v5863_v36, %v7927_v39 }
 0x905   :  { %v7935_v14 = vpop.permute.xlu0 %7934  ;;  %v5894_v19 = vsel %vm5002_vm7, %v5878_v43, %v7931_v25  ;;  %v5895_v5 = vsel %vm5002_vm7, %v5879_v59, %v7932_v2 }
 0x906   :  { %v7936_v6 = vunpack.i.l.bf16 %v7935_v14  ;;  %v7960_v54 = vpop.permute.xlu1 %7959  ;;  %6099 = vmatmul.mubr.f32.gmra.mrb[50].mxu0 %v5941_v37  ;;  %v7937_v51 = vunpack.i.h.bf16 %v7935_v14  ;;  %v7796_v37 = vunpack.i.l.bf16 %v13337_v42 }
 0x907   :  { %7110 = vmatprep.mubr.msk.f32.mxu0 %vm1292_vm3, %v13253_v1  ;;  %v7792_v1 = vunpack.i.h.bf16 %v13328_v62  ;;  %v5848_v62 = vsel %vm1292_vm3, %v12936_v21, %v7791_v8  ;;  %v7961_v25 = vunpack.i.l.bf16 %v7960_v54  ;;  %v7962_v30 = vunpack.i.h.bf16 %v7960_v54 }
 0x908   :  { %v5910_v46 = vsel %vm5019_vm8, %v5894_v19, %v7936_v6  ;;  %v5911_v27 = vsel %vm5019_vm8, %v5895_v5, %v7937_v51  ;;  %v5864_v63 = vsel %vm1360_vm11, %v5848_v62, %v7831_v11  ;;  %v7836_v19 = vunpack.i.l.bf16 %v13351_v58 }
 0x909   :  { %v7945_v38 = vpop.permute.xlu0 %7944  ;;  %v5926_v17 = vsel %vm5036_vm9, %v5910_v46, %v7941_v44  ;;  %v5849_v32 = vsel %vm1292_vm3, %v12940_v15, %v7792_v1  ;;  %v5880_v4 = vsel %vm4985_vm6, %v5864_v63, %v7951_v57  ;;  %v5927_v21 = vsel %vm5036_vm9, %v5911_v27, %v7942_v45 }
 0x90a   :  { %v7946_v40 = vunpack.i.l.bf16 %v7945_v38  ;;  %v7970_v10 = vpop.permute.xlu1 %7969  ;;  %v7947_v41 = vunpack.i.h.bf16 %v7945_v38  ;;  %v5865_v29 = vsel %vm1360_vm11, %v5849_v32, %v7832_v9  ;;  %v7797_v44 = vunpack.i.h.bf16 %v13337_v42 }
 0x90b   :  { %v5881_v43 = vsel %vm4985_vm6, %v5865_v29, %v7952_v22  ;;  %v7971_v0 = vunpack.i.l.bf16 %v7970_v10  ;;  %v5850_v38 = vsel %vm1292_vm3, %v12957_v20, %v7796_v37  ;;  %v7837_v11 = vunpack.i.h.bf16 %v13351_v58 }
 0x90c   :  { %v5942_v31 = vsel %vm5053_vm10, %v5926_v17, %v7946_v40  ;;  %v5943_v39 = vsel %vm5053_vm10, %v5927_v21, %v7947_v41  ;;  %v5866_v40 = vsel %vm1360_vm11, %v5850_v38, %v7836_v19  ;;  %v7972_v57 = vunpack.i.h.bf16 %v7970_v10 }
 0x90d   :  { %v7955_v26 = vpop.permute.xlu0 %7954  ;;  %6104 = vmatmul.mubr.f32.gmra.mrb[52].mxu0 %v5942_v31  ;;  %v5851_v9 = vsel %vm1292_vm3, %v12975_v48, %v7797_v44  ;;  %v7801_v45 = vunpack.i.l.bf16 %v13333_v18  ;;  %v7841_v63 = vunpack.i.l.bf16 %v13347_v16  ;;  %v7842_v29 = vunpack.i.h.bf16 %v13347_v16 }
 0x90e   :  { %v7957_v47 = vunpack.i.h.bf16 %v7955_v26  ;;  %v7956_v23 = vunpack.i.l.bf16 %v7955_v26  ;;  %v13458_v24 = vpop.permute.xlu1 %7979  ;;  %7111 = vmatprep.mubr.msk.f32.mxu0 %vm1292_vm3, %v5500_v12  ;;  %v5867_v58 = vsel %vm1360_vm11, %v5851_v9, %v7837_v11  ;;  %v7846_v44 = vunpack.i.l.bf16 %v13353_v49 }
 0x90f   :  { %v7981_v42 = vunpack.i.l.bf16 %v13458_v24  ;;  %v7982_v22 = vunpack.i.h.bf16 %v13458_v24  ;;  %v7807_v11 = vunpack.i.h.bf16 %v13341_v34 }
 0x910   :  { %v5896_v52 = vsel %vm5002_vm7, %v5880_v4, %v7956_v23  ;;  %v5897_v50 = vsel %vm5002_vm7, %v5881_v43, %v7957_v47  ;;  %v5852_v43 = vsel %vm1292_vm3, %v12988_v60, %v7801_v45 }
 0x911   :  { %v7965_v14 = vpop.permute.xlu0 %7964  ;;  %6109 = vmatmul.mubr.f32.gmra.mrb[54].mxu0 %v5943_v39  ;;  %v5912_v59 = vsel %vm5019_vm8, %v5896_v52, %v7961_v25  ;;  %v5913_v2 = vsel %vm5019_vm8, %v5897_v50, %v7962_v30 }
 0x912   :  { %v7967_v15 = vunpack.i.h.bf16 %v7965_v14  ;;  %v7966_v6 = vunpack.i.l.bf16 %v7965_v14  ;;  %v13471_v36 = vpop.permute.xlu1 %7989  ;;  %7112 = vmatprep.mubr.msk.f32.mxu0 %vm1292_vm3, %v13166_v3 }
 0x913   :  { %v7991_v48 = vunpack.i.l.bf16 %v13471_v36  ;;  %v7992_v25 = vunpack.i.h.bf16 %v13471_v36 }
 0x914   :  { %v5928_v51 = vsel %vm5036_vm9, %v5912_v59, %v7966_v6  ;;  %v5929_v54 = vsel %vm5036_vm9, %v5913_v2, %v7967_v15 }
 0x915   :  { %v7975_v46 = vpop.permute.xlu0 %7974  ;;  %v5944_v8 = vsel %vm5053_vm10, %v5928_v51, %v7971_v0  ;;  %v5945_v20 = vsel %vm5053_vm10, %v5929_v54, %v7972_v57 }
 0x916   :  { %v7976_v1 = vunpack.i.l.bf16 %v7975_v46  ;;  %v8000_v3 = vpop.permute.xlu1 %7999  ;;  %6114 = vmatmul.mubr.f32.gmra.mrb[56].mxu0 %v5944_v8  ;;  %v7977_v17 = vunpack.i.h.bf16 %v7975_v46 }
 0x917   :  { %7113 = vmatprep.mubr.msk.f32.mxu0 %vm1292_vm3, %v13158_v33  ;;  %v8001_v32 = vunpack.i.l.bf16 %v8000_v3  ;;  %v8002_v14 = vunpack.i.h.bf16 %v8000_v3 }
 0x918   :  { %v5882_v12 = vsel %vm4985_vm6, %v5866_v40, %v7976_v1  ;;  %v5883_v10 = vsel %vm4985_vm6, %v5867_v58, %v7977_v17 }
 0x919   :  { %v7985_v5 = vpop.permute.xlu0 %7984  ;;  %v5898_v33 = vsel %vm5002_vm7, %v5882_v12, %v7981_v42  ;;  %v5899_v21 = vsel %vm5002_vm7, %v5883_v10, %v7982_v22 }
 0x91a   :  { %v7986_v41 = vunpack.i.l.bf16 %v7985_v5  ;;  %v8010_v31 = vpop.permute.xlu1 %8009  ;;  %6119 = vmatmul.mubr.f32.gmra.mrb[58].mxu0 %v5945_v20  ;;  %v7987_v27 = vunpack.i.h.bf16 %v7985_v5 }
 0x91b   :  { %7114 = vmatprep.mubr.msk.f32.mxu0 %vm1292_vm3, %v13127_v55  ;;  %v7802_v55 = vunpack.i.h.bf16 %v13333_v18  ;;  %v5868_v18 = vsel %vm1360_vm11, %v5852_v43, %v7841_v63  ;;  %v8011_v51 = vunpack.i.l.bf16 %v8010_v31  ;;  %v8012_v38 = vunpack.i.h.bf16 %v8010_v31 }
 0x91c   :  { %v5914_v62 = vsel %vm5019_vm8, %v5898_v33, %v7986_v41  ;;  %v5915_v24 = vsel %vm5019_vm8, %v5899_v21, %v7987_v27  ;;  %v5884_v6 = vsel %vm4985_vm6, %v5868_v18, %v8001_v32  ;;  %v5502_v27 = vrot.slane %v13307_v61, 2  ;;  %v13575_v18 = vld [vmem:[%s14668_s12] sm:$0xff] }
 0x91d   :  { %v7995_v26 = vpop.permute.xlu0 %7994  ;;  %v5930_v4 = vsel %vm5036_vm9, %v5914_v62, %v7991_v48  ;;  %v5853_v16 = vsel %vm1292_vm3, %v13006_v13, %v7802_v55  ;;  %v5931_v19 = vsel %vm5036_vm9, %v5915_v24, %v7992_v25  ;;  %v13564_v24 = vld [vmem:[%s14667_s11] ss:$0 sm:$0xff] }
 0x91e   :  { %v7996_v47 = vunpack.i.l.bf16 %v7995_v26  ;;  %v8020_v23 = vpop.permute.xlu1 %8019  ;;  %v7997_v52 = vunpack.i.h.bf16 %v7995_v26  ;;  %v5869_v60 = vsel %vm1360_vm11, %v5853_v16, %v7842_v29  ;;  %v13585_v16 = vld [vmem:[%s14668_s12 + $0x180] sm:$0xff] }
 0x91f   :  { %v5885_v59 = vsel %vm4985_vm6, %v5869_v60, %v8002_v14  ;;  %v8021_v1 = vunpack.i.l.bf16 %v8020_v23  ;;  %v8022_v41 = vunpack.i.h.bf16 %v8020_v23 }
 0x920   :  { %v5946_v39 = vsel %vm5053_vm10, %v5930_v4, %v7996_v47  ;;  %v5947_v0 = vsel %vm5053_vm10, %v5931_v19, %v7997_v52  ;;  %v15524_v47 = vld [vmem:[#allocation59_spill] sm:$0xff] }
 0x921   :  { %v8005_v37 = vpop.permute.xlu0 %8004  ;;  %6124 = vmatmul.mubr.f32.gmra.mrb[60].mxu0 %v5946_v39  ;;  %v15525_v23 = vrot.slane %v15524_v47, 2  ;;  %v13590_v19 = vld [vmem:[%s14668_s12 + $0x80] sm:$0xff] }
 0x922   :  { %v8007_v50 = vunpack.i.h.bf16 %v8005_v37  ;;  %v8006_v15 = vunpack.i.l.bf16 %v8005_v37  ;;  %7115 = vmatprep.mubr.msk.f32.mxu0 %vm1292_vm3, %v13112_v35  ;;  %v8030_v30 = vpop.permute.xlu1 %8029  ;;  %v7806_v35 = vunpack.i.l.bf16 %v13341_v34  ;;  %v13570_v37 = vld [vmem:[%s14668_s12 + $0x40] sm:$0xff] }
 0x923   :  { %v8031_v31 = vunpack.i.l.bf16 %v8030_v30  ;;  %v8032_v48 = vunpack.i.h.bf16 %v8030_v30  ;;  %v5503_v55 = vsel %vm1603_vm4, %v15525_v23, %v5502_v27 }
 0x924   :  { %v5900_v36 = vsel %vm5002_vm7, %v5884_v6, %v8006_v15  ;;  %v5901_v13 = vsel %vm5002_vm7, %v5885_v59, %v8007_v50  ;;  %v5854_v12 = vsel %vm1292_vm3, %v13032_v28, %v7806_v35  ;;  %v5855_v28 = vsel %vm1292_vm3, %v13070_v7, %v7807_v11  ;;  %v13580_v15 = vld [vmem:[%s14668_s12 + $0x140] sm:$0xff]  ;;  %v13598_v59 = vld [vmem:[%s14668_s12 + $0x48] sm:$0xff] }
 0x925   :  { %v8015_v46 = vpop.permute.xlu0 %8014  ;;  %6129 = vmatmul.mubr.f32.gmra.mrb[62].mxu0 %v5947_v0  ;;  %v5916_v3 = vsel %vm5019_vm8, %v5900_v36, %v8011_v51  ;;  %v5917_v17 = vsel %vm5019_vm8, %v5901_v13, %v8012_v38  ;;  %v5870_v9 = vsel %vm1360_vm11, %v5854_v12, %v7846_v44  ;;  %v13612_v44 = vld [vmem:[%s14668_s12 + $0x148] sm:$0xff] }
 0x926   :  { %v8017_v8 = vunpack.i.h.bf16 %v8015_v46  ;;  %v8016_v2 = vunpack.i.l.bf16 %v8015_v46  ;;  %7116 = vmatprep.mubr.msk.f32.mxu0 %vm1292_vm3, %v13194_v53  ;;  %v7847_v53 = vunpack.i.h.bf16 %v13353_v49  ;;  %v5773_v42 = vpop.permute.xlu1 %5772  ;;  %v13617_v38 = vld [vmem:[%s14668_s12 + $0x188] sm:$0xff] }
 0x927   :  { %v13647_v12 = vld [vmem:[%s14668_s12 + $0x1c8] sm:$0xff] }
 0x928   :  { %v5932_v54 = vsel %vm5036_vm9, %v5916_v3, %v8016_v2  ;;  %v5933_v20 = vsel %vm5036_vm9, %v5917_v17, %v8017_v8  ;;  %v5871_v62 = vsel %vm1360_vm11, %v5855_v28, %v7847_v53  ;;  %v13627_v3 = vld [vmem:[%s14668_s12 + $0xc0] sm:$0xff] }
 0x929   :  { %v8025_v40 = vpop.permute.xlu0 %8024  ;;  %v5948_v57 = vsel %vm5053_vm10, %v5932_v54, %v8021_v1  ;;  %v5949_v10 = vsel %vm5053_vm10, %v5933_v20, %v8022_v41  ;;  %v13622_v1 = vld [vmem:[%s14668_s12 + $0x1c0] sm:$0xff]  ;;  %v13632_v54 = vld [vmem:[%s14668_s12 + $0x88] sm:$0xff] }
 0x92a   :  { %v8026_v5 = vunpack.i.l.bf16 %v8025_v40  ;;  %6134 = vmatmul.mubr.f32.gmra.mrb[64].mxu0 %v5948_v57  ;;  %v8027_v34 = vunpack.i.h.bf16 %v8025_v40  ;;  %v5727_v26 = vpop.permute.xlu1 %5726 }
 0x92b   :  { %7117 = vmatprep.mubr.msk.f32.mxu0 %vm1292_vm3, %v13179_v56  ;;  %v15523_v56 = vld [vmem:[#allocation99_spill] sm:$0xff] }
 0x92c   :  { %v5886_v58 = vsel %vm4985_vm6, %v5870_v9, %v8026_v5  ;;  %v5887_v22 = vsel %vm4985_vm6, %v5871_v62, %v8027_v34  ;;  %v13657_v34 = vld [vmem:[%s14668_s12 + $0x100] sm:$0xff] }
 0x92d   :  { %v5725_v33 = vpop.permute.xlu0 %5724  ;;  %v5902_v49 = vsel %vm5002_vm7, %v5886_v58, %v8031_v31  ;;  %v5903_v61 = vsel %vm5002_vm7, %v5887_v22, %v8032_v48  ;;  %v13662_v58 = vld [vmem:[%s14668_s12 + $0xc8] sm:$0xff]  ;;  %v13686_v48 = vld [vmem:[%s14668_s12 + $0x190] sm:$0xff] }
 0x92e   :  { %v5918_v45 = vsel %vm5019_vm8, %v5902_v49, %v5725_v33  ;;  %6139 = vmatmul.mubr.f32.gmra.mrb[66].mxu0 %v5949_v10  ;;  %v5823_v4 = vpop.permute.xlu1 %5822  ;;  %v5919_v21 = vsel %vm5019_vm8, %v5903_v61, %v5727_v26  ;;  %v13672_v49 = vld [vmem:[%s14668_s12 + $0x150] sm:$0xff]  ;;  %v13704_v61 = vld [vmem:[%s14668_s12 + $0x158] sm:$0xff] }
 0x92f   :  { %7118 = vmatprep.mubr.msk.f32.mxu0 %vm1292_vm3, %v15523_v56  ;;  %v5934_v63 = vsel %vm5036_vm9, %v5918_v45, %v5773_v42  ;;  %v13681_v56 = vld [vmem:[%s14668_s12 + $0x8] sm:$0xff] }
 0x931   :  { %v5821_v7 = vpop.permute.xlu0 %5820 }
 0x932   :  { %v5950_v32 = vsel %vm5053_vm10, %v5934_v63, %v5821_v7  ;;  %v13692_v63 = vld [vmem:[%s14668_s12 + $0x108] sm:$0xff] }
 0x933   :  { %6144 = vmatmul.mubr.f32.gmra.mrb[68].mxu0 %v5950_v32 }
 0x934   :  { %7119 = vmatprep.mubr.msk.f32.mxu0 %vm1292_vm3, %v5503_v55 }
 0x935   :  { %v5775_v29 = vpop.permute.xlu0 %5774 }
 0x936   :  { %v5935_v52 = vsel %vm5036_vm9, %v5919_v21, %v5775_v29 }
 0x937   :  { %v5951_v39 = vsel %vm5053_vm10, %v5935_v52, %v5823_v4  ;;  %v13716_v52 = vld [vmem:[%s14668_s12 + $0x198] sm:$0xff] }
 0x938   :  { %6149 = vmatmul.mubr.f32.gmra.mrb[70].mxu0 %v5951_v39 }
 0x9c1   :  { %v6075_v43 = vpop.f32.mrb[40].mxu0 }
 0x9c2   :  { %v6076_v25 = vadd.f32 %v13564_v24, %v6075_v43  ;;  %v6077_v14 = vpop.f32.mrb[41].mxu0  ;;  %v13721_v43 = vld [vmem:[%s14668_s12 + $0x50] sm:$0xff] }
 0x9c4   :  { %v6154_v50 = vmax.f32 %v6076_v25, 0.0  ;;  %v13726_v25 = vld [vmem:[%s14668_s12 + $0x10] sm:$0xff] }
 0x9c5   :  { %v6080_v6 = vpop.f32.mrb[42].mxu0 }
 0x9c6   :  { %v6081_v60 = vadd.f32 %v13564_v24, %v6080_v6  ;;  %v6082_v36 = vpop.f32.mrb[43].mxu0  ;;  %v6242_v30 = vmul.f32 %v13570_v37, %v6154_v50  ;;  %v6234_v0 = vmul.f32 %v13575_v18, %v6154_v50  ;;  %v13601_v51 = vmul.f32 %v13580_v15, %v6154_v50 }
 0x9c7   :  { %v13604_v46 = vmul.f32 %v13585_v16, %v6154_v50  ;;  %v6250_v2 = vmul.f32 %v13590_v19, %v6154_v50  ;;  %v13642_v17 = vmul.f32 %v13622_v1, %v6154_v50  ;;  %v6258_v20 = vmul.f32 %v13627_v3, %v6154_v50  ;;  %v13741_v36 = vld [vmem:[%s14668_s12 + $0x1d8] sm:$0xff] }
 0x9c8   :  { %15526 = vst [vmem:[#allocation115_spill] sm:$0xff] %v13601_v51  ;;  %v6155_v35 = vmax.f32 %v6081_v60, 0.0  ;;  %v6386_v13 = vsel %vm1292_vm3, %v6242_v30, 0.0  ;;  %v6362_v8 = vsel %vm1292_vm3, %v6234_v0, 0.0  ;;  %v6266_v45 = vmul.f32 %v13657_v34, %v6154_v50  ;;  %v13736_v60 = vld [vmem:[%s14668_s12 + $0x1d0] sm:$0xff] }
 0x9c9   :  { %15527 = vst [vmem:[#allocation125_spill] sm:$0xff] %v13604_v46  ;;  %6387 = vadd.xlane.f32.xlu1 %v6386_v13  ;;  %6363 = vadd.xlane.f32.xlu0 %v6362_v8  ;;  %15530 = vst [vmem:[#allocation89_spill] sm:$0xff] %v13642_v17  ;;  %v6410_v42 = vsel %vm1292_vm3, %v6250_v2, 0.0  ;;  %v6434_v27 = vsel %vm1292_vm3, %v6258_v20, 0.0  ;;  %v13747_v0 = vld [vmem:[%s14668_s12 + $0x90] sm:$0xff] }
 0x9ca   :  { %v6243_v11 = vmul.f32 %v13598_v59, %v6155_v35  ;;  %v13636_v40 = vmul.f32 %v13612_v44, %v6155_v35  ;;  %v13639_v57 = vmul.f32 %v13617_v38, %v6155_v35  ;;  %v6251_v9 = vmul.f32 %v13632_v54, %v6155_v35 }
 0x9cb   :  { %v13665_v28 = vmul.f32 %v13647_v12, %v6155_v35  ;;  %v6259_v22 = vmul.f32 %v13662_v58, %v6155_v35  ;;  %v6235_v55 = vmul.f32 %v13681_v56, %v6155_v35  ;;  %v6458_v4 = vsel %vm1292_vm3, %v6266_v45, 0.0 }
 0x9cc   :  { %15528 = vst [vmem:[#allocation85_spill] sm:$0xff] %v13636_v40  ;;  %15529 = vst [vmem:[#allocation148_spill] sm:$0xff] %v13639_v57  ;;  %v6085_v53 = vpop.f32.mrb[44].mxu0  ;;  %v6389_v5 = vsel %vm1292_vm3, %v6243_v11, 0.0  ;;  %v6413_v62 = vsel %vm1292_vm3, %v6251_v9, 0.0  ;;  %v6267_v29 = vmul.f32 %v13692_v63, %v6155_v35  ;;  %v13778_v9 = vld [vmem:[%s14668_s12 + $0x18] sm:$0xff] }
 0x9cd   :  { %v6086_v41 = vadd.f32 %v13564_v24, %v6085_v53  ;;  %v6087_v31 = vpop.f32.mrb[45].mxu0  ;;  %6411 = vadd.xlane.f32.xlu1 %v6410_v42  ;;  %6390 = vadd.xlane.f32.xlu0 %v6389_v5  ;;  %15531 = vst [vmem:[#allocation87_spill] sm:$0xff] %v13665_v28  ;;  %v6437_v21 = vsel %vm1292_vm3, %v6259_v22, 0.0  ;;  %v6365_v30 = vsel %vm1292_vm3, %v6235_v55, 0.0  ;;  %v13763_v53 = vld [vmem:[%s14668_s12 + $0x120] sm:$0xff]  ;;  %v13898_v57 = vld [vmem:[%s14668_s12 + $0x1b0] sm:$0xff] }
 0x9ce   :  { %v6461_v8 = vsel %vm1292_vm3, %v6267_v29, 0.0  ;;  %v13768_v42 = vld [vmem:[%s14668_s12 + $0x160] sm:$0xff]  ;;  %v13812_v29 = vld [vmem:[%s14668_s12 + $0x168] sm:$0xff]  ;;  %15550 = vst [vmem:[#allocation102_spill] sm:$0xff] %v13898_v57  ;;  %v13946_v40 = vld [vmem:[%s14668_s12 + $0x138] sm:$0xff] }
 0x9cf   :  { %v13667_v33 = vmax.f32 %v6086_v41, 0.0  ;;  %v13773_v5 = vld [vmem:[%s14668_s12 + $0x1a0] sm:$0xff]  ;;  %15541 = vst [vmem:[#allocation10_spill] sm:$0xff] %v13812_v29  ;;  %15557 = vst [vmem:[#allocation123_spill] sm:$0xff] %v13946_v40 }
 0x9d0   :  { %v6090_v10 = vpop.f32.mrb[46].mxu0 }
 0x9d1   :  { %v6091_v26 = vadd.f32 %v13564_v24, %v6090_v10  ;;  %v6092_v7 = vpop.f32.mrb[47].mxu0  ;;  %6435 = vadd.xlane.f32.xlu1 %v6434_v27  ;;  %6414 = vadd.xlane.f32.xlu0 %v6413_v62  ;;  %v13696_v47 = vmul.f32 %v13672_v49, %v13667_v33  ;;  %v13708_v32 = vmul.f32 %v13686_v48, %v13667_v33 }
 0x9d2   :  { %v6244_v2 = vmul.f32 %v13721_v43, %v13667_v33  ;;  %v6236_v11 = vmul.f32 %v13726_v25, %v13667_v33  ;;  %v13782_v41 = vmul.f32 %v13736_v60, %v13667_v33  ;;  %v6252_v62 = vmul.f32 %v13747_v0, %v13667_v33 }
 0x9d3   :  { %15532 = vst [vmem:[#allocation136_spill] sm:$0xff] %v13696_v47  ;;  %v13698_v23 = vmax.f32 %v6091_v26, 0.0  ;;  %15533 = vst [vmem:[#allocation23_spill] sm:$0xff] %v13708_v32 }
 0x9d4   :  { %15536 = vst [vmem:[#allocation113_spill] sm:$0xff] %v13782_v41  ;;  %v6392_v55 = vsel %vm1292_vm3, %v6244_v2, 0.0  ;;  %v13840_v2 = vld [vmem:[%s14668_s12 + $0x1e0] sm:$0xff]  ;;  %v13857_v41 = vld [vmem:[%s14668_s12 + $0x110] sm:$0xff] }
 0x9d5   :  { %v6095_v39 = vpop.f32.mrb[48].mxu0  ;;  %6459 = vadd.xlane.f32.xlu1 %v6458_v4  ;;  %6438 = vadd.xlane.f32.xlu0 %v6437_v21  ;;  %v13731_v6 = vmul.f32 %v13704_v61, %v13698_v23  ;;  %v13751_v35 = vmul.f32 %v13716_v52, %v13698_v23  ;;  %v13786_v31 = vmul.f32 %v13741_v36, %v13698_v23  ;;  %v6368_v4 = vsel %vm1292_vm3, %v6236_v11, 0.0  ;;  %v13845_v11 = vld [vmem:[%s14668_s12 + $0x1e8] sm:$0xff] }
 0x9d6   :  { %v6096_v14 = vadd.f32 %v13564_v24, %v6095_v39  ;;  %v6097_v50 = vpop.f32.mrb[49].mxu0  ;;  %v6237_v21 = vmul.f32 %v13778_v9, %v13698_v23  ;;  %v13817_v39 = vld [vmem:[%s14668_s12 + $0x1a8] sm:$0xff]  ;;  %15544 = vst [vmem:[#allocation78_spill] sm:$0xff] %v13845_v11  ;;  %v6268_v17 = vmul.f32 %v13857_v41, %v13667_v33 }
 0x9d7   :  { %15534 = vst [vmem:[#allocation80_spill] sm:$0xff] %v13731_v6  ;;  %15535 = vst [vmem:[#allocation93_spill] sm:$0xff] %v13751_v35  ;;  %v13827_v50 = vld [vmem:[%s14668_s12 + $0x58] sm:$0xff] }
 0x9d8   :  { %v13753_v13 = vmax.f32 %v6096_v14, 0.0  ;;  %15537 = vst [vmem:[#allocation8_spill] sm:$0xff] %v13786_v31  ;;  %v13822_v14 = vld [vmem:[%s14668_s12 + $0xd0] sm:$0xff]  ;;  %v13941_v6 = vld [vmem:[%s14668_s12 + $0xf8] sm:$0xff] }
 0x9d9   :  { %v6100_v20 = vpop.f32.mrb[50].mxu0  ;;  %6366 = vadd.xlane.f32.xlu1 %v6365_v30  ;;  %6462 = vadd.xlane.f32.xlu0 %v6461_v8  ;;  %15556 = vst [vmem:[#allocation13_spill] sm:$0xff] %v13941_v6 }
 0x9da   :  { %v6101_v10 = vadd.f32 %v13564_v24, %v6100_v20  ;;  %v6102_v27 = vpop.f32.mrb[51].mxu0  ;;  %v13793_v45 = vmul.f32 %v13763_v53, %v13753_v13  ;;  %v13797_v22 = vmul.f32 %v13768_v42, %v13753_v13  ;;  %v13801_v26 = vmul.f32 %v13773_v5, %v13753_v13 }
 0x9db   :  { %v6371_v27 = vsel %vm1292_vm3, %v6237_v21, 0.0  ;;  %v13866_v21 = vmul.f32 %v13840_v2, %v13753_v13 }
 0x9dc   :  { %15538 = vst [vmem:[#allocation144_spill] sm:$0xff] %v13793_v45  ;;  %15539 = vst [vmem:[#allocation105_spill] sm:$0xff] %v13797_v22  ;;  %v13803_v7 = vmax.f32 %v6101_v10, 0.0  ;;  %v6416_v10 = vsel %vm1292_vm3, %v6252_v62, 0.0  ;;  %v13862_v62 = vld [vmem:[%s14668_s12 + $0x98] sm:$0xff] }
 0x9dd   :  { %15540 = vst [vmem:[#allocation146_spill] sm:$0xff] %v13801_v26  ;;  %6393 = vadd.xlane.f32.xlu1 %v6392_v55  ;;  %6369 = vadd.xlane.f32.xlu0 %v6368_v4  ;;  %v6260_v55 = vmul.f32 %v13822_v14, %v13667_v33  ;;  %v6245_v4 = vmul.f32 %v13827_v50, %v13698_v23  ;;  %15545 = vst [vmem:[#allocation11_spill] sm:$0xff] %v13866_v21  ;;  %v13887_v21 = vld [vmem:[%s14668_s12 + $0x170] sm:$0xff]  ;;  %v13909_v33 = vld [vmem:[%s14668_s12 + $0xd8] sm:$0xff] }
 0x9de   :  { %v13831_v30 = vmul.f32 %v13812_v29, %v13803_v7  ;;  %v13835_v8 = vmul.f32 %v13817_v39, %v13803_v7  ;;  %15549 = vst [vmem:[#allocation21_spill] sm:$0xff] %v13887_v21  ;;  %v6253_v35 = vmul.f32 %v13862_v62, %v13698_v23  ;;  %v13951_v22 = vld [vmem:[%s14668_s12 + $0x178] sm:$0xff] }
 0x9df   :  { %15558 = vst [vmem:[#allocation149_spill] sm:$0xff] %v13951_v22 }
 0x9e0   :  { %15542 = vst [vmem:[#allocation57_spill] sm:$0xff] %v13831_v30  ;;  %15543 = vst [vmem:[#allocation131_spill] sm:$0xff] %v13835_v8  ;;  %v6105_v20 = vpop.f32.mrb[52].mxu0 }
 0x9e1   :  { %v6106_v31 = vadd.f32 %v13564_v24, %v6105_v20  ;;  %v6107_v28 = vpop.f32.mrb[53].mxu0  ;;  %6417 = vadd.xlane.f32.xlu1 %v6416_v10  ;;  %6372 = vadd.xlane.f32.xlu0 %v6371_v27  ;;  %v13870_v20 = vmul.f32 %v13845_v11, %v13803_v7  ;;  %v13877_v10 = vld [vmem:[%s14668_s12 + $0xf0] sm:$0xff] }
 0x9e2   :  { %15547 = vst [vmem:[#allocation76_spill] sm:$0xff] %v13877_v10  ;;  %v13882_v27 = vld [vmem:[%s14668_s12 + $0x130] sm:$0xff] }
 0x9e3   :  { %15546 = vst [vmem:[#allocation60_spill] sm:$0xff] %v13870_v20  ;;  %v13872_v28 = vmax.f32 %v6106_v31, 0.0  ;;  %15548 = vst [vmem:[#allocation92_spill] sm:$0xff] %v13882_v27  ;;  %v6440_v20 = vsel %vm1292_vm3, %v6260_v55, 0.0  ;;  %v6395_v31 = vsel %vm1292_vm3, %v6245_v4, 0.0  ;;  %v13904_v55 = vld [vmem:[%s14668_s12 + $0x20] sm:$0xff] }
 0x9e4   :  { %v6110_v8 = vpop.f32.mrb[54].mxu0  ;;  %v6238_v51 = vmul.f32 %v13904_v55, %v13753_v13 }
 0x9e5   :  { %v6111_v26 = vadd.f32 %v13564_v24, %v6110_v8  ;;  %v6112_v32 = vpop.f32.mrb[55].mxu0  ;;  %6441 = vadd.xlane.f32.xlu1 %v6440_v20  ;;  %6396 = vadd.xlane.f32.xlu0 %v6395_v31  ;;  %v13913_v4 = vmul.f32 %v13877_v10, %v13872_v28  ;;  %v13923_v8 = vld [vmem:[%s14668_s12 + $0x78] sm:$0xff]  ;;  %v13927_v20 = vmul.f32 %v13882_v27, %v13872_v28 }
 0x9e6   :  { %v13918_v32 = vld [vmem:[%s14668_s12 + $0x38] sm:$0xff]  ;;  %15552 = vst [vmem:[#allocation100_spill] sm:$0xff] %v13923_v8  ;;  %v13936_v30 = vmul.f32 %v13887_v21, %v13872_v28  ;;  %v13955_v47 = vmul.f32 %v13898_v57, %v13872_v28 }
 0x9e7   :  { %15551 = vst [vmem:[#allocation12_spill] sm:$0xff] %v13918_v32  ;;  %15553 = vst [vmem:[#allocation116_spill] sm:$0xff] %v13927_v20  ;;  %v13932_v31 = vld [vmem:[%s14668_s12 + $0xb8] sm:$0xff]  ;;  %v6161_v46 = vmax.f32 %v6111_v26, 0.0  ;;  %v6464_v26 = vsel %vm1292_vm3, %v6268_v17, 0.0  ;;  %v6261_v20 = vmul.f32 %v13909_v33, %v13698_v23  ;;  %v13976_v17 = vld [vmem:[%s14668_s12 + $0x60] sm:$0xff] }
 0x9e8   :  { %15554 = vst [vmem:[#allocation24_spill] sm:$0xff] %v13932_v31  ;;  %15555 = vst [vmem:[#allocation127_spill] sm:$0xff] %v13936_v30  ;;  %v6419_v30 = vsel %vm1292_vm3, %v6253_v35, 0.0  ;;  %v13966_v27 = vld [vmem:[%s14668_s12 + $0x118] sm:$0xff] }
 0x9e9   :  { %15559 = vst [vmem:[#allocation25_spill] sm:$0xff] %v13955_v47  ;;  %v13971_v57 = vld [vmem:[%s14668_s12 + $0x1b8] sm:$0xff]  ;;  %v6115_v47 = vpop.f32.mrb[56].mxu0  ;;  %6465 = vadd.xlane.f32.xlu1 %v6464_v26  ;;  %6420 = vadd.xlane.f32.xlu0 %v6419_v30  ;;  %v13979_v35 = vmul.f32 %v13918_v32, %v6161_v46  ;;  %v13982_v21 = vmul.f32 %v13923_v8, %v6161_v46  ;;  %v14000_v8 = vld [vmem:[%s14668_s12 + $0x1f0] sm:$0xff] }
 0x9ea   :  { %15560 = vst [vmem:[#allocation88_spill] sm:$0xff] %v13971_v57  ;;  %v13985_v10 = vmul.f32 %v13932_v31, %v6161_v46  ;;  %v6116_v45 = vadd.f32 %v13564_v24, %v6115_v47  ;;  %v6117_v11 = vpop.f32.mrb[57].mxu0  ;;  %v13989_v26 = vmul.f32 %v13941_v6, %v6161_v46  ;;  %v13992_v30 = vmul.f32 %v13946_v40, %v6161_v46  ;;  %v14005_v31 = vld [vmem:[%s14668_s12 + $0x1f8] sm:$0xff]  ;;  %v14019_v40 = vld [vmem:[%s14668_s12 + $0xa0] sm:$0xff] }
 0x9eb   :  { %v13995_v29 = vmul.f32 %v13951_v22, %v6161_v46  ;;  %v6269_v47 = vmul.f32 %v13966_v27, %v13698_v23  ;;  %v14010_v11 = vmul.f32 %v13971_v57, %v6161_v46  ;;  %v6246_v22 = vmul.f32 %v13976_v17, %v13753_v13  ;;  %v14024_v23 = vld [vmem:[%s14668_s12 + $0x28] sm:$0xff] }
 0x9ec   :  { %15561 = vst [vmem:[#allocation14_spill] sm:$0xff] %v13985_v10  ;;  %15562 = vst [vmem:[#allocation82_spill] sm:$0xff] %v13989_v26  ;;  %v6374_v26 = vsel %vm1292_vm3, %v6238_v51, 0.0  ;;  %v14028_v51 = vmul.f32 %v14000_v8, %v13872_v28 }
 0x9ed   :  { %15563 = vst [vmem:[#allocation86_spill] sm:$0xff] %v13992_v30  ;;  %15564 = vst [vmem:[#allocation81_spill] sm:$0xff] %v13995_v29  ;;  %v6162_v30 = vmax.f32 %v6116_v45, 0.0  ;;  %v6443_v29 = vsel %vm1292_vm3, %v6261_v20, 0.0  ;;  %v6120_v6 = vpop.f32.mrb[58].mxu0  ;;  %6375 = vadd.xlane.f32.xlu1 %v6374_v26  ;;  %v14031_v45 = vmul.f32 %v14005_v31, %v6161_v46  ;;  %v6467_v32 = vsel %vm1292_vm3, %v6269_v47, 0.0 }
 0x9ee   :  { %15565 = vst [vmem:[#allocation120_spill] sm:$0xff] %v14010_v11  ;;  %6444 = vadd.xlane.f32.xlu0 %v6443_v29  ;;  %v6121_v20 = vadd.f32 %v13564_v24, %v6120_v6  ;;  %v6122_v29 = vpop.f32.mrb[59].mxu0  ;;  %v6398_v6 = vsel %vm1292_vm3, %v6246_v22, 0.0 }
 0x9ef   :  { %15566 = vst [vmem:[#allocation114_spill] sm:$0xff] %v14031_v45  ;;  %v14035_v26 = vmul.f32 %v13575_v18, %v6162_v30  ;;  %v14038_v11 = vmul.f32 %v13570_v37, %v6162_v30  ;;  %v14041_v57 = vmul.f32 %v13590_v19, %v6162_v30  ;;  %v14045_v10 = vmul.f32 %v13627_v3, %v6162_v30  ;;  %v14058_v19 = vld [vmem:[%s14668_s12 + $0xe0] sm:$0xff]  ;;  %v14063_v3 = vld [vmem:[%s14668_s12 + $0x68] sm:$0xff] }
 0x9f0   :  { %v14048_v46 = vmul.f32 %v13657_v34, %v6162_v30  ;;  %v6163_v45 = vmax.f32 %v6121_v20, 0.0  ;;  %v6254_v18 = vmul.f32 %v14019_v40, %v13753_v13  ;;  %v6239_v37 = vmul.f32 %v14024_v23, %v13803_v7 }
 0x9f1   :  { %6399 = vadd.xlane.f32.xlu1 %v6398_v6  ;;  %v14066_v34 = vmul.f32 %v13580_v15, %v6162_v30  ;;  %v14069_v22 = vmul.f32 %v13585_v16, %v6162_v30  ;;  %v14087_v15 = vmul.f32 %v13622_v1, %v6162_v30  ;;  %v14099_v1 = vld [vmem:[%s14668_s12 + $0x30] sm:$0xff] }
 0x9f2   :  { %6468 = vadd.xlane.f32.xlu0 %v6467_v32  ;;  %v14072_v47 = vmul.f32 %v13681_v56, %v6163_v45  ;;  %v14075_v32 = vmul.f32 %v13598_v59, %v6163_v45  ;;  %v14078_v20 = vmul.f32 %v13632_v54, %v6163_v45  ;;  %v14081_v29 = vmul.f32 %v13662_v58, %v6163_v45 }
 0x9f3   :  { %15567 = vst [vmem:[#allocation16_spill] sm:$0xff] %v14069_v22  ;;  %v14084_v6 = vmul.f32 %v13692_v63, %v6163_v45  ;;  %15569 = vst [vmem:[#allocation112_spill] sm:$0xff] %v14087_v15  ;;  %v6422_v22 = vsel %vm1292_vm3, %v6254_v18, 0.0  ;;  %v6377_v56 = vsel %vm1292_vm3, %v6239_v37, 0.0  ;;  %v6262_v59 = vmul.f32 %v14058_v19, %v13753_v13  ;;  %v14104_v63 = vld [vmem:[%s14668_s12 + $0xa8] sm:$0xff] }
 0x9f4   :  { %15568 = vst [vmem:[#allocation168_spill] sm:$0xff] %v14081_v29  ;;  %v6125_v16 = vpop.f32.mrb[60].mxu0  ;;  %v6247_v54 = vmul.f32 %v14063_v3, %v13803_v7  ;;  %v14107_v13 = vmul.f32 %v13612_v44, %v6163_v45  ;;  %v14110_v30 = vmul.f32 %v13617_v38, %v6163_v45  ;;  %v14113_v18 = vmul.f32 %v13647_v12, %v6163_v45  ;;  %v14125_v38 = vld [vmem:[%s14668_s12 + $0x70] sm:$0xff]  ;;  %v14130_v12 = vld [vmem:[%s14668_s12 + $0xe8] sm:$0xff] }
 0x9f5   :  { %v6126_v58 = vadd.f32 %v13564_v24, %v6125_v16  ;;  %v6127_v29 = vpop.f32.mrb[61].mxu0  ;;  %6423 = vadd.xlane.f32.xlu1 %v6422_v22  ;;  %v6255_v15 = vmul.f32 %v14104_v63, %v13803_v7 }
 0x9f6   :  { %6378 = vadd.xlane.f32.xlu0 %v6377_v56  ;;  %15570 = vst [vmem:[#allocation106_spill] sm:$0xff] %v14107_v13  ;;  %15571 = vst [vmem:[#allocation122_spill] sm:$0xff] %v14113_v18  ;;  %v6446_v29 = vsel %vm1292_vm3, %v6262_v59, 0.0  ;;  %v6401_v16 = vsel %vm1292_vm3, %v6247_v54, 0.0  ;;  %v6240_v56 = vmul.f32 %v14099_v1, %v13872_v28 }
 0x9f7   :  { %v6164_v37 = vmax.f32 %v6126_v58, 0.0 }
 0x9f8   :  { %v6130_v22 = vpop.f32.mrb[62].mxu0 }
 0x9f9   :  { %v6131_v44 = vadd.f32 %v13564_v24, %v6130_v22  ;;  %v6132_v13 = vpop.f32.mrb[63].mxu0  ;;  %6447 = vadd.xlane.f32.xlu1 %v6446_v29  ;;  %v14133_v45 = vmul.f32 %v13726_v25, %v6164_v37  ;;  %v14136_v59 = vmul.f32 %v13721_v43, %v6164_v37  ;;  %v14139_v54 = vmul.f32 %v13747_v0, %v6164_v37 }
 0x9fa   :  { %6402 = vadd.xlane.f32.xlu0 %v6401_v16  ;;  %v14142_v58 = vmul.f32 %v13857_v41, %v6164_v37  ;;  %v14145_v13 = vmul.f32 %v13686_v48, %v6164_v37  ;;  %v14148_v22 = vmul.f32 %v13822_v14, %v6164_v37  ;;  %v14151_v16 = vmul.f32 %v13672_v49, %v6164_v37  ;;  %v6207_v48 = vld [vmem:[%s14668_s12 + $0x128] sm:$0xff]  ;;  %v6192_v49 = vld [vmem:[%s14668_s12 + $0xb0] sm:$0xff] }
 0x9fb   :  { %v6165_v29 = vmax.f32 %v6131_v44, 0.0  ;;  %v6380_v25 = vsel %vm1292_vm3, %v6240_v56, 0.0  ;;  %v6425_v43 = vsel %vm1292_vm3, %v6255_v15, 0.0  ;;  %v6248_v0 = vmul.f32 %v14125_v38, %v13872_v28 }
 0x9fc   :  { %15572 = vst [vmem:[#allocation147_spill] sm:$0xff] %v14145_v13  ;;  %15573 = vst [vmem:[#allocation17_spill] sm:$0xff] %v14148_v22  ;;  %v6263_v41 = vmul.f32 %v14130_v12, %v13803_v7 }
 0x9fd   :  { %15574 = vst [vmem:[#allocation169_spill] sm:$0xff] %v14151_v16  ;;  %v6135_v14 = vpop.f32.mrb[64].mxu0  ;;  %6381 = vadd.xlane.f32.xlu1 %v6380_v25  ;;  %v14166_v56 = vmul.f32 %v13778_v9, %v6165_v29  ;;  %v14169_v15 = vmul.f32 %v13827_v50, %v6165_v29  ;;  %v14172_v44 = vmul.f32 %v13862_v62, %v6165_v29  ;;  %v6404_v62 = vsel %vm1292_vm3, %v6248_v0, 0.0 }
 0x9fe   :  { %6426 = vadd.xlane.f32.xlu0 %v6425_v43  ;;  %v6136_v16 = vadd.f32 %v13564_v24, %v6135_v14  ;;  %v6137_v22 = vpop.f32.mrb[65].mxu0  ;;  %v14176_v13 = vmul.f32 %v13966_v27, %v6165_v29  ;;  %v14179_v25 = vmul.f32 %v13736_v60, %v6164_v37  ;;  %v14182_v43 = vmul.f32 %v13716_v52, %v6165_v29 }
 0x9ff   :  { %v6271_v9 = vmul.f32 %v6207_v48, %v13803_v7  ;;  %v14186_v50 = vmul.f32 %v13909_v33, %v6165_v29  ;;  %v6449_v14 = vsel %vm1292_vm3, %v6263_v41, 0.0  ;;  %v6256_v22 = vmul.f32 %v6192_v49, %v13872_v28 }
 0xa00   :  { %v6166_v18 = vmax.f32 %v6136_v16, 0.0  ;;  %v14192_v60 = vmul.f32 %v13704_v61, %v6165_v29  ;;  %v14195_v52 = vmul.f32 %v13741_v36, %v6165_v29 }
 0xa01   :  { %v6140_v27 = vpop.f32.mrb[66].mxu0  ;;  %6405 = vadd.xlane.f32.xlu1 %v6404_v62  ;;  %v6428_v29 = vsel %vm1292_vm3, %v6256_v22, 0.0  ;;  %v6473_v41 = vsel %vm1292_vm3, %v6271_v9, 0.0 }
 0xa02   :  { %6450 = vadd.xlane.f32.xlu0 %v6449_v14  ;;  %v6141_v7 = vadd.f32 %v13564_v24, %v6140_v27  ;;  %v6142_v33 = vpop.f32.mrb[67].mxu0  ;;  %v14199_v37 = vmul.f32 %v13904_v55, %v6166_v18  ;;  %v14202_v16 = vmul.f32 %v13976_v17, %v6166_v18  ;;  %v14205_v28 = vmul.f32 %v14019_v40, %v6166_v18 }
 0xa03   :  { %v14208_v0 = vmul.f32 %v13763_v53, %v6166_v18  ;;  %v14211_v61 = vmul.f32 %v13773_v5, %v6166_v18  ;;  %v14216_v55 = vmul.f32 %v14058_v19, %v6166_v18  ;;  %v14219_v17 = vmul.f32 %v13768_v42, %v6166_v18 }
 0xa04   :  { %v6167_v36 = vmax.f32 %v6141_v7, 0.0  ;;  %v14234_v19 = vmul.f32 %v13840_v2, %v6166_v18  ;;  %v6452_v42 = vsel %vm1292_vm3, %v13913_v4, 0.0  ;;  %v15576_v2 = vld [vmem:[#allocation78_spill] sm:$0xff] }
 0xa05   :  { %6429 = vadd.xlane.f32.xlu1 %v6428_v29 }
 0xa06   :  { %6474 = vadd.xlane.f32.xlu0 %v6473_v41  ;;  %v6145_v40 = vpop.f32.mrb[68].mxu0  ;;  %v14222_v53 = vmul.f32 %v14024_v23, %v6167_v36  ;;  %v14225_v5 = vmul.f32 %v14063_v3, %v6167_v36  ;;  %v14228_v62 = vmul.f32 %v14104_v63, %v6167_v36  ;;  %v14230_v14 = vmul.f32 %v6207_v48, %v6167_v36  ;;  %v15575_v48 = vld [vmem:[#allocation10_spill] sm:$0xff]  ;;  %v15577_v41 = vld [vmem:[#allocation144_spill] sm:$0xff] }
 0xa07   :  { %v6146_v9 = vadd.f32 %v13564_v24, %v6145_v40  ;;  %v6147_v22 = vpop.f32.mrb[69].mxu0  ;;  %v6383_v23 = vsel %vm1292_vm3, %v13979_v35, 0.0  ;;  %v14241_v3 = vmul.f32 %v13817_v39, %v6167_v36  ;;  %v14244_v63 = vmul.f32 %v14130_v12, %v6167_v36 }
 0xa08   :  { %v14247_v7 = vmul.f32 %v15575_v48, %v6167_v36  ;;  %v14250_v18 = vmul.f32 %v15576_v2, %v6167_v36  ;;  %v6470_v12 = vsel %vm1292_vm3, %v15577_v41, 0.0  ;;  %v6407_v40 = vsel %vm1292_vm3, %v13982_v21, 0.0  ;;  %v15579_v36 = vld [vmem:[#allocation21_spill] sm:$0xff]  ;;  %v15582_v2 = vld [vmem:[#allocation102_spill] sm:$0xff]  ;;  %v15584_v21 = vld [vmem:[#allocation116_spill] sm:$0xff] }
 0xa09   :  { %v6168_v27 = vmax.f32 %v6146_v9, 0.0  ;;  %6453 = vadd.xlane.f32.xlu1 %v6452_v42  ;;  %v15578_v9 = vld [vmem:[#allocation76_spill] sm:$0xff]  ;;  %v15585_v41 = vld [vmem:[#allocation14_spill] sm:$0xff] }
 0xa0a   :  { %6384 = vadd.xlane.f32.xlu0 %v6383_v23  ;;  %v15580_v23 = vld [vmem:[#allocation92_spill] sm:$0xff] }
 0xa0b   :  { %v6150_v33 = vpop.f32.mrb[70].mxu0  ;;  %v14253_v4 = vmul.f32 %v14099_v1, %v6168_v27  ;;  %v14256_v35 = vmul.f32 %v14125_v38, %v6168_v27  ;;  %v14264_v22 = vmul.f32 %v15578_v9, %v6168_v27  ;;  %v14267_v1 = vmul.f32 %v15579_v36, %v6168_v27 }
 0xa0c   :  { %v6151_v29 = vadd.f32 %v13564_v24, %v6150_v33  ;;  %v6152_v39 = vpop.f32.mrb[71].mxu0  ;;  %v14269_v42 = vmul.f32 %v6192_v49, %v6168_v27  ;;  %v14272_v24 = vmul.f32 %v14000_v8, %v6168_v27  ;;  %v14275_v48 = vmul.f32 %v15580_v23, %v6168_v27  ;;  %v15587_v49 = vld [vmem:[#allocation24_spill] sm:$0xff]  ;;  %v15588_v8 = vld [vmem:[#allocation123_spill] sm:$0xff] }
 0xa0d   :  { %6471 = vadd.xlane.f32.xlu1 %v6470_v12  ;;  %v14278_v33 = vmul.f32 %v15582_v2, %v6168_v27  ;;  %v6476_v39 = vsel %vm1292_vm3, %v15584_v21, 0.0  ;;  %v6431_v12 = vsel %vm1292_vm3, %v15585_v41, 0.0  ;;  %v15590_v23 = vld [vmem:[#allocation100_spill] sm:$0xff]  ;;  %v15593_v21 = vld [vmem:[#allocation13_spill] sm:$0xff] }
 0xa0e   :  { %6408 = vadd.xlane.f32.xlu0 %v6407_v40  ;;  %v6169_v38 = vmax.f32 %v6151_v29, 0.0  ;;  %15581 = vst [vmem:[#allocation145_spill] sm:$0xff] %v14275_v48  ;;  %v15586_v40 = vld [vmem:[#allocation12_spill] sm:$0xff]  ;;  %v15594_v41 = vld [vmem:[#allocation149_spill] sm:$0xff] }
 0xa0f   :  { %15583 = vst [vmem:[#allocation94_spill] sm:$0xff] %v14278_v33  ;;  %v15591_v2 = vld [vmem:[#allocation88_spill] sm:$0xff] }
 0xa10   :  { %v14285_v9 = vmul.f32 %v15586_v40, %v6169_v38  ;;  %v14288_v29 = vmul.f32 %v15587_v49, %v6169_v38  ;;  %v14291_v36 = vmul.f32 %v15588_v8, %v6169_v38  ;;  %v14294_v27 = vmul.f32 %v15590_v23, %v6169_v38  ;;  %v15597_v8 = vld [vmem:[#allocation82_spill] sm:$0xff]  ;;  %v15598_v23 = vld [vmem:[#allocation136_spill] sm:$0xff] }
 0xa11   :  { %6477 = vadd.xlane.f32.xlu1 %v6476_v39  ;;  %v14297_v33 = vmul.f32 %v15591_v2, %v6169_v38  ;;  %v14300_v48 = vmul.f32 %v15593_v21, %v6169_v38  ;;  %v14303_v40 = vmul.f32 %v15594_v41, %v6169_v38  ;;  %v14306_v49 = vmul.f32 %v14005_v31, %v6169_v38  ;;  %v15596_v39 = vld [vmem:[#allocation115_spill] sm:$0xff]  ;;  %v15600_v41 = vld [vmem:[#allocation105_spill] sm:$0xff] }
 0xa12   :  { %6432 = vadd.xlane.f32.xlu0 %v6431_v12  ;;  %15589 = vst [vmem:[#allocation52_spill] sm:$0xff] %v14291_v36  ;;  %v6482_v12 = vsel %vm1292_vm3, %v15596_v39, 0.0  ;;  %v6455_v36 = vsel %vm1292_vm3, %v15597_v8, 0.0  ;;  %v6488_v2 = vsel %vm1292_vm3, %v15598_v23, 0.0  ;;  %v6494_v31 = vsel %vm1292_vm3, %v15600_v41, 0.0  ;;  %v15601_v38 = vld [vmem:[#allocation85_spill] sm:$0xff] }
 0xa13   :  { %15592 = vst [vmem:[#allocation79_spill] sm:$0xff] %v14297_v33  ;;  %15595 = vst [vmem:[#allocation18_spill] sm:$0xff] %v14306_v49  ;;  %v15599_v33 = vld [vmem:[#allocation86_spill] sm:$0xff]  ;;  %v6485_v49 = vsel %vm1292_vm3, %v15601_v38, 0.0  ;;  %v15602_v39 = vld [vmem:[#allocation127_spill] sm:$0xff] }
 0xa14   :  { %v6479_v21 = vsel %vm1292_vm3, %v15599_v33, 0.0  ;;  %v15604_v23 = vld [vmem:[#allocation125_spill] sm:$0xff]  ;;  %v15606_v41 = vld [vmem:[#allocation23_spill] sm:$0xff] }
 0xa15   :  { %6483 = vadd.xlane.f32.xlu1 %v6482_v12  ;;  %v6500_v12 = vsel %vm1292_vm3, %v15602_v39, 0.0  ;;  %v6506_v33 = vsel %vm1292_vm3, %v15604_v23, 0.0  ;;  %v15608_v39 = vld [vmem:[#allocation146_spill] sm:$0xff]  ;;  %v15610_v23 = vld [vmem:[#allocation25_spill] sm:$0xff] }
 0xa16   :  { %6456 = vadd.xlane.f32.xlu0 %v6455_v36  ;;  %v15603_v36 = vld [vmem:[#allocation80_spill] sm:$0xff] }
 0xa17   :  { %v6491_v8 = vsel %vm1292_vm3, %v15603_v36, 0.0  ;;  %v15609_v36 = vld [vmem:[#allocation148_spill] sm:$0xff] }
 0xa19   :  { %6489 = vadd.xlane.f32.xlu1 %v6488_v2  ;;  %v15605_v2 = vld [vmem:[#allocation57_spill] sm:$0xff] }
 0xa1a   :  { %6480 = vadd.xlane.f32.xlu0 %v6479_v21  ;;  %v6497_v21 = vsel %vm1292_vm3, %v15605_v2, 0.0  ;;  %v15611_v2 = vld [vmem:[#allocation93_spill] sm:$0xff] }
 0xa1d   :  { %6495 = vadd.xlane.f32.xlu1 %v6494_v31  ;;  %v6512_v31 = vsel %vm1292_vm3, %v15606_v41, 0.0  ;;  %v15612_v41 = vld [vmem:[#allocation89_spill] sm:$0xff] }
 0xa1e   :  { %6486 = vadd.xlane.f32.xlu0 %v6485_v49  ;;  %v15607_v49 = vld [vmem:[#allocation81_spill] sm:$0xff] }
 0xa1f   :  { %v6503_v38 = vsel %vm1292_vm3, %v15607_v49, 0.0  ;;  %v15613_v49 = vld [vmem:[#allocation131_spill] sm:$0xff] }
 0xa21   :  { %6501 = vadd.xlane.f32.xlu1 %v6500_v12  ;;  %v6518_v12 = vsel %vm1292_vm3, %v15608_v39, 0.0  ;;  %v15614_v39 = vld [vmem:[#allocation113_spill] sm:$0xff] }
 0xa22   :  { %6492 = vadd.xlane.f32.xlu0 %v6491_v8  ;;  %v6509_v8 = vsel %vm1292_vm3, %v15609_v36, 0.0  ;;  %v15615_v36 = vld [vmem:[#allocation120_spill] sm:$0xff] }
 0xa25   :  { %6507 = vadd.xlane.f32.xlu1 %v6506_v33  ;;  %v6524_v33 = vsel %vm1292_vm3, %v15610_v23, 0.0  ;;  %v15616_v23 = vld [vmem:[#allocation11_spill] sm:$0xff] }
 0xa26   :  { %6498 = vadd.xlane.f32.xlu0 %v6497_v21  ;;  %v6515_v21 = vsel %vm1292_vm3, %v15611_v2, 0.0  ;;  %v15617_v2 = vld [vmem:[#allocation87_spill] sm:$0xff] }
 0xa29   :  { %6513 = vadd.xlane.f32.xlu1 %v6512_v31  ;;  %v6530_v31 = vsel %vm1292_vm3, %v15612_v41, 0.0  ;;  %v6548_v41 = vsel %vm1292_vm3, %v14028_v51, 0.0  ;;  %v6566_v51 = vsel %vm1292_vm3, %v14199_v37, 0.0 }
 0xa2a   :  { %6504 = vadd.xlane.f32.xlu0 %v6503_v38  ;;  %v6521_v38 = vsel %vm1292_vm3, %v15613_v49, 0.0 }
 0xa2d   :  { %6519 = vadd.xlane.f32.xlu1 %v6518_v12  ;;  %v6536_v12 = vsel %vm1292_vm3, %v15614_v39, 0.0  ;;  %v15619_v39 = vld [vmem:[#allocation60_spill] sm:$0xff] }
 0xa2e   :  { %6510 = vadd.xlane.f32.xlu0 %v6509_v8  ;;  %v6527_v8 = vsel %vm1292_vm3, %v15615_v36, 0.0  ;;  %v6560_v36 = vsel %vm1292_vm3, %v14133_v45, 0.0  ;;  %v6578_v45 = vsel %vm1292_vm3, %v14038_v11, 0.0 }
 0xa31   :  { %6525 = vadd.xlane.f32.xlu1 %v6524_v33  ;;  %v6542_v33 = vsel %vm1292_vm3, %v15616_v23, 0.0 }
 0xa32   :  { %6516 = vadd.xlane.f32.xlu0 %v6515_v21  ;;  %v6533_v21 = vsel %vm1292_vm3, %v15617_v2, 0.0  ;;  %v6563_v2 = vsel %vm1292_vm3, %v14166_v56, 0.0  ;;  %v6575_v56 = vsel %vm1292_vm3, %v14285_v9, 0.0  ;;  %v6602_v9 = vsel %vm1292_vm3, %v14041_v57, 0.0 }
 0xa33   :  { %v6650_v57 = vsel %vm1292_vm3, %v14048_v46, 0.0 }
 0xa35   :  { %6531 = vadd.xlane.f32.xlu1 %v6530_v31  ;;  %v15618_v31 = vld [vmem:[#allocation8_spill] sm:$0xff] }
 0xa36   :  { %6522 = vadd.xlane.f32.xlu0 %v6521_v38  ;;  %v6539_v49 = vsel %vm1292_vm3, %v15618_v31, 0.0  ;;  %v6554_v38 = vsel %vm1292_vm3, %v14035_v26, 0.0  ;;  %v6572_v26 = vsel %vm1292_vm3, %v14253_v4, 0.0  ;;  %v6584_v4 = vsel %vm1292_vm3, %v14136_v59, 0.0 }
 0xa37   :  { %v6581_v31 = vsel %vm1292_vm3, %v14075_v32, 0.0  ;;  %v6626_v32 = vsel %vm1292_vm3, %v14045_v10, 0.0  ;;  %v6674_v10 = vsel %vm1292_vm3, %v14066_v34, 0.0  ;;  %v15623_v34 = vld [vmem:[#allocation112_spill] sm:$0xff] }
 0xa39   :  { %6537 = vadd.xlane.f32.xlu1 %v6536_v12  ;;  %v6545_v12 = vsel %vm1292_vm3, %v15619_v39, 0.0 }
 0xa3a   :  { %6528 = vadd.xlane.f32.xlu0 %v6527_v8  ;;  %v15620_v8 = vld [vmem:[#allocation114_spill] sm:$0xff] }
 0xa3b   :  { %v6551_v23 = vsel %vm1292_vm3, %v15620_v8, 0.0 }
 0xa3d   :  { %6543 = vadd.xlane.f32.xlu1 %v6542_v33  ;;  %v6557_v33 = vsel %vm1292_vm3, %v14072_v47, 0.0 }
 0xa3e   :  { %6534 = vadd.xlane.f32.xlu0 %v6533_v21  ;;  %v6569_v21 = vsel %vm1292_vm3, %v14222_v53, 0.0  ;;  %v6590_v53 = vsel %vm1292_vm3, %v14202_v16, 0.0 }
 0xa41   :  { %6549 = vadd.xlane.f32.xlu1 %v6548_v41 }
 0xa42   :  { %6540 = vadd.xlane.f32.xlu0 %v6539_v49 }
 0xa45   :  { %6555 = vadd.xlane.f32.xlu1 %v6554_v38  ;;  %v6587_v38 = vsel %vm1292_vm3, %v14169_v15, 0.0  ;;  %v6605_v15 = vsel %vm1292_vm3, %v14078_v20, 0.0  ;;  %v6653_v20 = vsel %vm1292_vm3, %v14084_v6, 0.0  ;;  %v6608_v6 = vsel %vm1292_vm3, %v14139_v54, 0.0  ;;  %v15626_v54 = vld [vmem:[#allocation147_spill] sm:$0xff] }
 0xa46   :  { %6546 = vadd.xlane.f32.xlu0 %v6545_v12  ;;  %v6593_v12 = vsel %vm1292_vm3, %v14225_v5, 0.0 }
 0xa49   :  { %6561 = vadd.xlane.f32.xlu1 %v6560_v36 }
 0xa4a   :  { %6552 = vadd.xlane.f32.xlu0 %v6551_v23 }
 0xa4d   :  { %6567 = vadd.xlane.f32.xlu1 %v6566_v51 }
 0xa4e   :  { %6558 = vadd.xlane.f32.xlu0 %v6557_v33  ;;  %v15621_v33 = vld [vmem:[#allocation168_spill] sm:$0xff] }
 0xa4f   :  { %v6629_v5 = vsel %vm1292_vm3, %v15621_v33, 0.0 }
 0xa51   :  { %6573 = vadd.xlane.f32.xlu1 %v6572_v26 }
 0xa52   :  { %6564 = vadd.xlane.f32.xlu0 %v6563_v2 }
 0xa55   :  { %6579 = vadd.xlane.f32.xlu1 %v6578_v45  ;;  %v15622_v45 = vld [vmem:[#allocation16_spill] sm:$0xff] }
 0xa56   :  { %6570 = vadd.xlane.f32.xlu0 %v6569_v21  ;;  %v14376_v37 = vpop.xlane.xlu1 %6387  ;;  %v14378_v47 = vpop.xlane.xlu0 %6363  ;;  %v6698_v46 = vsel %vm1292_vm3, %v15622_v45, 0.0 }
 0xa59   :  { %6585 = vadd.xlane.f32.xlu1 %v6584_v4 }
 0xa5a   :  { %6576 = vadd.xlane.f32.xlu0 %v6575_v56  ;;  %v14384_v41 = vpop.xlane.xlu1 %6411  ;;  %v14386_v11 = vpop.xlane.xlu0 %6390  ;;  %v6722_v56 = vsel %vm1292_vm3, %v15623_v34, 0.0 }
 0xa5d   :  { %6591 = vadd.xlane.f32.xlu1 %v6590_v53  ;;  %v15624_v53 = vld [vmem:[#allocation106_spill] sm:$0xff] }
 0xa5e   :  { %6582 = vadd.xlane.f32.xlu0 %v6581_v31  ;;  %v14392_v49 = vpop.xlane.xlu1 %6435  ;;  %v14394_v59 = vpop.xlane.xlu0 %6414  ;;  %v6677_v31 = vsel %vm1292_vm3, %v15624_v53, 0.0  ;;  %v15628_v53 = vld [vmem:[#allocation169_spill] sm:$0xff] }
 0xa61   :  { %6603 = vadd.xlane.f32.xlu1 %v6602_v9 }
 0xa62   :  { %6588 = vadd.xlane.f32.xlu0 %v6587_v38  ;;  %v14400_v39 = vpop.xlane.xlu1 %6459  ;;  %v14402_v16 = vpop.xlane.xlu0 %6438 }
 0xa65   :  { %6627 = vadd.xlane.f32.xlu1 %v6626_v32  ;;  %v6701_v32 = vsel %vm1292_vm3, %v14110_v30, 0.0  ;;  %v15627_v30 = vld [vmem:[#allocation17_spill] sm:$0xff] }
 0xa66   :  { %6594 = vadd.xlane.f32.xlu0 %v6593_v12  ;;  %v6367_v36 = vpop.xlane.xlu1 %6366  ;;  %v14408_v8 = vpop.xlane.xlu0 %6462 }
 0xa69   :  { %6651 = vadd.xlane.f32.xlu1 %v6650_v57 }
 0xa6a   :  { %6606 = vadd.xlane.f32.xlu0 %v6605_v15  ;;  %v6394_v23 = vpop.xlane.xlu1 %6393  ;;  %v6370_v51 = vpop.xlane.xlu0 %6369  ;;  %v6656_v15 = vsel %vm1292_vm3, %v14142_v58, 0.0  ;;  %v6611_v58 = vsel %vm1292_vm3, %v14172_v44, 0.0  ;;  %v6707_v44 = vsel %vm1292_vm3, %v14182_v43, 0.0 }
 0xa6d   :  { %6675 = vadd.xlane.f32.xlu1 %v6674_v10  ;;  %v15625_v10 = vld [vmem:[#allocation122_spill] sm:$0xff] }
 0xa6e   :  { %6630 = vadd.xlane.f32.xlu0 %v6629_v5  ;;  %v14418_v26 = vpop.xlane.xlu1 %6417  ;;  %v6373_v2 = vpop.xlane.xlu0 %6372  ;;  %v6725_v33 = vsel %vm1292_vm3, %v15625_v10, 0.0  ;;  %v6728_v10 = vsel %vm1292_vm3, %v14179_v25, 0.0  ;;  %v6759_v25 = vadd.f32 %v14386_v11, %v14376_v37  ;;  %v6662_v37 = vsel %vm1292_vm3, %v14208_v0, 0.0 }
 0xa71   :  { %6699 = vadd.xlane.f32.xlu1 %v6698_v46  ;;  %v6704_v46 = vsel %vm1292_vm3, %v15626_v54, 0.0 }
 0xa72   :  { %6654 = vadd.xlane.f32.xlu0 %v6653_v20  ;;  %v14424_v21 = vpop.xlane.xlu1 %6441  ;;  %v6397_v4 = vpop.xlane.xlu0 %6396  ;;  %v6632_v20 = vsel %vm1292_vm3, %v15627_v30, 0.0  ;;  %v6635_v30 = vsel %vm1292_vm3, %v14186_v50, 0.0 }
 0xa75   :  { %6723 = vadd.xlane.f32.xlu1 %v6722_v56 }
 0xa76   :  { %6678 = vadd.xlane.f32.xlu0 %v6677_v31  ;;  %v14430_v9 = vpop.xlane.xlu1 %6465  ;;  %v14432_v38 = vpop.xlane.xlu0 %6420  ;;  %v6680_v31 = vsel %vm1292_vm3, %v15628_v53, 0.0 }
 0xa79   :  { %6609 = vadd.xlane.f32.xlu1 %v6608_v6 }
 0xa7a   :  { %6702 = vadd.xlane.f32.xlu0 %v6701_v32  ;;  %v6376_v12 = vpop.xlane.xlu1 %6375 }
 0xa7b   :  { %v14438_v57 = vpop.xlane.xlu0 %6444 }
 0xa7d   :  { %6657 = vadd.xlane.f32.xlu1 %v6656_v15  ;;  %v6659_v15 = vsel %vm1292_vm3, %v14176_v13, 0.0 }
 0xa7e   :  { %6726 = vadd.xlane.f32.xlu0 %v6725_v33  ;;  %v6400_v5 = vpop.xlane.xlu1 %6399 }
 0xa7f   :  { %v14444_v45 = vpop.xlane.xlu0 %6468 }
 0xa81   :  { %6705 = vadd.xlane.f32.xlu1 %v6704_v46  ;;  %v6746_v46 = vadd.f32 %v6367_v36, %v14378_v47  ;;  %v6683_v47 = vsel %vm1292_vm3, %v14192_v60, 0.0  ;;  %v6760_v36 = vadd.f32 %v6759_v25, %v6394_v23 }
 0xa82   :  { %6633 = vadd.xlane.f32.xlu0 %v6632_v20  ;;  %v6424_v34 = vpop.xlane.xlu1 %6423 }
 0xa83   :  { %v6379_v56 = vpop.xlane.xlu0 %6378  ;;  %v6747_v20 = vadd.f32 %v6746_v46, %v6370_v51 }
 0xa85   :  { %6612 = vadd.xlane.f32.xlu1 %v6611_v58  ;;  %v6748_v53 = vadd.f32 %v6747_v20, %v6373_v2  ;;  %v6798_v2 = vadd.f32 %v14408_v8, %v14400_v39 }
 0xa86   :  { %6681 = vadd.xlane.f32.xlu0 %v6680_v31  ;;  %v6448_v6 = vpop.xlane.xlu1 %6447  ;;  %v6614_v31 = vsel %vm1292_vm3, %v14205_v28, 0.0  ;;  %v6731_v28 = vsel %vm1292_vm3, %v14195_v52, 0.0 }
 0xa87   :  { %v6403_v32 = vpop.xlane.xlu0 %6402  ;;  %v6749_v43 = vadd.f32 %v6748_v53, %v6376_v12  ;;  %v6799_v52 = vadd.f32 %v6798_v2, %v14430_v9 }
 0xa89   :  { %6660 = vadd.xlane.f32.xlu1 %v6659_v15  ;;  %v6772_v15 = vadd.f32 %v14394_v59, %v14384_v41  ;;  %v6750_v46 = vadd.f32 %v6749_v43, %v6379_v56  ;;  %v6785_v41 = vadd.f32 %v14402_v16, %v14392_v49  ;;  %v6800_v49 = vadd.f32 %v6799_v52, %v14444_v45 }
 0xa8a   :  { %6729 = vadd.xlane.f32.xlu0 %v6728_v10  ;;  %v6382_v33 = vpop.xlane.xlu1 %6381  ;;  %v6761_v10 = vadd.f32 %v6760_v36, %v6397_v4 }
 0xa8b   :  { %v6427_v54 = vpop.xlane.xlu0 %6426  ;;  %v6773_v11 = vadd.f32 %v6772_v15, %v14418_v26  ;;  %v6751_v23 = vadd.f32 %v6750_v46, %v6382_v33  ;;  %v6710_v26 = vsel %vm1292_vm3, %v14211_v61, 0.0  ;;  %v6786_v56 = vadd.f32 %v6785_v41, %v14424_v21 }
 0xa8c   :  { %v6762_v60 = vadd.f32 %v6761_v10, %v6400_v5  ;;  %v6638_v5 = vsel %vm1292_vm3, %v14216_v55, 0.0  ;;  %v6617_v55 = vsel %vm1292_vm3, %v14228_v62, 0.0  ;;  %v6686_v21 = vsel %vm1292_vm3, %v14219_v17, 0.0 }
 0xa8d   :  { %6708 = vadd.xlane.f32.xlu1 %v6707_v44  ;;  %v6774_v59 = vadd.f32 %v6773_v11, %v14432_v38  ;;  %v6665_v15 = vsel %vm1292_vm3, %v14230_v14, 0.0  ;;  %v6734_v62 = vsel %vm1292_vm3, %v14234_v19, 0.0  ;;  %v6713_v19 = vsel %vm1292_vm3, %v14241_v3, 0.0 }
 0xa8e   :  { %6636 = vadd.xlane.f32.xlu0 %v6635_v30  ;;  %v6406_v58 = vpop.xlane.xlu1 %6405  ;;  %v6763_v0 = vadd.f32 %v6762_v60, %v6403_v32  ;;  %v6787_v32 = vadd.f32 %v6786_v56, %v14438_v57  ;;  %v6689_v56 = vsel %vm1292_vm3, %v14247_v7, 0.0 }
 0xa8f   :  { %v6451_v13 = vpop.xlane.xlu0 %6450  ;;  %v6775_v39 = vadd.f32 %v6774_v59, %v6424_v34  ;;  %v14510_v59 = vld [vmem:[%s14669_s13 + $0x1] sm:$0x1] }
 0xa90   :  { %v6764_v8 = vadd.f32 %v6763_v0, %v6406_v58  ;;  %v6788_v34 = vadd.f32 %v6787_v32, %v6448_v6 }
 0xa91   :  { %6615 = vadd.xlane.f32.xlu1 %v6614_v31  ;;  %v6776_v9 = vadd.f32 %v6775_v39, %v6427_v54 }
 0xa92   :  { %6684 = vadd.xlane.f32.xlu0 %v6683_v47  ;;  %v6430_v50 = vpop.xlane.xlu1 %6429  ;;  %v6789_v47 = vadd.f32 %v6788_v34, %v6451_v13  ;;  %v14500_v13 = vld [vmem:[%s14669_s13] sm:$0x1] }
 0xa93   :  { %v6475_v51 = vpop.xlane.xlu0 %6474  ;;  %v6777_v58 = vadd.f32 %v6776_v9, %v6430_v50 }
 0xa95   :  { %6663 = vadd.xlane.f32.xlu1 %v6662_v37 }
 0xa96   :  { %6732 = vadd.xlane.f32.xlu0 %v6731_v28  ;;  %v6454_v12 = vpop.xlane.xlu1 %6453 }
 0xa97   :  { %v6385_v44 = vpop.xlane.xlu0 %6384  ;;  %v6790_v17 = vadd.f32 %v6789_v47, %v6454_v12  ;;  %v6692_v47 = vsel %vm1292_vm3, %v14267_v1, 0.0 }
 0xa98   :  { %v6752_v4 = vadd.f32 %v6751_v23, %v6385_v44  ;;  %v6641_v23 = vsel %vm1292_vm3, %v14244_v63, 0.0 }
 0xa99   :  { %6711 = vadd.xlane.f32.xlu1 %v6710_v26 }
 0xa9a   :  { %v6753_v33 = vrot.slane %v6752_v4, 4  ;;  %6639 = vadd.xlane.f32.xlu0 %v6638_v5  ;;  %v6472_v16 = vpop.xlane.xlu1 %6471  ;;  %v6596_v5 = vsel %vm1292_vm3, %v14256_v35, 0.0 }
 0xa9b   :  { %v6409_v38 = vpop.xlane.xlu0 %6408  ;;  %v6801_v61 = vadd.f32 %v6800_v49, %v6472_v16  ;;  %v14524_v16 = vld [vmem:[%s14669_s13 + $0x2] sm:$0x1] }
 0xa9c   :  { %v6754_v30 = vadd.f32 %v6753_v33, %v6752_v4  ;;  %v6765_v20 = vadd.f32 %v6764_v8, %v6409_v38 }
 0xa9d   :  { %6618 = vadd.xlane.f32.xlu1 %v6617_v55  ;;  %v6802_v43 = vadd.f32 %v6801_v61, %v6475_v51  ;;  %v6737_v61 = vsel %vm1292_vm3, %v14250_v18, 0.0 }
 0xa9e   :  { %v6755_v25 = vrot.slane %v6754_v30, 2  ;;  %v6766_v53 = vrot.slane %v6765_v20, 4  ;;  %6687 = vadd.xlane.f32.xlu0 %v6686_v21  ;;  %v6478_v45 = vpop.xlane.xlu1 %6477 }
 0xa9f   :  { %v6433_v31 = vpop.xlane.xlu0 %6432  ;;  %v6803_v60 = vadd.f32 %v6802_v43, %v6478_v45 }
 0xaa0   :  { %v6756_v57 = vadd.f32 %v6755_v25, %v6754_v30  ;;  %v6767_v54 = vadd.f32 %v6766_v53, %v6765_v20  ;;  %v6778_v36 = vadd.f32 %v6777_v58, %v6433_v31  ;;  %v6644_v20 = vsel %vm1292_vm3, %v14264_v22, 0.0  ;;  %v14538_v25 = vld [vmem:[%s14669_s13 + $0x3] sm:$0x1] }
 0xaa1   :  { %6666 = vadd.xlane.f32.xlu1 %v6665_v15  ;;  %v14552_v15 = vld [vmem:[%s14669_s13 + $0x4] sm:$0x1] }
 0xaa2   :  { %v6757_v6 = vrot.slane %v6756_v57, 1  ;;  %v6768_v50 = vrot.slane %v6767_v54, 2  ;;  %v6779_v10 = vrot.slane %v6778_v36, 4  ;;  %6735 = vadd.xlane.f32.xlu0 %v6734_v62  ;;  %v6484_v46 = vpop.xlane.xlu1 %6483 }
 0xaa3   :  { %v6457_v37 = vpop.xlane.xlu0 %6456 }
 0xaa4   :  { %v6758_v51 = vadd.f32 %v6757_v6, %v6756_v57  ;;  %v6769_v28 = vadd.f32 %v6768_v50, %v6767_v54  ;;  %v6780_v11 = vadd.f32 %v6779_v10, %v6778_v36  ;;  %v6791_v14 = vadd.f32 %v6790_v17, %v6457_v37  ;;  %v15629_v50 = vld [vmem:[#allocation145_spill] sm:$0xff] }
 0xaa5   :  { %6714 = vadd.xlane.f32.xlu1 %v6713_v19  ;;  %v6620_v57 = vsel %vm1292_vm3, %v14269_v42, 0.0  ;;  %v6740_v6 = vsel %vm1292_vm3, %v14272_v24, 0.0  ;;  %v6668_v10 = vsel %vm1292_vm3, %v15629_v50, 0.0  ;;  %v15630_v24 = vld [vmem:[#allocation94_spill] sm:$0xff] }
 0xaa6   :  { %v6962_v2 = vadd.f32 %v14500_v13, %v6758_v51  ;;  %v6770_v12 = vrot.slane %v6769_v28, 1  ;;  %v6781_v44 = vrot.slane %v6780_v11, 2  ;;  %v6792_v41 = vrot.slane %v6791_v14, 4  ;;  %6642 = vadd.xlane.f32.xlu0 %v6641_v23  ;;  %v6490_v0 = vpop.xlane.xlu1 %6489 }
 0xaa7   :  { %v6481_v4 = vpop.xlane.xlu0 %6480 }
 0xaa8   :  { %6979 = vst.msk [vmem:[%s14670_s14] sm:$0x1] %vm6978_vm2, %v6962_v2  ;;  %v6771_v3 = vadd.f32 %v6770_v12, %v6769_v28  ;;  %v6782_v63 = vadd.f32 %v6781_v44, %v6780_v11  ;;  %v6793_v52 = vadd.f32 %v6792_v41, %v6791_v14  ;;  %v6804_v26 = vadd.f32 %v6803_v60, %v6481_v4  ;;  %v15631_v41 = vld [vmem:[#allocation52_spill] sm:$0xff] }
 0xaa9   :  { %6597 = vadd.xlane.f32.xlu1 %v6596_v5  ;;  %v6623_v14 = vsel %vm1292_vm3, %v14288_v29, 0.0  ;;  %v6716_v60 = vsel %vm1292_vm3, %v15630_v24, 0.0  ;;  %v6599_v4 = vsel %vm1292_vm3, %v14294_v27, 0.0  ;;  %v14582_v27 = vld [vmem:[%s14669_s13 + $0x5] sm:$0x1] }
 0xaaa   :  { %v6963_v39 = vadd.f32 %v14510_v59, %v6771_v3  ;;  %v6783_v8 = vrot.slane %v6782_v63, 1  ;;  %v6794_v33 = vrot.slane %v6793_v52, 2  ;;  %v6805_v49 = vrot.slane %v6804_v26, 4  ;;  %6690 = vadd.xlane.f32.xlu0 %v6689_v56  ;;  %v6496_v38 = vpop.xlane.xlu1 %6495  ;;  %v15632_v56 = vld [vmem:[#allocation79_spill] sm:$0xff] }
 0xaab   :  { %v6487_v32 = vpop.xlane.xlu0 %6486 }
 0xaac   :  { %6980 = vst.msk [vmem:[%s14670_s14 + $0x1] sm:$0x1] %vm6978_vm2, %v6963_v39  ;;  %v6784_v7 = vadd.f32 %v6783_v8, %v6782_v63  ;;  %v6795_v35 = vadd.f32 %v6794_v33, %v6793_v52  ;;  %v6806_v9 = vadd.f32 %v6805_v49, %v6804_v26  ;;  %v6811_v30 = vadd.f32 %v6487_v32, %v6484_v46 }
 0xaad   :  { %6645 = vadd.xlane.f32.xlu1 %v6644_v20  ;;  %v6719_v39 = vsel %vm1292_vm3, %v15632_v56, 0.0  ;;  %v6647_v8 = vsel %vm1292_vm3, %v14300_v48, 0.0 }
 0xaae   :  { %v6964_v55 = vadd.f32 %v14524_v16, %v6784_v7  ;;  %v6796_v21 = vrot.slane %v6795_v35, 1  ;;  %v6807_v34 = vrot.slane %v6806_v9, 2  ;;  %6738 = vadd.xlane.f32.xlu0 %v6737_v61  ;;  %v6812_v58 = vadd.f32 %v6811_v30, %v6490_v0  ;;  %v6502_v53 = vpop.xlane.xlu1 %6501 }
 0xaaf   :  { %v6493_v45 = vpop.xlane.xlu0 %6492  ;;  %v6671_v0 = vsel %vm1292_vm3, %v15631_v41, 0.0 }
 0xab0   :  { %6981 = vst.msk [vmem:[%s14670_s14 + $0x2] sm:$0x1] %vm6978_vm2, %v6964_v55  ;;  %v6797_v18 = vadd.f32 %v6796_v21, %v6795_v35  ;;  %v6808_v22 = vadd.f32 %v6807_v34, %v6806_v9  ;;  %v6813_v31 = vadd.f32 %v6812_v58, %v6493_v45  ;;  %v6695_v9 = vsel %vm1292_vm3, %v14303_v40, 0.0  ;;  %v15633_v21 = vld [vmem:[#allocation18_spill] sm:$0xff] }
 0xab1   :  { %6693 = vadd.xlane.f32.xlu1 %v6692_v47  ;;  %v6743_v34 = vsel %vm1292_vm3, %v15633_v21, 0.0 }
 0xab2   :  { %v6965_v54 = vadd.f32 %v14538_v25, %v6797_v18  ;;  %v6809_v36 = vrot.slane %v6808_v22, 1  ;;  %6621 = vadd.xlane.f32.xlu0 %v6620_v57  ;;  %v6814_v43 = vadd.f32 %v6813_v31, %v6496_v38  ;;  %v6508_v62 = vpop.xlane.xlu1 %6507 }
 0xab3   :  { %v6499_v17 = vpop.xlane.xlu0 %6498 }
 0xab4   :  { %6982 = vst.msk [vmem:[%s14670_s14 + $0x3] sm:$0x1] %vm6978_vm2, %v6965_v54  ;;  %v6810_v1 = vadd.f32 %v6809_v36, %v6808_v22  ;;  %v6815_v42 = vadd.f32 %v6814_v43, %v6499_v17  ;;  %v14596_v17 = vld [vmem:[%s14669_s13 + $0x6] sm:$0x1] }
 0xab5   :  { %6741 = vadd.xlane.f32.xlu1 %v6740_v6 }
 0xab6   :  { %v6966_v46 = vadd.f32 %v14552_v15, %v6810_v1  ;;  %6669 = vadd.xlane.f32.xlu0 %v6668_v10  ;;  %v6816_v37 = vadd.f32 %v6815_v42, %v6502_v53  ;;  %v6514_v51 = vpop.xlane.xlu1 %6513 }
 0xab7   :  { %v6505_v28 = vpop.xlane.xlu0 %6504 }
 0xab8   :  { %6983 = vst.msk [vmem:[%s14670_s14 + $0x4] sm:$0x1] %vm6978_vm2, %v6966_v46  ;;  %v6817_v11 = vadd.f32 %v6816_v37, %v6505_v28 }
 0xab9   :  { %6624 = vadd.xlane.f32.xlu1 %v6623_v14 }
 0xaba   :  { %v6818_v19 = vrot.slane %v6817_v11, 4  ;;  %6717 = vadd.xlane.f32.xlu0 %v6716_v60  ;;  %v6520_v23 = vpop.xlane.xlu1 %6519 }
 0xabb   :  { %v6511_v2 = vpop.xlane.xlu0 %6510 }
 0xabc   :  { %v6819_v12 = vadd.f32 %v6818_v19, %v6817_v11  ;;  %v6824_v44 = vadd.f32 %v6511_v2, %v6508_v62 }
 0xabd   :  { %6672 = vadd.xlane.f32.xlu1 %v6671_v0 }
 0xabe   :  { %v6820_v3 = vrot.slane %v6819_v12, 2  ;;  %6600 = vadd.xlane.f32.xlu0 %v6599_v4  ;;  %v6825_v29 = vadd.f32 %v6824_v44, %v6514_v51  ;;  %v6526_v63 = vpop.xlane.xlu1 %6525 }
 0xabf   :  { %v6517_v52 = vpop.xlane.xlu0 %6516 }
 0xac0   :  { %v6821_v26 = vadd.f32 %v6820_v3, %v6819_v12  ;;  %v6826_v5 = vadd.f32 %v6825_v29, %v6517_v52  ;;  %v14606_v29 = vld [vmem:[%s14669_s13 + $0x7] sm:$0x1] }
 0xac1   :  { %6720 = vadd.xlane.f32.xlu1 %v6719_v39 }
 0xac2   :  { %v6822_v33 = vrot.slane %v6821_v26, 1  ;;  %6648 = vadd.xlane.f32.xlu0 %v6647_v8  ;;  %v6827_v49 = vadd.f32 %v6826_v5, %v6520_v23  ;;  %v6532_v38 = vpop.xlane.xlu1 %6531 }
 0xac3   :  { %v6523_v32 = vpop.xlane.xlu0 %6522 }
 0xac4   :  { %v6823_v7 = vadd.f32 %v6822_v33, %v6821_v26  ;;  %v6828_v35 = vadd.f32 %v6827_v49, %v6523_v32 }
 0xac6   :  { %v6967_v30 = vadd.f32 %v14582_v27, %v6823_v7  ;;  %6696 = vadd.xlane.f32.xlu0 %v6695_v9  ;;  %v6829_v48 = vadd.f32 %v6828_v35, %v6526_v63  ;;  %v6538_v20 = vpop.xlane.xlu1 %6537 }
 0xac7   :  { %v6529_v61 = vpop.xlane.xlu0 %6528 }
 0xac8   :  { %6984 = vst.msk [vmem:[%s14670_s14 + $0x5] sm:$0x1] %vm6978_vm2, %v6967_v30  ;;  %v6830_v55 = vadd.f32 %v6829_v48, %v6529_v61 }
 0xaca   :  { %v6831_v58 = vrot.slane %v6830_v55, 4  ;;  %6744 = vadd.xlane.f32.xlu0 %v6743_v34  ;;  %v6544_v53 = vpop.xlane.xlu1 %6543 }
 0xacb   :  { %v6535_v45 = vpop.xlane.xlu0 %6534 }
 0xacc   :  { %v6832_v40 = vadd.f32 %v6831_v58, %v6830_v55  ;;  %v6837_v18 = vadd.f32 %v6535_v45, %v6532_v38 }
 0xace   :  { %v6833_v22 = vrot.slane %v6832_v40, 2  ;;  %v6838_v31 = vadd.f32 %v6837_v18, %v6538_v20  ;;  %v6550_v47 = vpop.xlane.xlu1 %6549 }
 0xacf   :  { %v6541_v57 = vpop.xlane.xlu0 %6540 }
 0xad0   :  { %v6834_v54 = vadd.f32 %v6833_v22, %v6832_v40  ;;  %v6839_v36 = vadd.f32 %v6838_v31, %v6541_v57 }
 0xad2   :  { %v6835_v43 = vrot.slane %v6834_v54, 1  ;;  %v6840_v62 = vadd.f32 %v6839_v36, %v6544_v53  ;;  %v6556_v1 = vpop.xlane.xlu1 %6555 }
 0xad3   :  { %v6547_v42 = vpop.xlane.xlu0 %6546 }
 0xad4   :  { %v6836_v6 = vadd.f32 %v6835_v43, %v6834_v54  ;;  %v6841_v50 = vadd.f32 %v6840_v62, %v6547_v42 }
 0xad6   :  { %v6968_v10 = vadd.f32 %v14596_v17, %v6836_v6  ;;  %v6842_v46 = vadd.f32 %v6841_v50, %v6550_v47  ;;  %v6562_v37 = vpop.xlane.xlu1 %6561 }
 0xad7   :  { %v6553_v51 = vpop.xlane.xlu0 %6552 }
 0xad8   :  { %6985 = vst.msk [vmem:[%s14670_s14 + $0x6] sm:$0x1] %vm6978_vm2, %v6968_v10  ;;  %v6843_v28 = vadd.f32 %v6842_v46, %v6553_v51 }
 0xada   :  { %v6844_v11 = vrot.slane %v6843_v28, 4  ;;  %v6568_v14 = vpop.xlane.xlu1 %6567 }
 0xadb   :  { %v6559_v24 = vpop.xlane.xlu0 %6558 }
 0xadc   :  { %v6845_v60 = vadd.f32 %v6844_v11, %v6843_v28  ;;  %v6850_v19 = vadd.f32 %v6559_v24, %v6556_v1 }
 0xade   :  { %v6846_v23 = vrot.slane %v6845_v60, 2  ;;  %v6851_v2 = vadd.f32 %v6850_v19, %v6562_v37  ;;  %v6574_v12 = vpop.xlane.xlu1 %6573 }
 0xadf   :  { %v6565_v44 = vpop.xlane.xlu0 %6564 }
 0xae0   :  { %v6847_v41 = vadd.f32 %v6846_v23, %v6845_v60  ;;  %v6852_v0 = vadd.f32 %v6851_v2, %v6565_v44 }
 0xae2   :  { %v6848_v4 = vrot.slane %v6847_v41, 1  ;;  %v6853_v3 = vadd.f32 %v6852_v0, %v6568_v14  ;;  %v6580_v63 = vpop.xlane.xlu1 %6579 }
 0xae3   :  { %v6571_v52 = vpop.xlane.xlu0 %6570 }
 0xae4   :  { %v6849_v26 = vadd.f32 %v6848_v4, %v6847_v41  ;;  %v6854_v5 = vadd.f32 %v6853_v3, %v6571_v52 }
 0xae6   :  { %v6969_v56 = vadd.f32 %v14606_v29, %v6849_v26  ;;  %v6855_v39 = vadd.f32 %v6854_v5, %v6574_v12  ;;  %v6586_v8 = vpop.xlane.xlu1 %6585 }
 0xae7   :  { %v6577_v33 = vpop.xlane.xlu0 %6576 }
 0xae8   :  { %6986 = vst.msk [vmem:[%s14670_s14 + $0x7] sm:$0x1] %vm6978_vm2, %v6969_v56  ;;  %v6856_v49 = vadd.f32 %v6855_v39, %v6577_v33 }
 0xaea   :  { %v6857_v38 = vrot.slane %v6856_v49, 4  ;;  %v6592_v32 = vpop.xlane.xlu1 %6591 }
 0xaeb   :  { %v6583_v7 = vpop.xlane.xlu0 %6582 }
 0xaec   :  { %v6858_v35 = vadd.f32 %v6857_v38, %v6856_v49  ;;  %v6863_v9 = vadd.f32 %v6583_v7, %v6580_v63 }
 0xaee   :  { %v6859_v30 = vrot.slane %v6858_v35, 2  ;;  %v6864_v48 = vadd.f32 %v6863_v9, %v6586_v8  ;;  %v6604_v20 = vpop.xlane.xlu1 %6603 }
 0xaef   :  { %v6589_v61 = vpop.xlane.xlu0 %6588 }
 0xaf0   :  { %v6860_v55 = vadd.f32 %v6859_v30, %v6858_v35  ;;  %v6865_v21 = vadd.f32 %v6864_v48, %v6589_v61 }
 0xaf2   :  { %v6861_v34 = vrot.slane %v6860_v55, 1  ;;  %v6866_v58 = vadd.f32 %v6865_v21, %v6592_v32  ;;  %v6628_v53 = vpop.xlane.xlu1 %6627 }
 0xaf3   :  { %v6595_v45 = vpop.xlane.xlu0 %6594 }
 0xaf4   :  { %v6862_v40 = vadd.f32 %v6861_v34, %v6860_v55  ;;  %v14613_v18 = vadd.f32 %v6866_v58, %v6595_v45 }
 0xaf6   :  { %v6970_v22 = vadd.f32 %v14500_v13, %v6862_v40  ;;  %v6652_v31 = vpop.xlane.xlu1 %6651 }
 0xaf7   :  { %v6607_v47 = vpop.xlane.xlu0 %6606 }
 0xaf8   :  { %6987 = vst.msk [vmem:[%s14670_s14 + $0x8] sm:$0x1] %vm6978_vm2, %v6970_v22  ;;  %v6876_v57 = vadd.f32 %v6607_v47, %v6604_v20 }
 0xafa   :  { %v6676_v54 = vpop.xlane.xlu1 %6675 }
 0xafb   :  { %v6631_v36 = vpop.xlane.xlu0 %6630 }
 0xafc   :  { %v6889_v43 = vadd.f32 %v6631_v36, %v6628_v53 }
 0xafe   :  { %v6700_v62 = vpop.xlane.xlu1 %6699 }
 0xaff   :  { %v6655_v1 = vpop.xlane.xlu0 %6654 }
 0xb00   :  { %v6902_v42 = vadd.f32 %v6655_v1, %v6652_v31 }
 0xb02   :  { %v6724_v6 = vpop.xlane.xlu1 %6723 }
 0xb03   :  { %v6679_v50 = vpop.xlane.xlu0 %6678 }
 0xb04   :  { %v6915_v10 = vadd.f32 %v6679_v50, %v6676_v54 }
 0xb06   :  { %v6610_v46 = vpop.xlane.xlu1 %6609 }
 0xb07   :  { %v6703_v37 = vpop.xlane.xlu0 %6702  ;;  %v6877_v7 = vadd.f32 %v6876_v57, %v6610_v46 }
 0xb08   :  { %v6928_v21 = vadd.f32 %v6703_v37, %v6700_v62 }
 0xb0a   :  { %v6658_v13 = vpop.xlane.xlu1 %6657 }
 0xb0b   :  { %v6727_v51 = vpop.xlane.xlu0 %6726  ;;  %v6903_v48 = vadd.f32 %v6902_v42, %v6658_v13 }
 0xb0c   :  { %v6941_v28 = vadd.f32 %v6727_v51, %v6724_v6 }
 0xb0e   :  { %v6706_v11 = vpop.xlane.xlu1 %6705 }
 0xb0f   :  { %v6634_v14 = vpop.xlane.xlu0 %6633  ;;  %v6929_v53 = vadd.f32 %v6928_v21, %v6706_v11 }
 0xb10   :  { %v6890_v22 = vadd.f32 %v6889_v43, %v6634_v14 }
 0xb12   :  { %v6613_v24 = vpop.xlane.xlu1 %6612 }
 0xb13   :  { %v6682_v60 = vpop.xlane.xlu0 %6681  ;;  %v6878_v30 = vadd.f32 %v6877_v7, %v6613_v24 }
 0xb14   :  { %v6916_v13 = vadd.f32 %v6915_v10, %v6682_v60 }
 0xb16   :  { %v6661_v19 = vpop.xlane.xlu1 %6660 }
 0xb17   :  { %v6730_v23 = vpop.xlane.xlu0 %6729  ;;  %v6904_v34 = vadd.f32 %v6903_v48, %v6661_v19 }
 0xb18   :  { %v6942_v43 = vadd.f32 %v6941_v28, %v6730_v23 }
 0xb1a   :  { %v6709_v2 = vpop.xlane.xlu1 %6708 }
 0xb1b   :  { %v6637_v12 = vpop.xlane.xlu0 %6636  ;;  %v6930_v54 = vadd.f32 %v6929_v53, %v6709_v2 }
 0xb1c   :  { %v6891_v57 = vadd.f32 %v6890_v22, %v6637_v12 }
 0xb1e   :  { %v6616_v44 = vpop.xlane.xlu1 %6615 }
 0xb1f   :  { %v6685_v41 = vpop.xlane.xlu0 %6684  ;;  %v6879_v20 = vadd.f32 %v6878_v30, %v6616_v44 }
 0xb20   :  { %v6917_v14 = vadd.f32 %v6916_v13, %v6685_v41 }
 0xb22   :  { %v6664_v0 = vpop.xlane.xlu1 %6663 }
 0xb23   :  { %v6733_v4 = vpop.xlane.xlu0 %6732  ;;  %v6905_v45 = vadd.f32 %v6904_v34, %v6664_v0 }
 0xb26   :  { %v6712_v3 = vpop.xlane.xlu1 %6711 }
 0xb27   :  { %v6640_v63 = vpop.xlane.xlu0 %6639  ;;  %v6931_v6 = vadd.f32 %v6930_v54, %v6712_v3  ;;  %v6943_v3 = vadd.f32 %v6942_v43, %v6733_v4 }
 0xb28   :  { %v6892_v51 = vadd.f32 %v6891_v57, %v6640_v63 }
 0xb2a   :  { %v6619_v52 = vpop.xlane.xlu1 %6618 }
 0xb2b   :  { %v6688_v26 = vpop.xlane.xlu0 %6687  ;;  %v6880_v58 = vadd.f32 %v6879_v20, %v6619_v52 }
 0xb2c   :  { %v6918_v7 = vadd.f32 %v6917_v14, %v6688_v26 }
 0xb2e   :  { %v6667_v5 = vpop.xlane.xlu1 %6666 }
 0xb2f   :  { %v6736_v56 = vpop.xlane.xlu0 %6735  ;;  %v6906_v36 = vadd.f32 %v6905_v45, %v6667_v5 }
 0xb32   :  { %v6715_v39 = vpop.xlane.xlu1 %6714 }
 0xb33   :  { %v6643_v8 = vpop.xlane.xlu0 %6642  ;;  %v6932_v24 = vadd.f32 %v6931_v6, %v6715_v39  ;;  %v6944_v39 = vadd.f32 %v6943_v3, %v6736_v56 }
 0xb34   :  { %v6893_v0 = vadd.f32 %v6892_v51, %v6643_v8 }
 0xb36   :  { %v6598_v33 = vpop.xlane.xlu1 %6597 }
 0xb37   :  { %v6691_v49 = vpop.xlane.xlu0 %6690  ;;  %v6868_v50 = vadd.f32 %v14613_v18, %v6598_v33 }
 0xb38   :  { %v6919_v48 = vadd.f32 %v6918_v7, %v6691_v49 }
 0xb3a   :  { %v6646_v38 = vpop.xlane.xlu1 %6645 }
 0xb3b   :  { %v6739_v32 = vpop.xlane.xlu0 %6738  ;;  %v6894_v18 = vadd.f32 %v6893_v0, %v6646_v38 }
 0xb3c   :  { %v6945_v8 = vadd.f32 %v6944_v39, %v6739_v32 }
 0xb3e   :  { %v6694_v35 = vpop.xlane.xlu1 %6693 }
 0xb3f   :  { %v6622_v9 = vpop.xlane.xlu0 %6621  ;;  %v6920_v21 = vadd.f32 %v6919_v48, %v6694_v35 }
 0xb40   :  { %v6881_v40 = vadd.f32 %v6880_v58, %v6622_v9 }
 0xb42   :  { %v6742_v61 = vpop.xlane.xlu1 %6741 }
 0xb43   :  { %v6670_v55 = vpop.xlane.xlu0 %6669  ;;  %v6946_v45 = vadd.f32 %v6945_v8, %v6742_v61 }
 0xb44   :  { %v6907_v42 = vadd.f32 %v6906_v36, %v6670_v55 }
 0xb46   :  { %v6625_v31 = vpop.xlane.xlu1 %6624 }
 0xb47   :  { %v6718_v47 = vpop.xlane.xlu0 %6717  ;;  %v6882_v1 = vadd.f32 %v6881_v40, %v6625_v31 }
 0xb48   :  { %v6933_v52 = vadd.f32 %v6932_v24, %v6718_v47 }
 0xb49   :  { %v6883_v46 = vrot.slane %v6882_v1, 4 }
 0xb4a   :  { %v6673_v62 = vpop.xlane.xlu1 %6672 }
 0xb4b   :  { %v6601_v37 = vpop.xlane.xlu0 %6600  ;;  %v6884_v11 = vadd.f32 %v6883_v46, %v6882_v1  ;;  %v6908_v19 = vadd.f32 %v6907_v42, %v6673_v62 }
 0xb4c   :  { %v6869_v44 = vadd.f32 %v6868_v50, %v6601_v37 }
 0xb4d   :  { %v6885_v2 = vrot.slane %v6884_v11, 2  ;;  %v6909_v5 = vrot.slane %v6908_v19, 4 }
 0xb4e   :  { %v6870_v12 = vrot.slane %v6869_v44, 4  ;;  %v6721_v33 = vpop.xlane.xlu1 %6720 }
 0xb4f   :  { %v6649_v9 = vpop.xlane.xlu0 %6648  ;;  %v6886_v10 = vadd.f32 %v6885_v2, %v6884_v11  ;;  %v6910_v60 = vadd.f32 %v6909_v5, %v6908_v19  ;;  %v6934_v30 = vadd.f32 %v6933_v52, %v6721_v33 }
 0xb50   :  { %v6871_v63 = vadd.f32 %v6870_v12, %v6869_v44  ;;  %v6895_v20 = vadd.f32 %v6894_v18, %v6649_v9 }
 0xb51   :  { %v6887_v55 = vrot.slane %v6886_v10, 1  ;;  %v6911_v28 = vrot.slane %v6910_v60, 2  ;;  %v6935_v41 = vrot.slane %v6934_v30, 4 }
 0xb52   :  { %v6872_v23 = vrot.slane %v6871_v63, 2  ;;  %v6896_v34 = vrot.slane %v6895_v20, 4 }
 0xb53   :  { %v6697_v58 = vpop.xlane.xlu0 %6696  ;;  %v6888_v4 = vadd.f32 %v6887_v55, %v6886_v10  ;;  %v6912_v26 = vadd.f32 %v6911_v28, %v6910_v60  ;;  %v6936_v53 = vadd.f32 %v6935_v41, %v6934_v30 }
 0xb54   :  { %v6873_v38 = vadd.f32 %v6872_v23, %v6871_v63  ;;  %v6897_v40 = vadd.f32 %v6896_v34, %v6895_v20  ;;  %v6921_v22 = vadd.f32 %v6920_v21, %v6697_v58 }
 0xb55   :  { %v6972_v31 = vadd.f32 %v14524_v16, %v6888_v4  ;;  %v6913_v56 = vrot.slane %v6912_v26, 1  ;;  %v6937_v47 = vrot.slane %v6936_v53, 2 }
 0xb56   :  { %v6874_v49 = vrot.slane %v6873_v38, 1  ;;  %v6898_v54 = vrot.slane %v6897_v40, 2  ;;  %v6922_v36 = vrot.slane %v6921_v22, 4 }
 0xb57   :  { %v6745_v1 = vpop.xlane.xlu0 %6744  ;;  %6989 = vst.msk [vmem:[%s14670_s14 + $0xa] sm:$0x1] %vm6978_vm2, %v6972_v31  ;;  %v6914_v32 = vadd.f32 %v6913_v56, %v6912_v26  ;;  %v6938_v57 = vadd.f32 %v6937_v47, %v6936_v53 }
 0xb58   :  { %v6875_v35 = vadd.f32 %v6874_v49, %v6873_v38  ;;  %v6947_v6 = vadd.f32 %v6946_v45, %v6745_v1  ;;  %v6899_v61 = vadd.f32 %v6898_v54, %v6897_v40  ;;  %v6923_v50 = vadd.f32 %v6922_v36, %v6921_v22 }
 0xb59   :  { %v6974_v42 = vadd.f32 %v14552_v15, %v6914_v32  ;;  %v6939_v46 = vrot.slane %v6938_v57, 1 }
 0xb5a   :  { %v6971_v16 = vadd.f32 %v14510_v59, %v6875_v35  ;;  %v6948_v13 = vrot.slane %v6947_v6, 4  ;;  %v6900_v51 = vrot.slane %v6899_v61, 1  ;;  %v6924_v62 = vrot.slane %v6923_v50, 2 }
 0xb5b   :  { %6991 = vst.msk [vmem:[%s14670_s14 + $0xc] sm:$0x1] %vm6978_vm2, %v6974_v42  ;;  %v6940_v37 = vadd.f32 %v6939_v46, %v6938_v57 }
 0xb5c   :  { %6988 = vst.msk [vmem:[%s14670_s14 + $0x9] sm:$0x1] %vm6978_vm2, %v6971_v16  ;;  %v6949_v24 = vadd.f32 %v6948_v13, %v6947_v6  ;;  %v6901_v11 = vadd.f32 %v6900_v51, %v6899_v61  ;;  %v6925_v15 = vadd.f32 %v6924_v62, %v6923_v50 }
 0xb5d   :  { %v6976_v59 = vadd.f32 %v14596_v17, %v6940_v37 }
 0xb5e   :  { %v6950_v19 = vrot.slane %v6949_v24, 2  ;;  %v6973_v44 = vadd.f32 %v14538_v25, %v6901_v11  ;;  %v6926_v43 = vrot.slane %v6925_v15, 1 }
 0xb5f   :  { %6993 = vst.msk [vmem:[%s14670_s14 + $0xe] sm:$0x1] %vm6978_vm2, %v6976_v59 }
 0xb60   :  { %v6951_v14 = vadd.f32 %v6950_v19, %v6949_v24  ;;  %6990 = vst.msk [vmem:[%s14670_s14 + $0xb] sm:$0x1] %vm6978_vm2, %v6973_v44  ;;  %v6927_v0 = vadd.f32 %v6926_v43, %v6925_v15 }
 0xb62   :  { %v6952_v2 = vrot.slane %v6951_v14, 1  ;;  %v6975_v52 = vadd.f32 %v14582_v27, %v6927_v0 }
 0xb64   :  { %v6953_v17 = vadd.f32 %v6952_v2, %v6951_v14  ;;  %6992 = vst.msk [vmem:[%s14670_s14 + $0xd] sm:$0x1] %vm6978_vm2, %v6975_v52 }
 0xb66   :  { %v6977_v25 = vadd.f32 %v14606_v29, %v6953_v17 }
 0xb68   :  { %6994 = vst.msk [vmem:[%s14670_s14 + $0xf] sm:$0x1] %vm6978_vm2, %v6977_v25 }

</bundles_post_ra>
